<compile_context>
chip_gen: v7x
topology: tpu7x:2x2x1
jax: 0.10.0
libtpu: 0.0.40
codegen_flags: <defaults>
</compile_context>

<pallas_src>
import jax
import jax.numpy as jnp
from jax.experimental import pallas as pl
from jax.experimental.pallas import tpu as pltpu

_EPS = 1e-5


def _ring_fill(ref, h, H, W, fill):
    """Fill only the halo ring of a (H+2h, W+2h, C) VMEM scratch buffer.

    Invariant: the interior ref[h:H+h, h:W+h, :] is fully overwritten every
    grid step by the caller; only the ring needs (re)initialization.
    """
    C = ref.shape[2]
    row = jnp.full((h, W + 2 * h, C), fill, ref.dtype)
    col = jnp.full((H, h, C), fill, ref.dtype)
    ref[0:h, :, :] = row
    ref[H + h:H + 2 * h, :, :] = row
    ref[h:H + h, 0:h, :] = col
    ref[h:H + h, W + h:W + 2 * h, :] = col


# ---------------------------------------------------------------------------
# Fused Inception kernel (per-image grid step)
# ---------------------------------------------------------------------------
def _inception_kernel(x_ref, w111_ref, b111_ref, w3_ref, b3_ref,
                      w5_ref, b5_ref, wm_ref, bm_ref, o_ref,
                      pad3_ref, pad5_ref, padm_ref, p3_ref, p5_ref):
    # x_ref:    (1, H, W, Cin)                 f32
    # w111_ref: (Cin, C1+C3r+C5r)              bf16  (fused 1x1 weights)
    # w3_ref:   (9*C3r, C3)  w5_ref: (25*C5r, C5)  wm_ref: (Cin, Cm)   bf16
    # b*_ref:   (1, C*)                        f32
    # o_ref:    (1, H, W, C1+C3+C5+Cm)         f32
    # pad3/pad5/padm: persistent bf16 VMEM halo scratch
    # p3/p5:    bf16 im2col staging buffers (M, K*K*Cred)
    _, H, W, Cin = x_ref.shape
    C3r = pad3_ref.shape[2]
    C5r = pad5_ref.shape[2]
    C1 = w111_ref.shape[1] - C3r - C5r
    C3 = w3_ref.shape[1]
    C5 = w5_ref.shape[1]
    Cm = wm_ref.shape[1]
    M = H * W

    # ---- halo-ring init (cheap: thin strips only; interiors overwritten) ----
    neg = float(jnp.finfo(jnp.bfloat16).min)
    _ring_fill(pad3_ref, 1, H, W, 0.0)
    _ring_fill(pad5_ref, 2, H, W, 0.0)
    _ring_fill(padm_ref, 1, H, W, neg)

    x = x_ref[0]                                   # (H, W, Cin) f32
    xb = x.astype(jnp.bfloat16)                    # single bf16 cast, reused

    # ---- fused 1x1 convs:  [conv_1x1 | 3x3-reduce | 5x5-reduce] -------------
    y = jnp.dot(xb.reshape(M, Cin), w111_ref[...],
                preferred_element_type=jnp.float32) + b111_ref[...]
    y = jnp.maximum(y, 0.0)                        # (M, C1 + C3r + C5r) f32

    # 1x1 branch: store directly into its channel slice of the output.
    o_ref[:, :, :, 0:C1] = y[:, 0:C1].reshape(1, H, W, C1).astype(o_ref.dtype)

    # Reducer activations -> bf16 halo-scratch interiors (fully overwritten).
    pad3_ref[1:H + 1, 1:W + 1, :] = (
        y[:, C1:C1 + C3r].reshape(H, W, C3r).astype(pad3_ref.dtype))
    pad5_ref[2:H + 2, 2:W + 2, :] = (
        y[:, C1 + C3r:].reshape(H, W, C5r).astype(pad5_ref.dtype))

    # ---- 3x3 branch: im2col into bf16 staging; kw (sublane) shift hoisted ---
    for kw in range(3):
        sw = pad3_ref[:, kw:kw + W, :]             # one W-shifted copy per kw
        for kh in range(3):                        # kh shift = free row offset
            c0 = (kh * 3 + kw) * C3r
            p3_ref[:, c0:c0 + C3r] = sw[kh:kh + H].reshape(M, C3r)
    x3 = jnp.maximum(
        jnp.dot(p3_ref[...], w3_ref[...], preferred_element_type=jnp.float32)
        + b3_ref[...], 0.0)
    o_ref[:, :, :, C1:C1 + C3] = x3.reshape(1, H, W, C3).astype(o_ref.dtype)

    # ---- 5x5 branch ----------------------------------------------------------
    for kw in range(5):
        sw = pad5_ref[:, kw:kw + W, :]
        for kh in range(5):
            c0 = (kh * 5 + kw) * C5r
            p5_ref[:, c0:c0 + C5r] = sw[kh:kh + H].reshape(M, C5r)
    x5 = jnp.maximum(
        jnp.dot(p5_ref[...], w5_ref[...], preferred_element_type=jnp.float32)
        + b5_ref[...], 0.0)
    o_ref[:, :, :, C1 + C3:C1 + C3 + C5] = (
        x5.reshape(1, H, W, C5).astype(o_ref.dtype))

    # ---- maxpool(3x3, stride 1, pad 1) + 1x1 conv branch ---------------------
    # Separable bf16 pool: max over W (2 ops) then over H (2 ops).  bf16 max is
    # order-preserving and the result feeds a bf16 MXU matmul -> same numerics
    # as an f32 pool followed by a bf16 cast.
    padm_ref[1:H + 1, 1:W + 1, :] = xb
    rowmax = jnp.maximum(
        jnp.maximum(padm_ref[:, 0:W, :], padm_ref[:, 1:W + 1, :]),
        padm_ref[:, 2:W + 2, :])                   # (H+2, W, Cin) bf16
    pooled = jnp.maximum(jnp.maximum(rowmax[0:H], rowmax[1:H + 1]),
                         rowmax[2:H + 2])          # (H, W, Cin) bf16
    xm = jnp.maximum(
        jnp.dot(pooled.reshape(M, Cin), wm_ref[...],
                preferred_element_type=jnp.float32) + bm_ref[...], 0.0)
    o_ref[:, :, :, C1 + C3 + C5:] = xm.reshape(1, H, W, Cm).astype(o_ref.dtype)


# ---------------------------------------------------------------------------
# Parameters (deterministic synthetic init) + BN folding
# ---------------------------------------------------------------------------
def make_conv_bn_params(key, cin, cout, k):
    kw, kb, kg, kbt, km, kv = jax.random.split(key, 6)
    return dict(
        w=jax.random.normal(kw, (k, k, cin, cout), jnp.float32) * 0.1,  # HWIO
        b=jax.random.normal(kb, (cout,), jnp.float32) * 0.1,
        gamma=1.0 + 0.1 * jax.random.normal(kg, (cout,), jnp.float32),
        beta=0.1 * jax.random.normal(kbt, (cout,), jnp.float32),
        mean=0.1 * jax.random.normal(km, (cout,), jnp.float32),
        var=0.5 + jax.random.uniform(kv, (cout,), jnp.float32),
    )


def fold_bn(p):
    s = p['gamma'] / jnp.sqrt(p['var'] + _EPS)
    return p['w'] * s, (p['b'] - p['mean']) * s + p['beta']


# ---------------------------------------------------------------------------
# InceptionBlock forward (fused Pallas kernel) and pure-JAX reference
# ---------------------------------------------------------------------------
def inception_block_forward(x_nchw, params):
    x = jnp.transpose(x_nchw, (0, 2, 3, 1))                   # NCHW -> NHWC
    N, H, W, Cin = x.shape

    w1, b1 = fold_bn(params['b1'])
    w3r, b3r = fold_bn(params['b3_red'])
    w3, b3 = fold_bn(params['b3'])
    w5r, b5r = fold_bn(params['b5_red'])
    w5, b5 = fold_bn(params['b5'])
    wm, bm = fold_bn(params['bmax'])

    C1, C3r, C5r = w1.shape[-1], w3r.shape[-1], w5r.shape[-1]
    C3, C5, Cm = w3.shape[-1], w5.shape[-1], wm.shape[-1]
    Ctot = C1 + C3 + C5 + Cm

    # Fused 1x1 weights and im2col-reshaped KxK weights (bf16 MXU inputs).
    w111 = jnp.concatenate([w1[0, 0], w3r[0, 0], w5r[0, 0]],
                           axis=-1).astype(jnp.bfloat16)       # (Cin, C1+C3r+C5r)
    b111 = jnp.concatenate([b1, b3r, b5r], axis=-1).reshape(1, -1)
    w3i = w3.reshape(9 * C3r, C3).astype(jnp.bfloat16)         # rows: (kh,kw,cin)
    w5i = w5.reshape(25 * C5r, C5).astype(jnp.bfloat16)
    wmi = wm[0, 0].astype(jnp.bfloat16)

    flops = 2 * N * H * W * (Cin * (C1 + C3r + C5r) + 9 * C3r * C3
                             + 25 * C5r * C5 + Cin * Cm)
    bytes_accessed = (4 * N * H * W * (Cin + Ctot)
                      + 2 * (w111.size + w3i.size + w5i.size + wmi.size)
                      + 4 * (C1 + C3r + C5r + C3 + C5 + Cm))

    # ---- per-step VMEM working set (derived, not a flat guess) --------------
    def _nbytes(shape, itemsize):
        n = 1
        for d in shape:
            n *= d
        return n * itemsize

    bf16, f32 = 2, 4
    vmem_need = (
        2 * _nbytes((1, H, W, Cin), f32)           # double-buffered input block
        + 2 * _nbytes((1, H, W, Ctot), f32)        # double-buffered output block
        + 2 * bf16 * (w111.size + w3i.size + w5i.size + wmi.size)
        + 2 * f32 * (C1 + C3r + C5r + C3 + C5 + Cm)
        + bf16 * ((H + 2) * (W + 2) * C3r + (H + 4) * (W + 4) * C5r
                  + (H + 2) * (W + 2) * Cin
                  + H * W * (9 * C3r + 25 * C5r))  # persistent bf16 scratch
        + f32 * H * W * (C1 + C3r + C5r + C3 + C5 + Cm))  # in-flight f32 temps
    # 2x headroom for compiler temps; floor 16 MiB; cap at v7x's 64 MiB/TC.
    vmem_limit = int(min(max(2 * vmem_need, 16 << 20), 64 << 20))

    out = pl.pallas_call(
        _inception_kernel,
        out_shape=jax.ShapeDtypeStruct((N, H, W, Ctot), jnp.float32),
        grid=(N,),
        in_specs=[
            pl.BlockSpec((1, H, W, Cin), lambda n: (n, 0, 0, 0)),
            pl.BlockSpec((Cin, C1 + C3r + C5r), lambda n: (0, 0)),
            pl.BlockSpec((1, C1 + C3r + C5r), lambda n: (0, 0)),
            pl.BlockSpec((9 * C3r, C3), lambda n: (0, 0)),
            pl.BlockSpec((1, C3), lambda n: (0, 0)),
            pl.BlockSpec((25 * C5r, C5), lambda n: (0, 0)),
            pl.BlockSpec((1, C5), lambda n: (0, 0)),
            pl.BlockSpec((Cin, Cm), lambda n: (0, 0)),
            pl.BlockSpec((1, Cm), lambda n: (0, 0)),
        ],
        out_specs=pl.BlockSpec((1, H, W, Ctot), lambda n: (n, 0, 0, 0)),
        scratch_shapes=[
            pltpu.VMEM((H + 2, W + 2, C3r), jnp.bfloat16),  # zero-halo t3
            pltpu.VMEM((H + 4, W + 4, C5r), jnp.bfloat16),  # zero-halo t5
            pltpu.VMEM((H + 2, W + 2, Cin), jnp.bfloat16),  # neg-halo x (pool)
            pltpu.VMEM((H * W, 9 * C3r), jnp.bfloat16),     # im2col staging 3x3
            pltpu.VMEM((H * W, 25 * C5r), jnp.bfloat16),    # im2col staging 5x5
        ],
        compiler_params=pltpu.CompilerParams(
            dimension_semantics=("parallel",),
            vmem_limit_bytes=vmem_limit),
        cost_estimate=pl.CostEstimate(flops=flops, transcendentals=0,
                                      bytes_accessed=bytes_accessed),
    )(x, w111, b111, w3i, b3.reshape(1, C3), w5i, b5.reshape(1, C5),
      wmi, bm.reshape(1, Cm))

    return jnp.transpose(out, (0, 3, 1, 2))                   # NHWC -> NCHW


def _ref_conv_bn_relu(x, p):
    y = jax.lax.conv_general_dilated(
        x, p['w'], window_strides=(1, 1), padding='SAME',
        dimension_numbers=('NHWC', 'HWIO', 'NHWC'))
    y = y + p['b']
    y = (y - p['mean']) / jnp.sqrt(p['var'] + _EPS) * p['gamma'] + p['beta']
    return jnp.maximum(y, 0.0)


def _ref_maxpool3(x):
    return jax.lax.reduce_window(
        x, -jnp.inf, jax.lax.max, (1, 3, 3, 1), (1, 1, 1, 1),
        [(0, 0), (1, 1), (1, 1), (0, 0)])


def inception_block_reference(x_nchw, params):
    x = jnp.transpose(x_nchw, (0, 2, 3, 1))
    x1 = _ref_conv_bn_relu(x, params['b1'])
    x3 = _ref_conv_bn_relu(_ref_conv_bn_relu(x, params['b3_red']), params['b3'])
    x5 = _ref_conv_bn_relu(_ref_conv_bn_relu(x, params['b5_red']), params['b5'])
    xm = _ref_conv_bn_relu(_ref_maxpool3(x), params['bmax'])
    out = jnp.concatenate([x1, x3, x5, xm], axis=-1)
    return jnp.transpose(out, (0, 3, 1, 2))


# ---------------------------------------------------------------------------
if __name__ == "__main__":
    key = jax.random.PRNGKey(0)
    N, Cin, H, W = 2, 4, 16, 16
    c_red = {"3x3": 4, "5x5": 4}
    c_out = {"1x1": 4, "3x3": 8, "5x5": 8, "max": 4}

    keys = jax.random.split(key, 7)
    x = jax.random.normal(keys[0], (N, Cin, H, W), jnp.float32)
    params = {
        'b1':     make_conv_bn_params(keys[1], Cin, c_out['1x1'], 1),
        'b3_red': make_conv_bn_params(keys[2], Cin, c_red['3x3'], 1),
        'b3':     make_conv_bn_params(keys[3], c_red['3x3'], c_out['3x3'], 3),
        'b5_red': make_conv_bn_params(keys[4], Cin, c_red['5x5'], 1),
        'b5':     make_conv_bn_params(keys[5], c_red['5x5'], c_out['5x5'], 5),
        'bmax':   make_conv_bn_params(keys[6], Cin, c_out['max'], 1),
    }

    fwd = jax.jit(inception_block_forward)
    ref_fn = jax.jit(inception_block_reference)

    out = jax.block_until_ready(fwd(x, params))
    ref = jax.block_until_ready(ref_fn(x, params))

    assert out.shape == (N, sum(c_out.values()), H, W), out.shape
    err = float(jnp.max(jnp.abs(out - ref)))
    # bf16 MXU inputs with f32 accumulation -> relaxed tolerance vs f32 ref.
    assert err < 5e-2, f"max abs error {err}"
    print("KERNEL_OK")
</pallas_src>

<mosaic_0001>
module attributes {stable_mosaic.version = 11 : i64} {
  func.func @_inception_kernel(%arg0: i32, %arg1: memref<1x16x16x4xf32, #tpu.memory_space<vmem>>, %arg2: memref<4x12xbf16, #tpu.memory_space<vmem>>, %arg3: memref<1x12xf32, #tpu.memory_space<vmem>>, %arg4: memref<36x8xbf16, #tpu.memory_space<vmem>>, %arg5: memref<1x8xf32, #tpu.memory_space<vmem>>, %arg6: memref<100x8xbf16, #tpu.memory_space<vmem>>, %arg7: memref<1x8xf32, #tpu.memory_space<vmem>>, %arg8: memref<4x4xbf16, #tpu.memory_space<vmem>>, %arg9: memref<1x4xf32, #tpu.memory_space<vmem>>, %arg10: memref<1x16x16x24xf32, #tpu.memory_space<vmem>>, %arg11: memref<18x18x4xbf16, #tpu.memory_space<vmem>>, %arg12: memref<20x20x4xbf16, #tpu.memory_space<vmem>>, %arg13: memref<18x18x4xbf16, #tpu.memory_space<vmem>>, %arg14: memref<256x36xbf16, #tpu.memory_space<vmem>>, %arg15: memref<256x100xbf16, #tpu.memory_space<vmem>>) attributes {dimension_semantics = [#tpu.dimension_semantics<parallel>], iteration_bounds = array<i64: 2>, scalar_prefetch = 0 : i64, scratch_operands = 5 : i64, tpu.core_type = #tpu.core_type<tc>, window_params = [{transform_indices = @transform_0, window_bounds = array<i64: 1, 16, 16, 4>}, {pipeline_mode = #tpu.pipeline_mode<synchronous>, transform_indices = @transform_1, window_bounds = array<i64: 4, 12>}, {pipeline_mode = #tpu.pipeline_mode<synchronous>, transform_indices = @transform_2, window_bounds = array<i64: 1, 12>}, {pipeline_mode = #tpu.pipeline_mode<synchronous>, transform_indices = @transform_3, window_bounds = array<i64: 36, 8>}, {pipeline_mode = #tpu.pipeline_mode<synchronous>, transform_indices = @transform_4, window_bounds = array<i64: 1, 8>}, {pipeline_mode = #tpu.pipeline_mode<synchronous>, transform_indices = @transform_5, window_bounds = array<i64: 100, 8>}, {pipeline_mode = #tpu.pipeline_mode<synchronous>, transform_indices = @transform_6, window_bounds = array<i64: 1, 8>}, {pipeline_mode = #tpu.pipeline_mode<synchronous>, transform_indices = @transform_7, window_bounds = array<i64: 4, 4>}, {pipeline_mode = #tpu.pipeline_mode<synchronous>, transform_indices = @transform_8, window_bounds = array<i64: 1, 4>}, {transform_indices = @transform_9, window_bounds = array<i64: 1, 16, 16, 24>}]} {
    %cst = arith.constant 0.000000e+00 : bf16
    %0 = vector.broadcast %cst : bf16 to vector<1x18x4xbf16>
    %cst_0 = arith.constant 0.000000e+00 : bf16
    %1 = vector.broadcast %cst_0 : bf16 to vector<16x1x4xbf16>
    %c0 = arith.constant 0 : index
    %c0_1 = arith.constant 0 : index
    %c0_2 = arith.constant 0 : index
    %2 = vector.load %arg11[%c0, %c0_1, %c0_2] : memref<18x18x4xbf16, #tpu.memory_space<vmem>>, vector<1x18x4xbf16>
    tpu.vector_store %arg11[%c0, %c0_1, %c0_2], %0 {strides = array<i32>} : memref<18x18x4xbf16, #tpu.memory_space<vmem>>, vector<1x18x4xbf16>,
    %c17 = arith.constant 17 : index
    %c0_3 = arith.constant 0 : index
    %c0_4 = arith.constant 0 : index
    %3 = vector.load %arg11[%c17, %c0_3, %c0_4] : memref<18x18x4xbf16, #tpu.memory_space<vmem>>, vector<1x18x4xbf16>
    tpu.vector_store %arg11[%c17, %c0_3, %c0_4], %0 {strides = array<i32>} : memref<18x18x4xbf16, #tpu.memory_space<vmem>>, vector<1x18x4xbf16>,
    %c1 = arith.constant 1 : index
    %c0_5 = arith.constant 0 : index
    %c0_6 = arith.constant 0 : index
    %4 = vector.load %arg11[%c1, %c0_5, %c0_6] : memref<18x18x4xbf16, #tpu.memory_space<vmem>>, vector<16x1x4xbf16>
    tpu.vector_store %arg11[%c1, %c0_5, %c0_6], %1 {strides = array<i32>} : memref<18x18x4xbf16, #tpu.memory_space<vmem>>, vector<16x1x4xbf16>,
    %c1_7 = arith.constant 1 : index
    %c17_8 = arith.constant 17 : index
    %c0_9 = arith.constant 0 : index
    %5 = vector.load %arg11[%c1_7, %c17_8, %c0_9] : memref<18x18x4xbf16, #tpu.memory_space<vmem>>, vector<16x1x4xbf16>
    tpu.vector_store %arg11[%c1_7, %c17_8, %c0_9], %1 {strides = array<i32>} : memref<18x18x4xbf16, #tpu.memory_space<vmem>>, vector<16x1x4xbf16>,
    %cst_10 = arith.constant 0.000000e+00 : bf16
    %6 = vector.broadcast %cst_10 : bf16 to vector<2x20x4xbf16>
    %cst_11 = arith.constant 0.000000e+00 : bf16
    %7 = vector.broadcast %cst_11 : bf16 to vector<16x2x4xbf16>
    %c0_12 = arith.constant 0 : index
    %c0_13 = arith.constant 0 : index
    %c0_14 = arith.constant 0 : index
    %8 = vector.load %arg12[%c0_12, %c0_13, %c0_14] : memref<20x20x4xbf16, #tpu.memory_space<vmem>>, vector<2x20x4xbf16>
    tpu.vector_store %arg12[%c0_12, %c0_13, %c0_14], %6 {strides = array<i32>} : memref<20x20x4xbf16, #tpu.memory_space<vmem>>, vector<2x20x4xbf16>,
    %c18 = arith.constant 18 : index
    %c0_15 = arith.constant 0 : index
    %c0_16 = arith.constant 0 : index
    %9 = vector.load %arg12[%c18, %c0_15, %c0_16] : memref<20x20x4xbf16, #tpu.memory_space<vmem>>, vector<2x20x4xbf16>
    tpu.vector_store %arg12[%c18, %c0_15, %c0_16], %6 {strides = array<i32>} : memref<20x20x4xbf16, #tpu.memory_space<vmem>>, vector<2x20x4xbf16>,
    %c2 = arith.constant 2 : index
    %c0_17 = arith.constant 0 : index
    %c0_18 = arith.constant 0 : index
    %10 = vector.load %arg12[%c2, %c0_17, %c0_18] : memref<20x20x4xbf16, #tpu.memory_space<vmem>>, vector<16x2x4xbf16>
    tpu.vector_store %arg12[%c2, %c0_17, %c0_18], %7 {strides = array<i32>} : memref<20x20x4xbf16, #tpu.memory_space<vmem>>, vector<16x2x4xbf16>,
    %c2_19 = arith.constant 2 : index
    %c18_20 = arith.constant 18 : index
    %c0_21 = arith.constant 0 : index
    %11 = vector.load %arg12[%c2_19, %c18_20, %c0_21] : memref<20x20x4xbf16, #tpu.memory_space<vmem>>, vector<16x2x4xbf16>
    tpu.vector_store %arg12[%c2_19, %c18_20, %c0_21], %7 {strides = array<i32>} : memref<20x20x4xbf16, #tpu.memory_space<vmem>>, vector<16x2x4xbf16>,
    %cst_22 = arith.constant -3.389530e+38 : bf16
    %12 = vector.broadcast %cst_22 : bf16 to vector<1x18x4xbf16>
    %cst_23 = arith.constant -3.389530e+38 : bf16
    %13 = vector.broadcast %cst_23 : bf16 to vector<16x1x4xbf16>
    %c0_24 = arith.constant 0 : index
    %c0_25 = arith.constant 0 : index
    %c0_26 = arith.constant 0 : index
    %14 = vector.load %arg13[%c0_24, %c0_25, %c0_26] : memref<18x18x4xbf16, #tpu.memory_space<vmem>>, vector<1x18x4xbf16>
    tpu.vector_store %arg13[%c0_24, %c0_25, %c0_26], %12 {strides = array<i32>} : memref<18x18x4xbf16, #tpu.memory_space<vmem>>, vector<1x18x4xbf16>,
    %c17_27 = arith.constant 17 : index
    %c0_28 = arith.constant 0 : index
    %c0_29 = arith.constant 0 : index
    %15 = vector.load %arg13[%c17_27, %c0_28, %c0_29] : memref<18x18x4xbf16, #tpu.memory_space<vmem>>, vector<1x18x4xbf16>
    tpu.vector_store %arg13[%c17_27, %c0_28, %c0_29], %12 {strides = array<i32>} : memref<18x18x4xbf16, #tpu.memory_space<vmem>>, vector<1x18x4xbf16>,
    %c1_30 = arith.constant 1 : index
    %c0_31 = arith.constant 0 : index
    %c0_32 = arith.constant 0 : index
    %16 = vector.load %arg13[%c1_30, %c0_31, %c0_32] : memref<18x18x4xbf16, #tpu.memory_space<vmem>>, vector<16x1x4xbf16>
    tpu.vector_store %arg13[%c1_30, %c0_31, %c0_32], %13 {strides = array<i32>} : memref<18x18x4xbf16, #tpu.memory_space<vmem>>, vector<16x1x4xbf16>,
    %c1_33 = arith.constant 1 : index
    %c17_34 = arith.constant 17 : index
    %c0_35 = arith.constant 0 : index
    %17 = vector.load %arg13[%c1_33, %c17_34, %c0_35] : memref<18x18x4xbf16, #tpu.memory_space<vmem>>, vector<16x1x4xbf16>
    tpu.vector_store %arg13[%c1_33, %c17_34, %c0_35], %13 {strides = array<i32>} : memref<18x18x4xbf16, #tpu.memory_space<vmem>>, vector<16x1x4xbf16>,
    %c0_36 = arith.constant 0 : index
    %c0_37 = arith.constant 0 : index
    %c0_38 = arith.constant 0 : index
    %c0_39 = arith.constant 0 : index
    %18 = vector.load %arg1[%c0_36, %c0_37, %c0_38, %c0_39] : memref<1x16x16x4xf32, #tpu.memory_space<vmem>>, vector<1x16x16x4xf32>
    %19 = vector.shape_cast %18 : vector<1x16x16x4xf32> to vector<16x16x4xf32>
    %20 = arith.truncf %19 : vector<16x16x4xf32> to vector<16x16x4xbf16>
    %21 = vector.shape_cast %20 : vector<16x16x4xbf16> to vector<256x4xbf16>
    %c0_40 = arith.constant 0 : index
    %c0_41 = arith.constant 0 : index
    %22 = vector.load %arg2[%c0_40, %c0_41] : memref<4x12xbf16, #tpu.memory_space<vmem>>, vector<4x12xbf16>
    %cst_42 = arith.constant dense<0.000000e+00> : vector<256x12xf32>
    %23 = tpu.matmul %21, %22, %cst_42 {dimension_numbers = #tpu.dot_dimension_numbers<[1], [0], [0], [1], [0, 0, 1, 1], [], []>} : vector<256x4xbf16>, vector<4x12xbf16>, vector<256x12xf32> -> vector<256x12xf32>
    %c0_43 = arith.constant 0 : index
    %c0_44 = arith.constant 0 : index
    %24 = vector.load %arg3[%c0_43, %c0_44] : memref<1x12xf32, #tpu.memory_space<vmem>>, vector<1x12xf32>
    %25 = vector.broadcast %24 : vector<1x12xf32> to vector<256x12xf32>
    %26 = arith.addf %23, %25 : vector<256x12xf32>
    %cst_45 = arith.constant 0.000000e+00 : f32
    %27 = vector.broadcast %cst_45 : f32 to vector<256x12xf32>
    %28 = arith.maximumf %26, %27 : vector<256x12xf32>
    %29 = vector.extract_strided_slice %28 {offsets = [0, 0], sizes = [256, 4], strides = [1, 1]} : vector<256x12xf32> to vector<256x4xf32>
    %30 = vector.shape_cast %29 : vector<256x4xf32> to vector<1x16x16x4xf32>
    %c0_46 = arith.constant 0 : index
    %c0_47 = arith.constant 0 : index
    %c0_48 = arith.constant 0 : index
    %c0_49 = arith.constant 0 : index
    %31 = vector.load %arg10[%c0_46, %c0_47, %c0_48, %c0_49] : memref<1x16x16x24xf32, #tpu.memory_space<vmem>>, vector<1x16x16x4xf32>
    tpu.vector_store %arg10[%c0_46, %c0_47, %c0_48, %c0_49], %30 {strides = array<i32>} : memref<1x16x16x24xf32, #tpu.memory_space<vmem>>, vector<1x16x16x4xf32>,
    %32 = vector.extract_strided_slice %28 {offsets = [0, 4], sizes = [256, 4], strides = [1, 1]} : vector<256x12xf32> to vector<256x4xf32>
    %33 = vector.shape_cast %32 : vector<256x4xf32> to vector<16x16x4xf32>
    %34 = arith.truncf %33 : vector<16x16x4xf32> to vector<16x16x4xbf16>
    %c1_50 = arith.constant 1 : index
    %c1_51 = arith.constant 1 : index
    %c0_52 = arith.constant 0 : index
    %35 = vector.load %arg11[%c1_50, %c1_51, %c0_52] : memref<18x18x4xbf16, #tpu.memory_space<vmem>>, vector<16x16x4xbf16>
    tpu.vector_store %arg11[%c1_50, %c1_51, %c0_52], %34 {strides = array<i32>} : memref<18x18x4xbf16, #tpu.memory_space<vmem>>, vector<16x16x4xbf16>,
    %36 = vector.extract_strided_slice %28 {offsets = [0, 8], sizes = [256, 4], strides = [1, 1]} : vector<256x12xf32> to vector<256x4xf32>
    %37 = vector.shape_cast %36 : vector<256x4xf32> to vector<16x16x4xf32>
    %38 = arith.truncf %37 : vector<16x16x4xf32> to vector<16x16x4xbf16>
    %c2_53 = arith.constant 2 : index
    %c2_54 = arith.constant 2 : index
    %c0_55 = arith.constant 0 : index
    %39 = vector.load %arg12[%c2_53, %c2_54, %c0_55] : memref<20x20x4xbf16, #tpu.memory_space<vmem>>, vector<16x16x4xbf16>
    tpu.vector_store %arg12[%c2_53, %c2_54, %c0_55], %38 {strides = array<i32>} : memref<20x20x4xbf16, #tpu.memory_space<vmem>>, vector<16x16x4xbf16>,
    %c0_56 = arith.constant 0 : index
    %c0_57 = arith.constant 0 : index
    %c0_58 = arith.constant 0 : index
    %40 = vector.load %arg11[%c0_56, %c0_57, %c0_58] : memref<18x18x4xbf16, #tpu.memory_space<vmem>>, vector<18x16x4xbf16>
    %41 = vector.extract_strided_slice %40 {offsets = [0, 0, 0], sizes = [16, 16, 4], strides = [1, 1, 1]} : vector<18x16x4xbf16> to vector<16x16x4xbf16>
    %42 = vector.shape_cast %41 : vector<16x16x4xbf16> to vector<256x4xbf16>
    %c0_59 = arith.constant 0 : index
    %c0_60 = arith.constant 0 : index
    %43 = vector.load %arg14[%c0_59, %c0_60] : memref<256x36xbf16, #tpu.memory_space<vmem>>, vector<256x4xbf16>
    tpu.vector_store %arg14[%c0_59, %c0_60], %42 {strides = array<i32>} : memref<256x36xbf16, #tpu.memory_space<vmem>>, vector<256x4xbf16>,
    %44 = vector.extract_strided_slice %40 {offsets = [1, 0, 0], sizes = [16, 16, 4], strides = [1, 1, 1]} : vector<18x16x4xbf16> to vector<16x16x4xbf16>
    %45 = vector.shape_cast %44 : vector<16x16x4xbf16> to vector<256x4xbf16>
    %c0_61 = arith.constant 0 : index
    %c12 = arith.constant 12 : index
    %46 = vector.load %arg14[%c0_61, %c12] : memref<256x36xbf16, #tpu.memory_space<vmem>>, vector<256x4xbf16>
    tpu.vector_store %arg14[%c0_61, %c12], %45 {strides = array<i32>} : memref<256x36xbf16, #tpu.memory_space<vmem>>, vector<256x4xbf16>,
    %47 = vector.extract_strided_slice %40 {offsets = [2, 0, 0], sizes = [16, 16, 4], strides = [1, 1, 1]} : vector<18x16x4xbf16> to vector<16x16x4xbf16>
    %48 = vector.shape_cast %47 : vector<16x16x4xbf16> to vector<256x4xbf16>
    %c0_62 = arith.constant 0 : index
    %c24 = arith.constant 24 : index
    %49 = vector.load %arg14[%c0_62, %c24] : memref<256x36xbf16, #tpu.memory_space<vmem>>, vector<256x4xbf16>
    tpu.vector_store %arg14[%c0_62, %c24], %48 {strides = array<i32>} : memref<256x36xbf16, #tpu.memory_space<vmem>>, vector<256x4xbf16>,
    %c0_63 = arith.constant 0 : index
    %c1_64 = arith.constant 1 : index
    %c0_65 = arith.constant 0 : index
    %50 = vector.load %arg11[%c0_63, %c1_64, %c0_65] : memref<18x18x4xbf16, #tpu.memory_space<vmem>>, vector<18x16x4xbf16>
    %51 = vector.extract_strided_slice %50 {offsets = [0, 0, 0], sizes = [16, 16, 4], strides = [1, 1, 1]} : vector<18x16x4xbf16> to vector<16x16x4xbf16>
    %52 = vector.shape_cast %51 : vector<16x16x4xbf16> to vector<256x4xbf16>
    %c0_66 = arith.constant 0 : index
    %c4 = arith.constant 4 : index
    %53 = vector.load %arg14[%c0_66, %c4] : memref<256x36xbf16, #tpu.memory_space<vmem>>, vector<256x4xbf16>
    tpu.vector_store %arg14[%c0_66, %c4], %52 {strides = array<i32>} : memref<256x36xbf16, #tpu.memory_space<vmem>>, vector<256x4xbf16>,
    %54 = vector.extract_strided_slice %50 {offsets = [1, 0, 0], sizes = [16, 16, 4], strides = [1, 1, 1]} : vector<18x16x4xbf16> to vector<16x16x4xbf16>
    %55 = vector.shape_cast %54 : vector<16x16x4xbf16> to vector<256x4xbf16>
    %c0_67 = arith.constant 0 : index
    %c16 = arith.constant 16 : index
    %56 = vector.load %arg14[%c0_67, %c16] : memref<256x36xbf16, #tpu.memory_space<vmem>>, vector<256x4xbf16>
    tpu.vector_store %arg14[%c0_67, %c16], %55 {strides = array<i32>} : memref<256x36xbf16, #tpu.memory_space<vmem>>, vector<256x4xbf16>,
    %57 = vector.extract_strided_slice %50 {offsets = [2, 0, 0], sizes = [16, 16, 4], strides = [1, 1, 1]} : vector<18x16x4xbf16> to vector<16x16x4xbf16>
    %58 = vector.shape_cast %57 : vector<16x16x4xbf16> to vector<256x4xbf16>
    %c0_68 = arith.constant 0 : index
    %c28 = arith.constant 28 : index
    %59 = vector.load %arg14[%c0_68, %c28] : memref<256x36xbf16, #tpu.memory_space<vmem>>, vector<256x4xbf16>
    tpu.vector_store %arg14[%c0_68, %c28], %58 {strides = array<i32>} : memref<256x36xbf16, #tpu.memory_space<vmem>>, vector<256x4xbf16>,
    %c0_69 = arith.constant 0 : index
    %c2_70 = arith.constant 2 : index
    %c0_71 = arith.constant 0 : index
    %60 = vector.load %arg11[%c0_69, %c2_70, %c0_71] : memref<18x18x4xbf16, #tpu.memory_space<vmem>>, vector<18x16x4xbf16>
    %61 = vector.extract_strided_slice %60 {offsets = [0, 0, 0], sizes = [16, 16, 4], strides = [1, 1, 1]} : vector<18x16x4xbf16> to vector<16x16x4xbf16>
    %62 = vector.shape_cast %61 : vector<16x16x4xbf16> to vector<256x4xbf16>
    %c0_72 = arith.constant 0 : index
    %c8 = arith.constant 8 : index
    %63 = vector.load %arg14[%c0_72, %c8] : memref<256x36xbf16, #tpu.memory_space<vmem>>, vector<256x4xbf16>
    tpu.vector_store %arg14[%c0_72, %c8], %62 {strides = array<i32>} : memref<256x36xbf16, #tpu.memory_space<vmem>>, vector<256x4xbf16>,
    %64 = vector.extract_strided_slice %60 {offsets = [1, 0, 0], sizes = [16, 16, 4], strides = [1, 1, 1]} : vector<18x16x4xbf16> to vector<16x16x4xbf16>
    %65 = vector.shape_cast %64 : vector<16x16x4xbf16> to vector<256x4xbf16>
    %c0_73 = arith.constant 0 : index
    %c20 = arith.constant 20 : index
    %66 = vector.load %arg14[%c0_73, %c20] : memref<256x36xbf16, #tpu.memory_space<vmem>>, vector<256x4xbf16>
    tpu.vector_store %arg14[%c0_73, %c20], %65 {strides = array<i32>} : memref<256x36xbf16, #tpu.memory_space<vmem>>, vector<256x4xbf16>,
    %67 = vector.extract_strided_slice %60 {offsets = [2, 0, 0], sizes = [16, 16, 4], strides = [1, 1, 1]} : vector<18x16x4xbf16> to vector<16x16x4xbf16>
    %68 = vector.shape_cast %67 : vector<16x16x4xbf16> to vector<256x4xbf16>
    %c0_74 = arith.constant 0 : index
    %c32 = arith.constant 32 : index
    %69 = vector.load %arg14[%c0_74, %c32] : memref<256x36xbf16, #tpu.memory_space<vmem>>, vector<256x4xbf16>
    tpu.vector_store %arg14[%c0_74, %c32], %68 {strides = array<i32>} : memref<256x36xbf16, #tpu.memory_space<vmem>>, vector<256x4xbf16>,
    %c0_75 = arith.constant 0 : index
    %c0_76 = arith.constant 0 : index
    %70 = vector.load %arg14[%c0_75, %c0_76] : memref<256x36xbf16, #tpu.memory_space<vmem>>, vector<256x36xbf16>
    %c0_77 = arith.constant 0 : index
    %c0_78 = arith.constant 0 : index
    %71 = vector.load %arg4[%c0_77, %c0_78] : memref<36x8xbf16, #tpu.memory_space<vmem>>, vector<36x8xbf16>
    %cst_79 = arith.constant dense<0.000000e+00> : vector<256x8xf32>
    %72 = tpu.matmul %70, %71, %cst_79 {dimension_numbers = #tpu.dot_dimension_numbers<[1], [0], [0], [1], [0, 0, 1, 1], [], []>} : vector<256x36xbf16>, vector<36x8xbf16>, vector<256x8xf32> -> vector<256x8xf32>
    %c0_80 = arith.constant 0 : index
    %c0_81 = arith.constant 0 : index
    %73 = vector.load %arg5[%c0_80, %c0_81] : memref<1x8xf32, #tpu.memory_space<vmem>>, vector<1x8xf32>
    %74 = vector.broadcast %73 : vector<1x8xf32> to vector<256x8xf32>
    %75 = arith.addf %72, %74 : vector<256x8xf32>
    %cst_82 = arith.constant 0.000000e+00 : f32
    %76 = vector.broadcast %cst_82 : f32 to vector<256x8xf32>
    %77 = arith.maximumf %75, %76 : vector<256x8xf32>
    %78 = vector.shape_cast %77 : vector<256x8xf32> to vector<1x16x16x8xf32>
    %c0_83 = arith.constant 0 : index
    %c0_84 = arith.constant 0 : index
    %c0_85 = arith.constant 0 : index
    %c4_86 = arith.constant 4 : index
    %79 = vector.load %arg10[%c0_83, %c0_84, %c0_85, %c4_86] : memref<1x16x16x24xf32, #tpu.memory_space<vmem>>, vector<1x16x16x8xf32>
    tpu.vector_store %arg10[%c0_83, %c0_84, %c0_85, %c4_86], %78 {strides = array<i32>} : memref<1x16x16x24xf32, #tpu.memory_space<vmem>>, vector<1x16x16x8xf32>,
    %c0_87 = arith.constant 0 : index
    %c0_88 = arith.constant 0 : index
    %c0_89 = arith.constant 0 : index
    %80 = vector.load %arg12[%c0_87, %c0_88, %c0_89] : memref<20x20x4xbf16, #tpu.memory_space<vmem>>, vector<20x16x4xbf16>
    %81 = vector.extract_strided_slice %80 {offsets = [0, 0, 0], sizes = [16, 16, 4], strides = [1, 1, 1]} : vector<20x16x4xbf16> to vector<16x16x4xbf16>
    %82 = vector.shape_cast %81 : vector<16x16x4xbf16> to vector<256x4xbf16>
    %c0_90 = arith.constant 0 : index
    %c0_91 = arith.constant 0 : index
    %83 = vector.load %arg15[%c0_90, %c0_91] : memref<256x100xbf16, #tpu.memory_space<vmem>>, vector<256x4xbf16>
    tpu.vector_store %arg15[%c0_90, %c0_91], %82 {strides = array<i32>} : memref<256x100xbf16, #tpu.memory_space<vmem>>, vector<256x4xbf16>,
    %84 = vector.extract_strided_slice %80 {offsets = [1, 0, 0], sizes = [16, 16, 4], strides = [1, 1, 1]} : vector<20x16x4xbf16> to vector<16x16x4xbf16>
    %85 = vector.shape_cast %84 : vector<16x16x4xbf16> to vector<256x4xbf16>
    %c0_92 = arith.constant 0 : index
    %c20_93 = arith.constant 20 : index
    %86 = vector.load %arg15[%c0_92, %c20_93] : memref<256x100xbf16, #tpu.memory_space<vmem>>, vector<256x4xbf16>
    tpu.vector_store %arg15[%c0_92, %c20_93], %85 {strides = array<i32>} : memref<256x100xbf16, #tpu.memory_space<vmem>>, vector<256x4xbf16>,
    %87 = vector.extract_strided_slice %80 {offsets = [2, 0, 0], sizes = [16, 16, 4], strides = [1, 1, 1]} : vector<20x16x4xbf16> to vector<16x16x4xbf16>
    %88 = vector.shape_cast %87 : vector<16x16x4xbf16> to vector<256x4xbf16>
    %c0_94 = arith.constant 0 : index
    %c40 = arith.constant 40 : index
    %89 = vector.load %arg15[%c0_94, %c40] : memref<256x100xbf16, #tpu.memory_space<vmem>>, vector<256x4xbf16>
    tpu.vector_store %arg15[%c0_94, %c40], %88 {strides = array<i32>} : memref<256x100xbf16, #tpu.memory_space<vmem>>, vector<256x4xbf16>,
    %90 = vector.extract_strided_slice %80 {offsets = [3, 0, 0], sizes = [16, 16, 4], strides = [1, 1, 1]} : vector<20x16x4xbf16> to vector<16x16x4xbf16>
    %91 = vector.shape_cast %90 : vector<16x16x4xbf16> to vector<256x4xbf16>
    %c0_95 = arith.constant 0 : index
    %c60 = arith.constant 60 : index
    %92 = vector.load %arg15[%c0_95, %c60] : memref<256x100xbf16, #tpu.memory_space<vmem>>, vector<256x4xbf16>
    tpu.vector_store %arg15[%c0_95, %c60], %91 {strides = array<i32>} : memref<256x100xbf16, #tpu.memory_space<vmem>>, vector<256x4xbf16>,
    %93 = vector.extract_strided_slice %80 {offsets = [4, 0, 0], sizes = [16, 16, 4], strides = [1, 1, 1]} : vector<20x16x4xbf16> to vector<16x16x4xbf16>
    %94 = vector.shape_cast %93 : vector<16x16x4xbf16> to vector<256x4xbf16>
    %c0_96 = arith.constant 0 : index
    %c80 = arith.constant 80 : index
    %95 = vector.load %arg15[%c0_96, %c80] : memref<256x100xbf16, #tpu.memory_space<vmem>>, vector<256x4xbf16>
    tpu.vector_store %arg15[%c0_96, %c80], %94 {strides = array<i32>} : memref<256x100xbf16, #tpu.memory_space<vmem>>, vector<256x4xbf16>,
    %c0_97 = arith.constant 0 : index
    %c1_98 = arith.constant 1 : index
    %c0_99 = arith.constant 0 : index
    %96 = vector.load %arg12[%c0_97, %c1_98, %c0_99] : memref<20x20x4xbf16, #tpu.memory_space<vmem>>, vector<20x16x4xbf16>
    %97 = vector.extract_strided_slice %96 {offsets = [0, 0, 0], sizes = [16, 16, 4], strides = [1, 1, 1]} : vector<20x16x4xbf16> to vector<16x16x4xbf16>
    %98 = vector.shape_cast %97 : vector<16x16x4xbf16> to vector<256x4xbf16>
    %c0_100 = arith.constant 0 : index
    %c4_101 = arith.constant 4 : index
    %99 = vector.load %arg15[%c0_100, %c4_101] : memref<256x100xbf16, #tpu.memory_space<vmem>>, vector<256x4xbf16>
    tpu.vector_store %arg15[%c0_100, %c4_101], %98 {strides = array<i32>} : memref<256x100xbf16, #tpu.memory_space<vmem>>, vector<256x4xbf16>,
    %100 = vector.extract_strided_slice %96 {offsets = [1, 0, 0], sizes = [16, 16, 4], strides = [1, 1, 1]} : vector<20x16x4xbf16> to vector<16x16x4xbf16>
    %101 = vector.shape_cast %100 : vector<16x16x4xbf16> to vector<256x4xbf16>
    %c0_102 = arith.constant 0 : index
    %c24_103 = arith.constant 24 : index
    %102 = vector.load %arg15[%c0_102, %c24_103] : memref<256x100xbf16, #tpu.memory_space<vmem>>, vector<256x4xbf16>
    tpu.vector_store %arg15[%c0_102, %c24_103], %101 {strides = array<i32>} : memref<256x100xbf16, #tpu.memory_space<vmem>>, vector<256x4xbf16>,
    %103 = vector.extract_strided_slice %96 {offsets = [2, 0, 0], sizes = [16, 16, 4], strides = [1, 1, 1]} : vector<20x16x4xbf16> to vector<16x16x4xbf16>
    %104 = vector.shape_cast %103 : vector<16x16x4xbf16> to vector<256x4xbf16>
    %c0_104 = arith.constant 0 : index
    %c44 = arith.constant 44 : index
    %105 = vector.load %arg15[%c0_104, %c44] : memref<256x100xbf16, #tpu.memory_space<vmem>>, vector<256x4xbf16>
    tpu.vector_store %arg15[%c0_104, %c44], %104 {strides = array<i32>} : memref<256x100xbf16, #tpu.memory_space<vmem>>, vector<256x4xbf16>,
    %106 = vector.extract_strided_slice %96 {offsets = [3, 0, 0], sizes = [16, 16, 4], strides = [1, 1, 1]} : vector<20x16x4xbf16> to vector<16x16x4xbf16>
    %107 = vector.shape_cast %106 : vector<16x16x4xbf16> to vector<256x4xbf16>
    %c0_105 = arith.constant 0 : index
    %c64 = arith.constant 64 : index
    %108 = vector.load %arg15[%c0_105, %c64] : memref<256x100xbf16, #tpu.memory_space<vmem>>, vector<256x4xbf16>
    tpu.vector_store %arg15[%c0_105, %c64], %107 {strides = array<i32>} : memref<256x100xbf16, #tpu.memory_space<vmem>>, vector<256x4xbf16>,
    %109 = vector.extract_strided_slice %96 {offsets = [4, 0, 0], sizes = [16, 16, 4], strides = [1, 1, 1]} : vector<20x16x4xbf16> to vector<16x16x4xbf16>
    %110 = vector.shape_cast %109 : vector<16x16x4xbf16> to vector<256x4xbf16>
    %c0_106 = arith.constant 0 : index
    %c84 = arith.constant 84 : index
    %111 = vector.load %arg15[%c0_106, %c84] : memref<256x100xbf16, #tpu.memory_space<vmem>>, vector<256x4xbf16>
    tpu.vector_store %arg15[%c0_106, %c84], %110 {strides = array<i32>} : memref<256x100xbf16, #tpu.memory_space<vmem>>, vector<256x4xbf16>,
    %c0_107 = arith.constant 0 : index
    %c2_108 = arith.constant 2 : index
    %c0_109 = arith.constant 0 : index
    %112 = vector.load %arg12[%c0_107, %c2_108, %c0_109] : memref<20x20x4xbf16, #tpu.memory_space<vmem>>, vector<20x16x4xbf16>
    %113 = vector.extract_strided_slice %112 {offsets = [0, 0, 0], sizes = [16, 16, 4], strides = [1, 1, 1]} : vector<20x16x4xbf16> to vector<16x16x4xbf16>
    %114 = vector.shape_cast %113 : vector<16x16x4xbf16> to vector<256x4xbf16>
    %c0_110 = arith.constant 0 : index
    %c8_111 = arith.constant 8 : index
    %115 = vector.load %arg15[%c0_110, %c8_111] : memref<256x100xbf16, #tpu.memory_space<vmem>>, vector<256x4xbf16>
    tpu.vector_store %arg15[%c0_110, %c8_111], %114 {strides = array<i32>} : memref<256x100xbf16, #tpu.memory_space<vmem>>, vector<256x4xbf16>,
    %116 = vector.extract_strided_slice %112 {offsets = [1, 0, 0], sizes = [16, 16, 4], strides = [1, 1, 1]} : vector<20x16x4xbf16> to vector<16x16x4xbf16>
    %117 = vector.shape_cast %116 : vector<16x16x4xbf16> to vector<256x4xbf16>
    %c0_112 = arith.constant 0 : index
    %c28_113 = arith.constant 28 : index
    %118 = vector.load %arg15[%c0_112, %c28_113] : memref<256x100xbf16, #tpu.memory_space<vmem>>, vector<256x4xbf16>
    tpu.vector_store %arg15[%c0_112, %c28_113], %117 {strides = array<i32>} : memref<256x100xbf16, #tpu.memory_space<vmem>>, vector<256x4xbf16>,
    %119 = vector.extract_strided_slice %112 {offsets = [2, 0, 0], sizes = [16, 16, 4], strides = [1, 1, 1]} : vector<20x16x4xbf16> to vector<16x16x4xbf16>
    %120 = vector.shape_cast %119 : vector<16x16x4xbf16> to vector<256x4xbf16>
    %c0_114 = arith.constant 0 : index
    %c48 = arith.constant 48 : index
    %121 = vector.load %arg15[%c0_114, %c48] : memref<256x100xbf16, #tpu.memory_space<vmem>>, vector<256x4xbf16>
    tpu.vector_store %arg15[%c0_114, %c48], %120 {strides = array<i32>} : memref<256x100xbf16, #tpu.memory_space<vmem>>, vector<256x4xbf16>,
    %122 = vector.extract_strided_slice %112 {offsets = [3, 0, 0], sizes = [16, 16, 4], strides = [1, 1, 1]} : vector<20x16x4xbf16> to vector<16x16x4xbf16>
    %123 = vector.shape_cast %122 : vector<16x16x4xbf16> to vector<256x4xbf16>
    %c0_115 = arith.constant 0 : index
    %c68 = arith.constant 68 : index
    %124 = vector.load %arg15[%c0_115, %c68] : memref<256x100xbf16, #tpu.memory_space<vmem>>, vector<256x4xbf16>
    tpu.vector_store %arg15[%c0_115, %c68], %123 {strides = array<i32>} : memref<256x100xbf16, #tpu.memory_space<vmem>>, vector<256x4xbf16>,
    %125 = vector.extract_strided_slice %112 {offsets = [4, 0, 0], sizes = [16, 16, 4], strides = [1, 1, 1]} : vector<20x16x4xbf16> to vector<16x16x4xbf16>
    %126 = vector.shape_cast %125 : vector<16x16x4xbf16> to vector<256x4xbf16>
    %c0_116 = arith.constant 0 : index
    %c88 = arith.constant 88 : index
    %127 = vector.load %arg15[%c0_116, %c88] : memref<256x100xbf16, #tpu.memory_space<vmem>>, vector<256x4xbf16>
    tpu.vector_store %arg15[%c0_116, %c88], %126 {strides = array<i32>} : memref<256x100xbf16, #tpu.memory_space<vmem>>, vector<256x4xbf16>,
    %c0_117 = arith.constant 0 : index
    %c3 = arith.constant 3 : index
    %c0_118 = arith.constant 0 : index
    %128 = vector.load %arg12[%c0_117, %c3, %c0_118] : memref<20x20x4xbf16, #tpu.memory_space<vmem>>, vector<20x16x4xbf16>
    %129 = vector.extract_strided_slice %128 {offsets = [0, 0, 0], sizes = [16, 16, 4], strides = [1, 1, 1]} : vector<20x16x4xbf16> to vector<16x16x4xbf16>
    %130 = vector.shape_cast %129 : vector<16x16x4xbf16> to vector<256x4xbf16>
    %c0_119 = arith.constant 0 : index
    %c12_120 = arith.constant 12 : index
    %131 = vector.load %arg15[%c0_119, %c12_120] : memref<256x100xbf16, #tpu.memory_space<vmem>>, vector<256x4xbf16>
    tpu.vector_store %arg15[%c0_119, %c12_120], %130 {strides = array<i32>} : memref<256x100xbf16, #tpu.memory_space<vmem>>, vector<256x4xbf16>,
    %132 = vector.extract_strided_slice %128 {offsets = [1, 0, 0], sizes = [16, 16, 4], strides = [1, 1, 1]} : vector<20x16x4xbf16> to vector<16x16x4xbf16>
    %133 = vector.shape_cast %132 : vector<16x16x4xbf16> to vector<256x4xbf16>
    %c0_121 = arith.constant 0 : index
    %c32_122 = arith.constant 32 : index
    %134 = vector.load %arg15[%c0_121, %c32_122] : memref<256x100xbf16, #tpu.memory_space<vmem>>, vector<256x4xbf16>
    tpu.vector_store %arg15[%c0_121, %c32_122], %133 {strides = array<i32>} : memref<256x100xbf16, #tpu.memory_space<vmem>>, vector<256x4xbf16>,
    %135 = vector.extract_strided_slice %128 {offsets = [2, 0, 0], sizes = [16, 16, 4], strides = [1, 1, 1]} : vector<20x16x4xbf16> to vector<16x16x4xbf16>
    %136 = vector.shape_cast %135 : vector<16x16x4xbf16> to vector<256x4xbf16>
    %c0_123 = arith.constant 0 : index
    %c52 = arith.constant 52 : index
    %137 = vector.load %arg15[%c0_123, %c52] : memref<256x100xbf16, #tpu.memory_space<vmem>>, vector<256x4xbf16>
    tpu.vector_store %arg15[%c0_123, %c52], %136 {strides = array<i32>} : memref<256x100xbf16, #tpu.memory_space<vmem>>, vector<256x4xbf16>,
    %138 = vector.extract_strided_slice %128 {offsets = [3, 0, 0], sizes = [16, 16, 4], strides = [1, 1, 1]} : vector<20x16x4xbf16> to vector<16x16x4xbf16>
    %139 = vector.shape_cast %138 : vector<16x16x4xbf16> to vector<256x4xbf16>
    %c0_124 = arith.constant 0 : index
    %c72 = arith.constant 72 : index
    %140 = vector.load %arg15[%c0_124, %c72] : memref<256x100xbf16, #tpu.memory_space<vmem>>, vector<256x4xbf16>
    tpu.vector_store %arg15[%c0_124, %c72], %139 {strides = array<i32>} : memref<256x100xbf16, #tpu.memory_space<vmem>>, vector<256x4xbf16>,
    %141 = vector.extract_strided_slice %128 {offsets = [4, 0, 0], sizes = [16, 16, 4], strides = [1, 1, 1]} : vector<20x16x4xbf16> to vector<16x16x4xbf16>
    %142 = vector.shape_cast %141 : vector<16x16x4xbf16> to vector<256x4xbf16>
    %c0_125 = arith.constant 0 : index
    %c92 = arith.constant 92 : index
    %143 = vector.load %arg15[%c0_125, %c92] : memref<256x100xbf16, #tpu.memory_space<vmem>>, vector<256x4xbf16>
    tpu.vector_store %arg15[%c0_125, %c92], %142 {strides = array<i32>} : memref<256x100xbf16, #tpu.memory_space<vmem>>, vector<256x4xbf16>,
    %c0_126 = arith.constant 0 : index
    %c4_127 = arith.constant 4 : index
    %c0_128 = arith.constant 0 : index
    %144 = vector.load %arg12[%c0_126, %c4_127, %c0_128] : memref<20x20x4xbf16, #tpu.memory_space<vmem>>, vector<20x16x4xbf16>
    %145 = vector.extract_strided_slice %144 {offsets = [0, 0, 0], sizes = [16, 16, 4], strides = [1, 1, 1]} : vector<20x16x4xbf16> to vector<16x16x4xbf16>
    %146 = vector.shape_cast %145 : vector<16x16x4xbf16> to vector<256x4xbf16>
    %c0_129 = arith.constant 0 : index
    %c16_130 = arith.constant 16 : index
    %147 = vector.load %arg15[%c0_129, %c16_130] : memref<256x100xbf16, #tpu.memory_space<vmem>>, vector<256x4xbf16>
    tpu.vector_store %arg15[%c0_129, %c16_130], %146 {strides = array<i32>} : memref<256x100xbf16, #tpu.memory_space<vmem>>, vector<256x4xbf16>,
    %148 = vector.extract_strided_slice %144 {offsets = [1, 0, 0], sizes = [16, 16, 4], strides = [1, 1, 1]} : vector<20x16x4xbf16> to vector<16x16x4xbf16>
    %149 = vector.shape_cast %148 : vector<16x16x4xbf16> to vector<256x4xbf16>
    %c0_131 = arith.constant 0 : index
    %c36 = arith.constant 36 : index
    %150 = vector.load %arg15[%c0_131, %c36] : memref<256x100xbf16, #tpu.memory_space<vmem>>, vector<256x4xbf16>
    tpu.vector_store %arg15[%c0_131, %c36], %149 {strides = array<i32>} : memref<256x100xbf16, #tpu.memory_space<vmem>>, vector<256x4xbf16>,
    %151 = vector.extract_strided_slice %144 {offsets = [2, 0, 0], sizes = [16, 16, 4], strides = [1, 1, 1]} : vector<20x16x4xbf16> to vector<16x16x4xbf16>
    %152 = vector.shape_cast %151 : vector<16x16x4xbf16> to vector<256x4xbf16>
    %c0_132 = arith.constant 0 : index
    %c56 = arith.constant 56 : index
    %153 = vector.load %arg15[%c0_132, %c56] : memref<256x100xbf16, #tpu.memory_space<vmem>>, vector<256x4xbf16>
    tpu.vector_store %arg15[%c0_132, %c56], %152 {strides = array<i32>} : memref<256x100xbf16, #tpu.memory_space<vmem>>, vector<256x4xbf16>,
    %154 = vector.extract_strided_slice %144 {offsets = [3, 0, 0], sizes = [16, 16, 4], strides = [1, 1, 1]} : vector<20x16x4xbf16> to vector<16x16x4xbf16>
    %155 = vector.shape_cast %154 : vector<16x16x4xbf16> to vector<256x4xbf16>
    %c0_133 = arith.constant 0 : index
    %c76 = arith.constant 76 : index
    %156 = vector.load %arg15[%c0_133, %c76] : memref<256x100xbf16, #tpu.memory_space<vmem>>, vector<256x4xbf16>
    tpu.vector_store %arg15[%c0_133, %c76], %155 {strides = array<i32>} : memref<256x100xbf16, #tpu.memory_space<vmem>>, vector<256x4xbf16>,
    %157 = vector.extract_strided_slice %144 {offsets = [4, 0, 0], sizes = [16, 16, 4], strides = [1, 1, 1]} : vector<20x16x4xbf16> to vector<16x16x4xbf16>
    %158 = vector.shape_cast %157 : vector<16x16x4xbf16> to vector<256x4xbf16>
    %c0_134 = arith.constant 0 : index
    %c96 = arith.constant 96 : index
    %159 = vector.load %arg15[%c0_134, %c96] : memref<256x100xbf16, #tpu.memory_space<vmem>>, vector<256x4xbf16>
    tpu.vector_store %arg15[%c0_134, %c96], %158 {strides = array<i32>} : memref<256x100xbf16, #tpu.memory_space<vmem>>, vector<256x4xbf16>,
    %c0_135 = arith.constant 0 : index
    %c0_136 = arith.constant 0 : index
    %160 = vector.load %arg15[%c0_135, %c0_136] : memref<256x100xbf16, #tpu.memory_space<vmem>>, vector<256x100xbf16>
    %c0_137 = arith.constant 0 : index
    %c0_138 = arith.constant 0 : index
    %161 = vector.load %arg6[%c0_137, %c0_138] : memref<100x8xbf16, #tpu.memory_space<vmem>>, vector<100x8xbf16>
    %cst_139 = arith.constant dense<0.000000e+00> : vector<256x8xf32>
    %162 = tpu.matmul %160, %161, %cst_139 {dimension_numbers = #tpu.dot_dimension_numbers<[1], [0], [0], [1], [0, 0, 1, 1], [], []>} : vector<256x100xbf16>, vector<100x8xbf16>, vector<256x8xf32> -> vector<256x8xf32>
    %c0_140 = arith.constant 0 : index
    %c0_141 = arith.constant 0 : index
    %163 = vector.load %arg7[%c0_140, %c0_141] : memref<1x8xf32, #tpu.memory_space<vmem>>, vector<1x8xf32>
    %164 = vector.broadcast %163 : vector<1x8xf32> to vector<256x8xf32>
    %165 = arith.addf %162, %164 : vector<256x8xf32>
    %cst_142 = arith.constant 0.000000e+00 : f32
    %166 = vector.broadcast %cst_142 : f32 to vector<256x8xf32>
    %167 = arith.maximumf %165, %166 : vector<256x8xf32>
    %168 = vector.shape_cast %167 : vector<256x8xf32> to vector<1x16x16x8xf32>
    %c0_143 = arith.constant 0 : index
    %c0_144 = arith.constant 0 : index
    %c0_145 = arith.constant 0 : index
    %c12_146 = arith.constant 12 : index
    %169 = vector.load %arg10[%c0_143, %c0_144, %c0_145, %c12_146] : memref<1x16x16x24xf32, #tpu.memory_space<vmem>>, vector<1x16x16x8xf32>
    tpu.vector_store %arg10[%c0_143, %c0_144, %c0_145, %c12_146], %168 {strides = array<i32>} : memref<1x16x16x24xf32, #tpu.memory_space<vmem>>, vector<1x16x16x8xf32>,
    %c1_147 = arith.constant 1 : index
    %c1_148 = arith.constant 1 : index
    %c0_149 = arith.constant 0 : index
    %170 = vector.load %arg13[%c1_147, %c1_148, %c0_149] : memref<18x18x4xbf16, #tpu.memory_space<vmem>>, vector<16x16x4xbf16>
    tpu.vector_store %arg13[%c1_147, %c1_148, %c0_149], %20 {strides = array<i32>} : memref<18x18x4xbf16, #tpu.memory_space<vmem>>, vector<16x16x4xbf16>,
    %c0_150 = arith.constant 0 : index
    %c0_151 = arith.constant 0 : index
    %c0_152 = arith.constant 0 : index
    %171 = vector.load %arg13[%c0_150, %c0_151, %c0_152] : memref<18x18x4xbf16, #tpu.memory_space<vmem>>, vector<18x16x4xbf16>
    %c0_153 = arith.constant 0 : index
    %c1_154 = arith.constant 1 : index
    %c0_155 = arith.constant 0 : index
    %172 = vector.load %arg13[%c0_153, %c1_154, %c0_155] : memref<18x18x4xbf16, #tpu.memory_space<vmem>>, vector<18x16x4xbf16>
    %173 = arith.maximumf %171, %172 : vector<18x16x4xbf16>
    %c0_156 = arith.constant 0 : index
    %c2_157 = arith.constant 2 : index
    %c0_158 = arith.constant 0 : index
    %174 = vector.load %arg13[%c0_156, %c2_157, %c0_158] : memref<18x18x4xbf16, #tpu.memory_space<vmem>>, vector<18x16x4xbf16>
    %175 = arith.maximumf %173, %174 : vector<18x16x4xbf16>
    %176 = vector.extract_strided_slice %175 {offsets = [0, 0, 0], sizes = [16, 16, 4], strides = [1, 1, 1]} : vector<18x16x4xbf16> to vector<16x16x4xbf16>
    %177 = vector.extract_strided_slice %175 {offsets = [1, 0, 0], sizes = [16, 16, 4], strides = [1, 1, 1]} : vector<18x16x4xbf16> to vector<16x16x4xbf16>
    %178 = arith.maximumf %176, %177 : vector<16x16x4xbf16>
    %179 = vector.extract_strided_slice %175 {offsets = [2, 0, 0], sizes = [16, 16, 4], strides = [1, 1, 1]} : vector<18x16x4xbf16> to vector<16x16x4xbf16>
    %180 = arith.maximumf %178, %179 : vector<16x16x4xbf16>
    %181 = vector.shape_cast %180 : vector<16x16x4xbf16> to vector<256x4xbf16>
    %c0_159 = arith.constant 0 : index
    %c0_160 = arith.constant 0 : index
    %182 = vector.load %arg8[%c0_159, %c0_160] : memref<4x4xbf16, #tpu.memory_space<vmem>>, vector<4x4xbf16>
    %cst_161 = arith.constant dense<0.000000e+00> : vector<256x4xf32>
    %183 = tpu.matmul %181, %182, %cst_161 {dimension_numbers = #tpu.dot_dimension_numbers<[1], [0], [0], [1], [0, 0, 1, 1], [], []>} : vector<256x4xbf16>, vector<4x4xbf16>, vector<256x4xf32> -> vector<256x4xf32>
    %c0_162 = arith.constant 0 : index
    %c0_163 = arith.constant 0 : index
    %184 = vector.load %arg9[%c0_162, %c0_163] : memref<1x4xf32, #tpu.memory_space<vmem>>, vector<1x4xf32>
    %185 = vector.broadcast %184 : vector<1x4xf32> to vector<256x4xf32>
    %186 = arith.addf %183, %185 : vector<256x4xf32>
    %cst_164 = arith.constant 0.000000e+00 : f32
    %187 = vector.broadcast %cst_164 : f32 to vector<256x4xf32>
    %188 = arith.maximumf %186, %187 : vector<256x4xf32>
    %189 = vector.shape_cast %188 : vector<256x4xf32> to vector<1x16x16x4xf32>
    %c0_165 = arith.constant 0 : index
    %c0_166 = arith.constant 0 : index
    %c0_167 = arith.constant 0 : index
    %c20_168 = arith.constant 20 : index
    %190 = vector.load %arg10[%c0_165, %c0_166, %c0_167, %c20_168] : memref<1x16x16x24xf32, #tpu.memory_space<vmem>>, vector<1x16x16x4xf32>
    tpu.vector_store %arg10[%c0_165, %c0_166, %c0_167, %c20_168], %189 {strides = array<i32>} : memref<1x16x16x24xf32, #tpu.memory_space<vmem>>, vector<1x16x16x4xf32>,
    return
  }
  func.func @transform_0(%arg0: i32) -> (i32, i32, i32, i32) {
    %c0_i32 = arith.constant 0 : i32
    %c0_i32_0 = arith.constant 0 : i32
    %c0_i32_1 = arith.constant 0 : i32
    %c0_i32_2 = arith.constant 0 : i32
    return %arg0, %c0_i32, %c0_i32_0, %c0_i32_1 : i32, i32, i32, i32
  }
  func.func @transform_1(%arg0: i32) -> (i32, i32) {
    %c0_i32 = arith.constant 0 : i32
    %c0_i32_0 = arith.constant 0 : i32
    %c0_i32_1 = arith.constant 0 : i32
    return %c0_i32, %c0_i32_0 : i32, i32
  }
  func.func @transform_2(%arg0: i32) -> (i32, i32) {
    %c0_i32 = arith.constant 0 : i32
    %c0_i32_0 = arith.constant 0 : i32
    %c0_i32_1 = arith.constant 0 : i32
    return %c0_i32, %c0_i32_0 : i32, i32
  }
  func.func @transform_3(%arg0: i32) -> (i32, i32) {
    %c0_i32 = arith.constant 0 : i32
    %c0_i32_0 = arith.constant 0 : i32
    %c0_i32_1 = arith.constant 0 : i32
    return %c0_i32, %c0_i32_0 : i32, i32
  }
  func.func @transform_4(%arg0: i32) -> (i32, i32) {
    %c0_i32 = arith.constant 0 : i32
    %c0_i32_0 = arith.constant 0 : i32
    %c0_i32_1 = arith.constant 0 : i32
    return %c0_i32, %c0_i32_0 : i32, i32
  }
  func.func @transform_5(%arg0: i32) -> (i32, i32) {
    %c0_i32 = arith.constant 0 : i32
    %c0_i32_0 = arith.constant 0 : i32
    %c0_i32_1 = arith.constant 0 : i32
    return %c0_i32, %c0_i32_0 : i32, i32
  }
  func.func @transform_6(%arg0: i32) -> (i32, i32) {
    %c0_i32 = arith.constant 0 : i32
    %c0_i32_0 = arith.constant 0 : i32
    %c0_i32_1 = arith.constant 0 : i32
    return %c0_i32, %c0_i32_0 : i32, i32
  }
  func.func @transform_7(%arg0: i32) -> (i32, i32) {
    %c0_i32 = arith.constant 0 : i32
    %c0_i32_0 = arith.constant 0 : i32
    %c0_i32_1 = arith.constant 0 : i32
    return %c0_i32, %c0_i32_0 : i32, i32
  }
  func.func @transform_8(%arg0: i32) -> (i32, i32) {
    %c0_i32 = arith.constant 0 : i32
    %c0_i32_0 = arith.constant 0 : i32
    %c0_i32_1 = arith.constant 0 : i32
    return %c0_i32, %c0_i32_0 : i32, i32
  }
  func.func @transform_9(%arg0: i32) -> (i32, i32, i32, i32) {
    %c0_i32 = arith.constant 0 : i32
    %c0_i32_0 = arith.constant 0 : i32
    %c0_i32_1 = arith.constant 0 : i32
    %c0_i32_2 = arith.constant 0 : i32
    return %arg0, %c0_i32, %c0_i32_0, %c0_i32_1 : i32, i32, i32, i32
  }
}

</mosaic_0001>

<bundles_post_ra>
// kernel: inception_block_forward.1
= control target key start
LH: loop header
LB: loop body
LE: loop exit
PB: predicated region body
PF: predicated region fallthrough
CT: control target
= control target key end

     0   :  { %14 = vsyncpa [#allocation8], 0  ;;  %s16168_s0 = inlined_call_operand.vmem [shape: f32[2,16,16,4], index: 0, kind: input, shape index: {}]   ;;  %s16169_s1 = inlined_call_operand.vmem [shape: bf16[4,12], index: 1, kind: input, shape index: {}]   ;;  %s16170_s2 = inlined_call_operand.vmem [shape: f32[1,12], index: 2, kind: input, shape index: {}]   ;;  %s16171_s3 = inlined_call_operand.vmem [shape: bf16[36,8], index: 3, kind: input, shape index: {}]   ;;  %s16172_s4 = inlined_call_operand.vmem [shape: f32[1,8], index: 4, kind: input, shape index: {}]   ;;  %s16173_s5 = inlined_call_operand.vmem [shape: bf16[100,8], index: 5, kind: input, shape index: {}]   ;;  %s16174_s6 = inlined_call_operand.vmem [shape: f32[1,8], index: 6, kind: input, shape index: {}]   ;;  %s16175_s7 = inlined_call_operand.vmem [shape: bf16[4,4], index: 7, kind: input, shape index: {}]   ;;  %s16176_s8 = inlined_call_operand.vmem [shape: f32[1,4], index: 8, kind: input, shape index: {}]   ;;  %s16177_s9 = inlined_call_operand.hbm [shape: f32[2,16,16,24], index: 9, kind: output, shape index: {}]  }
   0x1   :  { %16 = vsyncpa [#allocation8 + $0x1], 0  ;;  %s10856_s30 = smov 0   ;;  %s10858_s10 = smov 0  }
   0x2   :  { %s10860_s11 = smov 0   ;;  %s10862_s12 = smov 0  }
   0x3 LB: > { %s10877_s13 = sadd.s32 4294967295, %s10774_s12   ;;  %s9898_s14 = sadd.s32 4294967294, %s10774_s12   ;;  %s10774_s12 = sphi %s10862_s12, %s16337_s12   ;;  %s10770_s11 = sphi %s10860_s11, %s16336_s11   ;;  %s10766_s10 = sphi %s10858_s10, %s16335_s10   ;;  %s10762_s30 = sphi %s10856_s30, %s16334_s30  }
   0x4   : > { %s10881_s15 = sadd.s32 1, %s10774_s12   ;;  %s223_s16 = sadd.s32 1, %s10770_s11 }
   0x5   : > { %s220_s17 = ssub.s32 %s10774_s12, %s10881_s15  ;;  %p233_p0 = scmp.ne.s32.totalorder %s10770_s11, %s10766_s10 }
   0x6   : > { %p221_p1 = scmp.eq.s32.totalorder %s220_s17, 0  ;;  %p234_p2 = scmp.eq.s32.totalorder %s10877_s13, 1 }
   0x7   : > { %p239_p3 = scmp.ne.s32.totalorder %s10766_s10, %s10762_s30  ;;  %p240_p4 = scmp.eq.s32.totalorder %s9898_s14, 1 }
   0x8   : > { %s10892_s18 = scalar_select %p221_p1, %s10770_s11, %s223_s16  }
   0x9   : > { %p10894_p5 = por %p234_p2, %p233_p0  ;;  %p10898_p6 = por %p240_p4, %p239_p3 }
   0xa   : > { %p9901_p7 = scmp.ge.s32.totalorder %s10774_s12, 1  ;;  %p290_p8 = scmp.lt.s32.totalorder %s10774_s12, 3 }
   0xc   : > { %p291_p9 = pnand %p9901_p7, %p290_p8 }
   0xe   : > { %294 = sbr.rel (%p291_p9) target bundleno = 2090 (0x82a), region = 56 }
  0x15   : > { %v644_v0 = vld [vmem:[%s16169_s1] sm:$0x3]  ;;  %vm701_vm0 = vcmask 1041408   ;;  %p326_p10 = scmp.lt.s32.totalorder %s10877_s13, 1  ;;  %vm16219_vm1 = vcmask 24576   ;;  %vm333_vm6 = vcmask 27648  }
  0x16   : > { %10592 = vmatprep.subr.msk.bf16.mxu0 %vm701_vm0, %v644_v0  ;;  %v703_v1 = vsel %vm701_vm0, %v644_v0, 0  ;;  %vm344_vm2 = vsmask.f32 256  ;;  %vm394_vm3 = vsmask.f32 7938  ;;  %vm16218_vm8 = vcmask 31744  }
  0x17   : > { %10441 = vmatpush3.bf16.msra.mxu0 %v703_v1  ;;  %s327_s23 = scalar_select %p326_p10, %s10877_s13, 1  ;;  %vm10913_vm4 = vmand %vm16219_vm1, %vm344_vm2  ;;  %v500_v3 = vld [vmem:[#allocation4 + $0xc] sm:$0x1]  ;;  %v548_v4 = vld [vmem:[#allocation4 + $0x14] sm:$0x1]  ;;  %vm2962_vm11 = vcmask 1042432  }
  0x18   : > { %vm10919_vm5 = vmand %vm16219_vm1, %vm394_vm3  ;;  %v501_v6 = vsel %vm10913_vm4, 4286578559, %v500_v3  ;;  %v503_v7 = vld [vmem:[#allocation4 + $0x18] sm:$0x1]  ;;  %vm1026_vm7 = vsmask.f32 4368 }
  0x19   : > { %s10298_s24 = sshll.u32 %s327_s23, 8  ;;  %502 = vst [vmem:[#allocation4 + $0xc] sm:$0x1] %v501_v6  ;;  %v549_v8 = vsel %vm10919_vm5, 4286578559, %v548_v4  ;;  %vm10952_vm9 = vmor %vm344_vm2, %vm1026_vm7  ;;  %vm2963_vm12 = vcmask 1046532  }
  0x1a   : > { %v504_v9 = vsel %vm10913_vm4, 4286578559, %v503_v7  ;;  %s10932_s27 = scalar_lea.vmem %s16168_s0, %s10298_s24  ;;  %550 = vst [vmem:[#allocation4 + $0x14] sm:$0x1] %v549_v8  ;;  %v551_v10 = vld [vmem:[#allocation4 + $0x20] sm:$0x1]  ;;  %vm10959_vm10 = vmand %vm333_vm6, %vm394_vm3 }
  0x1b   : > { %505 = vst [vmem:[#allocation4 + $0x18] sm:$0x1] %v504_v9  ;;  %v506_v11 = vld [vmem:[#allocation4 + $0x24] sm:$0x1]  ;;  %v596_v12 = vld [vmem:[%s10932_s27] sm:$0xff]  ;;  %v598_v15 = vld [vmem:[%s10932_s27 + $0x10] sm:$0xff] }
  0x1c   : > { %v597_v13 = vld [vmem:[%s10932_s27 + $0x8] sm:$0xff]  ;;  %v552_v14 = vsel %vm10919_vm5, 4286578559, %v551_v10  ;;  %v10331_v17 = vpack.c.bf16 %v596_v12, %v596_v12  ;;  %v599_v19 = vld [vmem:[%s10932_s27 + $0x18] sm:$0xff]  ;;  %v10333_v20 = vpack.c.bf16 %v598_v15, %v598_v15  ;;  %v554_v21 = vld [vmem:[#allocation4 + $0x2c] sm:$0x1] }
  0x1d   : > { %v628_v16 = vpack.c.bf16 %v597_v13, %v596_v12  ;;  %v10332_v18 = vpack.c.bf16 %v597_v13, %v597_v13  ;;  %553 = vst [vmem:[#allocation4 + $0x20] sm:$0x1] %v552_v14  ;;  %v629_v22 = vpack.c.bf16 %v599_v19, %v598_v15  ;;  %v10334_v23 = vpack.c.bf16 %v599_v19, %v599_v19  ;;  %v600_v26 = vld [vmem:[%s10932_s27 + $0x20] sm:$0xff]  ;;  %v601_v27 = vld [vmem:[%s10932_s27 + $0x28] sm:$0xff]  ;;  %v602_v32 = vld [vmem:[%s10932_s27 + $0x30] sm:$0xff]  ;;  %s10777_s28 = smov 24  }
  0x1e   : > { %v507_v24 = vsel %vm10913_vm4, 4286578559, %v506_v11  ;;  %v555_v25 = vsel %vm10919_vm5, 4286578559, %v554_v21  ;;  %v8007_v28 = vshrl.u32 %v10331_v17, 16  ;;  %v8010_v29 = vshll.u32 %v10331_v17, 16  ;;  %vm11224_vm13 = vmor %vm2962_vm11, %vm2963_vm12 }
  0x1f   : > { %10442 = vmatprep.mubr.msk.bf16.mxu0 %vm16218_vm8, %v628_v16  ;;  %v8015_v30 = vshrl.u32 %v10332_v18, 16  ;;  %v8018_v31 = vshll.u32 %v10332_v18, 16  ;;  %508 = vst [vmem:[#allocation4 + $0x24] sm:$0x1] %v507_v24  ;;  %556 = vst [vmem:[#allocation4 + $0x2c] sm:$0x1] %v555_v25  ;;  %v630_v39 = vpack.c.bf16 %v601_v27, %v600_v26  ;;  %v10335_v40 = vpack.c.bf16 %v600_v26, %v600_v26 }
  0x20   : > { %10443 = vmatmul.mubr.msk.bf16.vlgmr.msra.gmra.mrb[0].mxu0 %vm16218_vm8, %v629_v22  ;;  %v8024_v33 = vshrl.u32 %v10333_v20, 16  ;;  %v8027_v34 = vshll.u32 %v10333_v20, 16  ;;  %v8032_v35 = vshrl.u32 %v10334_v23, 16  ;;  %v8035_v36 = vshll.u32 %v10334_v23, 16  ;;  %v603_v41 = vld [vmem:[%s10932_s27 + $0x38] sm:$0xff]  ;;  %v604_v10 = vld [vmem:[%s10932_s27 + $0x40] sm:$0xff] }
  0x21   : > { %v8009_v37 = vrot.slane %v8007_v28, 7  ;;  %v8017_v38 = vrot.slane %v8015_v30, 7  ;;  %v8326_v42 = vld [vmem:[#allocation4 + $0xc] sm:$0xf]  ;;  %v8330_v43 = vld [vmem:[#allocation4 + $0x14] sm:$0x1]  ;;  %v10336_v46 = vpack.c.bf16 %v601_v27, %v601_v27  ;;  %v631_v47 = vpack.c.bf16 %v603_v41, %v602_v32  ;;  %10446 = vmatprep.mubr.msk.bf16.mxu0 %vm16218_vm8, %v630_v39 }
  0x22   : > { %v8026_v44 = vrot.slane %v8024_v33, 7  ;;  %v8034_v45 = vrot.slane %v8032_v35, 7  ;;  %v8333_v53 = vld [vmem:[#allocation4 + $0x18] sm:$0xf]  ;;  %v509_v60 = vld [vmem:[#allocation4 + $0x30] sm:$0x1]  ;;  %v10337_v18 = vpack.c.bf16 %v602_v32, %v602_v32  ;;  %v10338_v19 = vpack.c.bf16 %v603_v41, %v603_v41 }
  0x23   : > { %v8012_v49 = vor.u32 %v8010_v29, %v8009_v37  ;;  %v8013_v50 = vrot.slane %v8009_v37, 4  ;;  %v8020_v51 = vor.u32 %v8018_v31, %v8017_v38  ;;  %v8022_v52 = vrot.slane %v8017_v38, 4  ;;  %v557_v1 = vld [vmem:[#allocation4 + $0x38] sm:$0x1]  ;;  %v512_v3 = vld [vmem:[#allocation4 + $0x3c] sm:$0x1] }
  0x24   : > { %v8029_v55 = vor.u32 %v8027_v34, %v8026_v44  ;;  %v8030_v56 = vrot.slane %v8026_v44, 4  ;;  %v8037_v57 = vor.u32 %v8035_v36, %v8034_v45  ;;  %v8039_v58 = vrot.slane %v8034_v45, 4  ;;  %v8337_v59 = vld [vmem:[#allocation4 + $0x20] sm:$0x1]  ;;  %v560_v9 = vld [vmem:[#allocation4 + $0x44] sm:$0x1] }
  0x25   : > { %v8021_v61 = vsel %vm10952_vm9, %v8013_v50, %v8020_v51  ;;  %v8327_v62 = vsel %vm10959_vm10, %v8012_v49, %v8326_v42  ;;  %v8331_v63 = vsel %vm10913_vm4, %v8022_v52, %v8330_v43  ;;  %v8041_v0 = vshrl.u32 %v10335_v40, 16  ;;  %v605_v15 = vld [vmem:[%s10932_s27 + $0x48] sm:$0xff]  ;;  %v515_v21 = vld [vmem:[#allocation4 + $0x48] sm:$0x1]  ;;  %v563_v26 = vld [vmem:[#allocation4 + $0x50] sm:$0x1] }
  0x26   : > { %8328 = vst [vmem:[#allocation4 + $0xc] sm:$0xf] %v8327_v62  ;;  %8329 = vst.msk [vmem:[#allocation4 + $0x10] sm:$0xf] %vm333_vm6, %v8021_v61  ;;  %v8038_v4 = vsel %vm10952_vm9, %v8030_v56, %v8037_v57  ;;  %v8334_v6 = vsel %vm10959_vm10, %v8029_v55, %v8333_v53  ;;  %v8338_v7 = vsel %vm10913_vm4, %v8039_v58, %v8337_v59  ;;  %v8044_v8 = vshll.u32 %v10335_v40, 16  ;;  %v606_v44 = vld [vmem:[%s10932_s27 + $0x50] sm:$0xff] }
  0x27   : > { %8332 = vst [vmem:[#allocation4 + $0x14] sm:$0x1] %v8331_v63  ;;  %8335 = vst [vmem:[#allocation4 + $0x18] sm:$0xf] %v8334_v6  ;;  %v8043_v11 = vrot.slane %v8041_v0, 7  ;;  %v8049_v12 = vshrl.u32 %v10336_v46, 16  ;;  %v632_v35 = vpack.c.bf16 %v605_v15, %v604_v10  ;;  %v10339_v38 = vpack.c.bf16 %v604_v10, %v604_v10 }
  0x28   : > { %8336 = vst.msk [vmem:[#allocation4 + $0x1c] sm:$0xf] %vm333_vm6, %v8038_v4  ;;  %8339 = vst [vmem:[#allocation4 + $0x20] sm:$0x1] %v8338_v7  ;;  %v8052_v13 = vshll.u32 %v10336_v46, 16  ;;  %10447 = vmatmul.mubr.msk.bf16.gmra.mrb[4].mxu0 %vm16218_vm8, %v631_v47  ;;  %v8058_v28 = vshrl.u32 %v10337_v18, 16  ;;  %v10340_v39 = vpack.c.bf16 %v605_v15, %v605_v15  ;;  %v10341_v63 = vpack.c.bf16 %v606_v44, %v606_v44 }
  0x29   : > { %v510_v14 = vsel %vm10913_vm4, 4286578559, %v509_v60  ;;  %v8340_v16 = vld [vmem:[#allocation4 + $0x24] sm:$0xf]  ;;  %v558_v17 = vsel %vm10919_vm5, 4286578559, %v557_v1  ;;  %v8046_v22 = vor.u32 %v8044_v8, %v8043_v11  ;;  %10450 = vmatprep.mubr.msk.bf16.mxu0 %vm16218_vm8, %v632_v35 }
  0x2a   : > { %511 = vst [vmem:[#allocation4 + $0x30] sm:$0x1] %v510_v14  ;;  %v513_v20 = vsel %vm10913_vm4, 4286578559, %v512_v3  ;;  %v8047_v23 = vrot.slane %v8043_v11, 4  ;;  %v8051_v24 = vrot.slane %v8049_v12, 7 }
  0x2b   : > { %559 = vst [vmem:[#allocation4 + $0x38] sm:$0x1] %v558_v17  ;;  %514 = vst [vmem:[#allocation4 + $0x3c] sm:$0x1] %v513_v20  ;;  %v561_v25 = vsel %vm10919_vm5, 4286578559, %v560_v9  ;;  %v8341_v34 = vsel %vm10959_vm10, %v8046_v22, %v8340_v16 }
  0x2c   : > { %v8344_v27 = vld [vmem:[#allocation4 + $0x2c] sm:$0x1]  ;;  %v8061_v29 = vshll.u32 %v10337_v18, 16  ;;  %v8066_v30 = vshrl.u32 %v10338_v19, 16  ;;  %v8069_v31 = vshll.u32 %v10338_v19, 16  ;;  %v8054_v32 = vor.u32 %v8052_v13, %v8051_v24  ;;  %v607_v45 = vld [vmem:[%s10932_s27 + $0x58] sm:$0xff] }
  0x2d   : > { %562 = vst [vmem:[#allocation4 + $0x44] sm:$0x1] %v561_v25  ;;  %v8056_v33 = vrot.slane %v8051_v24, 4  ;;  %8342 = vst [vmem:[#allocation4 + $0x24] sm:$0xf] %v8341_v34  ;;  %v8060_v36 = vrot.slane %v8058_v28, 7  ;;  %v633_v62 = vpack.c.bf16 %v607_v45, %v606_v44  ;;  %v10342_v9 = vpack.c.bf16 %v607_v45, %v607_v45 }
  0x2e   : > { %v8068_v37 = vrot.slane %v8066_v30, 7  ;;  %v8055_v40 = vsel %vm10952_vm9, %v8047_v23, %v8054_v32  ;;  %v516_v42 = vsel %vm10913_vm4, 4286578559, %v515_v21  ;;  %v564_v43 = vsel %vm10919_vm5, 4286578559, %v563_v26  ;;  %v608_v0 = vld [vmem:[%s10932_s27 + $0x60] sm:$0xff] }
  0x2f   : > { %v8345_v41 = vsel %vm10913_vm4, %v8056_v33, %v8344_v27  ;;  %8343 = vst.msk [vmem:[#allocation4 + $0x28] sm:$0xf] %vm333_vm6, %v8055_v40  ;;  %v8063_v46 = vor.u32 %v8061_v29, %v8060_v36  ;;  %v8064_v47 = vrot.slane %v8060_v36, 4  ;;  %517 = vst [vmem:[#allocation4 + $0x48] sm:$0x1] %v516_v42  ;;  %v8075_v55 = vshrl.u32 %v10339_v38, 16 }
  0x30   : > { %8346 = vst [vmem:[#allocation4 + $0x2c] sm:$0x1] %v8345_v41  ;;  %v8071_v49 = vor.u32 %v8069_v31, %v8068_v37  ;;  %v8073_v50 = vrot.slane %v8068_v37, 4  ;;  %565 = vst [vmem:[#allocation4 + $0x50] sm:$0x1] %v564_v43  ;;  %v8078_v56 = vshll.u32 %v10339_v38, 16  ;;  %10451 = vmatmul.mubr.msk.bf16.gmra.mrb[8].mxu0 %vm16218_vm8, %v633_v62  ;;  %v10343_v28 = vpack.c.bf16 %v608_v0, %v608_v0 }
  0x31   : > { %v518_v51 = vld [vmem:[#allocation4 + $0x54] sm:$0x1]  ;;  %v566_v52 = vld [vmem:[#allocation4 + $0x5c] sm:$0x1]  ;;  %v8347_v53 = vld [vmem:[#allocation4 + $0x30] sm:$0xf] }
  0x32   : > { %v8083_v57 = vshrl.u32 %v10340_v39, 16  ;;  %v8086_v58 = vshll.u32 %v10340_v39, 16  ;;  %v8072_v59 = vsel %vm10952_vm9, %v8064_v47, %v8071_v49  ;;  %v8348_v60 = vsel %vm10959_vm10, %v8063_v46, %v8347_v53  ;;  %v8351_v61 = vld [vmem:[#allocation4 + $0x38] sm:$0x1]  ;;  %v609_v1 = vld [vmem:[%s10932_s27 + $0x68] sm:$0xff]  ;;  %v610_v34 = vld [vmem:[%s10932_s27 + $0x70] sm:$0xff] }
  0x33   : > { %8349 = vst [vmem:[#allocation4 + $0x30] sm:$0xf] %v8348_v60  ;;  %8350 = vst.msk [vmem:[#allocation4 + $0x34] sm:$0xf] %vm333_vm6, %v8072_v59  ;;  %v8352_v3 = vsel %vm10913_vm4, %v8073_v50, %v8351_v61  ;;  %v8077_v4 = vrot.slane %v8075_v55, 7  ;;  %v8092_v10 = vshrl.u32 %v10341_v63, 16  ;;  %v634_v22 = vpack.c.bf16 %v609_v1, %v608_v0 }
  0x34   : > { %v8085_v6 = vrot.slane %v8083_v57, 7  ;;  %v8354_v7 = vld [vmem:[#allocation4 + $0x3c] sm:$0xf]  ;;  %v8358_v8 = vld [vmem:[#allocation4 + $0x44] sm:$0x1]  ;;  %v8095_v11 = vshll.u32 %v10341_v63, 16  ;;  %v10344_v33 = vpack.c.bf16 %v609_v1, %v609_v1  ;;  %v10345_v47 = vpack.c.bf16 %v610_v34, %v610_v34 }
  0x35   : > { %8353 = vst [vmem:[#allocation4 + $0x38] sm:$0x1] %v8352_v3  ;;  %v519_v12 = vsel %vm10913_vm4, 4286578559, %v518_v51  ;;  %v567_v13 = vsel %vm10919_vm5, 4286578559, %v566_v52  ;;  %v8080_v14 = vor.u32 %v8078_v56, %v8077_v4  ;;  %10454 = vmatprep.mubr.msk.bf16.mxu0 %vm16218_vm8, %v634_v22 }
  0x36   : > { %v8081_v15 = vrot.slane %v8077_v4, 4  ;;  %v8088_v16 = vor.u32 %v8086_v58, %v8085_v6  ;;  %v8090_v17 = vrot.slane %v8085_v6, 4  ;;  %520 = vst [vmem:[#allocation4 + $0x54] sm:$0x1] %v519_v12  ;;  %568 = vst [vmem:[#allocation4 + $0x5c] sm:$0x1] %v567_v13 }
  0x37   : > { %v521_v18 = vld [vmem:[#allocation4 + $0x60] sm:$0x1]  ;;  %v8094_v19 = vrot.slane %v8092_v10, 7  ;;  %v8100_v20 = vshrl.u32 %v10342_v9, 16  ;;  %v8103_v21 = vshll.u32 %v10342_v9, 16  ;;  %v8355_v25 = vsel %vm10959_vm10, %v8080_v14, %v8354_v7  ;;  %v611_v35 = vld [vmem:[%s10932_s27 + $0x78] sm:$0xff] }
  0x38   : > { %v569_v23 = vld [vmem:[#allocation4 + $0x68] sm:$0x1]  ;;  %v8089_v24 = vsel %vm10952_vm9, %v8081_v15, %v8088_v16  ;;  %v8359_v26 = vsel %vm10913_vm4, %v8090_v17, %v8358_v8  ;;  %8356 = vst [vmem:[#allocation4 + $0x3c] sm:$0xf] %v8355_v25  ;;  %v8365_v32 = vld [vmem:[#allocation4 + $0x50] sm:$0x1]  ;;  %v635_v46 = vpack.c.bf16 %v611_v35, %v610_v34  ;;  %v10346_v55 = vpack.c.bf16 %v611_v35, %v611_v35 }
  0x39   : > { %v8361_v27 = vld [vmem:[#allocation4 + $0x48] sm:$0xf]  ;;  %8357 = vst.msk [vmem:[#allocation4 + $0x40] sm:$0xf] %vm333_vm6, %v8089_v24  ;;  %8360 = vst [vmem:[#allocation4 + $0x44] sm:$0x1] %v8359_v26  ;;  %v8097_v29 = vor.u32 %v8095_v11, %v8094_v19 }
  0x3a   : > { %v8098_v30 = vrot.slane %v8094_v19, 4  ;;  %v8102_v31 = vrot.slane %v8100_v20, 7  ;;  %v8109_v36 = vshrl.u32 %v10343_v28, 16  ;;  %v8112_v37 = vshll.u32 %v10343_v28, 16  ;;  %v524_v49 = vld [vmem:[#allocation4 + $0x6c] sm:$0x1]  ;;  %10455 = vmatmul.mubr.msk.bf16.gmra.mrb[12].mxu0 %vm16218_vm8, %v635_v46 }
  0x3b   : > { %v522_v38 = vsel %vm10913_vm4, 4286578559, %v521_v18  ;;  %v570_v39 = vsel %vm10919_vm5, 4286578559, %v569_v23  ;;  %v8362_v42 = vsel %vm10959_vm10, %v8097_v29, %v8361_v27  ;;  %v8117_v43 = vshrl.u32 %v10344_v33, 16  ;;  %v612_v57 = vld [vmem:[%s10932_s27 + $0x80] sm:$0xff] }
  0x3c   : > { %v8105_v40 = vor.u32 %v8103_v21, %v8102_v31  ;;  %v8107_v41 = vrot.slane %v8102_v31, 4  ;;  %523 = vst [vmem:[#allocation4 + $0x60] sm:$0x1] %v522_v38  ;;  %571 = vst [vmem:[#allocation4 + $0x68] sm:$0x1] %v570_v39  ;;  %v8111_v44 = vrot.slane %v8109_v36, 7  ;;  %v10347_v21 = vpack.c.bf16 %v612_v57, %v612_v57 }
  0x3d   : > { %8363 = vst [vmem:[#allocation4 + $0x48] sm:$0xf] %v8362_v42  ;;  %v8120_v45 = vshll.u32 %v10344_v33, 16  ;;  %v8119_v52 = vrot.slane %v8117_v43, 7  ;;  %v8368_v53 = vld [vmem:[#allocation4 + $0x54] sm:$0xf] }
  0x3e   : > { %v8106_v50 = vsel %vm10952_vm9, %v8098_v30, %v8105_v40  ;;  %v8366_v51 = vsel %vm10913_vm4, %v8107_v41, %v8365_v32  ;;  %v572_v56 = vld [vmem:[#allocation4 + $0x74] sm:$0x1]  ;;  %v8114_v58 = vor.u32 %v8112_v37, %v8111_v44  ;;  %v8115_v59 = vrot.slane %v8111_v44, 4  ;;  %v8372_v60 = vld [vmem:[#allocation4 + $0x5c] sm:$0x1]  ;;  %v613_v63 = vld [vmem:[%s10932_s27 + $0x88] sm:$0xff] }
  0x3f   : > { %8364 = vst.msk [vmem:[#allocation4 + $0x4c] sm:$0xf] %vm333_vm6, %v8106_v50  ;;  %8367 = vst [vmem:[#allocation4 + $0x50] sm:$0x1] %v8366_v51  ;;  %v8126_v61 = vshrl.u32 %v10345_v47, 16  ;;  %v8129_v62 = vshll.u32 %v10345_v47, 16  ;;  %v8122_v1 = vor.u32 %v8120_v45, %v8119_v52  ;;  %v636_v15 = vpack.c.bf16 %v613_v63, %v612_v57 }
  0x40   : > { %v527_v0 = vld [vmem:[#allocation4 + $0x78] sm:$0x1]  ;;  %v8124_v3 = vrot.slane %v8119_v52, 4  ;;  %v8134_v4 = vshrl.u32 %v10346_v55, 16  ;;  %v8137_v6 = vshll.u32 %v10346_v55, 16  ;;  %v8369_v8 = vsel %vm10959_vm10, %v8114_v58, %v8368_v53  ;;  %v614_v16 = vld [vmem:[%s10932_s27 + $0x90] sm:$0xff] }
  0x41   : > { %v575_v7 = vld [vmem:[#allocation4 + $0x80] sm:$0x1]  ;;  %v8128_v9 = vrot.slane %v8126_v61, 7  ;;  %v525_v10 = vsel %vm10913_vm4, 4286578559, %v524_v49  ;;  %v8123_v12 = vsel %vm10952_vm9, %v8115_v59, %v8122_v1  ;;  %v10348_v22 = vpack.c.bf16 %v613_v63, %v613_v63  ;;  %v615_v23 = vld [vmem:[%s10932_s27 + $0x98] sm:$0xff]  ;;  %10458 = vmatprep.mubr.msk.bf16.mxu0 %vm16218_vm8, %v636_v15 }
  0x42   : > { %v573_v11 = vsel %vm10919_vm5, 4286578559, %v572_v56  ;;  %8370 = vst [vmem:[#allocation4 + $0x54] sm:$0xf] %v8369_v8  ;;  %v8373_v13 = vsel %vm10913_vm4, %v8124_v3, %v8372_v60  ;;  %v8136_v14 = vrot.slane %v8134_v4, 7  ;;  %v616_v30 = vld [vmem:[%s10932_s27 + $0xa0] sm:$0xff]  ;;  %v637_v39 = vpack.c.bf16 %v615_v23, %v614_v16 }
  0x43   : > { %526 = vst [vmem:[#allocation4 + $0x6c] sm:$0x1] %v525_v10  ;;  %574 = vst [vmem:[#allocation4 + $0x74] sm:$0x1] %v573_v11  ;;  %v8131_v17 = vor.u32 %v8129_v62, %v8128_v9  ;;  %v8132_v18 = vrot.slane %v8128_v9, 4  ;;  %v8143_v32 = vshrl.u32 %v10347_v21, 16  ;;  %v10349_v42 = vpack.c.bf16 %v614_v16, %v614_v16 }
  0x44   : > { %8371 = vst.msk [vmem:[#allocation4 + $0x58] sm:$0xf] %vm333_vm6, %v8123_v12  ;;  %8374 = vst [vmem:[#allocation4 + $0x5c] sm:$0x1] %v8373_v13  ;;  %v8375_v19 = vld [vmem:[#allocation4 + $0x60] sm:$0xf]  ;;  %v8139_v26 = vor.u32 %v8137_v6, %v8136_v14  ;;  %v10350_v43 = vpack.c.bf16 %v615_v23, %v615_v23  ;;  %10459 = vmatmul.mubr.msk.bf16.gmra.mrb[16].mxu0 %vm16218_vm8, %v637_v39  ;;  %v10351_v50 = vpack.c.bf16 %v616_v30, %v616_v30 }
  0x45   : > { %v8379_v20 = vld [vmem:[#allocation4 + $0x68] sm:$0x1]  ;;  %v530_v24 = vld [vmem:[#allocation4 + $0x84] sm:$0x1]  ;;  %v578_v25 = vld [vmem:[#allocation4 + $0x8c] sm:$0x1]  ;;  %v8376_v31 = vsel %vm10959_vm10, %v8131_v17, %v8375_v19 }
  0x46   : > { %v8141_v27 = vrot.slane %v8136_v14, 4  ;;  %v528_v28 = vsel %vm10913_vm4, 4286578559, %v527_v0  ;;  %v576_v29 = vsel %vm10919_vm5, 4286578559, %v575_v7  ;;  %v8146_v33 = vshll.u32 %v10347_v21, 16 }
  0x47   : > { %v8151_v34 = vshrl.u32 %v10348_v22, 16  ;;  %529 = vst [vmem:[#allocation4 + $0x78] sm:$0x1] %v528_v28  ;;  %577 = vst [vmem:[#allocation4 + $0x80] sm:$0x1] %v576_v29  ;;  %v617_v35 = vld [vmem:[%s10932_s27 + $0xa8] sm:$0xff]  ;;  %v8140_v36 = vsel %vm10952_vm9, %v8132_v18, %v8139_v26 }
  0x48   : > { %8377 = vst [vmem:[#allocation4 + $0x60] sm:$0xf] %v8376_v31  ;;  %v8380_v37 = vsel %vm10913_vm4, %v8141_v27, %v8379_v20  ;;  %v8154_v38 = vshll.u32 %v10348_v22, 16  ;;  %8378 = vst.msk [vmem:[#allocation4 + $0x64] sm:$0xf] %vm333_vm6, %v8140_v36  ;;  %v8145_v40 = vrot.slane %v8143_v32, 7  ;;  %v638_v49 = vpack.c.bf16 %v617_v35, %v616_v30 }
  0x49   : > { %8381 = vst [vmem:[#allocation4 + $0x68] sm:$0x1] %v8380_v37  ;;  %v8153_v41 = vrot.slane %v8151_v34, 7  ;;  %v618_v44 = vld [vmem:[%s10932_s27 + $0xb0] sm:$0xff]  ;;  %v619_v45 = vld [vmem:[%s10932_s27 + $0xb8] sm:$0xff]  ;;  %v8160_v58 = vshrl.u32 %v10349_v42, 16  ;;  %v10352_v4 = vpack.c.bf16 %v617_v35, %v617_v35 }
  0x4a   : > { %v531_v46 = vsel %vm10913_vm4, 4286578559, %v530_v24  ;;  %v579_v47 = vsel %vm10919_vm5, 4286578559, %v578_v25  ;;  %v8148_v51 = vor.u32 %v8146_v33, %v8145_v40  ;;  %v8149_v52 = vrot.slane %v8145_v40, 4  ;;  %10462 = vmatprep.mubr.msk.bf16.mxu0 %vm16218_vm8, %v638_v49  ;;  %v620_v26 = vld [vmem:[%s10932_s27 + $0xc0] sm:$0xff] }
  0x4b   : > { %v8156_v53 = vor.u32 %v8154_v38, %v8153_v41  ;;  %v8158_v55 = vrot.slane %v8153_v41, 4  ;;  %v8382_v56 = vld [vmem:[#allocation4 + $0x6c] sm:$0xf]  ;;  %v8386_v57 = vld [vmem:[#allocation4 + $0x74] sm:$0x1]  ;;  %v8163_v59 = vshll.u32 %v10349_v42, 16  ;;  %v639_v10 = vpack.c.bf16 %v619_v45, %v618_v44 }
  0x4c   : > { %532 = vst [vmem:[#allocation4 + $0x84] sm:$0x1] %v531_v46  ;;  %580 = vst [vmem:[#allocation4 + $0x8c] sm:$0x1] %v579_v47  ;;  %v8168_v60 = vshrl.u32 %v10350_v43, 16  ;;  %v8171_v61 = vshll.u32 %v10350_v43, 16  ;;  %v8383_v1 = vsel %vm10959_vm10, %v8148_v51, %v8382_v56  ;;  %v10353_v11 = vpack.c.bf16 %v618_v44, %v618_v44 }
  0x4d   : > { %v533_v62 = vld [vmem:[#allocation4 + $0x90] sm:$0x1]  ;;  %v581_v63 = vld [vmem:[#allocation4 + $0x98] sm:$0x1]  ;;  %v8157_v0 = vsel %vm10952_vm9, %v8149_v52, %v8156_v53  ;;  %v8387_v3 = vsel %vm10913_vm4, %v8158_v55, %v8386_v57  ;;  %8384 = vst [vmem:[#allocation4 + $0x6c] sm:$0xf] %v8383_v1  ;;  %10463 = vmatmul.mubr.msk.bf16.gmra.mrb[20].mxu0 %vm16218_vm8, %v639_v10  ;;  %v10354_v33 = vpack.c.bf16 %v619_v45, %v619_v45 }
  0x4e   : > { %8385 = vst.msk [vmem:[#allocation4 + $0x70] sm:$0xf] %vm333_vm6, %v8157_v0  ;;  %8388 = vst [vmem:[#allocation4 + $0x74] sm:$0x1] %v8387_v3  ;;  %v8162_v6 = vrot.slane %v8160_v58, 7  ;;  %v8170_v7 = vrot.slane %v8168_v60, 7  ;;  %v10355_v56 = vpack.c.bf16 %v620_v26, %v620_v26 }
  0x4f   : > { %v8389_v8 = vld [vmem:[#allocation4 + $0x78] sm:$0xf]  ;;  %v8393_v9 = vld [vmem:[#allocation4 + $0x80] sm:$0x1]  ;;  %v8177_v12 = vshrl.u32 %v10351_v50, 16  ;;  %v8180_v13 = vshll.u32 %v10351_v50, 16 }
  0x50   : > { %v8185_v14 = vshrl.u32 %v10352_v4, 16  ;;  %v8188_v15 = vshll.u32 %v10352_v4, 16  ;;  %v8165_v16 = vor.u32 %v8163_v59, %v8162_v6  ;;  %v8166_v17 = vrot.slane %v8162_v6, 4  ;;  %v536_v20 = vld [vmem:[#allocation4 + $0x9c] sm:$0x1]  ;;  %v621_v27 = vld [vmem:[%s10932_s27 + $0xc8] sm:$0xff] }
  0x51   : > { %v8173_v18 = vor.u32 %v8171_v61, %v8170_v7  ;;  %v8175_v19 = vrot.slane %v8170_v7, 4  ;;  %v8179_v21 = vrot.slane %v8177_v12, 7  ;;  %v534_v23 = vsel %vm10913_vm4, 4286578559, %v533_v62  ;;  %v584_v25 = vld [vmem:[#allocation4 + $0xa4] sm:$0x1] }
  0x52   : > { %v8187_v22 = vrot.slane %v8185_v14, 7  ;;  %v582_v24 = vsel %vm10919_vm5, 4286578559, %v581_v63  ;;  %v8390_v29 = vsel %vm10959_vm10, %v8165_v16, %v8389_v8  ;;  %535 = vst [vmem:[#allocation4 + $0x90] sm:$0x1] %v534_v23  ;;  %v8194_v40 = vshrl.u32 %v10353_v11, 16 }
  0x53   : > { %v8174_v28 = vsel %vm10952_vm9, %v8166_v17, %v8173_v18  ;;  %v8394_v30 = vsel %vm10913_vm4, %v8175_v19, %v8393_v9  ;;  %v8396_v31 = vld [vmem:[#allocation4 + $0x84] sm:$0xf]  ;;  %v8400_v32 = vld [vmem:[#allocation4 + $0x8c] sm:$0x1]  ;;  %583 = vst [vmem:[#allocation4 + $0x98] sm:$0x1] %v582_v24  ;;  %v8182_v36 = vor.u32 %v8180_v13, %v8179_v21  ;;  %v640_v52 = vpack.c.bf16 %v621_v27, %v620_v26 }
  0x54   : > { %v539_v34 = vld [vmem:[#allocation4 + $0xa8] sm:$0x1]  ;;  %v587_v35 = vld [vmem:[#allocation4 + $0xb0] sm:$0x1]  ;;  %8391 = vst [vmem:[#allocation4 + $0x78] sm:$0xf] %v8390_v29  ;;  %v8190_v38 = vor.u32 %v8188_v15, %v8187_v22  ;;  %v10356_v57 = vpack.c.bf16 %v621_v27, %v621_v27 }
  0x55   : > { %8392 = vst.msk [vmem:[#allocation4 + $0x7c] sm:$0xf] %vm333_vm6, %v8174_v28  ;;  %8395 = vst [vmem:[#allocation4 + $0x80] sm:$0x1] %v8394_v30  ;;  %v8183_v37 = vrot.slane %v8179_v21, 4  ;;  %v8192_v39 = vrot.slane %v8187_v22, 4  ;;  %v8397_v45 = vsel %vm10959_vm10, %v8182_v36, %v8396_v31  ;;  %10466 = vmatprep.mubr.msk.bf16.mxu0 %vm16218_vm8, %v640_v52 }
  0x56   : > { %v8197_v41 = vshll.u32 %v10353_v11, 16  ;;  %v8202_v42 = vshrl.u32 %v10354_v33, 16  ;;  %v8205_v43 = vshll.u32 %v10354_v33, 16  ;;  %v537_v47 = vsel %vm10913_vm4, 4286578559, %v536_v20  ;;  %v622_v53 = vld [vmem:[%s10932_s27 + $0xd0] sm:$0xff] }
  0x57   : > { %v8191_v44 = vsel %vm10952_vm9, %v8183_v37, %v8190_v38  ;;  %v8401_v46 = vsel %vm10913_vm4, %v8192_v39, %v8400_v32  ;;  %8398 = vst [vmem:[#allocation4 + $0x84] sm:$0xf] %v8397_v45  ;;  %v8196_v49 = vrot.slane %v8194_v40, 7  ;;  %538 = vst [vmem:[#allocation4 + $0x9c] sm:$0x1] %v537_v47  ;;  %v623_v55 = vld [vmem:[%s10932_s27 + $0xd8] sm:$0xff]  ;;  %v10357_v9 = vpack.c.bf16 %v622_v53, %v622_v53 }
  0x58   : > { %8399 = vst.msk [vmem:[#allocation4 + $0x88] sm:$0xf] %vm333_vm6, %v8191_v44  ;;  %8402 = vst [vmem:[#allocation4 + $0x8c] sm:$0x1] %v8401_v46  ;;  %v8204_v50 = vrot.slane %v8202_v42, 7  ;;  %v8211_v6 = vshrl.u32 %v10355_v56, 16  ;;  %v641_v8 = vpack.c.bf16 %v623_v55, %v622_v53  ;;  %v10358_v16 = vpack.c.bf16 %v623_v55, %v623_v55 }
  0x59   : > { %v585_v51 = vsel %vm10919_vm5, 4286578559, %v584_v25  ;;  %v540_v58 = vsel %vm10913_vm4, 4286578559, %v539_v34  ;;  %v588_v59 = vsel %vm10919_vm5, 4286578559, %v587_v35  ;;  %v8199_v60 = vor.u32 %v8197_v41, %v8196_v49 }
  0x5a   : > { %586 = vst [vmem:[#allocation4 + $0xa4] sm:$0x1] %v585_v51  ;;  %v8200_v61 = vrot.slane %v8196_v49, 4  ;;  %v8207_v62 = vor.u32 %v8205_v43, %v8204_v50  ;;  %v8209_v63 = vrot.slane %v8204_v50, 4  ;;  %541 = vst [vmem:[#allocation4 + $0xa8] sm:$0x1] %v540_v58  ;;  %10467 = vmatmul.mubr.msk.bf16.gmra.mrb[24].mxu0 %vm16218_vm8, %v641_v8 }
  0x5b   : > { %589 = vst [vmem:[#allocation4 + $0xb0] sm:$0x1] %v588_v59  ;;  %v542_v0 = vld [vmem:[#allocation4 + $0xb4] sm:$0x1]  ;;  %v590_v1 = vld [vmem:[#allocation4 + $0xbc] sm:$0x1] }
  0x5c   : > { %v8403_v3 = vld [vmem:[#allocation4 + $0x90] sm:$0xf]  ;;  %v8407_v4 = vld [vmem:[#allocation4 + $0x98] sm:$0x1]  ;;  %v8214_v7 = vshll.u32 %v10355_v56, 16  ;;  %v8208_v10 = vsel %vm10952_vm9, %v8200_v61, %v8207_v62  ;;  %v8219_v13 = vshrl.u32 %v10356_v57, 16 }
  0x5d   : > { %v8404_v11 = vsel %vm10959_vm10, %v8199_v60, %v8403_v3  ;;  %v8408_v12 = vsel %vm10913_vm4, %v8209_v63, %v8407_v4  ;;  %8406 = vst.msk [vmem:[#allocation4 + $0x94] sm:$0xf] %vm333_vm6, %v8208_v10  ;;  %v8213_v14 = vrot.slane %v8211_v6, 7  ;;  %v8222_v15 = vshll.u32 %v10356_v57, 16  ;;  %v624_v18 = vld [vmem:[%s10932_s27 + $0xe0] sm:$0xff]  ;;  %v625_v19 = vld [vmem:[%s10932_s27 + $0xe8] sm:$0xff] }
  0x5e   : > { %8405 = vst [vmem:[#allocation4 + $0x90] sm:$0xf] %v8404_v11  ;;  %8409 = vst [vmem:[#allocation4 + $0x98] sm:$0x1] %v8408_v12  ;;  %v8228_v17 = vshrl.u32 %v10357_v9, 16  ;;  %v8221_v20 = vrot.slane %v8219_v13, 7  ;;  %v642_v33 = vpack.c.bf16 %v625_v19, %v624_v18  ;;  %v10359_v44 = vpack.c.bf16 %v624_v18, %v624_v18 }
  0x5f   : > { %v8231_v21 = vshll.u32 %v10357_v9, 16  ;;  %v543_v22 = vsel %vm10913_vm4, 4286578559, %v542_v0  ;;  %v591_v23 = vsel %vm10919_vm5, 4286578559, %v590_v1  ;;  %v8216_v24 = vor.u32 %v8214_v7, %v8213_v14  ;;  %v626_v46 = vld [vmem:[%s10932_s27 + $0xf0] sm:$0xff] }
  0x60   : > { %v8217_v25 = vrot.slane %v8213_v14, 4  ;;  %v8410_v26 = vld [vmem:[#allocation4 + $0x9c] sm:$0xf]  ;;  %v8230_v27 = vrot.slane %v8228_v17, 7  ;;  %v8236_v28 = vshrl.u32 %v10358_v16, 16  ;;  %v8224_v29 = vor.u32 %v8222_v15, %v8221_v20  ;;  %10470 = vmatprep.mubr.msk.bf16.mxu0 %vm16218_vm8, %v642_v33  ;;  %v627_v47 = vld [vmem:[%s10932_s27 + $0xf8] sm:$0xff] }
  0x61   : > { %544 = vst [vmem:[#allocation4 + $0xb4] sm:$0x1] %v543_v22  ;;  %592 = vst [vmem:[#allocation4 + $0xbc] sm:$0x1] %v591_v23  ;;  %v8226_v30 = vrot.slane %v8221_v20, 4  ;;  %v8239_v32 = vshll.u32 %v10358_v16, 16  ;;  %v8411_v35 = vsel %vm10959_vm10, %v8216_v24, %v8410_v26  ;;  %v10360_v45 = vpack.c.bf16 %v625_v19, %v625_v19 }
  0x62   : > { %v8414_v31 = vld [vmem:[#allocation4 + $0xa4] sm:$0x1]  ;;  %v545_v34 = vld [vmem:[#allocation4 + $0xc0] sm:$0x1]  ;;  %v8233_v36 = vor.u32 %v8231_v21, %v8230_v27  ;;  %v8234_v37 = vrot.slane %v8230_v27, 4  ;;  %v8238_v38 = vrot.slane %v8236_v28, 7  ;;  %v8225_v41 = vsel %vm10952_vm9, %v8217_v25, %v8224_v29 }
  0x63   : > { %v8417_v39 = vld [vmem:[#allocation4 + $0xa8] sm:$0xf]  ;;  %8412 = vst [vmem:[#allocation4 + $0x9c] sm:$0xf] %v8411_v35  ;;  %v8415_v42 = vsel %vm10913_vm4, %v8226_v30, %v8414_v31  ;;  %v8421_v43 = vld [vmem:[#allocation4 + $0xb0] sm:$0x1]  ;;  %v643_v61 = vpack.c.bf16 %v627_v47, %v626_v46  ;;  %v10361_v0 = vpack.c.bf16 %v626_v46, %v626_v46  ;;  %v10362_v1 = vpack.c.bf16 %v627_v47, %v627_v47 }
  0x64   : > { %v593_v40 = vld [vmem:[#allocation4 + $0xc8] sm:$0x1]  ;;  %8413 = vst.msk [vmem:[#allocation4 + $0xa0] sm:$0xf] %vm333_vm6, %v8225_v41  ;;  %8416 = vst [vmem:[#allocation4 + $0xa4] sm:$0x1] %v8415_v42  ;;  %v8241_v49 = vor.u32 %v8239_v32, %v8238_v38  ;;  %v8418_v51 = vsel %vm10959_vm10, %v8233_v36, %v8417_v39 }
  0x65   : > { %v8243_v50 = vrot.slane %v8238_v38, 4  ;;  %v546_v52 = vsel %vm10913_vm4, 4286578559, %v545_v34  ;;  %8419 = vst [vmem:[#allocation4 + $0xa8] sm:$0xf] %v8418_v51  ;;  %v8245_v53 = vshrl.u32 %v10359_v44, 16  ;;  %10471 = vmatmul.mubr.msk.bf16.gmra.mrb[28].mxu0 %vm16218_vm8, %v643_v61 }
  0x66   : > { %v8248_v55 = vshll.u32 %v10359_v44, 16  ;;  %v8253_v56 = vshrl.u32 %v10360_v45, 16  ;;  %v8256_v57 = vshll.u32 %v10360_v45, 16  ;;  %547 = vst [vmem:[#allocation4 + $0xc0] sm:$0x1] %v546_v52  ;;  %v8242_v58 = vsel %vm10952_vm9, %v8234_v37, %v8241_v49  ;;  %s16214_s29 = smov 8  }
  0x67   : > { %v8422_v59 = vsel %vm10913_vm4, %v8243_v50, %v8421_v43  ;;  %v594_v60 = vsel %vm10919_vm5, 4286578559, %v593_v40  ;;  %8420 = vst.msk [vmem:[#allocation4 + $0xac] sm:$0xf] %vm333_vm6, %v8242_v58  ;;  %v8247_v62 = vrot.slane %v8245_v53, 7  ;;  %v8262_v10 = vshrl.u32 %v10361_v0, 16 }
  0x68   : > { %8423 = vst [vmem:[#allocation4 + $0xb0] sm:$0x1] %v8422_v59  ;;  %v8255_v63 = vrot.slane %v8253_v56, 7  ;;  %595 = vst [vmem:[#allocation4 + $0xc8] sm:$0x1] %v594_v60  ;;  %v8265_v11 = vshll.u32 %v10361_v0, 16 }
  0x69   : > { %v8424_v3 = vld [vmem:[#allocation4 + $0xb4] sm:$0xf]  ;;  %v8428_v4 = vld [vmem:[#allocation4 + $0xbc] sm:$0x1]  ;;  %v8250_v6 = vor.u32 %v8248_v55, %v8247_v62  ;;  %v8251_v7 = vrot.slane %v8247_v62, 4  ;;  %v8270_v12 = vshrl.u32 %v10362_v1, 16 }
  0x6a   : > { %v8258_v8 = vor.u32 %v8256_v57, %v8255_v63  ;;  %v8260_v9 = vrot.slane %v8255_v63, 4  ;;  %v8273_v13 = vshll.u32 %v10362_v1, 16  ;;  %v8264_v17 = vrot.slane %v8262_v10, 7  ;;  %s10779_s14 = smov 28   ;;  %s10780_s16 = smov 4  }
  0x6b   : > { %v8425_v15 = vsel %vm10959_vm10, %v8250_v6, %v8424_v3  ;;  %v8272_v18 = vrot.slane %v8270_v12, 7  ;;  %v16178_v25 = vmov 0   ;;  %v16232_v45 = vmov 0  ;;  %s16211_s17 = sand.u32 1, %s10766_s10   ;;  %s10781_s25 = smov 120  }
  0x6c   : > { %v8259_v14 = vsel %vm10952_vm9, %v8251_v7, %v8258_v8  ;;  %v8429_v16 = vsel %vm10913_vm4, %v8260_v9, %v8428_v4  ;;  %8426 = vst [vmem:[#allocation4 + $0xb4] sm:$0xf] %v8425_v15  ;;  %v8267_v20 = vor.u32 %v8265_v11, %v8264_v17  ;;  %v8268_v21 = vrot.slane %v8264_v17, 4  ;;  %339 = vst.msk [vmem:[#allocation2 + $0xcc] sm:$0xf] %vm333_vm6, %v16178_v25  ;;  %s9902_s23 = sshll.u32 %s16211_s17, 8 }
  0x6d   : > { %8427 = vst.msk [vmem:[#allocation4 + $0xb8] sm:$0xf] %vm333_vm6, %v8259_v14  ;;  %8430 = vst [vmem:[#allocation4 + $0xbc] sm:$0x1] %v8429_v16  ;;  %v8431_v19 = vld [vmem:[#allocation4 + $0xc0] sm:$0xf]  ;;  %v8275_v22 = vor.u32 %v8273_v13, %v8272_v18 }
  0x6e   : > { %v8277_v23 = vrot.slane %v8272_v18, 4  ;;  %340 = vst.msk [vmem:[#allocation2 + $0xd0] sm:$0xf] %vm333_vm6, %v16178_v25  ;;  %334 = vst.msk [vmem:[#allocation2] sm:$0xf] %vm333_vm6, %v16178_v25  ;;  %v8432_v27 = vsel %vm10959_vm10, %v8267_v20, %v8431_v19  ;;  %v16233_v45 = vsel %vm11224_vm13, 4294967295, %v16232_v45 }
  0x6f   : > { %v8435_v24 = vld [vmem:[#allocation4 + $0xc8] sm:$0x1]  ;;  %335 = vst.msk [vmem:[#allocation2 + $0x4] sm:$0xf] %vm333_vm6, %v16178_v25  ;;  %444 = vst.msk [vmem:[#allocation3] sm:$0xf] %vm333_vm6, %v16178_v25  ;;  %v8276_v26 = vsel %vm10952_vm9, %v8268_v21, %v8275_v22 }
  0x70   : > { %337 = vst.msk [vmem:[#allocation2 + $0x8] sm:$0x1] %vm16219_vm1, %v16178_v25  ;;  %341 = vst.msk [vmem:[#allocation2 + $0xd4] sm:$0x1] %vm16219_vm1, %v16178_v25  ;;  %v8436_v28 = vsel %vm10913_vm4, %v8277_v23, %v8435_v24  ;;  %vm2176_vm14 = vsmask.f32 3328 }
  0x71   : > { %445 = vst.msk [vmem:[#allocation3 + $0x4] sm:$0xf] %vm333_vm6, %v16178_v25  ;;  %448 = vst.msk [vmem:[#allocation3 + $0xc] sm:$0xf] %vm333_vm6, %v16178_v25  ;;  %vm2177_vm15 = vsmask.f32 7440 }
  0x72   : > { %449 = vst.msk [vmem:[#allocation3 + $0x10] sm:$0xf] %vm333_vm6, %v16178_v25  ;;  %452 = vst.msk [vmem:[#allocation3 + $0xd8] sm:$0xf] %vm333_vm6, %v16178_v25  ;;  %v16235_v1 = vmov 0  ;;  %s11264_s24 = scalar_lea.vmem [#allocation7], %s9902_s23 }
  0x73   : > { %453 = vst.msk [vmem:[#allocation3 + $0xdc] sm:$0xf] %vm333_vm6, %v16178_v25  ;;  %455 = vst.msk [vmem:[#allocation3 + $0xe4] sm:$0xf] %vm333_vm6, %v16178_v25  ;;  %v2173_v29 = vld [vmem:[#allocation2 + $0xcc] sm:$0xf] }
  0x74   : > { %456 = vst.msk [vmem:[#allocation3 + $0xe8] sm:$0xf] %vm333_vm6, %v16178_v25  ;;  %8433 = vst [vmem:[#allocation4 + $0xc0] sm:$0xf] %v8432_v27  ;;  %v2769_v32 = vshrl.u32 %v2173_v29, 16  ;;  %v2772_v33 = vshll.u32 %v2173_v29, 16 }
  0x75   : > { %459 = vst.msk [vmem:[#allocation3 + $0x18] sm:$0x1] %vm16219_vm1, %v16178_v25  ;;  %460 = vst.msk [vmem:[#allocation3 + $0x24] sm:$0x1] %vm16219_vm1, %v16178_v25  ;;  %v2174_v31 = vld [vmem:[#allocation2 + $0xd0] sm:$0xf] }
  0x76   : > { %461 = vst.msk [vmem:[#allocation3 + $0x30] sm:$0x1] %vm16219_vm1, %v16178_v25  ;;  %462 = vst.msk [vmem:[#allocation3 + $0x3c] sm:$0x1] %vm16219_vm1, %v16178_v25  ;;  %v2861_v30 = vld [vmem:[#allocation2 + $0x4] sm:$0xf] }
  0x77   : > { %463 = vst.msk [vmem:[#allocation3 + $0x48] sm:$0x1] %vm16219_vm1, %v16178_v25  ;;  %464 = vst.msk [vmem:[#allocation3 + $0x54] sm:$0x1] %vm16219_vm1, %v16178_v25  ;;  %v2967_v34 = vrot.slane %v2861_v30, 5  ;;  %v2778_v35 = vshll.u32 %v2174_v31, 16 }
  0x78   : > { %465 = vst.msk [vmem:[#allocation3 + $0x60] sm:$0x1] %vm16219_vm1, %v16178_v25  ;;  %466 = vst.msk [vmem:[#allocation3 + $0x6c] sm:$0x1] %vm16219_vm1, %v16178_v25  ;;  %v2782_v36 = vshrl.u32 %v2174_v31, 16  ;;  %v2771_v40 = vrot.slane %v2769_v32, 4 }
  0x79   : > { %467 = vst.msk [vmem:[#allocation3 + $0x78] sm:$0x1] %vm16219_vm1, %v16178_v25  ;;  %468 = vst.msk [vmem:[#allocation3 + $0x84] sm:$0x1] %vm16219_vm1, %v16178_v25  ;;  %v2122_v37 = vld [vmem:[#allocation2] sm:$0xf] }
  0x7a   : > { %469 = vst.msk [vmem:[#allocation3 + $0x90] sm:$0x1] %vm16219_vm1, %v16178_v25  ;;  %470 = vst.msk [vmem:[#allocation3 + $0x9c] sm:$0x1] %vm16219_vm1, %v16178_v25  ;;  %v2860_v38 = vld [vmem:[#allocation2] sm:$0xe] }
  0x7b   : > { %471 = vst.msk [vmem:[#allocation3 + $0xa8] sm:$0x1] %vm16219_vm1, %v16178_v25  ;;  %472 = vst.msk [vmem:[#allocation3 + $0xb4] sm:$0x1] %vm16219_vm1, %v16178_v25  ;;  %v2862_v39 = vld [vmem:[#allocation2 + $0x8] sm:$0x1] }
  0x7c   : > { %473 = vst.msk [vmem:[#allocation3 + $0xc0] sm:$0x1] %vm16219_vm1, %v16178_v25  ;;  %474 = vst.msk [vmem:[#allocation3 + $0xcc] sm:$0x1] %vm16219_vm1, %v16178_v25  ;;  %v2774_v41 = vrot.slane %v2772_v33, 5  ;;  %v9990_v42 = vrot.slane %v2860_v38, 9 }
  0x7d   : > { %8434 = vst.msk [vmem:[#allocation4 + $0xc4] sm:$0xf] %vm333_vm6, %v8276_v26  ;;  %8437 = vst [vmem:[#allocation4 + $0xc8] sm:$0x1] %v8436_v28  ;;  %v2969_v43 = vrot.slane %v2967_v34, 4  ;;  %v2970_v46 = vrot.slane %v2862_v39, 5 }
  0x7e   : > { %v2175_v44 = vld [vmem:[#allocation2 + $0xd4] sm:$0x1]  ;;  %16234 = vst [vmem:[#allocation10_spill] sm:$0xff] %v16233_v45  ;;  %v2775_v47 = vor.u32 %v2774_v41, %v2771_v40  ;;  %v2780_v49 = vrot.slane %v2778_v35, 5  ;;  %v2784_v50 = vrot.slane %v2782_v36, 4  ;;  %v10664_v51 = vld [vmem:[#allocation2 + $0xcc] sm:$0xff]   ;;  %v2968_v52 = vsel %vm11224_vm13, %v9990_v42, %v2967_v34  ;;  %vm11233_vm2 = vmor %vm2176_vm14, %vm2177_vm15 }
  0x7f   : > { %v2788_v53 = vshll.u32 %v2175_v44, 16  ;;  %v2123_v55 = vld [vmem:[#allocation2 + $0x4] sm:$0xf]  ;;  %v2180_v56 = vshrl.u32 %v2122_v37, 16  ;;  %v2183_v57 = vshll.u32 %v2122_v37, 16  ;;  %v2971_v58 = vsel %vm11224_vm13, %v2969_v43, %v2970_v46  ;;  %2087 = vrot.lane.b32.xlu1 %v10664_v51, %s10777_s28  ;;  %s10782_s26 = smov 124  }
  0x80   : > { %v2776_v59 = vrot.slane %v2775_v47, 4  ;;  %v2785_v60 = vor.u32 %v2784_v50, %v2780_v49  ;;  %v2124_v61 = vld [vmem:[#allocation2 + $0x8] sm:$0x1]  ;;  %v10006_v62 = vcombine.low %v2968_v52, %v2971_v58  ;;  %v16236_v1 = vsel %vm11233_vm2, 4294967295, %v16235_v1  ;;  %v349_v22 = vld [vmem:[#allocation2 + $0x18] sm:$0x1] }
  0x81   : > { %v2790_v63 = vrot.slane %v2788_v53, 5  ;;  %v2182_v0 = vrot.slane %v2180_v56, 4  ;;  %16237 = vst [vmem:[#allocation11_spill] sm:$0xff] %v16236_v1  ;;  %v2185_v4 = vrot.slane %v2183_v57, 5  ;;  %v2189_v6 = vshll.u32 %v2123_v55, 16  ;;  %s16220_s27 = smov 12  }
  0x82   : > { %v2786_v3 = vrot.slane %v2785_v60, 4  ;;  %v2193_v7 = vshrl.u32 %v2123_v55, 16  ;;  %3125 = vrot.lane.b32.xlu0 %v10006_v62, %s16214_s29  ;;  %v2781_v8 = vsel %vm11233_vm2, %v2776_v59, %v2780_v49  ;;  %v2199_v9 = vshll.u32 %v2124_v61, 16  ;;  %v11254_v24 = vld [vmem:[%s16170_s2] ss:$0 sm:$0xff]  ;;  %s16215_s21 = smov 20  }
  0x83   : > { %v2186_v11 = vor.u32 %v2185_v4, %v2182_v0  ;;  %v2191_v12 = vrot.slane %v2189_v6, 5  ;;  %v350_v23 = vsel %vm10913_vm4, 0, %v349_v22  ;;  %v346_v27 = vld [vmem:[#allocation2 + $0xc] sm:$0x1]  ;;  %vm1558_vm3 = vcmask 1040384   ;;  %s10785_s22 = smov 32  }
  0x84   : > { %v2791_v10 = vsel %vm11233_vm2, %v2786_v3, %v2790_v63  ;;  %v2195_v13 = vrot.slane %v2193_v7, 4  ;;  %v2201_v17 = vrot.slane %v2199_v9, 5  ;;  %351 = vst [vmem:[#allocation2 + $0x18] sm:$0x1] %v350_v23  ;;  %v347_v30 = vsel %vm10913_vm4, 0, %v346_v27  ;;  %s16212_s23 = smov 16  }
  0x85   : > { %v9989_v14 = vcombine.low %v2781_v8, %v2791_v10  ;;  %v2187_v15 = vrot.slane %v2186_v11, 4  ;;  %348 = vst [vmem:[#allocation2 + $0xc] sm:$0x1] %v347_v30  ;;  %vm1559_vm7 = vcmask 1044484   ;;  %v399_v11 = vld [vmem:[#allocation2 + $0x20] sm:$0x1] }
  0x86   : > { %v2196_v16 = vor.u32 %v2195_v13, %v2191_v12  ;;  %vm11276_vm11 = vmor %vm1558_vm3, %vm1559_vm7  ;;  %v400_v23 = vsel %vm10919_vm5, 0, %v399_v11  ;;  %s16272_s17 = smov 16   ;;  %vm2751_vm12 = vcmask 162944   ;;  %vm2843_vm14 = vcmask 261344  }
  0x87   : > { %2825 = vrot.lane.b32.xlu1 %v9989_v14, %s10779_s14  ;;  %v2192_v18 = vsel %vm11233_vm2, %v2187_v15, %v2191_v12  ;;  %401 = vst [vmem:[#allocation2 + $0x20] sm:$0x1] %v400_v23  ;;  %vm3173_vm15 = vcmask 97344   ;;  %vm16217_vm3 = vcmask 195744   ;;  %vm3329_vm7 = vcmask 294144  }
  0x88   : > { %v2197_v19 = vrot.slane %v2196_v16, 4 }
  0x8a   : > { %v2202_v20 = vsel %vm11233_vm2, %v2197_v19, %v2201_v17 }
  0x8b   : > { %v9972_v21 = vcombine.low %v2192_v18, %v2202_v20 }
  0x8d   : > { %2611 = vrot.lane.b32.xlu0 %v9972_v21, %s10780_s16 }
  0xf3   : > { %v10444_v26 = vpop.f32.mrb[0].mxu0 }
  0xf4   : > { %v748_v28 = vadd.f32 %v10444_v26, %v11254_v24  ;;  %v739_v29 = vpop.f32.mrb[1].mxu0 }
  0xf5   : > { %v740_v31 = vadd.f32 %v11254_v24, %v739_v29  ;;  %v10445_v32 = vpop.f32.mrb[2].mxu0 }
  0xf6   : > { %v868_v33 = vmax.f32 %v748_v28, 0.0  ;;  %v751_v34 = vadd.f32 %v10445_v32, %v11254_v24  ;;  %v742_v35 = vpop.f32.mrb[3].mxu0 }
  0xf7   : > { %v866_v36 = vmax.f32 %v740_v31, 0.0  ;;  %v743_v37 = vadd.f32 %v11254_v24, %v742_v35 }
  0xf8   : > { %900 = vst.msk [vmem:[%s11264_s24 + $0x10] sm:$0xff] %vm16218_vm8, %v868_v33  ;;  %v10301_v38 = vpack.c.bf16 %v868_v33, %v868_v33  ;;  %v869_v39 = vmax.f32 %v751_v34, 0.0 }
  0xf9   : > { %898 = vst.msk [vmem:[%s11264_s24] sm:$0xff] %vm16218_vm8, %v866_v36  ;;  %v10299_v40 = vpack.c.bf16 %v866_v36, %v866_v36  ;;  %v867_v41 = vmax.f32 %v743_v37, 0.0 }
  0xfa   : > { %901 = vst.msk [vmem:[%s11264_s24 + $0x18] sm:$0xff] %vm16218_vm8, %v869_v39  ;;  %v10302_v42 = vpack.c.bf16 %v869_v39, %v869_v39  ;;  %v1566_v43 = vrot.slane %v10301_v38, 7  ;;  %v1046_v44 = vshrl.u32 %v10301_v38, 16  ;;  %v1049_v55 = vshll.u32 %v10301_v38, 16 }
  0xfb   : > { %899 = vst.msk [vmem:[%s11264_s24 + $0x8] sm:$0xff] %vm16218_vm8, %v867_v41  ;;  %v11274_v46 = vpack.c.bf16 %v867_v41, %v867_v41  ;;  %v1561_v47 = vrot.slane %v10299_v40, 7  ;;  %v1029_v50 = vshrl.u32 %v10299_v40, 16  ;;  %v10448_v51 = vpop.f32.mrb[4].mxu0  ;;  %v1032_v12 = vshll.u32 %v10299_v40, 16 }
  0xfc   : > { %1647 = vrot.lane.b32.xlu1 %v1566_v43, %s10781_s25  ;;  %v1567_v52 = vrot.slane %v1566_v43, 4  ;;  %v1048_v53 = vrot.slane %v1046_v44, 7  ;;  %v1568_v56 = vrot.slane %v10302_v42, 7  ;;  %v755_v57 = vpop.f32.mrb[5].mxu0  ;;  %v764_v63 = vadd.f32 %v10448_v51, %v11254_v24 }
  0xfd   : > { %1641 = vrot.lane.b32.xlu0 %v1561_v47, %s10781_s25  ;;  %v1562_v58 = vrot.slane %v1561_v47, 4  ;;  %v1563_v59 = vrot.slane %v11274_v46, 7  ;;  %v10449_v60 = vpop.f32.mrb[6].mxu0  ;;  %v756_v0 = vadd.f32 %v11254_v24, %v755_v57  ;;  %v1031_v6 = vrot.slane %v1029_v50, 7 }
  0xfe   : > { %v1051_v61 = vor.u32 %v1049_v55, %v1048_v53  ;;  %v1569_v62 = vsel %vm11276_vm11, %v1567_v52, %v1568_v56  ;;  %v758_v3 = vpop.f32.mrb[7].mxu0  ;;  %v767_v7 = vadd.f32 %v10449_v60, %v11254_v24  ;;  %v872_v8 = vmax.f32 %v764_v63, 0.0 }
  0xff   : > { %v1564_v4 = vsel %vm11276_vm11, %v1562_v58, %v1563_v59  ;;  %v870_v9 = vmax.f32 %v756_v0, 0.0  ;;  %v759_v10 = vadd.f32 %v11254_v24, %v758_v3  ;;  %v1054_v14 = vshrl.u32 %v10302_v42, 16 }
 0x100   : > { %1306 = vrot.lane.b32.xlu1 %v1051_v61, %s10782_s26  ;;  %v873_v13 = vmax.f32 %v767_v7, 0.0  ;;  %v1037_v15 = vshrl.u32 %v11274_v46, 16  ;;  %v1057_v16 = vshll.u32 %v10302_v42, 16  ;;  %904 = vst.msk [vmem:[%s11264_s24 + $0x30] sm:$0xff] %vm16218_vm8, %v872_v8  ;;  %v11296_v17 = vpack.c.bf16 %v872_v8, %v872_v8 }
 0x101   : > { %1649 = vrot.lane.b32.xlu0 %v1569_v62, %s10781_s25  ;;  %902 = vst.msk [vmem:[%s11264_s24 + $0x20] sm:$0xff] %vm16218_vm8, %v870_v9  ;;  %v11300_v18 = vpack.c.bf16 %v870_v9, %v870_v9  ;;  %v871_v19 = vmax.f32 %v759_v10, 0.0  ;;  %v1034_v20 = vor.u32 %v1032_v12, %v1031_v6  ;;  %v1056_v21 = vrot.slane %v1054_v14, 7 }
 0x102   : > { %905 = vst.msk [vmem:[%s11264_s24 + $0x38] sm:$0xff] %vm16218_vm8, %v873_v13  ;;  %v11304_v22 = vrot.slane %v1037_v15, 7  ;;  %v1040_v26 = vshll.u32 %v11274_v46, 16  ;;  %v1570_v27 = vrot.slane %v1568_v56, 4  ;;  %v1576_v28 = vrot.slane %v11296_v17, 7 }
 0x103   : > { %903 = vst.msk [vmem:[%s11264_s24 + $0x28] sm:$0xff] %vm16218_vm8, %v871_v19  ;;  %v1571_v29 = vrot.slane %v11300_v18, 7  ;;  %v11315_v30 = vpack.c.bf16 %v873_v13, %v873_v13  ;;  %v1052_v31 = vrot.slane %v1048_v53, 4  ;;  %v1059_v32 = vor.u32 %v1057_v16, %v1056_v21  ;;  %v10452_v34 = vpop.f32.mrb[8].mxu0 }
 0x104   : > { %1643 = vrot.lane.b32.xlu1 %v1564_v4, %s10781_s25  ;;  %v1035_v33 = vrot.slane %v1031_v6, 4  ;;  %v11317_v35 = vpack.c.bf16 %v871_v19, %v871_v19  ;;  %v1042_v36 = vor.u32 %v1040_v26, %v11304_v22  ;;  %v1577_v37 = vrot.slane %v1576_v28, 4  ;;  %v771_v39 = vpop.f32.mrb[9].mxu0 }
 0x105   : > { %1300 = vrot.lane.b32.xlu0 %v1034_v20, %s10782_s26  ;;  %v1572_v38 = vrot.slane %v1571_v29, 4  ;;  %v1565_v40 = vrot.slane %v1563_v59, 4  ;;  %v1060_v41 = vsel %vm10952_vm9, %v1052_v31, %v1059_v32  ;;  %v1080_v42 = vshrl.u32 %v11296_v17, 16  ;;  %v10453_v44 = vpop.f32.mrb[10].mxu0 }
 0x106   : > { %v1578_v43 = vrot.slane %v11315_v30, 7  ;;  %v1043_v46 = vsel %vm10952_vm9, %v1035_v33, %v1042_v36  ;;  %v1573_v47 = vrot.slane %v11317_v35, 7  ;;  %v1063_v50 = vshrl.u32 %v11300_v18, 16  ;;  %v774_v51 = vpop.f32.mrb[11].mxu0 }
 0x107   : > { %v780_v53 = vadd.f32 %v10452_v34, %v11254_v24  ;;  %v772_v55 = vadd.f32 %v11254_v24, %v771_v39  ;;  %v1061_v56 = vrot.slane %v1056_v21, 4  ;;  %v783_v59 = vadd.f32 %v10453_v44, %v11254_v24 }
 0x108   : > { %1651 = vrot.lane.b32.xlu1 %v1570_v27, %s10781_s25  ;;  %v11338_v52 = vsel %vm11276_vm11, %v1577_v37, %v1578_v43  ;;  %v11346_v57 = vsel %vm11276_vm11, %v1572_v38, %v1573_v47  ;;  %v11348_v58 = vrot.slane %v1063_v50, 7  ;;  %v1082_v60 = vrot.slane %v1080_v42, 7 }
 0x109   : > { %1645 = vrot.lane.b32.xlu0 %v1565_v40, %s10781_s25  ;;  %v876_v61 = vmax.f32 %v780_v53, 0.0  ;;  %v874_v62 = vmax.f32 %v772_v55, 0.0  ;;  %v775_v63 = vadd.f32 %v11254_v24, %v774_v51  ;;  %v1074_v0 = vshll.u32 %v11317_v35, 16 }
 0x10a   : > { %v877_v3 = vmax.f32 %v783_v59, 0.0  ;;  %v1088_v4 = vshrl.u32 %v11315_v30, 16  ;;  %v1071_v6 = vshrl.u32 %v11317_v35, 16  ;;  %v1091_v7 = vshll.u32 %v11315_v30, 16 }
 0x10b   : > { %908 = vst.msk [vmem:[%s11264_s24 + $0x50] sm:$0xff] %vm16218_vm8, %v876_v61  ;;  %v11360_v8 = vpack.c.bf16 %v876_v61, %v876_v61  ;;  %906 = vst.msk [vmem:[%s11264_s24 + $0x40] sm:$0xff] %vm16218_vm8, %v874_v62  ;;  %v11364_v9 = vpack.c.bf16 %v874_v62, %v874_v62  ;;  %v875_v10 = vmax.f32 %v775_v63, 0.0  ;;  %v1044_v11 = vrot.slane %v11304_v22, 4 }
 0x10c   : > { %1310 = vrot.lane.b32.xlu1 %v1061_v56, %s10782_s26  ;;  %909 = vst.msk [vmem:[%s11264_s24 + $0x58] sm:$0xff] %vm16218_vm8, %v877_v3  ;;  %v11369_v12 = vrot.slane %v1088_v4, 7  ;;  %v11371_v13 = vrot.slane %v1071_v6, 7  ;;  %v1069_v14 = vrot.slane %v11348_v58, 4  ;;  %v1086_v16 = vrot.slane %v1082_v60, 4 }
 0x10d   : > { %1308 = vrot.lane.b32.xlu0 %v1060_v41, %s10782_s26  ;;  %v10456_v15 = vpop.f32.mrb[12].mxu0  ;;  %907 = vst.msk [vmem:[%s11264_s24 + $0x48] sm:$0xff] %vm16218_vm8, %v875_v10  ;;  %v1586_v19 = vrot.slane %v11360_v8, 7  ;;  %v1581_v20 = vrot.slane %v11364_v9, 7  ;;  %v1083_v22 = vshll.u32 %v11296_v17, 16  ;;  %v11380_v23 = vpack.c.bf16 %v877_v3, %v877_v3 }
 0x10e   : > { %v787_v21 = vpop.f32.mrb[13].mxu0  ;;  %v1076_v26 = vor.u32 %v1074_v0, %v11371_v13  ;;  %v11384_v31 = vpack.c.bf16 %v875_v10, %v875_v10  ;;  %v1093_v32 = vor.u32 %v1091_v7, %v11369_v12  ;;  %v1114_v38 = vshrl.u32 %v11360_v8, 16 }
 0x10f   : > { %v10457_v27 = vpop.f32.mrb[14].mxu0  ;;  %v1587_v33 = vrot.slane %v1586_v19, 4  ;;  %v1582_v34 = vrot.slane %v1581_v20, 4  ;;  %v1588_v39 = vrot.slane %v11380_v23, 7  ;;  %v1097_v42 = vshrl.u32 %v11364_v9, 16 }
 0x110   : > { %1304 = vrot.lane.b32.xlu1 %v1044_v11, %s10782_s26  ;;  %v790_v36 = vpop.f32.mrb[15].mxu0  ;;  %v11393_v37 = vsel %vm10952_vm9, %v1069_v14, %v1076_v26  ;;  %v11399_v40 = vsel %vm10952_vm9, %v1086_v16, %v1093_v32  ;;  %v1583_v41 = vrot.slane %v11384_v31, 7  ;;  %v1066_v44 = vshll.u32 %v11300_v18, 16 }
 0x111   : > { %1302 = vrot.lane.b32.xlu0 %v1043_v46, %s10782_s26  ;;  %v11411_v46 = vsel %vm11276_vm11, %v1587_v33, %v1588_v39  ;;  %v796_v50 = vadd.f32 %v10456_v15, %v11254_v24  ;;  %v788_v51 = vadd.f32 %v11254_v24, %v787_v21  ;;  %v1085_v53 = vor.u32 %v1083_v22, %v1082_v60 }
 0x112   : > { %v11422_v17 = vsel %vm11276_vm11, %v1582_v34, %v1583_v41  ;;  %v799_v55 = vadd.f32 %v10457_v27, %v11254_v24  ;;  %v11427_v56 = vrot.slane %v1114_v38, 7  ;;  %v791_v18 = vadd.f32 %v11254_v24, %v790_v36 }
 0x113   : > { %v880_v59 = vmax.f32 %v796_v50, 0.0  ;;  %v878_v61 = vmax.f32 %v788_v51, 0.0  ;;  %v1122_v62 = vshrl.u32 %v11380_v23, 16  ;;  %v1105_v63 = vshrl.u32 %v11384_v31, 16 }
 0x114   : > { %1659 = vrot.lane.b32.xlu1 %v1576_v28, %s10781_s25  ;;  %v11424_v28 = vrot.slane %v1097_v42, 7  ;;  %v881_v60 = vmax.f32 %v799_v55, 0.0  ;;  %v1125_v3 = vshll.u32 %v11380_v23, 16  ;;  %v879_v7 = vmax.f32 %v791_v18, 0.0 }
 0x115   : > { %1653 = vrot.lane.b32.xlu0 %v1571_v29, %s10781_s25  ;;  %v1108_v29 = vshll.u32 %v11384_v31, 16  ;;  %912 = vst.msk [vmem:[%s11264_s24 + $0x70] sm:$0xff] %vm16218_vm8, %v880_v59  ;;  %v11437_v4 = vpack.c.bf16 %v880_v59, %v880_v59  ;;  %910 = vst.msk [vmem:[%s11264_s24 + $0x60] sm:$0xff] %vm16218_vm8, %v878_v61  ;;  %v11441_v6 = vpack.c.bf16 %v878_v61, %v878_v61  ;;  %v11447_v11 = vrot.slane %v1122_v62, 7 }
 0x116   : > { %913 = vst.msk [vmem:[%s11264_s24 + $0x78] sm:$0xff] %vm16218_vm8, %v881_v60  ;;  %v11449_v14 = vrot.slane %v1105_v63, 7  ;;  %v1103_v15 = vrot.slane %v11424_v28, 4  ;;  %911 = vst.msk [vmem:[%s11264_s24 + $0x68] sm:$0xff] %vm16218_vm8, %v879_v7  ;;  %v1120_v21 = vrot.slane %v11427_v56, 4  ;;  %v11458_v32 = vpack.c.bf16 %v881_v60, %v881_v60 }
 0x117   : > { %v10460_v0 = vpop.f32.mrb[16].mxu0  ;;  %v16187_v22 = vrot.slane %v11437_v4, 7  ;;  %v16186_v26 = vrot.slane %v11441_v6, 7  ;;  %v11463_v34 = vpack.c.bf16 %v879_v7, %v879_v7  ;;  %v1127_v36 = vor.u32 %v1125_v3, %v11447_v11 }
 0x118   : > { %1318 = vrot.lane.b32.xlu1 %v1085_v53, %s10782_s26  ;;  %v803_v10 = vpop.f32.mrb[17].mxu0  ;;  %v1110_v33 = vor.u32 %v1108_v29, %v11449_v14  ;;  %v16185_v50 = vrot.slane %v11458_v32, 7  ;;  %v1575_v51 = vrot.slane %v1573_v47, 4  ;;  %v1131_v30 = vshrl.u32 %v11441_v6, 16 }
 0x119   : > { %1661 = vrot.lane.b32.xlu0 %v11338_v52, %s10781_s25  ;;  %v10461_v16 = vpop.f32.mrb[18].mxu0  ;;  %v1068_v52 = vor.u32 %v1066_v44, %v11348_v58  ;;  %v1597_v38 = vrot.slane %v16187_v22, 4  ;;  %v1592_v42 = vrot.slane %v16186_v26, 4  ;;  %v1580_v58 = vrot.slane %v1578_v43, 4 }
 0x11a   : > { %v806_v27 = vpop.f32.mrb[19].mxu0  ;;  %v11475_v44 = vsel %vm10952_vm9, %v1103_v15, %v1110_v33  ;;  %v11483_v53 = vsel %vm10952_vm9, %v1120_v21, %v1127_v36  ;;  %v16184_v55 = vrot.slane %v11463_v34, 7  ;;  %v1095_v43 = vrot.slane %v11369_v12, 4 }
 0x11b   : > { %v11492_v59 = vsel %vm11276_vm11, %v1597_v38, %v16185_v50  ;;  %v812_v61 = vadd.f32 %v10460_v0, %v11254_v24  ;;  %v804_v35 = vadd.f32 %v11254_v24, %v803_v10  ;;  %v1078_v18 = vrot.slane %v11371_v13, 4 }
 0x11c   : > { %1655 = vrot.lane.b32.xlu1 %v11346_v57, %s10781_s25  ;;  %v1148_v57 = vshrl.u32 %v11437_v4, 16  ;;  %v11502_v12 = vsel %vm11276_vm11, %v1592_v42, %v16184_v55  ;;  %v11504_v29 = vrot.slane %v1131_v30, 7  ;;  %v815_v60 = vadd.f32 %v10461_v16, %v11254_v24 }
 0x11d   : > { %1312 = vrot.lane.b32.xlu0 %v1068_v52, %s10782_s26  ;;  %v884_v0 = vmax.f32 %v812_v61, 0.0  ;;  %v882_v13 = vmax.f32 %v804_v35, 0.0  ;;  %v807_v3 = vadd.f32 %v11254_v24, %v806_v27  ;;  %v1142_v10 = vshll.u32 %v11463_v34, 16 }
 0x11e   : > { %v11508_v63 = vrot.slane %v1148_v57, 7  ;;  %v885_v15 = vmax.f32 %v815_v60, 0.0  ;;  %v1156_v21 = vshrl.u32 %v11458_v32, 16  ;;  %v1139_v16 = vshrl.u32 %v11463_v34, 16 }
 0x11f   : > { %v1159_v33 = vshll.u32 %v11458_v32, 16  ;;  %916 = vst.msk [vmem:[%s11264_s24 + $0x90] sm:$0xff] %vm16218_vm8, %v884_v0  ;;  %v11517_v36 = vpack.c.bf16 %v884_v0, %v884_v0  ;;  %914 = vst.msk [vmem:[%s11264_s24 + $0x80] sm:$0xff] %vm16218_vm8, %v882_v13  ;;  %v11521_v38 = vpack.c.bf16 %v882_v13, %v882_v13  ;;  %v883_v27 = vmax.f32 %v807_v3, 0.0 }
 0x120   : > { %v10464_v47 = vpop.f32.mrb[20].mxu0  ;;  %1663 = vrot.lane.b32.xlu1 %v1580_v58, %s10781_s25  ;;  %917 = vst.msk [vmem:[%s11264_s24 + $0x98] sm:$0xff] %vm16218_vm8, %v885_v15  ;;  %v11526_v42 = vrot.slane %v1156_v21, 7  ;;  %v11528_v58 = vrot.slane %v1139_v16, 7  ;;  %v1137_v57 = vrot.slane %v11504_v29, 4  ;;  %v11538_v35 = vpack.c.bf16 %v885_v15, %v885_v15 }
 0x121   : > { %v819_v62 = vpop.f32.mrb[21].mxu0  ;;  %1657 = vrot.lane.b32.xlu0 %v1575_v51, %s10781_s25  ;;  %915 = vst.msk [vmem:[%s11264_s24 + $0x88] sm:$0xff] %vm16218_vm8, %v883_v27  ;;  %v1154_v51 = vrot.slane %v11508_v63, 4  ;;  %v16181_v30 = vrot.slane %v11517_v36, 7  ;;  %v16180_v61 = vrot.slane %v11521_v38, 7  ;;  %v11541_v0 = vpack.c.bf16 %v883_v27, %v883_v27 }
 0x122   : > { %v10465_v7 = vpop.f32.mrb[22].mxu0  ;;  %v1144_v60 = vor.u32 %v1142_v10, %v11528_v58  ;;  %v1161_v13 = vor.u32 %v1159_v33, %v11526_v42  ;;  %v1182_v15 = vshrl.u32 %v11517_v36, 16  ;;  %v16182_v10 = vrot.slane %v11538_v35, 7 }
 0x123   : > { %v822_v52 = vpop.f32.mrb[23].mxu0  ;;  %v1602_v3 = vrot.slane %v16180_v61, 4  ;;  %v16183_v27 = vrot.slane %v11541_v0, 7  ;;  %v820_v61 = vadd.f32 %v11254_v24, %v819_v62 }
 0x124   : > { %1322 = vrot.lane.b32.xlu1 %v1095_v43, %s10782_s26  ;;  %v1117_v43 = vshll.u32 %v11360_v8, 16  ;;  %v11552_v21 = vsel %vm10952_vm9, %v1137_v57, %v1144_v60  ;;  %v11562_v33 = vsel %vm10952_vm9, %v1154_v51, %v1161_v13  ;;  %v828_v60 = vadd.f32 %v10464_v47, %v11254_v24 }
 0x125   : > { %1316 = vrot.lane.b32.xlu0 %v1078_v18, %s10782_s26  ;;  %v1607_v18 = vrot.slane %v16181_v30, 4  ;;  %v11579_v51 = vsel %vm11276_vm11, %v1602_v3, %v16183_v27  ;;  %v11587_v47 = vrot.slane %v1182_v15, 7  ;;  %v886_v62 = vmax.f32 %v820_v61, 0.0 }
 0x126   : > { %v1119_v30 = vor.u32 %v1117_v43, %v11427_v56  ;;  %v888_v56 = vmax.f32 %v828_v60, 0.0  ;;  %v823_v43 = vadd.f32 %v11254_v24, %v822_v52  ;;  %v1176_v3 = vshll.u32 %v11541_v0, 16 }
 0x127   : > { %v11570_v57 = vsel %vm11276_vm11, %v1607_v18, %v16182_v10  ;;  %v831_v18 = vadd.f32 %v10465_v7, %v11254_v24  ;;  %v1173_v8 = vshrl.u32 %v11541_v0, 16  ;;  %918 = vst.msk [vmem:[%s11264_s24 + $0xa0] sm:$0xff] %vm16218_vm8, %v886_v62  ;;  %v11603_v52 = vpack.c.bf16 %v886_v62, %v886_v62 }
 0x128   : > { %1314 = vrot.lane.b32.xlu1 %v11393_v37, %s10782_s26  ;;  %v1165_v37 = vshrl.u32 %v11521_v38, 16  ;;  %920 = vst.msk [vmem:[%s11264_s24 + $0xb0] sm:$0xff] %vm16218_vm8, %v888_v56  ;;  %v11599_v15 = vpack.c.bf16 %v888_v56, %v888_v56  ;;  %v887_v61 = vmax.f32 %v823_v43, 0.0  ;;  %v1188_v56 = vrot.slane %v11587_v47, 4 }
 0x129   : > { %1320 = vrot.lane.b32.xlu0 %v11399_v40, %s10782_s26  ;;  %v889_v7 = vmax.f32 %v831_v18, 0.0  ;;  %v11610_v18 = vrot.slane %v1173_v8, 7  ;;  %v16188_v43 = vrot.slane %v11603_v52, 7 }
 0x12a   : > { %v11581_v13 = vrot.slane %v1165_v37, 7  ;;  %v1190_v37 = vshrl.u32 %v11538_v35, 16  ;;  %919 = vst.msk [vmem:[%s11264_s24 + $0xa8] sm:$0xff] %vm16218_vm8, %v887_v61  ;;  %v16189_v62 = vrot.slane %v11599_v15, 7  ;;  %v1216_v26 = vshrl.u32 %v11599_v15, 16 }
 0x12b   : > { %921 = vst.msk [vmem:[%s11264_s24 + $0xb8] sm:$0xff] %vm16218_vm8, %v889_v7  ;;  %v1178_v8 = vor.u32 %v1176_v3, %v11610_v18  ;;  %v1612_v50 = vrot.slane %v16188_v43, 4 }
 0x12c   : > { %1671 = vrot.lane.b32.xlu1 %v1586_v19, %s10781_s25  ;;  %v1193_v19 = vshll.u32 %v11538_v35, 16  ;;  %v11608_v60 = vrot.slane %v1190_v37, 7  ;;  %v1171_v27 = vrot.slane %v11581_v13, 4  ;;  %v11623_v37 = vpack.c.bf16 %v887_v61, %v887_v61 }
 0x12d   : > { %v11556_v16 = vpop.f32.mrb[24].mxu0  ;;  %1665 = vrot.lane.b32.xlu0 %v1581_v20, %s10781_s25  ;;  %v1100_v20 = vshll.u32 %v11364_v9, 16  ;;  %v11621_v9 = vpack.c.bf16 %v889_v7, %v889_v7 }
 0x12e   : > { %v835_v25 = vpop.f32.mrb[25].mxu0  ;;  %16241 = vst [vmem:[#allocation13_spill] sm:$0xff] %v11623_v37  ;;  %v1195_v55 = vor.u32 %v1193_v19, %v11608_v60  ;;  %v11637_v7 = vsel %vm10952_vm9, %v1171_v27, %v1178_v8  ;;  %v1590_v19 = vrot.slane %v1588_v39, 4  ;;  %v1585_v8 = vrot.slane %v1583_v41, 4 }
 0x12f   : > { %v10469_v40 = vpop.f32.mrb[26].mxu0  ;;  %16240 = vst [vmem:[#allocation12_spill] sm:$0xff] %v11621_v9  ;;  %v16190_v3 = vrot.slane %v11621_v9, 7  ;;  %v844_v39 = vadd.f32 %v11556_v16, %v11254_v24 }
 0x130   : > { %v838_v10 = vpop.f32.mrb[27].mxu0  ;;  %1330 = vrot.lane.b32.xlu1 %v1119_v30, %s10782_s26  ;;  %v1617_v30 = vrot.slane %v16189_v62, 4  ;;  %v11648_v43 = vsel %vm10952_vm9, %v1188_v56, %v1195_v55  ;;  %v396_v55 = vld [vmem:[#allocation2 + $0x14] sm:$0x1]  ;;  %v11669_v62 = vrot.slane %v1216_v26, 7  ;;  %v847_v41 = vadd.f32 %v10469_v40, %v11254_v24 }
 0x131   : > { %1673 = vrot.lane.b32.xlu0 %v11411_v46, %s10781_s25  ;;  %v1102_v46 = vor.u32 %v1100_v20, %v11424_v28  ;;  %v16195_v28 = vrot.slane %v11623_v37, 7  ;;  %v1199_v20 = vshrl.u32 %v11603_v52, 16  ;;  %v1210_v26 = vshll.u32 %v11623_v37, 16 }
 0x132   : > { %v11661_v23 = vsel %vm11276_vm11, %v1617_v30, %v16190_v3  ;;  %v839_v3 = vadd.f32 %v11254_v24, %v838_v10  ;;  %v893_v1 = vmax.f32 %v847_v41, 0.0  ;;  %v397_v45 = vsel %vm10919_vm5, 0, %v396_v55 }
 0x133   : > { %v11675_v31 = vsel %vm11276_vm11, %v1612_v50, %v16195_v28  ;;  %v11678_v16 = vrot.slane %v1199_v20, 7  ;;  %v1224_v50 = vshrl.u32 %v11621_v9, 16  ;;  %v355_v28 = vld [vmem:[#allocation2 + $0x30] sm:$0x1]  ;;  %398 = vst [vmem:[#allocation2 + $0x14] sm:$0x1] %v397_v45 }
 0x134   : > { %1667 = vrot.lane.b32.xlu1 %v11422_v17, %s10781_s25  ;;  %v836_v17 = vadd.f32 %v11254_v24, %v835_v25  ;;  %v892_v25 = vmax.f32 %v844_v39, 0.0  ;;  %v1207_v20 = vshrl.u32 %v11623_v37, 16  ;;  %v1129_v39 = vrot.slane %v11447_v11, 4  ;;  %925 = vst.msk [vmem:[%s11264_s24 + $0xd8] sm:$0xff] %vm16218_vm8, %v893_v1  ;;  %v352_v11 = vld [vmem:[#allocation2 + $0x24] sm:$0x1] }
 0x135   : > { %1324 = vrot.lane.b32.xlu0 %v1102_v46, %s10782_s26  ;;  %v1227_v46 = vshll.u32 %v11621_v9, 16  ;;  %v11700_v55 = vrot.slane %v1224_v50, 7  ;;  %v356_v45 = vsel %vm10913_vm4, 0, %v355_v28  ;;  %v11715_v50 = vpack.c.bf16 %v893_v1, %v893_v1 }
 0x136   : > { %v890_v30 = vmax.f32 %v836_v17, 0.0  ;;  %924 = vst.msk [vmem:[%s11264_s24 + $0xd0] sm:$0xff] %vm16218_vm8, %v892_v25  ;;  %v11689_v40 = vpack.c.bf16 %v892_v25, %v892_v25  ;;  %v1112_v17 = vrot.slane %v11449_v14, 4  ;;  %v11705_v41 = vrot.slane %v1207_v20, 7  ;;  %357 = vst [vmem:[#allocation2 + $0x30] sm:$0x1] %v356_v45 }
 0x137   : > { %v1205_v25 = vrot.slane %v11678_v16, 4  ;;  %v1229_v14 = vor.u32 %v1227_v46, %v11700_v55  ;;  %16242 = vst [vmem:[#allocation14_spill] sm:$0xff] %v11715_v50 }
 0x138   : > { %v11632_v22 = vpop.f32.mrb[28].mxu0  ;;  %1675 = vrot.lane.b32.xlu1 %v1590_v19, %s10781_s25  ;;  %922 = vst.msk [vmem:[%s11264_s24 + $0xc0] sm:$0xff] %vm16218_vm8, %v890_v30  ;;  %v11693_v10 = vpack.c.bf16 %v890_v30, %v890_v30  ;;  %v891_v19 = vmax.f32 %v839_v3, 0.0  ;;  %v16201_v3 = vrot.slane %v11689_v40, 7  ;;  %v1212_v37 = vor.u32 %v1210_v26, %v11705_v41 }
 0x139   : > { %v11640_v61 = vpop.f32.mrb[29].mxu0  ;;  %1669 = vrot.lane.b32.xlu0 %v1585_v8, %s10781_s25  ;;  %v1222_v8 = vrot.slane %v11669_v62, 4  ;;  %v1250_v1 = vshrl.u32 %v11689_v40, 16  ;;  %v16199_v26 = vrot.slane %v11715_v50, 7 }
 0x13a   : > { %v11652_v27 = vpop.f32.mrb[30].mxu0  ;;  %923 = vst.msk [vmem:[%s11264_s24 + $0xc8] sm:$0xff] %vm16218_vm8, %v891_v19  ;;  %v16198_v30 = vrot.slane %v11693_v10, 7  ;;  %v11717_v20 = vpack.c.bf16 %v891_v19, %v891_v19  ;;  %v1627_v28 = vrot.slane %v16201_v3, 4  ;;  %v11733_v19 = vsel %vm10952_vm9, %v1205_v25, %v1212_v37 }
 0x13b   : > { %v11666_v56 = vpop.f32.mrb[31].mxu0  ;;  %v11724_v9 = vsel %vm10952_vm9, %v1222_v8, %v1229_v14  ;;  %v402_v8 = vld [vmem:[#allocation2 + $0x2c] sm:$0x1]  ;;  %v1233_v14 = vshrl.u32 %v11693_v10, 16 }
 0x13c   : > { %1334 = vrot.lane.b32.xlu1 %v1129_v39, %s10782_s26  ;;  %v1622_v46 = vrot.slane %v16198_v30, 4  ;;  %v353_v39 = vsel %vm10913_vm4, 0, %v352_v11  ;;  %v16200_v45 = vrot.slane %v11717_v20, 7  ;;  %v860_v11 = vadd.f32 %v11632_v22, %v11254_v24 }
 0x13d   : > { %1328 = vrot.lane.b32.xlu0 %v1112_v17, %s10782_s26  ;;  %v405_v17 = vld [vmem:[#allocation2 + $0x38] sm:$0x1]  ;;  %354 = vst [vmem:[#allocation2 + $0x24] sm:$0x1] %v353_v39  ;;  %v11748_v37 = vsel %vm11276_vm11, %v1627_v28, %v16199_v26  ;;  %v852_v22 = vadd.f32 %v11254_v24, %v11640_v61  ;;  %v11761_v39 = vrot.slane %v1250_v1, 7  ;;  %v403_v28 = vsel %vm10919_vm5, 0, %v402_v8 }
 0x13e   : > { %v11754_v25 = vsel %vm11276_vm11, %v1622_v46, %v16200_v45  ;;  %v896_v30 = vmax.f32 %v860_v11, 0.0  ;;  %v11765_v26 = vrot.slane %v1233_v14, 7  ;;  %404 = vst [vmem:[#allocation2 + $0x2c] sm:$0x1] %v403_v28  ;;  %v855_v61 = vadd.f32 %v11254_v24, %v11666_v56  ;;  %v361_v45 = vld [vmem:[#allocation2 + $0x48] sm:$0x1] }
 0x13f   : > { %v894_v46 = vmax.f32 %v852_v22, 0.0  ;;  %v16243_v1 = vrot.slane %v11437_v4, 7  ;;  %v1261_v11 = vshll.u32 %v11715_v50, 16  ;;  %v1241_v22 = vshrl.u32 %v11717_v20, 16  ;;  %v358_v28 = vld [vmem:[#allocation2 + $0x3c] sm:$0x1] }
 0x140   : > { %1326 = vrot.lane.b32.xlu1 %v11475_v44, %s10782_s26  ;;  %v406_v44 = vsel %vm10919_vm5, 0, %v405_v17  ;;  %v863_v17 = vadd.f32 %v11652_v27, %v11254_v24  ;;  %928 = vst.msk [vmem:[%s11264_s24 + $0xf0] sm:$0xff] %vm16218_vm8, %v896_v30  ;;  %v11778_v8 = vpack.c.bf16 %v896_v30, %v896_v30  ;;  %v1258_v27 = vshrl.u32 %v11715_v50, 16 }
 0x141   : > { %1332 = vrot.lane.b32.xlu0 %v11483_v53, %s10782_s26  ;;  %v1151_v53 = vshll.u32 %v11437_v4, 16  ;;  %407 = vst [vmem:[#allocation2 + $0x38] sm:$0x1] %v406_v44  ;;  %v1244_v44 = vshll.u32 %v11717_v20, 16  ;;  %v16245_v24 = vrot.slane %v11441_v6, 7  ;;  %926 = vst.msk [vmem:[%s11264_s24 + $0xe0] sm:$0xff] %vm16218_vm8, %v894_v46  ;;  %v11786_v4 = vpack.c.bf16 %v894_v46, %v894_v46 }
 0x142   : > { %16244 = vst [vmem:[#allocation15_spill] sm:$0xff] %v11778_v8  ;;  %v897_v56 = vmax.f32 %v863_v17, 0.0  ;;  %v895_v14 = vmax.f32 %v855_v61, 0.0  ;;  %v11790_v3 = vrot.slane %v1258_v27, 7  ;;  %v1256_v30 = vrot.slane %v11761_v39, 4 }
 0x143   : > { %16246 = vst [vmem:[#allocation16_spill] sm:$0xff] %v11786_v4  ;;  %v362_v50 = vsel %vm10913_vm4, 0, %v361_v45  ;;  %v11800_v46 = vrot.slane %v1241_v22, 7  ;;  %v1239_v17 = vrot.slane %v11765_v26, 4  ;;  %v16204_v61 = vrot.slane %v11786_v4, 7 }
 0x144   : > { %1683 = vrot.lane.b32.xlu1 %v16243_v1, %s10781_s25  ;;  %v1153_v1 = vor.u32 %v1151_v53, %v11508_v63  ;;  %929 = vst.msk [vmem:[%s11264_s24 + $0xf8] sm:$0xff] %vm16218_vm8, %v897_v56  ;;  %927 = vst.msk [vmem:[%s11264_s24 + $0xe8] sm:$0xff] %vm16218_vm8, %v895_v14  ;;  %v16203_v63 = vrot.slane %v11778_v8, 7  ;;  %v1263_v53 = vor.u32 %v1261_v11, %v11790_v3  ;;  %v411_v22 = vld [vmem:[#allocation2 + $0x50] sm:$0x1] }
 0x145   : > { %1677 = vrot.lane.b32.xlu0 %v16245_v24, %s10781_s25  ;;  %v1134_v24 = vshll.u32 %v11441_v6, 16  ;;  %363 = vst [vmem:[#allocation2 + $0x48] sm:$0x1] %v362_v50  ;;  %v359_v6 = vsel %vm10913_vm4, 0, %v358_v28  ;;  %v11811_v45 = vpack.c.bf16 %v897_v56, %v897_v56  ;;  %v11813_v27 = vpack.c.bf16 %v895_v14, %v895_v14  ;;  %v408_v56 = vld [vmem:[#allocation2 + $0x44] sm:$0x1] }
 0x146   : > { %v1246_v50 = vor.u32 %v1244_v44, %v11800_v46  ;;  %360 = vst [vmem:[#allocation2 + $0x3c] sm:$0x1] %v359_v6  ;;  %v1637_v11 = vrot.slane %v16203_v63, 4  ;;  %v1632_v28 = vrot.slane %v16204_v61, 4  ;;  %v1267_v61 = vshrl.u32 %v11786_v4, 16 }
 0x147   : > { %v1136_v14 = vor.u32 %v1134_v24, %v11504_v29  ;;  %v16209_v6 = vrot.slane %v11811_v45, 7  ;;  %v364_v29 = vld [vmem:[#allocation2 + $0x54] sm:$0x1]  ;;  %v16247_v24 = vrot.slane %v11458_v32, 7  ;;  %v16248_v32 = vrot.slane %v11463_v34, 7 }
 0x148   : > { %1342 = vrot.lane.b32.xlu1 %v1153_v1, %s10782_s26  ;;  %v11818_v1 = vsel %vm10952_vm9, %v1256_v30, %v1263_v53  ;;  %v11828_v44 = vsel %vm10952_vm9, %v1239_v17, %v1246_v50  ;;  %v16210_v30 = vrot.slane %v11813_v27, 7  ;;  %v367_v53 = vld [vmem:[#allocation2 + $0x60] sm:$0x1]  ;;  %v11859_v4 = vrot.slane %v1267_v61, 7  ;;  %v373_v34 = vld [vmem:[#allocation2 + $0x78] sm:$0x1] }
 0x149   : > { %1685 = vrot.lane.b32.xlu0 %v11492_v59, %s10781_s25  ;;  %v1284_v59 = vshrl.u32 %v11778_v8, 16  ;;  %v412_v8 = vsel %vm10919_vm5, 0, %v411_v22  ;;  %v1600_v17 = vrot.slane %v16247_v24, 4  ;;  %v11846_v50 = vsel %vm11276_vm11, %v1637_v11, %v16209_v6  ;;  %v414_v6 = vld [vmem:[#allocation2 + $0x5c] sm:$0x1] }
 0x14a   : > { %413 = vst [vmem:[#allocation2 + $0x50] sm:$0x1] %v412_v8  ;;  %v409_v22 = vsel %vm10919_vm5, 0, %v408_v56  ;;  %v1295_v24 = vshll.u32 %v11811_v45, 16  ;;  %v1292_v11 = vshrl.u32 %v11811_v45, 16  ;;  %v1278_v49 = vshll.u32 %v11813_v27, 16 }
 0x14b   : > { %v11834_v63 = vrot.slane %v1284_v59, 7  ;;  %v417_v59 = vld [vmem:[#allocation2 + $0x68] sm:$0x1]  ;;  %410 = vst [vmem:[#allocation2 + $0x44] sm:$0x1] %v409_v22  ;;  %v368_v8 = vsel %vm10913_vm4, 0, %v367_v53 }
 0x14c   : > { %1679 = vrot.lane.b32.xlu1 %v11502_v12, %s10781_s25  ;;  %v11852_v12 = vsel %vm11276_vm11, %v1632_v28, %v16210_v30  ;;  %v1275_v28 = vshrl.u32 %v11813_v27, 16  ;;  %v365_v56 = vsel %vm10913_vm4, 0, %v364_v29  ;;  %369 = vst [vmem:[#allocation2 + $0x60] sm:$0x1] %v368_v8  ;;  %v418_v22 = vsel %vm10919_vm5, 0, %v417_v59 }
 0x14d   : > { %1336 = vrot.lane.b32.xlu0 %v1136_v14, %s10782_s26  ;;  %v1595_v14 = vrot.slane %v16248_v32, 4  ;;  %v11869_v32 = vrot.slane %v1292_v11, 7  ;;  %v1290_v61 = vrot.slane %v11834_v63, 4  ;;  %366 = vst [vmem:[#allocation2 + $0x54] sm:$0x1] %v365_v56  ;;  %v1273_v53 = vrot.slane %v11859_v4, 4 }
 0x14e   : > { %v11875_v30 = vrot.slane %v1275_v28, 7  ;;  %419 = vst [vmem:[#allocation2 + $0x68] sm:$0x1] %v418_v22  ;;  %v415_v29 = vsel %vm10919_vm5, 0, %v414_v6  ;;  %v1163_v11 = vrot.slane %v11526_v42, 4  ;;  %v1146_v59 = vrot.slane %v11528_v58, 4 }
 0x14f   : > { %v1297_v8 = vor.u32 %v1295_v24, %v11869_v32  ;;  %416 = vst [vmem:[#allocation2 + $0x5c] sm:$0x1] %v415_v29  ;;  %v370_v28 = vld [vmem:[#allocation2 + $0x6c] sm:$0x1]  ;;  %v1185_v58 = vshll.u32 %v11517_v36, 16  ;;  %v1168_v22 = vshll.u32 %v11521_v38, 16  ;;  %v11921_v29 = vpop.permute.xlu0 %3125 }
 0x150   : > { %1687 = vrot.lane.b32.xlu1 %v1600_v17, %s10781_s25  ;;  %v374_v17 = vsel %vm10913_vm4, 0, %v373_v34  ;;  %v371_v6 = vsel %vm10913_vm4, 0, %v370_v28  ;;  %v423_v24 = vld [vmem:[#allocation2 + $0x80] sm:$0x1]  ;;  %v420_v34 = vld [vmem:[#allocation2 + $0x74] sm:$0x1] }
 0x151   : > { %1681 = vrot.lane.b32.xlu0 %v1595_v14, %s10781_s25  ;;  %375 = vst [vmem:[#allocation2 + $0x78] sm:$0x1] %v374_v17  ;;  %v1280_v14 = vor.u32 %v1278_v49, %v11875_v30  ;;  %v11889_v56 = vsel %vm10952_vm9, %v1290_v61, %v1297_v8  ;;  %372 = vst [vmem:[#allocation2 + $0x6c] sm:$0x1] %v371_v6  ;;  %v424_v49 = vsel %vm10919_vm5, 0, %v423_v24  ;;  %v16249_v61 = vrot.slane %v11517_v36, 7  ;;  %v11918_v36 = vpop.permute.xlu1 %2087 }
 0x152   : > { %425 = vst [vmem:[#allocation2 + $0x80] sm:$0x1] %v424_v49  ;;  %v421_v48 = vsel %vm10919_vm5, 0, %v420_v34  ;;  %v429_v24 = vld [vmem:[#allocation2 + $0x98] sm:$0x1]  ;;  %vm475_vm11 = vcmask 25601  }
 0x153   : > { %v11896_v42 = vsel %vm10952_vm9, %v1273_v53, %v1280_v14  ;;  %422 = vst [vmem:[#allocation2 + $0x74] sm:$0x1] %v421_v48  ;;  %v1170_v53 = vor.u32 %v1168_v22, %v11581_v13  ;;  %v376_v14 = vld [vmem:[#allocation2 + $0x84] sm:$0x1]  ;;  %vm1785_vm9 = vcmask 27649  }
 0x154   : > { %1346 = vrot.lane.b32.xlu1 %v1163_v11, %s10782_s26  ;;  %v16252_v11 = vrot.slane %v11541_v0, 7  ;;  %v377_v0 = vsel %vm10913_vm4, 0, %v376_v14  ;;  %v426_v48 = vld [vmem:[#allocation2 + $0x8c] sm:$0x1]  ;;  %v385_v14 = vld [vmem:[#allocation2 + $0xa8] sm:$0x1] }
 0x155   : > { %1340 = vrot.lane.b32.xlu0 %v1146_v59, %s10782_s26  ;;  %v11933_v13 = vpop.permute.xlu1 %2825  ;;  %v1197_v59 = vrot.slane %v11608_v60, 4  ;;  %378 = vst [vmem:[#allocation2 + $0x84] sm:$0x1] %v377_v0  ;;  %v1453_v60 = vld [vmem:[#allocation2 + $0x18] sm:$0xf] }
 0x156   : > { %v1605_v8 = vrot.slane %v16252_v11, 4 }
 0x158   : > { %1338 = vrot.lane.b32.xlu1 %v11552_v21, %s10782_s26  ;;  %v16250_v21 = vrot.slane %v11521_v38, 7  ;;  %v379_v38 = vld [vmem:[#allocation2 + $0x90] sm:$0x1] }
 0x159   : > { %1344 = vrot.lane.b32.xlu0 %v11562_v33, %s10782_s26  ;;  %v1187_v33 = vor.u32 %v1185_v58, %v11587_v47  ;;  %v16251_v47 = vrot.slane %v11538_v35, 7  ;;  %v1180_v35 = vrot.slane %v11610_v18, 4  ;;  %v1219_v58 = vshll.u32 %v11599_v15, 16 }
 0x15b   : > { %v1610_v17 = vrot.slane %v16251_v47, 4 }
 0x15c   : > { %1695 = vrot.lane.b32.xlu1 %v16249_v61, %s10781_s25  ;;  %v430_v61 = vsel %vm10919_vm5, 0, %v429_v24 }
 0x15d   : > { %1689 = vrot.lane.b32.xlu0 %v16250_v21, %s10781_s25  ;;  %431 = vst [vmem:[#allocation2 + $0x98] sm:$0x1] %v430_v61  ;;  %v16254_v21 = vrot.slane %v11603_v52, 7 }
 0x160   : > { %1354 = vrot.lane.b32.xlu1 %v1187_v33, %s10782_s26  ;;  %v1446_v33 = vld [vmem:[#allocation2 + $0xc] sm:$0xf] }
 0x161   : > { %1697 = vrot.lane.b32.xlu0 %v11570_v57, %s10781_s25  ;;  %v380_v57 = vsel %vm10913_vm4, 0, %v379_v38 }
 0x162   : > { %381 = vst [vmem:[#allocation2 + $0x90] sm:$0x1] %v380_v57 }
 0x164   : > { %1691 = vrot.lane.b32.xlu1 %v11579_v51, %s10781_s25  ;;  %v11936_v51 = vpop.permute.xlu0 %2611 }
 0x165   : > { %1348 = vrot.lane.b32.xlu0 %v1170_v53, %s10782_s26  ;;  %v1221_v53 = vor.u32 %v1219_v58, %v11669_v62  ;;  %v1450_v58 = vld [vmem:[#allocation2 + $0x14] sm:$0x1] }
 0x168   : > { %1699 = vrot.lane.b32.xlu1 %v1610_v17, %s10781_s25  ;;  %v1202_v17 = vshll.u32 %v11603_v52, 16  ;;  %v1457_v52 = vld [vmem:[#allocation2 + $0x20] sm:$0x1] }
 0x169   : > { %1693 = vrot.lane.b32.xlu0 %v1605_v8, %s10781_s25 }
 0x16a   : > { %v1204_v62 = vor.u32 %v1202_v17, %v11678_v16 }
 0x16c   : > { %1358 = vrot.lane.b32.xlu1 %v1197_v59, %s10782_s26  ;;  %v16255_v59 = vld [vmem:[#allocation12_spill] sm:$0xff] }
 0x16d   : > { %1352 = vrot.lane.b32.xlu0 %v1180_v35, %s10782_s26  ;;  %v16256_v35 = vrot.slane %v16255_v59, 7  ;;  %v432_v59 = vld [vmem:[#allocation2 + $0xa4] sm:$0x1] }
 0x16e   : > { %v1648_v28 = vpop.permute.xlu1 %1647 }
 0x16f   : > { %1789 = vst.msk [vmem:[#allocation3 + $0x24] sm:$0xe] %vm1785_vm9, %v1648_v28  ;;  %v1642_v6 = vpop.permute.xlu0 %1641  ;;  %v16257_v28 = vld [vmem:[#allocation13_spill] sm:$0xff] }
 0x170   : > { %1786 = vst.msk [vmem:[#allocation3 + $0x18] sm:$0xe] %vm1785_vm9, %v1642_v6  ;;  %1350 = vrot.lane.b32.xlu1 %v11637_v7, %s10782_s26  ;;  %v16253_v7 = vrot.slane %v11599_v15, 7  ;;  %v16258_v6 = vrot.slane %v16257_v28, 7 }
 0x171   : > { %1356 = vrot.lane.b32.xlu0 %v11648_v43, %s10782_s26  ;;  %v427_v43 = vsel %vm10919_vm5, 0, %v426_v48  ;;  %v1214_v48 = vrot.slane %v11705_v41, 4  ;;  %v1467_v41 = vld [vmem:[#allocation2 + $0x30] sm:$0xf] }
 0x172   : > { %v1307_v18 = vpop.permute.xlu1 %1306  ;;  %428 = vst [vmem:[#allocation2 + $0x8c] sm:$0x1] %v427_v43 }
 0x173   : > { %v1454_v49 = vsel %vm10959_vm10, %v1307_v18, %v1453_v60  ;;  %v1650_v34 = vpop.permute.xlu0 %1649  ;;  %v386_v60 = vsel %vm10913_vm4, 0, %v385_v14 }
 0x174   : > { %1455 = vst [vmem:[#allocation2 + $0x18] sm:$0xf] %v1454_v49  ;;  %1790 = vst.msk [vmem:[#allocation3 + $0x28] sm:$0xf] %vm333_vm6, %v1650_v34  ;;  %1707 = vrot.lane.b32.xlu1 %v16253_v7, %s10781_s25  ;;  %v1231_v49 = vrot.slane %v11700_v55, 4 }
 0x175   : > { %1701 = vrot.lane.b32.xlu0 %v16254_v21, %s10781_s25  ;;  %387 = vst [vmem:[#allocation2 + $0xa8] sm:$0x1] %v386_v60  ;;  %v382_v7 = vld [vmem:[#allocation2 + $0x9c] sm:$0x1]  ;;  %v16261_v60 = vld [vmem:[#allocation14_spill] sm:$0xff] }
 0x176   : > { %v1644_v22 = vpop.permute.xlu1 %1643  ;;  %v383_v43 = vsel %vm10913_vm4, 0, %v382_v7 }
 0x177   : > { %1787 = vst.msk [vmem:[#allocation3 + $0x1c] sm:$0xf] %vm333_vm6, %v1644_v22  ;;  %v1301_v47 = vpop.permute.xlu0 %1300  ;;  %384 = vst [vmem:[#allocation2 + $0x9c] sm:$0x1] %v383_v43  ;;  %v1265_v43 = vrot.slane %v11790_v3, 4 }
 0x178   : > { %v1447_v15 = vsel %vm10959_vm10, %v1301_v47, %v1446_v33  ;;  %1366 = vrot.lane.b32.xlu1 %v1221_v53, %s10782_s26  ;;  %v1253_v53 = vshll.u32 %v11689_v40, 16  ;;  %v435_v47 = vld [vmem:[#allocation2 + $0xb0] sm:$0x1] }
 0x179   : > { %1448 = vst [vmem:[#allocation2 + $0xc] sm:$0xf] %v1447_v15  ;;  %1709 = vrot.lane.b32.xlu0 %v11661_v23, %s10781_s25  ;;  %v1620_v23 = vrot.slane %v16256_v35, 4  ;;  %v1236_v35 = vshll.u32 %v11693_v10, 16 }
 0x17a   : > { %v1652_v38 = vpop.permute.xlu1 %1651 }
 0x17b   : > { %1791 = vst.msk [vmem:[#allocation3 + $0x2c] sm:$0x1] %vm16219_vm1, %v1652_v38  ;;  %v1646_v11 = vpop.permute.xlu0 %1645  ;;  %v11977_v8 = vld [vmem:[#allocation3 + $0x24] sm:$0xff]  }
 0x17c   : > { %1788 = vst.msk [vmem:[#allocation3 + $0x20] sm:$0x1] %vm16219_vm1, %v1646_v11  ;;  %1703 = vrot.lane.b32.xlu1 %v11675_v31, %s10781_s25  ;;  %v1615_v31 = vrot.slane %v16258_v6, 4  ;;  %v1460_v11 = vld [vmem:[#allocation2 + $0x24] sm:$0xf] }
 0x17d   : > { %1360 = vrot.lane.b32.xlu0 %v1204_v62, %s10782_s26  ;;  %3934 = vst.msk [vmem:[#allocation6 + $0x18] sm:$0xff] %vm16218_vm8, %v11977_v8  ;;  %v436_v62 = vsel %vm10919_vm5, 0, %v435_v47  ;;  %v1464_v6 = vld [vmem:[#allocation2 + $0x2c] sm:$0x1] }
 0x17e   : > { %v1311_v57 = vpop.permute.xlu1 %1310  ;;  %v11990_v18 = vld [vmem:[#allocation3 + $0x18] sm:$0xff]   ;;  %437 = vst [vmem:[#allocation2 + $0xb0] sm:$0x1] %v436_v62 }
 0x17f   : > { %v1458_v16 = vsel %vm10913_vm4, %v1311_v57, %v1457_v52  ;;  %v1309_v0 = vpop.permute.xlu0 %1308  ;;  %3933 = vst.msk [vmem:[#allocation6 + $0x10] sm:$0xff] %vm16218_vm8, %v11990_v18  ;;  %v1255_v57 = vor.u32 %v1253_v53, %v11761_v39 }
 0x180   : > { %1459 = vst [vmem:[#allocation2 + $0x20] sm:$0x1] %v1458_v16  ;;  %1456 = vst.msk [vmem:[#allocation2 + $0x1c] sm:$0xf] %vm333_vm6, %v1309_v0  ;;  %1711 = vrot.lane.b32.xlu1 %v1620_v23, %s10781_s25  ;;  %v433_v23 = vsel %vm10919_vm5, 0, %v432_v59  ;;  %v1238_v0 = vor.u32 %v1236_v35, %v11765_v26 }
 0x181   : > { %1705 = vrot.lane.b32.xlu0 %v1615_v31, %s10781_s25  ;;  %434 = vst [vmem:[#allocation2 + $0xa4] sm:$0x1] %v433_v23  ;;  %v441_v35 = vld [vmem:[#allocation2 + $0xc8] sm:$0x1] }
 0x182   : > { %v1305_v24 = vpop.permute.xlu1 %1304 }
 0x183   : > { %v1451_v34 = vsel %vm10913_vm4, %v1305_v24, %v1450_v58  ;;  %v1303_v61 = vpop.permute.xlu0 %1302  ;;  %v391_v24 = vld [vmem:[#allocation2 + $0xc0] sm:$0x1] }
 0x184   : > { %1452 = vst [vmem:[#allocation2 + $0x14] sm:$0x1] %v1451_v34  ;;  %1449 = vst.msk [vmem:[#allocation2 + $0x10] sm:$0xf] %vm333_vm6, %v1303_v61  ;;  %1370 = vrot.lane.b32.xlu1 %v1231_v49, %s10782_s26  ;;  %v392_v61 = vsel %vm10913_vm4, 0, %v391_v24 }
 0x185   : > { %1364 = vrot.lane.b32.xlu0 %v1214_v48, %s10782_s26  ;;  %393 = vst [vmem:[#allocation2 + $0xc0] sm:$0x1] %v392_v61 }
 0x186   : > { %v1660_v21 = vpop.permute.xlu1 %1659 }
 0x187   : > { %1795 = vst.msk [vmem:[#allocation3 + $0x3c] sm:$0xe] %vm1785_vm9, %v1660_v21  ;;  %v1654_v55 = vpop.permute.xlu0 %1653  ;;  %v12007_v33 = vld [vmem:[#allocation2 + $0x18] sm:$0xff]  }
 0x188   : > { %1792 = vst.msk [vmem:[#allocation3 + $0x30] sm:$0xe] %vm1785_vm9, %v1654_v55  ;;  %1362 = vrot.lane.b32.xlu1 %v11733_v19, %s10782_s26  ;;  %v16259_v19 = vrot.slane %v11689_v40, 7  ;;  %v1248_v55 = vrot.slane %v11800_v46, 4  ;;  %v1481_v46 = vld [vmem:[#allocation2 + $0x48] sm:$0xf] }
 0x189   : > { %1368 = vrot.lane.b32.xlu0 %v11724_v9, %s10782_s26  ;;  %1968 = vst.msk [vmem:[#allocation5 + $0x10] sm:$0xff] %vm16218_vm8, %v12007_v33  ;;  %v16260_v9 = vrot.slane %v11693_v10, 7  ;;  %v1471_v10 = vld [vmem:[#allocation2 + $0x38] sm:$0x1]  ;;  %v2867_v61 = vld [vmem:[#allocation2 + $0x1c] sm:$0xf] }
 0x18a   : > { %v1319_v22 = vpop.permute.xlu1 %1318 }
 0x18b   : > { %v1468_v17 = vsel %vm10959_vm10, %v1319_v22, %v1467_v41  ;;  %v1662_v15 = vpop.permute.xlu0 %1661  ;;  %v12019_v38 = vld [vmem:[#allocation2 + $0xc] sm:$0xff]   ;;  %v388_v41 = vld [vmem:[#allocation2 + $0xb4] sm:$0x1] }
 0x18c   : > { %1469 = vst [vmem:[#allocation2 + $0x30] sm:$0xf] %v1468_v17  ;;  %1796 = vst.msk [vmem:[#allocation3 + $0x40] sm:$0xf] %vm333_vm6, %v1662_v15  ;;  %1719 = vrot.lane.b32.xlu1 %v16259_v19, %s10781_s25  ;;  %v389_v22 = vsel %vm10913_vm4, 0, %v388_v41  ;;  %v16264_v17 = vld [vmem:[#allocation15_spill] sm:$0xff] }
 0x18d   : > { %1713 = vrot.lane.b32.xlu0 %v16260_v9, %s10781_s25  ;;  %1967 = vst.msk [vmem:[#allocation5 + $0x8] sm:$0xff] %vm16218_vm8, %v12019_v38  ;;  %390 = vst [vmem:[#allocation2 + $0xb4] sm:$0x1] %v389_v22  ;;  %v1287_v15 = vshll.u32 %v16264_v17, 16  ;;  %v2866_v22 = vld [vmem:[#allocation2 + $0x18] sm:$0xe] }
 0x18e   : > { %v1656_v52 = vpop.permute.xlu1 %1655 }
 0x18f   : > { %1793 = vst.msk [vmem:[#allocation3 + $0x34] sm:$0xf] %vm333_vm6, %v1656_v52  ;;  %v1313_v40 = vpop.permute.xlu0 %1312 }
 0x190   : > { %v1461_v14 = vsel %vm10959_vm10, %v1313_v40, %v1460_v11  ;;  %1378 = vrot.lane.b32.xlu1 %v1255_v57, %s10782_s26  ;;  %v1474_v57 = vld [vmem:[#allocation2 + $0x3c] sm:$0xf]  ;;  %v1289_v40 = vor.u32 %v1287_v15, %v11834_v63 }
 0x191   : > { %1462 = vst [vmem:[#allocation2 + $0x24] sm:$0xf] %v1461_v14  ;;  %1721 = vrot.lane.b32.xlu0 %v11748_v37, %s10781_s25  ;;  %v16262_v37 = vrot.slane %v16261_v60, 7 }
 0x192   : > { %v1664_v39 = vpop.permute.xlu1 %1663 }
 0x193   : > { %1797 = vst.msk [vmem:[#allocation3 + $0x44] sm:$0x1] %vm16219_vm1, %v1664_v39  ;;  %v1658_v16 = vpop.permute.xlu0 %1657  ;;  %v12047_v28 = vld [vmem:[#allocation3 + $0x3c] sm:$0xff]   ;;  %v1630_v58 = vrot.slane %v16262_v37, 4  ;;  %v442_v39 = vsel %vm10919_vm5, 0, %v441_v35 }
 0x194   : > { %1794 = vst.msk [vmem:[#allocation3 + $0x38] sm:$0x1] %vm16219_vm1, %v1658_v16  ;;  %1715 = vrot.lane.b32.xlu1 %v11754_v25, %s10781_s25  ;;  %v16263_v25 = vrot.slane %v11717_v20, 7  ;;  %v438_v16 = vld [vmem:[#allocation2 + $0xbc] sm:$0x1] }
 0x195   : > { %1372 = vrot.lane.b32.xlu0 %v1238_v0, %s10782_s26  ;;  %3936 = vst.msk [vmem:[#allocation6 + $0x28] sm:$0xff] %vm16218_vm8, %v12047_v28  ;;  %443 = vst [vmem:[#allocation2 + $0xc8] sm:$0x1] %v442_v39  ;;  %v1485_v37 = vld [vmem:[#allocation2 + $0x50] sm:$0x1] }
 0x196   : > { %v1323_v31 = vpop.permute.xlu1 %1322  ;;  %v1625_v34 = vrot.slane %v16263_v25, 4  ;;  %v12060_v48 = vld [vmem:[#allocation3 + $0x30] sm:$0xff]   ;;  %v16269_v25 = vrot.slane %v11813_v27, 7 }
 0x197   : > { %v1472_v26 = vsel %vm10913_vm4, %v1323_v31, %v1471_v10  ;;  %v1317_v49 = vpop.permute.xlu0 %1316  ;;  %3935 = vst.msk [vmem:[#allocation6 + $0x20] sm:$0xff] %vm16218_vm8, %v12060_v48  ;;  %v439_v10 = vsel %vm10919_vm5, 0, %v438_v16  ;;  %v1488_v16 = vld [vmem:[#allocation2 + $0x54] sm:$0xf]  ;;  %vm2105_vm5 = vcmask 228544  }
 0x198   : > { %1473 = vst [vmem:[#allocation2 + $0x38] sm:$0x1] %v1472_v26  ;;  %v1465_v7 = vsel %vm10913_vm4, %v1317_v49, %v1464_v6  ;;  %1723 = vrot.lane.b32.xlu1 %v1630_v58, %s10781_s25  ;;  %440 = vst [vmem:[#allocation2 + $0xbc] sm:$0x1] %v439_v10  ;;  %v16268_v58 = vrot.slane %v11811_v45, 7 }
 0x199   : > { %1466 = vst [vmem:[#allocation2 + $0x2c] sm:$0x1] %v1465_v7  ;;  %1717 = vrot.lane.b32.xlu0 %v1625_v34, %s10781_s25  ;;  %v1299_v7 = vrot.slane %v11869_v32, 4 }
 0x19a   : > { %v1315_v20 = vpop.permute.xlu1 %1314  ;;  %v1640_v24 = vrot.slane %v16268_v58, 4  ;;  %v2125_v58 = vld [vmem:[#allocation2 + $0xc] sm:$0xf] }
 0x19b   : > { %1463 = vst.msk [vmem:[#allocation2 + $0x28] sm:$0xf] %vm333_vm6, %v1315_v20  ;;  %v1321_v21 = vpop.permute.xlu0 %1320  ;;  %v10675_v20 = vld [vmem:[#allocation2] sm:$0xff]  }
 0x19c   : > { %1470 = vst.msk [vmem:[#allocation2 + $0x34] sm:$0xf] %vm333_vm6, %v1321_v21  ;;  %1382 = vrot.lane.b32.xlu1 %v1265_v43, %s10782_s26  ;;  %v1282_v43 = vrot.slane %v11875_v30, 4  ;;  %v2981_v21 = vrot.slane %v2867_v61, 5  ;;  %v1495_v30 = vld [vmem:[#allocation2 + $0x60] sm:$0xf] }
 0x19d   : > { %1376 = vrot.lane.b32.xlu0 %v1248_v55, %s10782_s26  ;;  %v2864_v55 = vld [vmem:[#allocation2 + $0x10] sm:$0xf]  ;;  %1966 = vst.msk [vmem:[#allocation5] sm:$0xff] %vm16218_vm8, %v10675_v20  ;;  %v1555_v54 = vld [vmem:[#allocation2 + $0xc8] sm:$0x1] }
 0x19e   : > { %v1672_v53 = vpop.permute.xlu1 %1671 }
 0x19f   : > { %1801 = vst.msk [vmem:[#allocation3 + $0x54] sm:$0xe] %vm1785_vm9, %v1672_v53  ;;  %v1666_v3 = vpop.permute.xlu0 %1665  ;;  %v2868_v53 = vld [vmem:[#allocation2 + $0x20] sm:$0x1] }
 0x1a0   : > { %1798 = vst.msk [vmem:[#allocation3 + $0x48] sm:$0xe] %vm1785_vm9, %v1666_v3  ;;  %1374 = vrot.lane.b32.xlu1 %v11828_v44, %s10782_s26  ;;  %v16265_v44 = vrot.slane %v16264_v17, 7  ;;  %v2983_v3 = vrot.slane %v2981_v21, 4  ;;  %v9992_v17 = vrot.slane %v2866_v22, 9  ;;  %v2984_v15 = vrot.slane %v2868_v53, 5 }
 0x1a1   : > { %1380 = vrot.lane.b32.xlu0 %v11818_v1, %s10782_s26  ;;  %v16266_v1 = vld [vmem:[#allocation16_spill] sm:$0xff] }
 0x1a2   : > { %v1331_v47 = vpop.permute.xlu1 %1330  ;;  %v12083_v19 = vld [vmem:[#allocation2 + $0x24] sm:$0xff]   ;;  %v16267_v52 = vrot.slane %v16266_v1, 7  ;;  %v1270_v14 = vshll.u32 %v16266_v1, 16  ;;  %v2865_v1 = vld [vmem:[#allocation2 + $0x14] sm:$0x1] }
 0x1a3   : > { %v1482_v9 = vsel %vm10959_vm10, %v1331_v47, %v1481_v46  ;;  %v1674_v11 = vpop.permute.xlu0 %1673  ;;  %v12087_v62 = vld [vmem:[#allocation2 + $0x30] sm:$0xff]   ;;  %1969 = vst.msk [vmem:[#allocation5 + $0x18] sm:$0xff] %vm16218_vm8, %v12083_v19  ;;  %v2974_v46 = vrot.slane %v2864_v55, 5  ;;  %v2129_v47 = vld [vmem:[#allocation2 + $0x1c] sm:$0xf] }
 0x1a4   : > { %1483 = vst [vmem:[#allocation2 + $0x48] sm:$0xf] %v1482_v9  ;;  %1802 = vst.msk [vmem:[#allocation3 + $0x58] sm:$0xf] %vm333_vm6, %v1674_v11  ;;  %1731 = vrot.lane.b32.xlu1 %v16265_v44, %s10781_s25  ;;  %v1272_v31 = vor.u32 %v1270_v14, %v11859_v4  ;;  %v2863_v9 = vld [vmem:[#allocation2 + $0xc] sm:$0xe] }
 0x1a5   : > { %1725 = vrot.lane.b32.xlu0 %v16267_v52, %s10781_s25  ;;  %1970 = vst.msk [vmem:[#allocation5 + $0x20] sm:$0xff] %vm16218_vm8, %v12087_v62  ;;  %v2128_v11 = vld [vmem:[#allocation2 + $0x18] sm:$0xf]  ;;  %v2237_v52 = vshll.u32 %v2129_v47, 16  ;;  %v2241_v14 = vshrl.u32 %v2129_v47, 16 }
 0x1a6   : > { %v1668_v59 = vpop.permute.xlu1 %1667  ;;  %v2228_v10 = vshrl.u32 %v2128_v11, 16 }
 0x1a7   : > { %1799 = vst.msk [vmem:[#allocation3 + $0x4c] sm:$0xf] %vm333_vm6, %v1668_v59  ;;  %v1325_v23 = vpop.permute.xlu0 %1324 }
 0x1a8   : > { %v1475_v0 = vsel %vm10959_vm10, %v1325_v23, %v1474_v57  ;;  %1390 = vrot.lane.b32.xlu1 %v1289_v40, %s10782_s26  ;;  %v2976_v23 = vrot.slane %v2974_v46, 4  ;;  %v2230_v20 = vrot.slane %v2228_v10, 4 }
 0x1a9   : > { %1476 = vst [vmem:[#allocation2 + $0x3c] sm:$0xf] %v1475_v0  ;;  %1733 = vrot.lane.b32.xlu0 %v11846_v50, %s10781_s25  ;;  %v1478_v50 = vld [vmem:[#allocation2 + $0x44] sm:$0x1]  ;;  %v2982_v0 = vsel %vm11224_vm13, %v9992_v17, %v2981_v21  ;;  %v2127_v17 = vld [vmem:[#allocation2 + $0x14] sm:$0x1] }
 0x1aa   : > { %v1676_v63 = vpop.permute.xlu1 %1675 }
 0x1ab   : > { %1803 = vst.msk [vmem:[#allocation3 + $0x5c] sm:$0x1] %vm16219_vm1, %v1676_v63  ;;  %v1670_v6 = vpop.permute.xlu0 %1669  ;;  %v12114_v60 = vld [vmem:[#allocation3 + $0x54] sm:$0xff]   ;;  %v2977_v63 = vrot.slane %v2865_v1, 5 }
 0x1ac   : > { %1800 = vst.msk [vmem:[#allocation3 + $0x50] sm:$0x1] %vm16219_vm1, %v1670_v6  ;;  %1727 = vrot.lane.b32.xlu1 %v11852_v12, %s10781_s25  ;;  %v1635_v12 = vrot.slane %v16269_v25, 4  ;;  %v2231_v6 = vshll.u32 %v2128_v11, 16 }
 0x1ad   : > { %1384 = vrot.lane.b32.xlu0 %v1272_v31, %s10782_s26  ;;  %3938 = vst.msk [vmem:[#allocation6 + $0x38] sm:$0xff] %vm16218_vm8, %v12114_v60 }
 0x1ae   : > { %v1335_v5 = vpop.permute.xlu1 %1334  ;;  %v12124_v4 = vld [vmem:[#allocation3 + $0x48] sm:$0xff]  }
 0x1af   : > { %v1486_v26 = vsel %vm10913_vm4, %v1335_v5, %v1485_v37  ;;  %v1329_v49 = vpop.permute.xlu0 %1328  ;;  %3937 = vst.msk [vmem:[#allocation6 + $0x30] sm:$0xff] %vm16218_vm8, %v12124_v4  ;;  %v12168_v5 = vrot.slane %v2237_v52, 5 }
 0x1b0   : > { %1487 = vst [vmem:[#allocation2 + $0x50] sm:$0x1] %v1486_v26  ;;  %v1479_v34 = vsel %vm10913_vm4, %v1329_v49, %v1478_v50  ;;  %1735 = vrot.lane.b32.xlu1 %v1640_v24, %s10781_s25  ;;  %v9991_v50 = vrot.slane %v2863_v9, 9  ;;  %v2243_v26 = vrot.slane %v2241_v14, 4  ;;  %v2223_v14 = vshll.u32 %v2127_v17, 16 }
 0x1b1   : > { %1480 = vst [vmem:[#allocation2 + $0x44] sm:$0x1] %v1479_v34  ;;  %1729 = vrot.lane.b32.xlu0 %v1635_v12, %s10781_s25  ;;  %v1502_v17 = vld [vmem:[#allocation2 + $0x6c] sm:$0xf]  ;;  %s10788_s25 = smov 60  }
 0x1b2   : > { %v1327_v45 = vpop.permute.xlu1 %1326  ;;  %v2975_v34 = vsel %vm11224_vm13, %v9991_v50, %v2974_v46  ;;  %v2244_v55 = vor.u32 %v2243_v26, %v12168_v5 }
 0x1b3   : > { %1477 = vst.msk [vmem:[#allocation2 + $0x40] sm:$0xf] %vm333_vm6, %v1327_v45  ;;  %v1333_v27 = vpop.permute.xlu0 %1332 }
 0x1b4   : > { %1484 = vst.msk [vmem:[#allocation2 + $0x4c] sm:$0xf] %vm333_vm6, %v1333_v27  ;;  %1394 = vrot.lane.b32.xlu1 %v1299_v7, %s10782_s26  ;;  %v2130_v7 = vld [vmem:[#allocation2 + $0x20] sm:$0x1]  ;;  %v2233_v27 = vrot.slane %v2231_v6, 5  ;;  %v2245_v1 = vrot.slane %v2244_v55, 4 }
 0x1b5   : > { %1388 = vrot.lane.b32.xlu0 %v1282_v43, %s10782_s26  ;;  %v2204_v43 = vshrl.u32 %v2125_v58, 16  ;;  %v2247_v46 = vshll.u32 %v2130_v7, 16 }
 0x1b6   : > { %v1684_v41 = vpop.permute.xlu1 %1683 }
 0x1b7   : > { %1807 = vst.msk [vmem:[#allocation3 + $0x6c] sm:$0xe] %vm1785_vm9, %v1684_v41  ;;  %v1678_v32 = vpop.permute.xlu0 %1677  ;;  %v2207_v41 = vshll.u32 %v2125_v58, 16  ;;  %v2870_v58 = vld [vmem:[#allocation2 + $0x28] sm:$0xf] }
 0x1b8   : > { %1804 = vst.msk [vmem:[#allocation3 + $0x60] sm:$0xe] %vm1785_vm9, %v1678_v32  ;;  %1386 = vrot.lane.b32.xlu1 %v11896_v42, %s10782_s26  ;;  %v2985_v42 = vsel %vm11224_vm13, %v2983_v3, %v2984_v15  ;;  %v1492_v3 = vld [vmem:[#allocation2 + $0x5c] sm:$0x1]  ;;  %v2206_v15 = vrot.slane %v2204_v43, 4 }
 0x1b9   : > { %1392 = vrot.lane.b32.xlu0 %v11889_v56, %s10782_s26  ;;  %v2126_v56 = vld [vmem:[#allocation2 + $0x10] sm:$0xf]  ;;  %v10008_v37 = vcombine.low %v2982_v0, %v2985_v42  ;;  %v2209_v52 = vrot.slane %v2207_v41, 5  ;;  %v2873_v42 = vld [vmem:[#allocation2 + $0x34] sm:$0xf]  ;;  %s10789_s26 = smov 80  }
 0x1ba   : > { %v1343_v44 = vpop.permute.xlu1 %1342  ;;  %v12149_v57 = vld [vmem:[#allocation2 + $0x3c] sm:$0xff]   ;;  %v2213_v49 = vshll.u32 %v2126_v56, 16  ;;  %v2217_v25 = vshrl.u32 %v2126_v56, 16  ;;  %v2995_v50 = vrot.slane %v2873_v42, 5  ;;  %v2871_v41 = vld [vmem:[#allocation2 + $0x2c] sm:$0x1] }
 0x1bb   : > { %v1496_v59 = vsel %vm10959_vm10, %v1343_v44, %v1495_v30  ;;  %v1686_v40 = vpop.permute.xlu0 %1685  ;;  %v12155_v39 = vld [vmem:[#allocation2 + $0x48] sm:$0xff]   ;;  %1971 = vst.msk [vmem:[#allocation5 + $0x28] sm:$0xff] %vm16218_vm8, %v12149_v57  ;;  %v2234_v30 = vor.u32 %v2233_v27, %v2230_v20  ;;  %v2210_v6 = vor.u32 %v2209_v52, %v2206_v15  ;;  %v2988_v20 = vrot.slane %v2870_v58, 5 }
 0x1bc   : > { %1497 = vst [vmem:[#allocation2 + $0x60] sm:$0xf] %v1496_v59  ;;  %1808 = vst.msk [vmem:[#allocation3 + $0x70] sm:$0xf] %vm333_vm6, %v1686_v40  ;;  %1989 = vrot.lane.b32.xlu1 %v12007_v33, %s16220_s27  ;;  %v12182_v22 = vrot.slane %v2213_v49, 5  ;;  %v2219_v53 = vrot.slane %v2217_v25, 4 }
 0x1bd   : > { %2057 = vrot.lane.b32.xlu0 %v12007_v33, %s10777_s28  ;;  %1972 = vst.msk [vmem:[#allocation5 + $0x30] sm:$0xff] %vm16218_vm8, %v12155_v39  ;;  %v2978_v33 = vsel %vm11224_vm13, %v2976_v23, %v2977_v63  ;;  %v2249_v23 = vrot.slane %v2247_v46, 5  ;;  %v2874_v49 = vld [vmem:[#allocation2 + $0x38] sm:$0x1]  ;;  %v2997_v7 = vrot.slane %v2995_v50, 4 }
 0x1be   : > { %v1680_v31 = vpop.permute.xlu1 %1679  ;;  %v10007_v45 = vcombine.low %v2975_v34, %v2978_v33  ;;  %v2220_v59 = vor.u32 %v2219_v53, %v12182_v22  ;;  %v2998_v27 = vrot.slane %v2874_v49, 5 }
 0x1bf   : > { %1805 = vst.msk [vmem:[#allocation3 + $0x64] sm:$0xf] %vm333_vm6, %v1680_v31  ;;  %v1337_v24 = vpop.permute.xlu0 %1336  ;;  %v2250_v10 = vsel %vm11233_vm2, %v2245_v1, %v2249_v23 }
 0x1c0   : > { %v1489_v12 = vsel %vm10959_vm10, %v1337_v24, %v1488_v16  ;;  %3205 = vrot.lane.b32.xlu1 %v10008_v37, %s16215_s21  ;;  %v2235_v16 = vrot.slane %v2234_v30, 4  ;;  %v2221_v31 = vrot.slane %v2220_v59, 4  ;;  %v2225_v24 = vrot.slane %v2223_v14, 5  ;;  %v2134_v59 = vld [vmem:[#allocation2 + $0x30] sm:$0xf] }
 0x1c1   : > { %1490 = vst [vmem:[#allocation2 + $0x54] sm:$0xf] %v1489_v12  ;;  %1987 = vrot.lane.b32.xlu0 %v12019_v38, %s16220_s27  ;;  %v1499_v38 = vld [vmem:[#allocation2 + $0x68] sm:$0x1]  ;;  %v2211_v12 = vrot.slane %v2210_v6, 4  ;;  %v2999_v46 = vsel %vm11224_vm13, %v2997_v7, %v2998_v27 }
 0x1c2   : > { %v1688_v61 = vpop.permute.xlu1 %1687  ;;  %v2226_v34 = vsel %vm11233_vm2, %v2221_v31, %v2225_v24  ;;  %v2132_v14 = vld [vmem:[#allocation2 + $0x28] sm:$0xf] }
 0x1c3   : > { %1809 = vst.msk [vmem:[#allocation3 + $0x74] sm:$0x1] %vm16219_vm1, %v1688_v61  ;;  %v1682_v21 = vpop.permute.xlu0 %1681  ;;  %v12184_v32 = vld [vmem:[#allocation3 + $0x6c] sm:$0xff]   ;;  %v2872_v61 = vld [vmem:[#allocation2 + $0x30] sm:$0xe]  ;;  %v2261_v58 = vshll.u32 %v2132_v14, 16 }
 0x1c4   : > { %1806 = vst.msk [vmem:[#allocation3 + $0x68] sm:$0x1] %vm16219_vm1, %v1682_v21  ;;  %3127 = vrot.lane.b32.xlu1 %v10007_v45, %s16214_s29  ;;  %v9994_v55 = vrot.slane %v2872_v61, 9  ;;  %v2265_v49 = vshrl.u32 %v2132_v14, 16 }
 0x1c5   : > { %3129 = vrot.lane.b32.xlu0 %v10008_v37, %s16214_s29  ;;  %3940 = vst.msk [vmem:[#allocation6 + $0x48] sm:$0xff] %vm16218_vm8, %v12184_v32 }
 0x1c6   : > { %v1347_v47 = vpop.permute.xlu1 %1346  ;;  %v12191_v9 = vld [vmem:[#allocation3 + $0x60] sm:$0xff]   ;;  %v2996_v15 = vsel %vm11224_vm13, %v9994_v55, %v2995_v50  ;;  %v2131_v50 = vld [vmem:[#allocation2 + $0x24] sm:$0xf] }
 0x1c7   : > { %v1500_v11 = vsel %vm10913_vm4, %v1347_v47, %v1499_v38  ;;  %v1341_v44 = vpop.permute.xlu0 %1340  ;;  %3939 = vst.msk [vmem:[#allocation6 + $0x40] sm:$0xff] %vm16218_vm8, %v12191_v9  ;;  %v2990_v47 = vrot.slane %v2988_v20, 4  ;;  %v12247_v1 = vcombine.low %v2996_v15, %v2999_v46  ;;  %v2255_v27 = vshll.u32 %v2131_v50, 16 }
 0x1c8   : > { %1501 = vst [vmem:[#allocation2 + $0x68] sm:$0x1] %v1500_v11  ;;  %v1493_v40 = vsel %vm10913_vm4, %v1341_v44, %v1492_v3  ;;  %1993 = vrot.lane.b32.xlu1 %v12087_v62, %s16220_s27  ;;  %v2991_v11 = vrot.slane %v2871_v41, 5  ;;  %v2267_v46 = vrot.slane %v2265_v49, 4 }
 0x1c9   : > { %1494 = vst [vmem:[#allocation2 + $0x5c] sm:$0x1] %v1493_v40  ;;  %3281 = vrot.lane.b32.xlu0 %v10008_v37, %s10785_s22  ;;  %v2240_v37 = vsel %vm11233_vm2, %v2235_v16, %v12168_v5  ;;  %v1509_v5 = vld [vmem:[#allocation2 + $0x78] sm:$0xf] }
 0x1ca   : > { %v1339_v56 = vpop.permute.xlu1 %1338  ;;  %v12213_v26 = vcombine.low %v2240_v37, %v2250_v10  ;;  %v2992_v42 = vsel %vm11224_vm13, %v2990_v47, %v2991_v11  ;;  %v2279_v10 = vshll.u32 %v2134_v59, 16 }
 0x1cb   : > { %1491 = vst.msk [vmem:[#allocation2 + $0x58] sm:$0xf] %vm333_vm6, %v1339_v56  ;;  %v1345_v0 = vpop.permute.xlu0 %1344 }
 0x1cc   : > { %1498 = vst.msk [vmem:[#allocation2 + $0x64] sm:$0xf] %vm333_vm6, %v1345_v0  ;;  %2059 = vrot.lane.b32.xlu1 %v12083_v19, %s10777_s28  ;;  %v2276_v0 = vshrl.u32 %v2134_v59, 16  ;;  %v2281_v7 = vrot.slane %v2279_v10, 5  ;;  %v1523_v10 = vld [vmem:[#allocation2 + $0x90] sm:$0xf] }
 0x1cd   : > { %3203 = vrot.lane.b32.xlu0 %v10007_v45, %s16215_s21  ;;  %v2216_v45 = vsel %vm11233_vm2, %v2211_v12, %v12182_v22  ;;  %v2135_v22 = vld [vmem:[#allocation2 + $0x34] sm:$0xf]  ;;  %v1513_v12 = vld [vmem:[#allocation2 + $0x80] sm:$0x1] }
 0x1ce   : > { %v1696_v33 = vpop.permute.xlu1 %1695  ;;  %v12226_v21 = vcombine.low %v2216_v45, %v2226_v34  ;;  %v2289_v23 = vshrl.u32 %v2135_v22, 16  ;;  %v1506_v34 = vld [vmem:[#allocation2 + $0x74] sm:$0x1]  ;;  %v2278_v61 = vrot.slane %v2276_v0, 4  ;;  %v2136_v45 = vld [vmem:[#allocation2 + $0x38] sm:$0x1] }
 0x1cf   : > { %1813 = vst.msk [vmem:[#allocation3 + $0x84] sm:$0xe] %vm1785_vm9, %v1696_v33  ;;  %v1690_v25 = vpop.permute.xlu0 %1689 }
 0x1d0   : > { %1810 = vst.msk [vmem:[#allocation3 + $0x78] sm:$0xe] %vm1785_vm9, %v1690_v25  ;;  %2705 = vrot.lane.b32.xlu1 %v12213_v26, %s16212_s23  ;;  %v2291_v33 = vrot.slane %v2289_v23, 4 }
 0x1d1   : > { %2061 = vrot.lane.b32.xlu0 %v12087_v62, %s10777_s28  ;;  %v2869_v62 = vld [vmem:[#allocation2 + $0x24] sm:$0xe] }
 0x1d2   : > { %v1355_v43 = vpop.permute.xlu1 %1354  ;;  %v12228_v53 = vld [vmem:[#allocation2 + $0x54] sm:$0xff]   ;;  %v9993_v52 = vrot.slane %v2869_v62, 9  ;;  %v2295_v62 = vshll.u32 %v2136_v45, 16 }
 0x1d3   : > { %v1510_v38 = vsel %vm10959_vm10, %v1355_v43, %v1509_v5  ;;  %v1698_v3 = vpop.permute.xlu0 %1697  ;;  %v12234_v30 = vld [vmem:[#allocation2 + $0x60] sm:$0xff]   ;;  %1973 = vst.msk [vmem:[#allocation5 + $0x38] sm:$0xff] %vm16218_vm8, %v12228_v53 }
 0x1d4   : > { %1511 = vst [vmem:[#allocation2 + $0x78] sm:$0xf] %v1510_v38  ;;  %1814 = vst.msk [vmem:[#allocation3 + $0x88] sm:$0xf] %vm333_vm6, %v1698_v3  ;;  %2613 = vrot.lane.b32.xlu1 %v12226_v21, %s10780_s16  ;;  %v2989_v16 = vsel %vm11224_vm13, %v9993_v52, %v2988_v20  ;;  %v2252_v20 = vshrl.u32 %v2131_v50, 16  ;;  %v2263_v3 = vrot.slane %v2261_v58, 5 }
 0x1d5   : > { %1991 = vrot.lane.b32.xlu0 %v12083_v19, %s16220_s27  ;;  %1974 = vst.msk [vmem:[#allocation5 + $0x40] sm:$0xff] %vm16218_vm8, %v12234_v30  ;;  %v2285_v19 = vshll.u32 %v2135_v22, 16  ;;  %v12260_v31 = vcombine.low %v2989_v16, %v2992_v42  ;;  %v2282_v22 = vor.u32 %v2281_v7, %v2278_v61  ;;  %v2257_v52 = vrot.slane %v2255_v27, 5  ;;  %v10680_v42 = vld [vmem:[%s16171_s3] sm:$0xff]   ;;  %v2878_v27 = vld [vmem:[#allocation2 + $0x48] sm:$0xe] }
 0x1d6   : > { %v1692_v44 = vpop.permute.xlu1 %1691  ;;  %v2268_v59 = vor.u32 %v2267_v46, %v2263_v3  ;;  %10474 = vmatprep.subr.bf16.mxu1 %v10680_v42  ;;  %v2880_v46 = vld [vmem:[#allocation2 + $0x50] sm:$0x1] }
 0x1d7   : > { %1811 = vst.msk [vmem:[#allocation3 + $0x7c] sm:$0xf] %vm333_vm6, %v1692_v44  ;;  %v1349_v40 = vpop.permute.xlu0 %1348  ;;  %v2287_v24 = vrot.slane %v2285_v19, 5  ;;  %v2254_v44 = vrot.slane %v2252_v20, 4  ;;  %v2283_v14 = vrot.slane %v2282_v22, 4  ;;  %10475 = vmatpush3.bf16.msra.mxu1 %v10680_v42  ;;  %v3012_v22 = vrot.slane %v2880_v46, 5 }
 0x1d8   : > { %v1503_v56 = vsel %vm10959_vm10, %v1349_v40, %v1502_v17  ;;  %3209 = vrot.lane.b32.xlu1 %v12247_v1, %s16215_s21  ;;  %v2133_v17 = vld [vmem:[#allocation2 + $0x2c] sm:$0x1]  ;;  %v2269_v0 = vrot.slane %v2268_v59, 4 }
 0x1d9   : > { %1504 = vst [vmem:[#allocation2 + $0x6c] sm:$0xf] %v1503_v56  ;;  %2615 = vrot.lane.b32.xlu0 %v12213_v26, %s10780_s16  ;;  %v2292_v38 = vor.u32 %v2291_v33, %v2287_v24  ;;  %v2271_v40 = vshll.u32 %v2133_v17, 16  ;;  %v2258_v16 = vor.u32 %v2257_v52, %v2254_v44  ;;  %v2288_v50 = vsel %vm11233_vm2, %v2283_v14, %v2287_v24  ;;  %v1516_v24 = vld [vmem:[#allocation2 + $0x84] sm:$0xf] }
 0x1da   : > { %v1700_v6 = vpop.permute.xlu1 %1699 }
 0x1db   : > { %1815 = vst.msk [vmem:[#allocation3 + $0x8c] sm:$0x1] %vm16219_vm1, %v1700_v6  ;;  %v1694_v37 = vpop.permute.xlu0 %1693  ;;  %v12263_v25 = vld [vmem:[#allocation3 + $0x84] sm:$0xff]   ;;  %v2293_v11 = vrot.slane %v2292_v38, 4  ;;  %v2879_v6 = vld [vmem:[#allocation2 + $0x4c] sm:$0xf] }
 0x1dc   : > { %1812 = vst.msk [vmem:[#allocation3 + $0x80] sm:$0x1] %vm16219_vm1, %v1694_v37  ;;  %3131 = vrot.lane.b32.xlu1 %v12260_v31, %s16214_s29  ;;  %v2273_v58 = vrot.slane %v2271_v40, 5  ;;  %v2259_v61 = vrot.slane %v2258_v16, 4  ;;  %v3009_v20 = vrot.slane %v2879_v6, 5 }
 0x1dd   : > { %2795 = vrot.lane.b32.xlu0 %v12213_v26, %s10779_s14  ;;  %3942 = vst.msk [vmem:[#allocation6 + $0x58] sm:$0xff] %vm16218_vm8, %v12263_v25 }
 0x1de   : > { %v1359_v5 = vpop.permute.xlu1 %1358  ;;  %v12272_v43 = vld [vmem:[#allocation3 + $0x78] sm:$0xff]   ;;  %v2274_v7 = vsel %vm11233_vm2, %v2269_v0, %v2273_v58  ;;  %v2264_v45 = vsel %vm11233_vm2, %v2259_v61, %v2263_v3  ;;  %v3011_v3 = vrot.slane %v3009_v20, 4 }
 0x1df   : > { %v1514_v55 = vsel %vm10913_vm4, %v1359_v5, %v1513_v12  ;;  %v1353_v41 = vpop.permute.xlu0 %1352  ;;  %3941 = vst.msk [vmem:[#allocation6 + $0x50] sm:$0xff] %vm16218_vm8, %v12272_v43  ;;  %v12329_v38 = vcombine.low %v2264_v45, %v2274_v7  ;;  %v2138_v7 = vld [vmem:[#allocation2 + $0x40] sm:$0xf] }
 0x1e0   : > { %1515 = vst [vmem:[#allocation2 + $0x80] sm:$0x1] %v1514_v55  ;;  %v1507_v26 = vsel %vm10913_vm4, %v1353_v41, %v1506_v34  ;;  %3283 = vrot.lane.b32.xlu1 %v12260_v31, %s10785_s22  ;;  %v10681_v55 = vld [vmem:[%s16171_s3 + $0x8] sm:$0xff]   ;;  %v3013_v59 = vsel %vm11224_vm13, %v3011_v3, %v3012_v22  ;;  %v2313_v3 = vshrl.u32 %v2138_v7, 16 }
 0x1e1   : > { %1508 = vst [vmem:[#allocation2 + $0x74] sm:$0x1] %v1507_v26  ;;  %2703 = vrot.lane.b32.xlu0 %v12226_v21, %s16212_s23  ;;  %v2297_v21 = vrot.slane %v2295_v62, 5  ;;  %10476 = vmatprep.subr.bf16.mxu1 %v10681_v55 }
 0x1e2   : > { %v1351_v47 = vpop.permute.xlu1 %1350  ;;  %10477 = vmatpush3.bf16.msra.mxu1 %v10681_v55 }
 0x1e3   : > { %1505 = vst.msk [vmem:[#allocation2 + $0x70] sm:$0xf] %vm333_vm6, %v1351_v47  ;;  %v1357_v15 = vpop.permute.xlu0 %1356  ;;  %v2298_v56 = vsel %vm11233_vm2, %v2293_v11, %v2297_v21  ;;  %v2877_v11 = vld [vmem:[#allocation2 + $0x44] sm:$0x1]  ;;  %v2875_v21 = vld [vmem:[#allocation2 + $0x3c] sm:$0xe] }
 0x1e4   : > { %1512 = vst.msk [vmem:[#allocation2 + $0x7c] sm:$0xf] %vm333_vm6, %v1357_v15  ;;  %1997 = vrot.lane.b32.xlu1 %v12155_v39, %s16220_s27  ;;  %v12303_v33 = vcombine.low %v2288_v50, %v2298_v56  ;;  %v9996_v15 = vrot.slane %v2878_v27, 9  ;;  %v3005_v56 = vrot.slane %v2877_v11, 5 }
 0x1e5   : > { %3133 = vrot.lane.b32.xlu0 %v12247_v1, %s16214_s29 }
 0x1e6   : > { %v1708_v19 = vpop.permute.xlu1 %1707  ;;  %v3010_v14 = vsel %vm11224_vm13, %v9996_v15, %v3009_v20 }
 0x1e7   : > { %1819 = vst.msk [vmem:[#allocation3 + $0x9c] sm:$0xe] %vm1785_vm9, %v1708_v19  ;;  %v1702_v23 = vpop.permute.xlu0 %1701  ;;  %v2141_v19 = vld [vmem:[#allocation2 + $0x4c] sm:$0xf]  ;;  %v12358_v0 = vcombine.low %v3010_v14, %v3013_v59 }
 0x1e8   : > { %1816 = vst.msk [vmem:[#allocation3 + $0x90] sm:$0xe] %vm1785_vm9, %v1702_v23  ;;  %2063 = vrot.lane.b32.xlu1 %v12149_v57, %s10777_s28  ;;  %v1520_v23 = vld [vmem:[#allocation2 + $0x8c] sm:$0x1] }
 0x1e9   : > { %3285 = vrot.lane.b32.xlu0 %v12247_v1, %s10785_s22  ;;  %v12316_v1 = vld [vmem:[#allocation2 + $0x40] sm:$0xf] }
 0x1ea   : > { %v1367_v37 = vpop.permute.xlu1 %1366  ;;  %v12305_v49 = vld [vmem:[#allocation2 + $0x6c] sm:$0xff]   ;;  %v3002_v62 = vrot.slane %v12316_v1, 5 }
 0x1eb   : > { %v1524_v12 = vsel %vm10959_vm10, %v1367_v37, %v1523_v10  ;;  %v1710_v34 = vpop.permute.xlu0 %1709  ;;  %v12311_v5 = vld [vmem:[#allocation2 + $0x78] sm:$0xff]   ;;  %1975 = vst.msk [vmem:[#allocation5 + $0x48] sm:$0xff] %vm16218_vm8, %v12305_v49  ;;  %v9995_v10 = vrot.slane %v2875_v21, 9  ;;  %v2140_v37 = vld [vmem:[#allocation2 + $0x48] sm:$0xf]  ;;  %v2315_v21 = vrot.slane %v2313_v3, 4 }
 0x1ec   : > { %1525 = vst [vmem:[#allocation2 + $0x90] sm:$0xf] %v1524_v12  ;;  %1820 = vst.msk [vmem:[#allocation3 + $0xa0] sm:$0xf] %vm333_vm6, %v1710_v34  ;;  %2709 = vrot.lane.b32.xlu1 %v12303_v33, %s16212_s23  ;;  %v3004_v40 = vrot.slane %v3002_v62, 4  ;;  %v2333_v12 = vshll.u32 %v2141_v19, 16 }
 0x1ed   : > { %3207 = vrot.lane.b32.xlu0 %v12260_v31, %s16215_s21  ;;  %1976 = vst.msk [vmem:[#allocation5 + $0x50] sm:$0xff] %vm16218_vm8, %v12311_v5  ;;  %v10682_v31 = vld [vmem:[%s16171_s3 + $0x10] ss:$0 sps:$4 sm:$0x33]   ;;  %v2337_v34 = vshrl.u32 %v2141_v19, 16  ;;  %v3003_v20 = vsel %vm11224_vm13, %v9995_v10, %v3002_v62  ;;  %v2324_v45 = vshrl.u32 %v2140_v37, 16 }
 0x1ee   : > { %v1704_v41 = vpop.permute.xlu1 %1703  ;;  %10593 = vmatprep.subr.msk.bf16.mxu1 %vm701_vm0, %v10682_v31  ;;  %v3439_v44 = vsel %vm701_vm0, %v10682_v31, 0  ;;  %v2327_v27 = vshll.u32 %v2140_v37, 16  ;;  %v2137_v31 = vld [vmem:[#allocation2 + $0x3c] sm:$0xf]  ;;  %s10787_s23 = smov 40  }
 0x1ef   : > { %1817 = vst.msk [vmem:[#allocation3 + $0x94] sm:$0xf] %vm333_vm6, %v1704_v41  ;;  %v1361_v26 = vpop.permute.xlu0 %1360  ;;  %10479 = vmatpush3.bf16.msra.mxu1 %v3439_v44  ;;  %v2335_v41 = vrot.slane %v2333_v12, 5  ;;  %v2339_v46 = vrot.slane %v2337_v34, 4  ;;  %v2326_v22 = vrot.slane %v2324_v45, 4  ;;  %v2300_v15 = vshrl.u32 %v2137_v31, 16 }
 0x1f0   : > { %v1517_v47 = vsel %vm10959_vm10, %v1361_v26, %v1516_v24  ;;  %2617 = vrot.lane.b32.xlu1 %v12329_v38, %s10780_s16  ;;  %v2309_v26 = vshll.u32 %v2138_v7, 16 }
 0x1f1   : > { %1518 = vst [vmem:[#allocation2 + $0x84] sm:$0xf] %v1517_v47  ;;  %2065 = vrot.lane.b32.xlu0 %v12155_v39, %s10777_s28  ;;  %v1527_v39 = vld [vmem:[#allocation2 + $0x98] sm:$0x1]  ;;  %v2142_v47 = vld [vmem:[#allocation2 + $0x50] sm:$0x1]  ;;  %v2340_v44 = vor.u32 %v2339_v46, %v2335_v41 }
 0x1f2   : > { %v1712_v17 = vpop.permute.xlu1 %1711  ;;  %v2311_v59 = vrot.slane %v2309_v26, 5  ;;  %v2302_v14 = vrot.slane %v2300_v15, 4  ;;  %v2885_v46 = vld [vmem:[#allocation2 + $0x64] sm:$0xf] }
 0x1f3   : > { %1821 = vst.msk [vmem:[#allocation3 + $0xa4] sm:$0x1] %vm16219_vm1, %v1712_v17  ;;  %v1706_v52 = vpop.permute.xlu0 %1705  ;;  %v12347_v42 = vld [vmem:[#allocation3 + $0x9c] sm:$0xff]   ;;  %v2329_v17 = vrot.slane %v2327_v27, 5  ;;  %v3023_v15 = vrot.slane %v2885_v46, 5 }
 0x1f4   : > { %1818 = vst.msk [vmem:[#allocation3 + $0x98] sm:$0x1] %vm16219_vm1, %v1706_v52  ;;  %2797 = vrot.lane.b32.xlu1 %v12329_v38, %s10779_s14  ;;  %v2303_v52 = vshll.u32 %v2137_v31, 16 }
 0x1f5   : > { %1995 = vrot.lane.b32.xlu0 %v12149_v57, %s16220_s27  ;;  %3944 = vst.msk [vmem:[#allocation6 + $0x68] sm:$0xff] %vm16218_vm8, %v12347_v42  ;;  %v3006_v57 = vsel %vm11224_vm13, %v3004_v40, %v3005_v56  ;;  %v1537_v40 = vld [vmem:[#allocation2 + $0xa8] sm:$0xf]  ;;  %v2330_v19 = vor.u32 %v2329_v17, %v2326_v22 }
 0x1f6   : > { %v1371_v16 = vpop.permute.xlu1 %1370  ;;  %v12360_v6 = vld [vmem:[#allocation3 + $0x90] sm:$0xff]   ;;  %v12376_v24 = vcombine.low %v3003_v20, %v3006_v57  ;;  %v2316_v57 = vor.u32 %v2315_v21, %v2311_v59 }
 0x1f7   : > { %v1528_v50 = vsel %vm10913_vm4, %v1371_v16, %v1527_v39  ;;  %v1365_v58 = vpop.permute.xlu0 %1364  ;;  %3943 = vst.msk [vmem:[#allocation6 + $0x60] sm:$0xff] %vm16218_vm8, %v12360_v6  ;;  %v2331_v20 = vrot.slane %v2330_v19, 4 }
 0x1f8   : > { %1529 = vst [vmem:[#allocation2 + $0x98] sm:$0x1] %v1528_v50  ;;  %v1521_v61 = vsel %vm10913_vm4, %v1365_v58, %v1520_v23  ;;  %3213 = vrot.lane.b32.xlu1 %v12358_v0, %s16215_s21  ;;  %v2139_v23 = vld [vmem:[#allocation2 + $0x44] sm:$0x1]  ;;  %v2341_v50 = vrot.slane %v2340_v44, 4  ;;  %v2305_v58 = vrot.slane %v2303_v52, 5 }
 0x1f9   : > { %1522 = vst [vmem:[#allocation2 + $0x8c] sm:$0x1] %v1521_v61  ;;  %2619 = vrot.lane.b32.xlu0 %v12303_v33, %s10780_s16  ;;  %v2319_v34 = vshll.u32 %v2139_v23, 16  ;;  %v2317_v27 = vrot.slane %v2316_v57, 4  ;;  %v2336_v31 = vsel %vm11233_vm2, %v2331_v20, %v2335_v41  ;;  %v2882_v41 = vld [vmem:[#allocation2 + $0x58] sm:$0xf] }
 0x1fa   : > { %v1363_v1 = vpop.permute.xlu1 %1362  ;;  %v2306_v45 = vor.u32 %v2305_v58, %v2302_v14  ;;  %v1534_v44 = vld [vmem:[#allocation2 + $0xa4] sm:$0x1]  ;;  %v3025_v14 = vrot.slane %v3023_v15, 4  ;;  %v2883_v58 = vld [vmem:[#allocation2 + $0x5c] sm:$0x1] }
 0x1fb   : > { %1519 = vst.msk [vmem:[#allocation2 + $0x88] sm:$0xf] %vm333_vm6, %v1363_v1  ;;  %v1369_v55 = vpop.permute.xlu0 %1368  ;;  %v2321_v26 = vrot.slane %v2319_v34, 5  ;;  %v3019_v20 = vrot.slane %v2883_v58, 5  ;;  %v2148_v58 = vld [vmem:[#allocation2 + $0x68] sm:$0x1] }
 0x1fc   : > { %1526 = vst.msk [vmem:[#allocation2 + $0x94] sm:$0xf] %vm333_vm6, %v1369_v55  ;;  %3135 = vrot.lane.b32.xlu1 %v12376_v24, %s16214_s29  ;;  %v2307_v22 = vrot.slane %v2306_v45, 4 }
 0x1fd   : > { %2799 = vrot.lane.b32.xlu0 %v12303_v33, %s10779_s14  ;;  %v2343_v33 = vshll.u32 %v2142_v47, 16  ;;  %v2322_v17 = vsel %vm11233_vm2, %v2317_v27, %v2321_v26  ;;  %v2146_v27 = vld [vmem:[#allocation2 + $0x60] sm:$0xf] }
 0x1fe   : > { %v1720_v62 = vpop.permute.xlu1 %1719  ;;  %v2312_v52 = vsel %vm11233_vm2, %v2307_v22, %v2311_v59  ;;  %v2884_v59 = vld [vmem:[#allocation2 + $0x60] sm:$0xe] }
 0x1ff   : > { %1825 = vst.msk [vmem:[#allocation3 + $0xb4] sm:$0xe] %vm1785_vm9, %v1720_v62  ;;  %v1714_v11 = vpop.permute.xlu0 %1713  ;;  %v2345_v12 = vrot.slane %v2343_v33, 5  ;;  %v2886_v33 = vld [vmem:[#allocation2 + $0x68] sm:$0x1] }
 0x200   : > { %1822 = vst.msk [vmem:[#allocation3 + $0xa8] sm:$0xe] %vm1785_vm9, %v1714_v11  ;;  %3287 = vrot.lane.b32.xlu1 %v12376_v24, %s10785_s22 }
 0x201   : > { %2707 = vrot.lane.b32.xlu0 %v12329_v38, %s16272_s17  ;;  %v1530_v38 = vld [vmem:[#allocation2 + $0x9c] sm:$0xf]  ;;  %v2346_v1 = vsel %vm11233_vm2, %v2341_v50, %v2345_v12 }
 0x202   : > { %v1379_v39 = vpop.permute.xlu1 %1378  ;;  %v12390_v56 = vld [vmem:[#allocation2 + $0x84] sm:$0xff]   ;;  %v12416_v62 = vcombine.low %v2336_v31, %v2346_v1 }
 0x203   : > { %v1538_v16 = vsel %vm10959_vm10, %v1379_v39, %v1537_v40  ;;  %v1722_v10 = vpop.permute.xlu0 %1721  ;;  %v12394_v37 = vld [vmem:[#allocation2 + $0x90] sm:$0xff]   ;;  %1977 = vst.msk [vmem:[#allocation5 + $0x58] sm:$0xff] %vm16218_vm8, %v12390_v56  ;;  %v12432_v40 = vcombine.low %v2312_v52, %v2322_v17  ;;  %v2372_v17 = vshrl.u32 %v2146_v27, 16 }
 0x204   : > { %1539 = vst [vmem:[#allocation2 + $0xa8] sm:$0xf] %v1538_v16  ;;  %1826 = vst.msk [vmem:[#allocation3 + $0xb8] sm:$0xf] %vm333_vm6, %v1722_v10  ;;  %2001 = vrot.lane.b32.xlu1 %v12234_v30, %s16220_s27  ;;  %v3016_v16 = vrot.slane %v2882_v41, 5  ;;  %v3026_v10 = vrot.slane %v2886_v33, 5 }
 0x205   : > { %3137 = vrot.lane.b32.xlu0 %v12358_v0, %s16214_s29  ;;  %1978 = vst.msk [vmem:[#allocation5 + $0x60] sm:$0xff] %vm16218_vm8, %v12394_v37 }
 0x206   : > { %v1716_v61 = vpop.permute.xlu1 %1715  ;;  %v3027_v12 = vsel %vm11224_vm13, %v3025_v14, %v3026_v10  ;;  %v3018_v34 = vrot.slane %v3016_v16, 4  ;;  %v2374_v10 = vrot.slane %v2372_v17, 4 }
 0x207   : > { %1823 = vst.msk [vmem:[#allocation3 + $0xac] sm:$0xf] %vm333_vm6, %v1716_v61  ;;  %v1373_v7 = vpop.permute.xlu0 %1372  ;;  %v2881_v61 = vld [vmem:[#allocation2 + $0x54] sm:$0xe] }
 0x208   : > { %v1531_v55 = vsel %vm10959_vm10, %v1373_v7, %v1530_v38  ;;  %2067 = vrot.lane.b32.xlu1 %v12228_v53, %s10777_s28  ;;  %v9998_v38 = vrot.slane %v2884_v59, 9  ;;  %v2147_v7 = vld [vmem:[#allocation2 + $0x64] sm:$0xf]  ;;  %v9997_v46 = vrot.slane %v2881_v61, 9  ;;  %v3020_v31 = vsel %vm11224_vm13, %v3018_v34, %v3019_v20 }
 0x209   : > { %1532 = vst [vmem:[#allocation2 + $0x9c] sm:$0xf] %v1531_v55  ;;  %3289 = vrot.lane.b32.xlu0 %v12358_v0, %s10785_s22  ;;  %v1541_v0 = vld [vmem:[#allocation2 + $0xb0] sm:$0x1]  ;;  %v2381_v26 = vshll.u32 %v2147_v7, 16 }
 0x20a   : > { %v1724_v3 = vpop.permute.xlu1 %1723  ;;  %v3017_v22 = vsel %vm11224_vm13, %v9997_v46, %v3016_v16  ;;  %v1544_v16 = vld [vmem:[#allocation2 + $0xb4] sm:$0xf] }
 0x20b   : > { %1827 = vst.msk [vmem:[#allocation3 + $0xbc] sm:$0x1] %vm16219_vm1, %v1724_v3  ;;  %v1718_v47 = vpop.permute.xlu0 %1717  ;;  %v12421_v11 = vld [vmem:[#allocation3 + $0xb4] sm:$0xff]   ;;  %v2385_v3 = vshrl.u32 %v2147_v7, 16  ;;  %v12468_v41 = vcombine.low %v3017_v22, %v3020_v31 }
 0x20c   : > { %1824 = vst.msk [vmem:[#allocation3 + $0xb0] sm:$0x1] %vm16219_vm1, %v1718_v47  ;;  %2713 = vrot.lane.b32.xlu1 %v12416_v62, %s16272_s17  ;;  %v2144_v47 = vld [vmem:[#allocation2 + $0x58] sm:$0xf] }
 0x20d   : > { %3211 = vrot.lane.b32.xlu0 %v12376_v24, %s16215_s21  ;;  %3946 = vst.msk [vmem:[#allocation6 + $0x78] sm:$0xff] %vm16218_vm8, %v12421_v11  ;;  %v2357_v52 = vshll.u32 %v2144_v47, 16  ;;  %v2387_v14 = vrot.slane %v2385_v3, 4 }
 0x20e   : > { %v1383_v21 = vpop.permute.xlu1 %1382  ;;  %v12434_v39 = vld [vmem:[#allocation3 + $0xa8] sm:$0xff]  }
 0x20f   : > { %v1542_v19 = vsel %vm10913_vm4, %v1383_v21, %v1541_v0  ;;  %v1377_v23 = vpop.permute.xlu0 %1376  ;;  %3945 = vst.msk [vmem:[#allocation6 + $0x70] sm:$0xff] %vm16218_vm8, %v12434_v39  ;;  %v2359_v7 = vrot.slane %v2357_v52, 5 }
 0x210   : > { %1543 = vst [vmem:[#allocation2 + $0xb0] sm:$0x1] %v1542_v19  ;;  %v1535_v24 = vsel %vm10913_vm4, %v1377_v23, %v1534_v44  ;;  %2621 = vrot.lane.b32.xlu1 %v12432_v40, %s10780_s16  ;;  %v2143_v44 = vld [vmem:[#allocation2 + $0x54] sm:$0xf]  ;;  %v2383_v23 = vrot.slane %v2381_v26, 5 }
 0x211   : > { %1536 = vst [vmem:[#allocation2 + $0xa4] sm:$0x1] %v1535_v24  ;;  %2069 = vrot.lane.b32.xlu0 %v12234_v30, %s10777_s28  ;;  %v3024_v30 = vsel %vm11224_vm13, %v9998_v38, %v3023_v15  ;;  %v2375_v15 = vshll.u32 %v2146_v27, 16  ;;  %v2361_v24 = vshrl.u32 %v2144_v47, 16  ;;  %v2348_v38 = vshrl.u32 %v2143_v44, 16 }
 0x212   : > { %v1375_v50 = vpop.permute.xlu1 %1374  ;;  %v12456_v45 = vcombine.low %v3024_v30, %v3027_v12  ;;  %v2388_v34 = vor.u32 %v2387_v14, %v2383_v23  ;;  %v2351_v61 = vshll.u32 %v2143_v44, 16 }
 0x213   : > { %1533 = vst.msk [vmem:[#allocation2 + $0xa0] sm:$0xf] %vm333_vm6, %v1375_v50  ;;  %v1381_v57 = vpop.permute.xlu0 %1380  ;;  %v2363_v30 = vrot.slane %v2361_v24, 4  ;;  %v2350_v26 = vrot.slane %v2348_v38, 4  ;;  %v2891_v24 = vld [vmem:[#allocation2 + $0x7c] sm:$0xf] }
 0x214   : > { %1540 = vst.msk [vmem:[#allocation2 + $0xac] sm:$0xf] %vm333_vm6, %v1381_v57  ;;  %2801 = vrot.lane.b32.xlu1 %v12432_v40, %s10779_s14  ;;  %v2377_v57 = vrot.slane %v2375_v15, 5  ;;  %v2389_v31 = vrot.slane %v2388_v34, 4  ;;  %v2353_v3 = vrot.slane %v2351_v61, 5 }
 0x215   : > { %1999 = vrot.lane.b32.xlu0 %v12228_v53, %s16220_s27  ;;  %v1551_v53 = vld [vmem:[#allocation2 + $0xc0] sm:$0xf]  ;;  %v2364_v47 = vor.u32 %v2363_v30, %v2359_v7 }
 0x216   : > { %v1732_v1 = vpop.permute.xlu1 %1731  ;;  %v2378_v27 = vor.u32 %v2377_v57, %v2374_v10  ;;  %v2892_v30 = vld [vmem:[#allocation2 + $0x80] sm:$0x1] }
 0x217   : > { %1831 = vst.msk [vmem:[#allocation3 + $0xcc] sm:$0xe] %vm1785_vm9, %v1732_v1  ;;  %v1726_v55 = vpop.permute.xlu0 %1725 }
 0x218   : > { %1828 = vst.msk [vmem:[#allocation3 + $0xc0] sm:$0xe] %vm1785_vm9, %v1726_v55  ;;  %3217 = vrot.lane.b32.xlu1 %v12456_v45, %s16215_s21  ;;  %v2145_v55 = vld [vmem:[#allocation2 + $0x5c] sm:$0x1]  ;;  %v2379_v15 = vrot.slane %v2378_v27, 4  ;;  %vm3389_vm9 = vcmask 293888  }
 0x219   : > { %2623 = vrot.lane.b32.xlu0 %v12416_v62, %s10780_s16  ;;  %v2367_v22 = vshll.u32 %v2145_v55, 16  ;;  %v2890_v27 = vld [vmem:[#allocation2 + $0x78] sm:$0xe] }
 0x21a   : > { %v1391_v0 = vpop.permute.xlu1 %1390  ;;  %v12470_v21 = vld [vmem:[#allocation2 + $0x9c] sm:$0xff]  }
 0x21b   : > { %v1552_v33 = vsel %vm10959_vm10, %v1391_v0, %v1551_v53  ;;  %v1734_v19 = vpop.permute.xlu0 %1733  ;;  %v12474_v59 = vld [vmem:[#allocation2 + $0xa8] sm:$0xff]   ;;  %1979 = vst.msk [vmem:[#allocation5 + $0x68] sm:$0xff] %vm16218_vm8, %v12470_v21  ;;  %v2369_v10 = vrot.slane %v2367_v22, 5 }
 0x21c   : > { %1553 = vst [vmem:[#allocation2 + $0xc0] sm:$0xf] %v1552_v33  ;;  %1832 = vst.msk [vmem:[#allocation3 + $0xd0] sm:$0xf] %vm333_vm6, %v1734_v19  ;;  %3139 = vrot.lane.b32.xlu1 %v12468_v41, %s16214_s29  ;;  %v2354_v33 = vor.u32 %v2353_v3, %v2350_v26  ;;  %v2365_v19 = vrot.slane %v2364_v47, 4  ;;  %v10000_v26 = vrot.slane %v2890_v27, 9 }
 0x21d   : > { %2803 = vrot.lane.b32.xlu0 %v12416_v62, %s10779_s14  ;;  %1980 = vst.msk [vmem:[#allocation5 + $0x70] sm:$0xff] %vm16218_vm8, %v12474_v59  ;;  %v2391_v62 = vshll.u32 %v2148_v58, 16 }
 0x21e   : > { %v1728_v50 = vpop.permute.xlu1 %1727  ;;  %v2355_v2 = vrot.slane %v2354_v33, 4  ;;  %v2370_v38 = vsel %vm11233_vm2, %v2365_v19, %v2369_v10  ;;  %v2150_v19 = vld [vmem:[#allocation2 + $0x70] sm:$0xf] }
 0x21f   : > { %1829 = vst.msk [vmem:[#allocation3 + $0xc4] sm:$0xf] %vm333_vm6, %v1728_v50  ;;  %v1385_v12 = vpop.permute.xlu0 %1384  ;;  %v2393_v53 = vrot.slane %v2391_v62, 5 }
 0x220   : > { %v1545_v20 = vsel %vm10959_vm10, %v1385_v12, %v1544_v16  ;;  %3291 = vrot.lane.b32.xlu1 %v12468_v41, %s10785_s22  ;;  %v2384_v16 = vsel %vm11233_vm2, %v2379_v15, %v2383_v23  ;;  %v3037_v12 = vrot.slane %v2891_v24, 5  ;;  %v2360_v23 = vsel %vm11233_vm2, %v2355_v2, %v2359_v7  ;;  %v2889_v7 = vld [vmem:[#allocation2 + $0x74] sm:$0x1] }
 0x221   : > { %1546 = vst [vmem:[#allocation2 + $0xb4] sm:$0xf] %v1545_v20  ;;  %2711 = vrot.lane.b32.xlu0 %v12432_v40, %s16272_s17  ;;  %v1548_v40 = vld [vmem:[#allocation2 + $0xbc] sm:$0x1]  ;;  %v2394_v52 = vsel %vm11233_vm2, %v2389_v31, %v2393_v53  ;;  %v12522_v61 = vcombine.low %v2360_v23, %v2370_v38  ;;  %vm2659_vm10 = vcmask 64544   ;;  %v3033_v53 = vrot.slane %v2889_v7, 5 }
 0x222   : > { %v1736_v1 = vpop.permute.xlu1 %1735  ;;  %v12510_v58 = vcombine.low %v2384_v16, %v2394_v52  ;;  %v3039_v62 = vrot.slane %v3037_v12, 4  ;;  %v2152_v52 = vld [vmem:[#allocation2 + $0x78] sm:$0xf]  ;;  %v2409_v23 = vshrl.u32 %v2150_v19, 16 }
 0x223   : > { %1833 = vst.msk [vmem:[#allocation3 + $0xd4] sm:$0x1] %vm16219_vm1, %v1736_v1  ;;  %v1730_v46 = vpop.permute.xlu0 %1729  ;;  %v2420_v10 = vshrl.u32 %v2152_v52, 16 }
 0x224   : > { %1830 = vst.msk [vmem:[#allocation3 + $0xc8] sm:$0x1] %vm16219_vm1, %v1730_v46  ;;  %2005 = vrot.lane.b32.xlu1 %v12311_v5, %s16220_s27  ;;  %vm7520_vm1 = vcmask 818176  }
 0x225   : > { %3141 = vrot.lane.b32.xlu0 %v12456_v45, %s16214_s29 }
 0x226   : > { %v1395_v17 = vpop.permute.xlu1 %1394 }
 0x227   : > { %v1556_v0 = vsel %vm10913_vm4, %v1395_v17, %v1555_v54  ;;  %v1389_v44 = vpop.permute.xlu0 %1388  ;;  %v2153_v54 = vld [vmem:[#allocation2 + $0x7c] sm:$0xf] }
 0x228   : > { %1557 = vst [vmem:[#allocation2 + $0xc8] sm:$0x1] %v1556_v0  ;;  %v1549_v14 = vsel %vm10913_vm4, %v1389_v44, %v1548_v40  ;;  %2071 = vrot.lane.b32.xlu1 %v12305_v49, %s10777_s28  ;;  %vm2035_vm4 = vcmask 130144   ;;  %v3038_v40 = vsel %vm11224_vm13, %v10000_v26, %v3037_v12  ;;  %v2429_v33 = vshll.u32 %v2153_v54, 16  ;;  %v2149_v12 = vld [vmem:[#allocation2 + $0x6c] sm:$0xf] }
 0x229   : > { %1550 = vst [vmem:[#allocation2 + $0xbc] sm:$0x1] %v1549_v14  ;;  %3293 = vrot.lane.b32.xlu0 %v12456_v45, %s10785_s22  ;;  %v2888_v45 = vld [vmem:[#allocation2 + $0x70] sm:$0xf]  ;;  %v12557_v14 = vld [vmem:[#allocation3 + $0xc] sm:$0xff]   ;;  %v2399_v7 = vshll.u32 %v2149_v12, 16 }
 0x22a   : > { %v1387_v50 = vpop.permute.xlu1 %1386  ;;  %v3030_v1 = vrot.slane %v2888_v45, 5  ;;  %3932 = vst.msk [vmem:[#allocation6 + $0x8] sm:$0xff] %vm16218_vm8, %v12557_v14  ;;  %v2431_v2 = vrot.slane %v2429_v33, 5  ;;  %v2405_v45 = vshll.u32 %v2150_v19, 16  ;;  %v2411_v26 = vrot.slane %v2409_v23, 4 }
 0x22b   : > { %1547 = vst.msk [vmem:[#allocation2 + $0xb8] sm:$0xf] %vm333_vm6, %v1387_v50  ;;  %v1393_v57 = vpop.permute.xlu0 %1392  ;;  %v2423_v50 = vshll.u32 %v2152_v52, 16 }
 0x22c   : > { %1554 = vst.msk [vmem:[#allocation2 + $0xc4] sm:$0xf] %vm333_vm6, %v1393_v57  ;;  %2717 = vrot.lane.b32.xlu1 %v12510_v58, %s16272_s17  ;;  %v3032_v47 = vrot.slane %v3030_v1, 4 }
 0x22d   : > { %3215 = vrot.lane.b32.xlu0 %v12468_v41, %s16215_s21  ;;  %v3040_v41 = vrot.slane %v2892_v30, 5  ;;  %v2154_v30 = vld [vmem:[#allocation2 + $0x80] sm:$0x1] }
 0x22e   : > { %v1990_v34 = vpop.permute.xlu1 %1989  ;;  %v3034_v44 = vsel %vm11224_vm13, %v3032_v47, %v3033_v53 }
 0x22f   : > { %2037 = vst.msk [vmem:[#allocation5 + $0x8] sm:$0xff] %vm2035_vm4, %v1990_v34  ;;  %v2058_v20 = vpop.permute.xlu0 %2057  ;;  %v3041_v3 = vsel %vm11224_vm13, %v3039_v62, %v3040_v41  ;;  %v2425_v62 = vrot.slane %v2423_v50, 5  ;;  %v2897_v50 = vld [vmem:[#allocation2 + $0x94] sm:$0xf] }
 0x230   : > { %2625 = vrot.lane.b32.xlu1 %v12522_v61, %s10780_s16  ;;  %v12547_v17 = vcombine.low %v3038_v40, %v3041_v3  ;;  %v2439_v3 = vshll.u32 %v2154_v30, 16 }
 0x231   : > { %2073 = vrot.lane.b32.xlu0 %v12311_v5, %s10777_s28  ;;  %v2887_v5 = vld [vmem:[#allocation2 + $0x6c] sm:$0xe] }
 0x232   : > { %v12529_v55 = vpop.permute.xlu1 %3205  ;;  %v12531_v46 = vld [vmem:[#allocation2 + $0xb4] sm:$0xff]   ;;  %v9999_v0 = vrot.slane %v2887_v5, 9  ;;  %v2441_v52 = vrot.slane %v2439_v3, 5 }
 0x233   : > { %v1988_v31 = vpop.permute.xlu0 %1987  ;;  %1981 = vst.msk [vmem:[#allocation5 + $0x78] sm:$0xff] %vm16218_vm8, %v12531_v46  ;;  %v2151_v5 = vld [vmem:[#allocation2 + $0x74] sm:$0x1] }
 0x234   : > { %2036 = vst.msk [vmem:[#allocation5] sm:$0xff] %vm2035_vm4, %v1988_v31  ;;  %2805 = vrot.lane.b32.xlu1 %v12522_v61, %s10779_s14  ;;  %v2407_v31 = vrot.slane %v2405_v45, 5  ;;  %v2415_v33 = vshll.u32 %v2151_v5, 16  ;;  %v2159_v5 = vld [vmem:[#allocation2 + $0x94] sm:$0xf] }
 0x235   : > { %2106 = vst.msk [vmem:[#allocation5] sm:$0xff] %vm2105_vm5, %v2058_v20  ;;  %2003 = vrot.lane.b32.xlu0 %v12305_v49, %s16220_s27  ;;  %v2433_v49 = vshrl.u32 %v2153_v54, 16  ;;  %v2422_v20 = vrot.slane %v2420_v10, 4 }
 0x236   : > { %v12545_v22 = vpop.permute.xlu1 %3127  ;;  %2660 = vst.msk [vmem:[#allocation5] sm:$0xff] %vm2659_vm10, %v11936_v51  ;;  %v3031_v51 = vsel %vm11224_vm13, %v9999_v0, %v3030_v1  ;;  %v2396_v1 = vshrl.u32 %v2149_v12, 16  ;;  %v2401_v0 = vrot.slane %v2399_v7, 5  ;;  %v2417_v12 = vrot.slane %v2415_v33, 5  ;;  %v2896_v7 = vld [vmem:[#allocation2 + $0x90] sm:$0xe] }
 0x237   : > { %v12551_v15 = vpop.permute.xlu0 %3129  ;;  %v10015_v16 = vcombine.low %v3031_v51, %v3034_v44  ;;  %v2435_v38 = vrot.slane %v2433_v49, 4  ;;  %v2426_v47 = vor.u32 %v2425_v62, %v2422_v20  ;;  %v2412_v44 = vor.u32 %v2411_v26, %v2407_v31  ;;  %v2898_v26 = vld [vmem:[#allocation2 + $0x98] sm:$0x1] }
 0x238   : > { %3221 = vrot.lane.b32.xlu1 %v12547_v17, %s16215_s21  ;;  %v2398_v53 = vrot.slane %v2396_v1, 4  ;;  %v3051_v62 = vrot.slane %v2897_v50, 5  ;;  %v2894_v1 = vld [vmem:[#allocation2 + $0x88] sm:$0xf] }
 0x239   : > { %2627 = vrot.lane.b32.xlu0 %v12510_v58, %s10780_s16  ;;  %v2436_v41 = vor.u32 %v2435_v38, %v2431_v2  ;;  %v2427_v19 = vrot.slane %v2426_v47, 4  ;;  %v2413_v10 = vrot.slane %v2412_v44, 4  ;;  %v3044_v47 = vrot.slane %v2894_v1, 5 }
 0x23a   : > { %v1994_v24 = vpop.permute.xlu1 %1993 }
 0x23b   : > { %2039 = vst.msk [vmem:[#allocation5 + $0x18] sm:$0xff] %vm2035_vm4, %v1994_v24  ;;  %v12566_v57 = vpop.permute.xlu0 %3281  ;;  %v2437_v40 = vrot.slane %v2436_v41, 4  ;;  %v2402_v24 = vor.u32 %v2401_v0, %v2398_v53  ;;  %v2432_v38 = vsel %vm11233_vm2, %v2427_v19, %v2431_v2  ;;  %v2418_v20 = vsel %vm11233_vm2, %v2413_v10, %v2417_v12  ;;  %v2895_v53 = vld [vmem:[#allocation2 + $0x8c] sm:$0x1]  ;;  %v2158_v0 = vld [vmem:[#allocation2 + $0x90] sm:$0xf] }
 0x23c   : > { %3143 = vrot.lane.b32.xlu1 %v10015_v16, %s16214_s29  ;;  %v3046_v33 = vrot.slane %v3044_v47, 4  ;;  %v2156_v19 = vld [vmem:[#allocation2 + $0x88] sm:$0xf]  ;;  %v2471_v12 = vshll.u32 %v2158_v0, 16 }
 0x23d   : > { %2807 = vrot.lane.b32.xlu0 %v12510_v58, %s10779_s14  ;;  %v2442_v51 = vsel %vm11233_vm2, %v2437_v40, %v2441_v52  ;;  %v2403_v30 = vrot.slane %v2402_v24, 4  ;;  %v2893_v40 = vld [vmem:[#allocation2 + $0x84] sm:$0xe]  ;;  %v2468_v24 = vshrl.u32 %v2158_v0, 16  ;;  %v16273_v0 = vmov 0  }
 0x23e   : > { %v2060_v34 = vpop.permute.xlu1 %2059  ;;  %v9982_v23 = vcombine.low %v2432_v38, %v2442_v51  ;;  %v3047_v51 = vrot.slane %v2895_v53, 5  ;;  %v10001_v38 = vrot.slane %v2893_v40, 9  ;;  %476 = vst.msk [vmem:[#allocation3 + $0x20] sm:$0x2] %vm475_vm11, %v16273_v0  ;;  %477 = vst.msk [vmem:[#allocation3 + $0x2c] sm:$0x2] %vm475_vm11, %v16273_v0 }
 0x23f   : > { %2107 = vst.msk [vmem:[#allocation5 + $0x8] sm:$0xff] %vm2105_vm5, %v2060_v34  ;;  %v12572_v27 = vpop.permute.xlu0 %3203 }
 0x240   : > { %3295 = vrot.lane.b32.xlu1 %v10015_v16, %s10785_s22  ;;  %478 = vst.msk [vmem:[#allocation3 + $0x38] sm:$0x2] %vm475_vm11, %v16273_v0  ;;  %479 = vst.msk [vmem:[#allocation3 + $0x44] sm:$0x2] %vm475_vm11, %v16273_v0 }
 0x241   : > { %2715 = vrot.lane.b32.xlu0 %v12522_v61, %s16272_s17  ;;  %480 = vst.msk [vmem:[#allocation3 + $0x50] sm:$0x2] %vm475_vm11, %v16273_v0  ;;  %481 = vst.msk [vmem:[#allocation3 + $0x5c] sm:$0x2] %vm475_vm11, %v16273_v0 }
 0x242   : > { %v2706_v58 = vpop.permute.xlu1 %2705  ;;  %482 = vst.msk [vmem:[#allocation3 + $0x68] sm:$0x2] %vm475_vm11, %v16273_v0  ;;  %483 = vst.msk [vmem:[#allocation3 + $0x74] sm:$0x2] %vm475_vm11, %v16273_v0 }
 0x243   : > { %v2062_v54 = vpop.permute.xlu0 %2061  ;;  %484 = vst.msk [vmem:[#allocation3 + $0x80] sm:$0x2] %vm475_vm11, %v16273_v0  ;;  %485 = vst.msk [vmem:[#allocation3 + $0x8c] sm:$0x2] %vm475_vm11, %v16273_v0 }
 0x244   : > { %2009 = vrot.lane.b32.xlu1 %v12394_v37, %s16220_s27  ;;  %486 = vst.msk [vmem:[#allocation3 + $0x98] sm:$0x2] %vm475_vm11, %v16273_v0  ;;  %487 = vst.msk [vmem:[#allocation3 + $0xa4] sm:$0x2] %vm475_vm11, %v16273_v0 }
 0x245   : > { %3145 = vrot.lane.b32.xlu0 %v12547_v17, %s16214_s29  ;;  %488 = vst.msk [vmem:[#allocation3 + $0xb0] sm:$0x2] %vm475_vm11, %v16273_v0  ;;  %489 = vst.msk [vmem:[#allocation3 + $0xbc] sm:$0x2] %vm475_vm11, %v16273_v0 }
 0x246   : > { %v2614_v49 = vpop.permute.xlu1 %2613  ;;  %490 = vst.msk [vmem:[#allocation3 + $0xc8] sm:$0x2] %vm475_vm11, %v16273_v0  ;;  %491 = vst.msk [vmem:[#allocation3 + $0xd4] sm:$0x2] %vm475_vm11, %v16273_v0  ;;  %vm446_vm11 = vcmask 25600  }
 0x247   : > { %2661 = vst.msk [vmem:[#allocation5 + $0x8] sm:$0xff] %vm2659_vm10, %v2614_v49  ;;  %v1992_v61 = vpop.permute.xlu0 %1991  ;;  %v2477_v49 = vshll.u32 %v2159_v5, 16 }
 0x248   : > { %2038 = vst.msk [vmem:[#allocation5 + $0x10] sm:$0xff] %vm2035_vm4, %v1992_v61  ;;  %2075 = vrot.lane.b32.xlu1 %v12390_v56, %s10777_s28  ;;  %v2481_v61 = vshrl.u32 %v2159_v5, 16  ;;  %v2473_v5 = vrot.slane %v2471_v12, 5 }
 0x249   : > { %2753 = vst.msk [vmem:[#allocation5 + $0x8] sm:$0xff] %vm2751_vm12, %v2706_v58  ;;  %3219 = vrot.lane.b32.xlu0 %v10015_v16, %s16215_s21  ;;  %v2408_v16 = vsel %vm11233_vm2, %v2403_v30, %v2407_v31  ;;  %v3053_v58 = vrot.slane %v3051_v62, 4  ;;  %v3054_v31 = vrot.slane %v2898_v26, 5 }
 0x24a   : > { %2108 = vst.msk [vmem:[#allocation5 + $0x10] sm:$0xff] %vm2105_vm5, %v2062_v54  ;;  %v12592_v45 = vpop.permute.xlu1 %3209  ;;  %v12604_v41 = vcombine.low %v2408_v16, %v2418_v20  ;;  %v3048_v20 = vsel %vm11224_vm13, %v3046_v33, %v3047_v51  ;;  %v2483_v1 = vrot.slane %v2481_v61, 4  ;;  %v2457_v16 = vshrl.u32 %v2156_v19, 16  ;;  %v2157_v33 = vld [vmem:[#allocation2 + $0x8c] sm:$0x1] }
 0x24b   : > { %v2616_v34 = vpop.permute.xlu0 %2615  ;;  %v3055_v52 = vsel %vm11224_vm13, %v3053_v58, %v3054_v31  ;;  %v2160_v58 = vld [vmem:[#allocation2 + $0x98] sm:$0x1]  ;;  %450 = vst.msk [vmem:[#allocation3 + $0x14] sm:$0x3] %vm446_vm11, %v16273_v0  ;;  %447 = vst.msk [vmem:[#allocation3 + $0x8] sm:$0x3] %vm446_vm11, %v16273_v0 }
 0x24c   : > { %2662 = vst.msk [vmem:[#allocation5 + $0x10] sm:$0xff] %vm2659_vm10, %v2616_v34  ;;  %2721 = vrot.lane.b32.xlu1 %v9982_v23, %s16272_s17  ;;  %v2453_v34 = vshll.u32 %v2156_v19, 16 }
 0x24d   : > { %2077 = vrot.lane.b32.xlu0 %v12394_v37, %s10777_s28  ;;  %v10002_v37 = vrot.slane %v2896_v7, 9  ;;  %v2470_v7 = vrot.slane %v2468_v24, 4  ;;  %454 = vst.msk [vmem:[#allocation3 + $0xe0] sm:$0x3] %vm446_vm11, %v16273_v0  ;;  %457 = vst.msk [vmem:[#allocation3 + $0xec] sm:$0x3] %vm446_vm11, %v16273_v0 }
 0x24e   : > { %v12602_v2 = vpop.permute.xlu1 %3131  ;;  %v12647_v53 = vrot.slane %v2453_v34, 5  ;;  %vm4139_vm11 = vcmask 523744  }
 0x24f   : > { %v2796_v3 = vpop.permute.xlu0 %2795 }
 0x250   : > { %2629 = vrot.lane.b32.xlu1 %v12604_v41, %s10780_s16 }
 0x251   : > { %2007 = vrot.lane.b32.xlu0 %v12390_v56, %s16220_s27  ;;  %v3052_v56 = vsel %vm11224_vm13, %v10002_v37, %v3051_v62  ;;  %v12632_v62 = vrot.slane %v2477_v49, 5 }
 0x252   : > { %v12610_v54 = vpop.permute.xlu1 %3283  ;;  %v12623_v50 = vcombine.low %v3052_v56, %v3055_v52  ;;  %v2474_v52 = vor.u32 %v2473_v5, %v2470_v7 }
 0x253   : > { %v2704_v44 = vpop.permute.xlu0 %2703 }
 0x254   : > { %2752 = vst.msk [vmem:[#allocation5] sm:$0xff] %vm2751_vm12, %v2704_v44  ;;  %2809 = vrot.lane.b32.xlu1 %v12604_v41, %s10779_s14  ;;  %v2475_v34 = vrot.slane %v2474_v52, 4  ;;  %v2904_v52 = vld [vmem:[#allocation2 + $0xb0] sm:$0x1] }
 0x255   : > { %2844 = vst.msk [vmem:[#allocation5] sm:$0xff] %vm2843_vm14, %v2796_v3  ;;  %2631 = vrot.lane.b32.xlu0 %v9982_v23, %s10780_s16 }
 0x256   : > { %3174 = vst.msk [vmem:[#allocation5] sm:$0xff] %vm3173_vm15, %v11921_v29  ;;  %v1998_v10 = vpop.permute.xlu1 %1997  ;;  %v2155_v29 = vld [vmem:[#allocation2 + $0x84] sm:$0xf] }
 0x257   : > { %3252 = vst.msk [vmem:[#allocation5] sm:$0xff] %vm16217_vm3, %v12572_v27  ;;  %v12628_v30 = vpop.permute.xlu0 %3133  ;;  %v3045_v27 = vsel %vm11224_vm13, %v10001_v38, %v3044_v47  ;;  %v2444_v37 = vshrl.u32 %v2155_v29, 16  ;;  %v2447_v40 = vshll.u32 %v2155_v29, 16  ;;  %v2487_v47 = vshll.u32 %v2160_v58, 16 }
 0x258   : > { %2041 = vst.msk [vmem:[#allocation5 + $0x28] sm:$0xff] %vm2035_vm4, %v1998_v10  ;;  %3225 = vrot.lane.b32.xlu1 %v12623_v50, %s16215_s21  ;;  %v12641_v3 = vcombine.low %v3045_v27, %v3048_v20  ;;  %v2463_v10 = vshll.u32 %v2157_v33, 16  ;;  %v2480_v27 = vsel %vm11233_vm2, %v2475_v34, %v12632_v62 }
 0x259   : > { %3330 = vst.msk [vmem:[#allocation5] sm:$0xff] %vm3329_vm7, %v12566_v57  ;;  %2811 = vrot.lane.b32.xlu0 %v9982_v23, %s10779_s14  ;;  %v2484_v57 = vor.u32 %v2483_v1, %v12632_v62  ;;  %v2459_v23 = vrot.slane %v2457_v16, 4  ;;  %v2446_v56 = vrot.slane %v2444_v37, 4  ;;  %v2449_v51 = vrot.slane %v2447_v40, 5  ;;  %v2903_v16 = vld [vmem:[#allocation2 + $0xac] sm:$0xf] }
 0x25a   : > { %v2064_v26 = vpop.permute.xlu1 %2063  ;;  %v2465_v7 = vrot.slane %v2463_v10, 5  ;;  %v3065_v40 = vrot.slane %v2903_v16, 5 }
 0x25b   : > { %2109 = vst.msk [vmem:[#allocation5 + $0x18] sm:$0xff] %vm2105_vm5, %v2064_v26  ;;  %v12644_v31 = vpop.permute.xlu0 %3285  ;;  %v2485_v19 = vrot.slane %v2484_v57, 4  ;;  %v2460_v24 = vor.u32 %v2459_v23, %v12647_v53  ;;  %v2450_v1 = vor.u32 %v2449_v51, %v2446_v56  ;;  %v2900_v23 = vld [vmem:[#allocation2 + $0xa0] sm:$0xf]  ;;  %v2901_v51 = vld [vmem:[#allocation2 + $0xa4] sm:$0x1] }
 0x25c   : > { %3147 = vrot.lane.b32.xlu1 %v12641_v3, %s16214_s29 }
 0x25d   : > { %2719 = vrot.lane.b32.xlu0 %v12604_v41, %s16272_s17  ;;  %v2489_v41 = vrot.slane %v2487_v47, 5  ;;  %v2461_v29 = vrot.slane %v2460_v24, 4  ;;  %v2451_v37 = vrot.slane %v2450_v1, 4  ;;  %v2164_v24 = vld [vmem:[#allocation2 + $0xa8] sm:$0xf] }
 0x25e   : > { %v2710_v44 = vpop.permute.xlu1 %2709  ;;  %v2516_v16 = vshrl.u32 %v2164_v24, 16 }
 0x25f   : > { %v12685_v49 = vpop.permute.xlu0 %3207  ;;  %v2490_v20 = vsel %vm11233_vm2, %v2485_v19, %v2489_v41  ;;  %v2466_v57 = vsel %vm11233_vm2, %v2461_v29, %v2465_v7  ;;  %v2456_v62 = vsel %vm11233_vm2, %v2451_v37, %v12647_v53  ;;  %v3068_v19 = vrot.slane %v2904_v52, 5  ;;  %v2161_v52 = vld [vmem:[#allocation2 + $0x9c] sm:$0xf] }
 0x260   : > { %v3346_v61 = vld [vmem:[#allocation5] sm:$0xff]  ;;  %2013 = vrot.lane.b32.xlu1 %v12474_v59, %s16220_s27  ;;  %v9984_v58 = vcombine.low %v2480_v27, %v2490_v20  ;;  %v9983_v47 = vcombine.low %v2456_v62, %v2466_v57  ;;  %v3061_v29 = vrot.slane %v2901_v51, 5  ;;  %v2492_v51 = vshrl.u32 %v2161_v52, 16 }
 0x261   : > { %10480 = vmatprep.mubr.msk.bf16.mxu1 %vm3389_vm9, %v3346_v61  ;;  %3149 = vrot.lane.b32.xlu0 %v12623_v50, %s16214_s29  ;;  %v3067_v61 = vrot.slane %v3065_v40, 4  ;;  %v2162_v20 = vld [vmem:[#allocation2 + $0xa0] sm:$0xf] }
 0x262   : > { %v2618_v38 = vpop.permute.xlu1 %2617  ;;  %v2501_v37 = vshll.u32 %v2162_v20, 16 }
 0x263   : > { %2663 = vst.msk [vmem:[#allocation5 + $0x18] sm:$0xff] %vm2659_vm10, %v2618_v38  ;;  %v2066_v12 = vpop.permute.xlu0 %2065  ;;  %v3069_v10 = vsel %vm11224_vm13, %v3067_v61, %v3068_v19  ;;  %v2518_v19 = vrot.slane %v2516_v16, 4 }
 0x264   : > { %2755 = vst.msk [vmem:[#allocation5 + $0x18] sm:$0xff] %vm2751_vm12, %v2710_v44  ;;  %2079 = vrot.lane.b32.xlu1 %v12470_v21, %s10777_s28  ;;  %v2902_v44 = vld [vmem:[#allocation2 + $0xa8] sm:$0xe] }
 0x265   : > { %3223 = vrot.lane.b32.xlu0 %v12641_v3, %s16215_s21  ;;  %v10004_v53 = vrot.slane %v2902_v44, 9 }
 0x266   : > { %v2798_v26 = vpop.permute.xlu1 %2797 }
 0x267   : > { %2845 = vst.msk [vmem:[#allocation5 + $0x8] sm:$0xff] %vm2843_vm14, %v2798_v26  ;;  %v1996_v5 = vpop.permute.xlu0 %1995  ;;  %v3066_v1 = vsel %vm11224_vm13, %v10004_v53, %v3065_v40  ;;  %v2166_v53 = vld [vmem:[#allocation2 + $0xb0] sm:$0x1] }
 0x268   : > { %3175 = vst.msk [vmem:[#allocation5 + $0x8] sm:$0xff] %vm3173_vm15, %v12545_v22  ;;  %2725 = vrot.lane.b32.xlu1 %v9984_v58, %s16272_s17  ;;  %v12738_v7 = vcombine.low %v3066_v1, %v3069_v10  ;;  %v2494_v1 = vrot.slane %v2492_v51, 4 }
 0x269   : > { %2040 = vst.msk [vmem:[#allocation5 + $0x20] sm:$0xff] %vm2035_vm4, %v1996_v5  ;;  %2081 = vrot.lane.b32.xlu0 %v12474_v59, %s10777_s28  ;;  %v2165_v59 = vld [vmem:[#allocation2 + $0xac] sm:$0xf]  ;;  %v2519_v5 = vshll.u32 %v2164_v24, 16 }
 0x26a   : > { %3253 = vst.msk [vmem:[#allocation5 + $0x8] sm:$0xff] %vm16217_vm3, %v12529_v55  ;;  %v12721_v22 = vpop.permute.xlu1 %3213  ;;  %v3058_v55 = vrot.slane %v2900_v23, 5  ;;  %v2529_v34 = vshrl.u32 %v2165_v59, 16 }
 0x26b   : > { %2110 = vst.msk [vmem:[#allocation5 + $0x20] sm:$0xff] %vm2105_vm5, %v2066_v12  ;;  %v2620_v33 = vpop.permute.xlu0 %2619  ;;  %v2525_v12 = vshll.u32 %v2165_v59, 16 }
 0x26c   : > { %3331 = vst.msk [vmem:[#allocation5 + $0x8] sm:$0xff] %vm3329_vm7, %v12610_v54  ;;  %2633 = vrot.lane.b32.xlu1 %v9983_v47, %s10780_s16  ;;  %v2899_v54 = vld [vmem:[#allocation2 + $0x9c] sm:$0xe]  ;;  %v3060_v38 = vrot.slane %v3058_v55, 4  ;;  %v2531_v44 = vrot.slane %v2529_v34, 4 }
 0x26d   : > { %2664 = vst.msk [vmem:[#allocation5 + $0x20] sm:$0xff] %vm2659_vm10, %v2620_v33  ;;  %2011 = vrot.lane.b32.xlu0 %v12470_v21, %s16220_s27  ;;  %v10003_v26 = vrot.slane %v2899_v54, 9  ;;  %v2527_v62 = vrot.slane %v2525_v12, 5  ;;  %v2505_v33 = vshrl.u32 %v2162_v20, 16  ;;  %v2521_v54 = vrot.slane %v2519_v5, 5  ;;  %v10683_v12 = vld [vmem:[#allocation2 + $0xc0] sm:$0xff]  }
 0x26e   : > { %v12727_v56 = vpop.permute.xlu1 %3135  ;;  %v3062_v23 = vsel %vm11224_vm13, %v3060_v38, %v3061_v29  ;;  %v2163_v34 = vld [vmem:[#allocation2 + $0xa4] sm:$0x1] }
 0x26f   : > { %v2800_v41 = vpop.permute.xlu0 %2799  ;;  %v3059_v40 = vsel %vm11224_vm13, %v10003_v26, %v3058_v55  ;;  %v2503_v55 = vrot.slane %v2501_v37, 5  ;;  %v2507_v10 = vrot.slane %v2505_v33, 4  ;;  %v12773_v33 = vld [vmem:[#allocation2 + $0xc4] sm:$0xf] }
 0x270   : > { %2813 = vrot.lane.b32.xlu1 %v9983_v47, %s10779_s14  ;;  %v12751_v59 = vcombine.low %v3059_v40, %v3062_v23  ;;  %v2171_v40 = vld [vmem:[#allocation2 + $0xc4] sm:$0xf]  ;;  %v3195_v51 = vrot.slane %v12773_v33, 5 }
 0x271   : > { %2635 = vrot.lane.b32.xlu0 %v9984_v58, %s10780_s16  ;;  %v2508_v16 = vor.u32 %v2507_v10, %v2503_v55 }
 0x272   : > { %v12735_v27 = vpop.permute.xlu1 %3287 }
 0x273   : > { %v3347_v21 = vld [vmem:[#allocation5 + $0x8] sm:$0xff]  ;;  %v2708_v57 = vpop.permute.xlu0 %2707 }
 0x274   : > { %10481 = vmatmul.mubr.msk.bf16.vlgmr.msra.gmra.mrb[0].mxu1 %vm3389_vm9, %v3347_v21  ;;  %2754 = vst.msk [vmem:[#allocation5 + $0x10] sm:$0xff] %vm2751_vm12, %v2708_v57  ;;  %3229 = vrot.lane.b32.xlu1 %v12738_v7, %s16215_s21 }
 0x275   : > { %2846 = vst.msk [vmem:[#allocation5 + $0x10] sm:$0xff] %vm2843_vm14, %v2800_v41  ;;  %2815 = vrot.lane.b32.xlu0 %v9984_v58, %s10779_s14  ;;  %v2532_v58 = vor.u32 %v2531_v44, %v2527_v62  ;;  %v2495_v41 = vshll.u32 %v2161_v52, 16  ;;  %v2509_v52 = vrot.slane %v2508_v16, 4 }
 0x276   : > { %3176 = vst.msk [vmem:[#allocation5 + $0x10] sm:$0xff] %vm3173_vm15, %v12551_v15  ;;  %v2002_v61 = vpop.permute.xlu1 %2001  ;;  %v2535_v15 = vshll.u32 %v2166_v53, 16 }
 0x277   : > { %3254 = vst.msk [vmem:[#allocation5 + $0x10] sm:$0xff] %vm16217_vm3, %v12685_v49  ;;  %v12756_v24 = vpop.permute.xlu0 %3137  ;;  %v2522_v49 = vor.u32 %v2521_v54, %v2518_v19  ;;  %v2533_v21 = vrot.slane %v2532_v58, 4  ;;  %v2497_v29 = vrot.slane %v2495_v41, 5  ;;  %v2170_v58 = vld [vmem:[#allocation2 + $0xc0] sm:$0xf] }
 0x278   : > { %2043 = vst.msk [vmem:[#allocation5 + $0x38] sm:$0xff] %vm2035_vm4, %v2002_v61  ;;  %3151 = vrot.lane.b32.xlu1 %v12751_v59, %s16214_s29  ;;  %v2680_v16 = vshll.u32 %v2170_v58, 16 }
 0x279   : > { %3332 = vst.msk [vmem:[#allocation5 + $0x10] sm:$0xff] %vm3329_vm7, %v12644_v31  ;;  %2723 = vrot.lane.b32.xlu0 %v9983_v47, %s16272_s17  ;;  %v2537_v31 = vrot.slane %v2535_v15, 5  ;;  %v2511_v47 = vshll.u32 %v2163_v34, 16  ;;  %v2523_v57 = vrot.slane %v2522_v49, 4  ;;  %v2498_v44 = vor.u32 %v2497_v29, %v2494_v1  ;;  %v2908_v1 = vld [vmem:[#allocation2 + $0xc0] sm:$0xe] }
 0x27a   : > { %v2068_v38 = vpop.permute.xlu1 %2067  ;;  %v2686_v49 = vshll.u32 %v2171_v40, 16  ;;  %v2690_v34 = vshrl.u32 %v2171_v40, 16  ;;  %v2677_v29 = vshrl.u32 %v2170_v58, 16 }
 0x27b   : > { %2111 = vst.msk [vmem:[#allocation5 + $0x28] sm:$0xff] %vm2105_vm5, %v2068_v38  ;;  %v12764_v20 = vpop.permute.xlu0 %3289  ;;  %v2538_v23 = vsel %vm11233_vm2, %v2533_v21, %v2537_v31  ;;  %v2528_v61 = vsel %vm11233_vm2, %v2523_v57, %v2527_v62  ;;  %v2513_v53 = vrot.slane %v2511_v47, 5  ;;  %v2499_v10 = vrot.slane %v2498_v44, 4  ;;  %v12788_v38 = vld [vmem:[#allocation2 + $0xb8] sm:$0xf] }
 0x27c   : > { %2017 = vrot.lane.b32.xlu1 %v10683_v12, %s16220_s27  ;;  %v12782_v54 = vcombine.low %v2528_v61, %v2538_v23  ;;  %v2168_v62 = vld [vmem:[#allocation2 + $0xb8] sm:$0xf]  ;;  %v3197_v57 = vrot.slane %v3195_v51, 4  ;;  %v3072_v23 = vrot.slane %v12788_v38, 5  ;;  %v2172_v38 = vld [vmem:[#allocation2 + $0xc8] sm:$0x1] }
 0x27d   : > { %3153 = vrot.lane.b32.xlu0 %v12738_v7, %s16214_s29  ;;  %v2514_v15 = vsel %vm11233_vm2, %v2509_v52, %v2513_v53  ;;  %v2504_v21 = vsel %vm11233_vm2, %v2499_v10, %v2503_v55  ;;  %v12800_v52 = vrot.slane %v2686_v49, 5  ;;  %v2549_v33 = vshll.u32 %v2168_v62, 16  ;;  %v2907_v10 = vld [vmem:[#allocation2 + $0xbc] sm:$0x1] }
 0x27e   : > { %v2714_v26 = vpop.permute.xlu1 %2713  ;;  %v12796_v47 = vcombine.low %v2504_v21, %v2514_v15  ;;  %v2553_v40 = vshrl.u32 %v2168_v62, 16  ;;  %v10022_v55 = vrot.slane %v2908_v1, 9  ;;  %v2679_v53 = vrot.slane %v2677_v29, 4 }
 0x27f   : > { %v12769_v5 = vpop.permute.xlu0 %3211  ;;  %v3074_v15 = vrot.slane %v3072_v23, 4  ;;  %v2551_v62 = vrot.slane %v2549_v33, 5  ;;  %v3075_v1 = vrot.slane %v2907_v10, 5  ;;  %v2696_v29 = vshll.u32 %v2172_v38, 16 }
 0x280   : > { %v3348_v37 = vld [vmem:[#allocation5 + $0x10] sm:$0xff]  ;;  %2083 = vrot.lane.b32.xlu1 %v12531_v46, %s10777_s28  ;;  %v2555_v21 = vrot.slane %v2553_v40, 4 }
 0x281   : > { %10484 = vmatprep.mubr.msk.bf16.mxu1 %vm3389_vm9, %v3348_v37  ;;  %3227 = vrot.lane.b32.xlu0 %v12751_v59, %s16215_s21  ;;  %v2910_v37 = vld [vmem:[#allocation2 + $0xc8] sm:$0x1]  ;;  %v3076_v33 = vsel %vm11224_vm13, %v3074_v15, %v3075_v1 }
 0x282   : > { %v2622_v19 = vpop.permute.xlu1 %2621  ;;  %v3198_v61 = vrot.slane %v2910_v37, 5 }
 0x283   : > { %2665 = vst.msk [vmem:[#allocation5 + $0x28] sm:$0xff] %vm2659_vm10, %v2622_v19  ;;  %v2070_v41 = vpop.permute.xlu0 %2069  ;;  %v2682_v19 = vrot.slane %v2680_v16, 5 }
 0x284   : > { %2757 = vst.msk [vmem:[#allocation5 + $0x28] sm:$0xff] %vm2751_vm12, %v2714_v26  ;;  %2729 = vrot.lane.b32.xlu1 %v12782_v54, %s16272_s17  ;;  %v2167_v26 = vld [vmem:[#allocation2 + $0xb4] sm:$0xf] }
 0x285   : > { %2085 = vrot.lane.b32.xlu0 %v10683_v12, %s10777_s28  ;;  %v2692_v12 = vrot.slane %v2690_v34, 4  ;;  %v2540_v58 = vshrl.u32 %v2167_v26, 16  ;;  %v2543_v49 = vshll.u32 %v2167_v26, 16  ;;  %v2169_v26 = vld [vmem:[#allocation2 + $0xbc] sm:$0x1] }
 0x286   : > { %v2802_v31 = vpop.permute.xlu1 %2801 }
 0x287   : > { %2847 = vst.msk [vmem:[#allocation5 + $0x18] sm:$0xff] %vm2843_vm14, %v2802_v31  ;;  %v2000_v44 = vpop.permute.xlu0 %1999 }
 0x288   : > { %3177 = vst.msk [vmem:[#allocation5 + $0x18] sm:$0xff] %vm3173_vm15, %v12602_v2  ;;  %2637 = vrot.lane.b32.xlu1 %v12796_v47, %s10780_s16 }
 0x289   : > { %2042 = vst.msk [vmem:[#allocation5 + $0x30] sm:$0xff] %vm2035_vm4, %v2000_v44  ;;  %2015 = vrot.lane.b32.xlu0 %v12531_v46, %s16220_s27  ;;  %v2693_v46 = vor.u32 %v2692_v12, %v12800_v52  ;;  %v2542_v44 = vrot.slane %v2540_v58, 4 }
 0x28a   : > { %3255 = vst.msk [vmem:[#allocation5 + $0x18] sm:$0xff] %vm16217_vm3, %v12592_v45  ;;  %v12814_v2 = vpop.permute.xlu1 %3217  ;;  %v3199_v45 = vsel %vm11224_vm13, %v3197_v57, %v3198_v61  ;;  %v2683_v57 = vor.u32 %v2682_v19, %v2679_v53  ;;  %v2545_v61 = vrot.slane %v2543_v49, 5  ;;  %v2698_v53 = vrot.slane %v2696_v29, 5 }
 0x28b   : > { %2112 = vst.msk [vmem:[#allocation5 + $0x30] sm:$0xff] %vm2105_vm5, %v2070_v41  ;;  %v2624_v34 = vpop.permute.xlu0 %2623  ;;  %v2905_v41 = vld [vmem:[#allocation2 + $0xb4] sm:$0xe]  ;;  %v2694_v40 = vrot.slane %v2693_v46, 4  ;;  %v2559_v19 = vshll.u32 %v2169_v26, 16 }
 0x28c   : > { %3333 = vst.msk [vmem:[#allocation5 + $0x18] sm:$0xff] %vm3329_vm7, %v12735_v27  ;;  %2817 = vrot.lane.b32.xlu1 %v12796_v47, %s10779_s14  ;;  %v3196_v27 = vsel %vm11224_vm13, %v10022_v55, %v3195_v51  ;;  %v10005_v37 = vrot.slane %v2905_v41, 9  ;;  %v2684_v38 = vrot.slane %v2683_v57, 4 }
 0x28d   : > { %2666 = vst.msk [vmem:[#allocation5 + $0x30] sm:$0xff] %vm2659_vm10, %v2624_v34  ;;  %2639 = vrot.lane.b32.xlu0 %v12782_v54, %s10780_s16  ;;  %v12828_v31 = vcombine.low %v3196_v27, %v3199_v45  ;;  %v2556_v34 = vor.u32 %v2555_v21, %v2551_v62  ;;  %v2699_v49 = vsel %vm11233_vm2, %v2694_v40, %v2698_v53 }
 0x28e   : > { %v12826_v16 = vpop.permute.xlu1 %3139  ;;  %v3073_v55 = vsel %vm11224_vm13, %v10005_v37, %v3072_v23  ;;  %v2546_v45 = vor.u32 %v2545_v61, %v2542_v44  ;;  %v2561_v23 = vrot.slane %v2559_v19, 5  ;;  %v10703_v19 = vld [vmem:[#allocation3] sm:$0xff]  }
 0x28f   : > { %v2804_v12 = vpop.permute.xlu0 %2803  ;;  %v12841_v10 = vcombine.low %v3073_v55, %v3076_v33  ;;  %v2557_v41 = vrot.slane %v2556_v34, 4  ;;  %v2913_v33 = vld [vmem:[#allocation2 + $0xd4] sm:$0x1]  ;;  %3931 = vst.msk [vmem:[#allocation6] sm:$0xff] %vm16218_vm8, %v10703_v19  ;;  %vm7428_vm8 = vcmask 818944  }
 0x290   : > { %3233 = vrot.lane.b32.xlu1 %v12828_v31, %s16215_s21  ;;  %v2547_v1 = vrot.slane %v2546_v45, 4 }
 0x291   : > { %2819 = vrot.lane.b32.xlu0 %v12782_v54, %s10779_s14  ;;  %v2689_v54 = vsel %vm11233_vm2, %v2684_v38, %v12800_v52 }
 0x292   : > { %v12838_v58 = vpop.permute.xlu1 %3291  ;;  %v9988_v21 = vcombine.low %v2689_v54, %v2699_v49 }
 0x293   : > { %v3349_v51 = vld [vmem:[#allocation5 + $0x18] sm:$0xff]  ;;  %v2712_v15 = vpop.permute.xlu0 %2711 }
 0x294   : > { %10485 = vmatmul.mubr.msk.bf16.gmra.mrb[4].mxu1 %vm3389_vm9, %v3349_v51  ;;  %2756 = vst.msk [vmem:[#allocation5 + $0x20] sm:$0xff] %vm2751_vm12, %v2712_v15  ;;  %3155 = vrot.lane.b32.xlu1 %v12841_v10, %s16214_s29  ;;  %v3276_v51 = vrot.slane %v2913_v33, 5 }
 0x295   : > { %2848 = vst.msk [vmem:[#allocation5 + $0x20] sm:$0xff] %vm2843_vm14, %v2804_v12  ;;  %2727 = vrot.lane.b32.xlu0 %v12796_v47, %s16272_s17  ;;  %v2562_v47 = vsel %vm11233_vm2, %v2557_v41, %v2561_v23  ;;  %v2911_v12 = vld [vmem:[#allocation2 + $0xcc] sm:$0xe] }
 0x296   : > { %3178 = vst.msk [vmem:[#allocation5 + $0x20] sm:$0xff] %vm3173_vm15, %v12628_v30  ;;  %v2006_v46 = vpop.permute.xlu1 %2005  ;;  %v2552_v30 = vsel %vm11233_vm2, %v2547_v1, %v2551_v62  ;;  %v10024_v61 = vrot.slane %v2911_v12, 9 }
 0x297   : > { %3256 = vst.msk [vmem:[#allocation5 + $0x20] sm:$0xff] %vm16217_vm3, %v12769_v5  ;;  %v12859_v27 = vpop.permute.xlu0 %3141  ;;  %v9987_v52 = vcombine.low %v2552_v30, %v2562_v47  ;;  %v12974_v47 = vld [vmem:[#allocation3 + $0xc0] sm:$0xff]  }
 0x298   : > { %2045 = vst.msk [vmem:[#allocation5 + $0x48] sm:$0xff] %vm2035_vm4, %v2006_v46  ;;  %2733 = vrot.lane.b32.xlu1 %v9988_v21, %s16272_s17 }
 0x299   : > { %3334 = vst.msk [vmem:[#allocation5 + $0x20] sm:$0xff] %vm3329_vm7, %v12764_v20  ;;  %3231 = vrot.lane.b32.xlu0 %v12841_v10, %s16215_s21  ;;  %v2912_v20 = vld [vmem:[#allocation2 + $0xd0] sm:$0xf] }
 0x29a   : > { %v2072_v5 = vpop.permute.xlu1 %2071  ;;  %v3273_v62 = vrot.slane %v2912_v20, 5 }
 0x29b   : > { %2113 = vst.msk [vmem:[#allocation5 + $0x38] sm:$0xff] %vm2105_vm5, %v2072_v5  ;;  %v12871_v29 = vpop.permute.xlu0 %3293 }
 0x29c   : > { %2641 = vrot.lane.b32.xlu1 %v9987_v52, %s10780_s16  ;;  %v3275_v34 = vrot.slane %v3273_v62, 4 }
 0x29d   : > { %2823 = vrot.lane.b32.xlu0 %v9988_v21, %s10779_s14 }
 0x29e   : > { %v2718_v37 = vpop.permute.xlu1 %2717 }
 0x29f   : > { %v3216_v57 = vpop.permute.xlu0 %3215 }
 0x2a0   : > { %v3350_v26 = vld [vmem:[#allocation5 + $0x20] sm:$0xff]  ;;  %2821 = vrot.lane.b32.xlu1 %v9987_v52, %s10779_s14 }
 0x2a1   : > { %10488 = vmatprep.mubr.msk.bf16.mxu1 %vm3389_vm9, %v3350_v26  ;;  %2731 = vrot.lane.b32.xlu0 %v9987_v52, %s16272_s17 }
 0x2a2   : > { %v2626_v44 = vpop.permute.xlu1 %2625 }
 0x2a3   : > { %2667 = vst.msk [vmem:[#allocation5 + $0x38] sm:$0xff] %vm2659_vm10, %v2626_v44  ;;  %v2074_v40 = vpop.permute.xlu0 %2073 }
 0x2a4   : > { %2759 = vst.msk [vmem:[#allocation5 + $0x38] sm:$0xff] %vm2751_vm12, %v2718_v37  ;;  %3299 = vrot.lane.b32.xlu1 %v12641_v3, %s10785_s22  ;;  %v3277_v3 = vsel %vm11224_vm13, %v3275_v34, %v3276_v51  ;;  %v13036_v34 = vld [vmem:[#allocation3 + $0xcc] sm:$0xff]  }
 0x2a5   : > { %3297 = vrot.lane.b32.xlu0 %v12547_v17, %s10785_s22  ;;  %v3274_v17 = vsel %vm11224_vm13, %v10024_v61, %v3273_v62 }
 0x2a6   : > { %v2806_v55 = vpop.permute.xlu1 %2805 }
 0x2a7   : > { %2849 = vst.msk [vmem:[#allocation5 + $0x28] sm:$0xff] %vm2843_vm14, %v2806_v55  ;;  %v2004_v53 = vpop.permute.xlu0 %2003 }
 0x2a8   : > { %3179 = vst.msk [vmem:[#allocation5 + $0x28] sm:$0xff] %vm3173_vm15, %v12727_v56  ;;  %3303 = vrot.lane.b32.xlu1 %v12751_v59, %s10785_s22 }
 0x2a9   : > { %2044 = vst.msk [vmem:[#allocation5 + $0x40] sm:$0xff] %vm2035_vm4, %v2004_v53  ;;  %3301 = vrot.lane.b32.xlu0 %v12623_v50, %s10785_s22 }
 0x2aa   : > { %3257 = vst.msk [vmem:[#allocation5 + $0x28] sm:$0xff] %vm16217_vm3, %v12721_v22  ;;  %v12902_v56 = vpop.permute.xlu1 %3221  ;;  %v10025_v22 = vcombine.low %v3274_v17, %v3277_v3 }
 0x2ab   : > { %2114 = vst.msk [vmem:[#allocation5 + $0x40] sm:$0xff] %vm2105_vm5, %v2074_v40  ;;  %v2628_v50 = vpop.permute.xlu0 %2627 }
 0x2ac   : > { %3335 = vst.msk [vmem:[#allocation5 + $0x28] sm:$0xff] %vm3329_vm7, %v12838_v58  ;;  %3307 = vrot.lane.b32.xlu1 %v12841_v10, %s10785_s22 }
 0x2ad   : > { %2668 = vst.msk [vmem:[#allocation5 + $0x40] sm:$0xff] %vm2659_vm10, %v2628_v50  ;;  %3305 = vrot.lane.b32.xlu0 %v12738_v7, %s10785_s22  ;;  %v4235_v50 = vld [vmem:[#allocation3 + $0x24] sm:$0xf] }
 0x2ae   : > { %v12913_v59 = vpop.permute.xlu1 %3143 }
 0x2af   : > { %v2808_v58 = vpop.permute.xlu0 %2807 }
 0x2b0   : > { %3311 = vrot.lane.b32.xlu1 %v10025_v22, %s10785_s22 }
 0x2b1   : > { %3309 = vrot.lane.b32.xlu0 %v12828_v31, %s10785_s22 }
 0x2b2   : > { %v3296_v0 = vpop.permute.xlu1 %3295 }
 0x2b3   : > { %v3351_v15 = vld [vmem:[#allocation5 + $0x28] sm:$0xff]  ;;  %v2716_v38 = vpop.permute.xlu0 %2715 }
 0x2b4   : > { %10489 = vmatmul.mubr.msk.bf16.gmra.mrb[8].mxu1 %vm3389_vm9, %v3351_v15  ;;  %2758 = vst.msk [vmem:[#allocation5 + $0x30] sm:$0xff] %vm2751_vm12, %v2716_v38  ;;  %3954 = vrot.lane.b32.xlu1 %v11990_v18, %s16215_s21  ;;  %v4359_v15 = vshrl.u32 %v4235_v50, 16  ;;  %v4232_v38 = vld [vmem:[#allocation3 + $0x18] sm:$0xf] }
 0x2b5   : > { %2850 = vst.msk [vmem:[#allocation5 + $0x30] sm:$0xff] %vm2843_vm14, %v2808_v58  ;;  %3952 = vrot.lane.b32.xlu0 %v12557_v14, %s16215_s21 }
 0x2b6   : > { %3180 = vst.msk [vmem:[#allocation5 + $0x30] sm:$0xff] %vm3173_vm15, %v12756_v24  ;;  %v2010_v7 = vpop.permute.xlu1 %2009 }
 0x2b7   : > { %3258 = vst.msk [vmem:[#allocation5 + $0x30] sm:$0xff] %vm16217_vm3, %v3216_v57  ;;  %v12929_v31 = vpop.permute.xlu0 %3145 }
 0x2b8   : > { %2047 = vst.msk [vmem:[#allocation5 + $0x58] sm:$0xff] %vm2035_vm4, %v2010_v7  ;;  %3958 = vrot.lane.b32.xlu1 %v12060_v48, %s16215_s21  ;;  %v4236_v7 = vld [vmem:[#allocation3 + $0x28] sm:$0xf] }
 0x2b9   : > { %3336 = vst.msk [vmem:[#allocation5 + $0x30] sm:$0xff] %vm3329_vm7, %v12871_v29  ;;  %3956 = vrot.lane.b32.xlu0 %v11977_v8, %s16215_s21 }
 0x2ba   : > { %v2076_v14 = vpop.permute.xlu1 %2075 }
 0x2bb   : > { %2115 = vst.msk [vmem:[#allocation5 + $0x48] sm:$0xff] %vm2105_vm5, %v2076_v14  ;;  %v3220_v24 = vpop.permute.xlu0 %3219 }
 0x2bc   : > { %3962 = vrot.lane.b32.xlu1 %v12124_v4, %s16215_s21 }
 0x2bd   : > { %3960 = vrot.lane.b32.xlu0 %v12047_v28, %s16215_s21 }
 0x2be   : > { %v2722_v10 = vpop.permute.xlu1 %2721 }
 0x2bf   : > { %v2078_v49 = vpop.permute.xlu0 %2077 }
 0x2c0   : > { %v3352_v45 = vld [vmem:[#allocation5 + $0x30] sm:$0xff]  ;;  %3966 = vrot.lane.b32.xlu1 %v12191_v9, %s16215_s21 }
 0x2c1   : > { %10492 = vmatprep.mubr.msk.bf16.mxu1 %vm3389_vm9, %v3352_v45  ;;  %3964 = vrot.lane.b32.xlu0 %v12114_v60, %s16215_s21  ;;  %v4338_v45 = vshll.u32 %v4232_v38, 16 }
 0x2c2   : > { %v2630_v41 = vpop.permute.xlu1 %2629 }
 0x2c3   : > { %2669 = vst.msk [vmem:[#allocation5 + $0x48] sm:$0xff] %vm2659_vm10, %v2630_v41  ;;  %v2008_v54 = vpop.permute.xlu0 %2007  ;;  %v4242_v41 = vld [vmem:[#allocation3 + $0x40] sm:$0xf] }
 0x2c4   : > { %2761 = vst.msk [vmem:[#allocation5 + $0x48] sm:$0xff] %vm2751_vm12, %v2722_v10  ;;  %3970 = vrot.lane.b32.xlu1 %v12272_v43, %s16215_s21 }
 0x2c5   : > { %2046 = vst.msk [vmem:[#allocation5 + $0x50] sm:$0xff] %vm2035_vm4, %v2008_v54  ;;  %3968 = vrot.lane.b32.xlu0 %v12184_v32, %s16215_s21 }
 0x2c6   : > { %2116 = vst.msk [vmem:[#allocation5 + $0x50] sm:$0xff] %vm2105_vm5, %v2078_v49  ;;  %v2810_v23 = vpop.permute.xlu1 %2809  ;;  %v4335_v49 = vshrl.u32 %v4232_v38, 16 }
 0x2c7   : > { %2851 = vst.msk [vmem:[#allocation5 + $0x38] sm:$0xff] %vm2843_vm14, %v2810_v23  ;;  %v2632_v46 = vpop.permute.xlu0 %2631  ;;  %v4361_v23 = vrot.slane %v4359_v15, 4 }
 0x2c8   : > { %3181 = vst.msk [vmem:[#allocation5 + $0x38] sm:$0xff] %vm3173_vm15, %v12826_v16  ;;  %3974 = vrot.lane.b32.xlu1 %v12360_v6, %s16215_s21 }
 0x2c9   : > { %2670 = vst.msk [vmem:[#allocation5 + $0x50] sm:$0xff] %vm2659_vm10, %v2632_v46  ;;  %3972 = vrot.lane.b32.xlu0 %v12263_v25, %s16215_s21 }
 0x2ca   : > { %3259 = vst.msk [vmem:[#allocation5 + $0x38] sm:$0xff] %vm16217_vm3, %v12814_v2  ;;  %v12966_v21 = vpop.permute.xlu1 %3225 }
 0x2cb   : > { %3337 = vst.msk [vmem:[#allocation5 + $0x38] sm:$0xff] %vm3329_vm7, %v3296_v0  ;;  %v2812_v1 = vpop.permute.xlu0 %2811  ;;  %v4362_v0 = vshll.u32 %v4235_v50, 16 }
 0x2cc   : > { %3978 = vrot.lane.b32.xlu1 %v12434_v39, %s16215_s21 }
 0x2cd   : > { %3976 = vrot.lane.b32.xlu0 %v12347_v42, %s16215_s21  ;;  %v4364_v46 = vrot.slane %v4362_v0, 5 }
 0x2ce   : > { %v12972_v16 = vpop.permute.xlu1 %3147 }
 0x2cf   : > { %v2720_v30 = vpop.permute.xlu0 %2719 }
 0x2d0   : > { %2760 = vst.msk [vmem:[#allocation5 + $0x40] sm:$0xff] %vm2751_vm12, %v2720_v30  ;;  %3982 = vrot.lane.b32.xlu1 %v12974_v47, %s16215_s21  ;;  %v4237_v30 = vld [vmem:[#allocation3 + $0x2c] sm:$0x1] }
 0x2d1   : > { %2852 = vst.msk [vmem:[#allocation5 + $0x40] sm:$0xff] %vm2843_vm14, %v2812_v1  ;;  %3980 = vrot.lane.b32.xlu0 %v12421_v11, %s16215_s21  ;;  %v4372_v1 = vshrl.u32 %v4236_v7, 16  ;;  %s10801_s21 = smov 76  }
 0x2d2   : > { %v3353_v2 = vld [vmem:[#allocation5 + $0x38] sm:$0xff]  ;;  %3182 = vst.msk [vmem:[#allocation5 + $0x40] sm:$0xff] %vm3173_vm15, %v12859_v27  ;;  %v2014_v5 = vpop.permute.xlu1 %2013 }
 0x2d3   : > { %10493 = vmatmul.mubr.msk.bf16.gmra.mrb[12].mxu1 %vm3389_vm9, %v3353_v2  ;;  %3260 = vst.msk [vmem:[#allocation5 + $0x40] sm:$0xff] %vm16217_vm3, %v3220_v24  ;;  %v12987_v52 = vpop.permute.xlu0 %3149  ;;  %v4241_v24 = vld [vmem:[#allocation3 + $0x3c] sm:$0xf] }
 0x2d4   : > { %2049 = vst.msk [vmem:[#allocation5 + $0x68] sm:$0xff] %vm2035_vm4, %v2014_v5  ;;  %4023 = vrot.lane.b32.xlu1 %v11977_v8, %s10787_s23  ;;  %v4407_v2 = vshrl.u32 %v4241_v24, 16  ;;  %v4410_v5 = vshll.u32 %v4241_v24, 16 }
 0x2d5   : > { %4021 = vrot.lane.b32.xlu0 %v11990_v18, %s10787_s23 }
 0x2d6   : > { %v2080_v29 = vpop.permute.xlu1 %2079 }
 0x2d7   : > { %2117 = vst.msk [vmem:[#allocation5 + $0x58] sm:$0xff] %vm2105_vm5, %v2080_v29  ;;  %v3224_v27 = vpop.permute.xlu0 %3223 }
 0x2d8   : > { %4027 = vrot.lane.b32.xlu1 %v12047_v28, %s10787_s23 }
 0x2d9   : > { %4025 = vrot.lane.b32.xlu0 %v12060_v48, %s10787_s23 }
 0x2da   : > { %v2726_v37 = vpop.permute.xlu1 %2725 }
 0x2db   : > { %v2082_v20 = vpop.permute.xlu0 %2081 }
 0x2dc   : > { %4031 = vrot.lane.b32.xlu1 %v12114_v60, %s10787_s23 }
 0x2dd   : > { %4029 = vrot.lane.b32.xlu0 %v12124_v4, %s10787_s23 }
 0x2de   : > { %v2634_v57 = vpop.permute.xlu1 %2633 }
 0x2df   : > { %2671 = vst.msk [vmem:[#allocation5 + $0x58] sm:$0xff] %vm2659_vm10, %v2634_v57  ;;  %v2012_v18 = vpop.permute.xlu0 %2011  ;;  %v4239_v57 = vld [vmem:[#allocation3 + $0x34] sm:$0xf] }
 0x2e0   : > { %2763 = vst.msk [vmem:[#allocation5 + $0x58] sm:$0xff] %vm2751_vm12, %v2726_v37  ;;  %4035 = vrot.lane.b32.xlu1 %v12184_v32, %s10787_s23  ;;  %v4416_v37 = vshll.u32 %v4242_v41, 16  ;;  %v4392_v50 = vshll.u32 %v4239_v57, 16 }
 0x2e1   : > { %2048 = vst.msk [vmem:[#allocation5 + $0x60] sm:$0xff] %vm2035_vm4, %v2012_v18  ;;  %4033 = vrot.lane.b32.xlu0 %v12191_v9, %s10787_s23 }
 0x2e2   : > { %2118 = vst.msk [vmem:[#allocation5 + $0x60] sm:$0xff] %vm2105_vm5, %v2082_v20  ;;  %v2814_v26 = vpop.permute.xlu1 %2813  ;;  %v4420_v20 = vshrl.u32 %v4242_v41, 16  ;;  %v13110_v15 = vrot.slane %v4416_v37, 5 }
 0x2e3   : > { %2853 = vst.msk [vmem:[#allocation5 + $0x48] sm:$0xff] %vm2843_vm14, %v2814_v26  ;;  %v2636_v62 = vpop.permute.xlu0 %2635  ;;  %v4234_v26 = vld [vmem:[#allocation3 + $0x20] sm:$0x1] }
 0x2e4   : > { %3183 = vst.msk [vmem:[#allocation5 + $0x48] sm:$0xff] %vm3173_vm15, %v12913_v59  ;;  %4039 = vrot.lane.b32.xlu1 %v12263_v25, %s10787_s23  ;;  %v4233_v59 = vld [vmem:[#allocation3 + $0x1c] sm:$0xf]  ;;  %v4422_v0 = vrot.slane %v4420_v20, 4 }
 0x2e5   : > { %2672 = vst.msk [vmem:[#allocation5 + $0x60] sm:$0xff] %vm2659_vm10, %v2636_v62  ;;  %4037 = vrot.lane.b32.xlu0 %v12272_v43, %s10787_s23  ;;  %v4348_v14 = vshrl.u32 %v4233_v59, 16  ;;  %v13095_v62 = vrot.slane %v4335_v49, 4 }
 0x2e6   : > { %3261 = vst.msk [vmem:[#allocation5 + $0x48] sm:$0xff] %vm16217_vm3, %v12902_v56  ;;  %v13020_v44 = vpop.permute.xlu1 %3229 }
 0x2e7   : > { %v2816_v12 = vpop.permute.xlu0 %2815 }
 0x2e8   : > { %4043 = vrot.lane.b32.xlu1 %v12347_v42, %s10787_s23 }
 0x2e9   : > { %4041 = vrot.lane.b32.xlu0 %v12360_v6, %s10787_s23 }
 0x2ea   : > { %v13026_v33 = vpop.permute.xlu1 %3151 }
 0x2eb   : > { %v2724_v40 = vpop.permute.xlu0 %2723 }
 0x2ec   : > { %2762 = vst.msk [vmem:[#allocation5 + $0x50] sm:$0xff] %vm2751_vm12, %v2724_v40  ;;  %4047 = vrot.lane.b32.xlu1 %v12421_v11, %s10787_s23 }
 0x2ed   : > { %2854 = vst.msk [vmem:[#allocation5 + $0x50] sm:$0xff] %vm2843_vm14, %v2816_v12  ;;  %4045 = vrot.lane.b32.xlu0 %v12434_v39, %s10787_s23  ;;  %v4340_v12 = vrot.slane %v4338_v45, 5 }
 0x2ee   : > { %3184 = vst.msk [vmem:[#allocation5 + $0x50] sm:$0xff] %vm3173_vm15, %v12929_v31  ;;  %v2018_v61 = vpop.permute.xlu1 %2017  ;;  %v4344_v31 = vshll.u32 %v4233_v59, 16  ;;  %v4396_v59 = vshrl.u32 %v4239_v57, 16 }
 0x2ef   : > { %3262 = vst.msk [vmem:[#allocation5 + $0x50] sm:$0xff] %vm16217_vm3, %v3224_v27  ;;  %v13040_v51 = vpop.permute.xlu0 %3153  ;;  %v4350_v27 = vrot.slane %v4348_v14, 4  ;;  %v4341_v41 = vor.u32 %v4340_v12, %v13095_v62 }
 0x2f0   : > { %2051 = vst.msk [vmem:[#allocation5 + $0x78] sm:$0xff] %vm2035_vm4, %v2018_v61  ;;  %4051 = vrot.lane.b32.xlu1 %v13036_v34, %s10787_s23  ;;  %v13091_v29 = vrot.slane %v4344_v31, 5 }
 0x2f1   : > { %2121 = vst.msk [vmem:[#allocation5 + $0x78] sm:$0xff] %vm2105_vm5, %v11918_v36  ;;  %4049 = vrot.lane.b32.xlu0 %v12974_v47, %s10787_s23  ;;  %s10790_s23 = smov 44  }
 0x2f2   : > { %v2084_v55 = vpop.permute.xlu1 %2083 }
 0x2f3   : > { %2119 = vst.msk [vmem:[#allocation5 + $0x68] sm:$0xff] %vm2105_vm5, %v2084_v55  ;;  %v13049_v53 = vpop.permute.xlu0 %3227 }
 0x2f4   : > { %4093 = vrot.lane.b32.xlu1 %v12060_v48, %s10788_s25 }
 0x2f5   : > { %4091 = vrot.lane.b32.xlu0 %v11977_v8, %s10788_s25 }
 0x2f6   : > { %v2730_v19 = vpop.permute.xlu1 %2729 }
 0x2f7   : > { %v2086_v36 = vpop.permute.xlu0 %2085 }
 0x2f8   : > { %4097 = vrot.lane.b32.xlu1 %v12124_v4, %s10788_s25 }
 0x2f9   : > { %4095 = vrot.lane.b32.xlu0 %v12047_v28, %s10788_s25 }
 0x2fa   : > { %v2638_v17 = vpop.permute.xlu1 %2637 }
 0x2fb   : > { %2673 = vst.msk [vmem:[#allocation5 + $0x68] sm:$0xff] %vm2659_vm10, %v2638_v17  ;;  %v2016_v3 = vpop.permute.xlu0 %2015  ;;  %v4374_v17 = vrot.slane %v4372_v1, 4  ;;  %v13120_v1 = vrot.slane %v4392_v50, 5  ;;  %v4245_v50 = vld [vmem:[#allocation3 + $0x4c] sm:$0xf] }
 0x2fc   : > { %2765 = vst.msk [vmem:[#allocation5 + $0x68] sm:$0xff] %vm2751_vm12, %v2730_v19  ;;  %4101 = vrot.lane.b32.xlu1 %v12191_v9, %s10788_s25  ;;  %v4365_v19 = vor.u32 %v4364_v46, %v4361_v23  ;;  %v4247_v23 = vld [vmem:[#allocation3 + $0x54] sm:$0xf] }
 0x2fd   : > { %2050 = vst.msk [vmem:[#allocation5 + $0x70] sm:$0xff] %vm2035_vm4, %v2016_v3  ;;  %4099 = vrot.lane.b32.xlu0 %v12114_v60, %s10788_s25  ;;  %v4378_v3 = vshll.u32 %v4237_v30, 16  ;;  %v4248_v30 = vld [vmem:[#allocation3 + $0x58] sm:$0xf]  ;;  %v4458_v62 = vshll.u32 %v4247_v23, 16 }
 0x2fe   : > { %2120 = vst.msk [vmem:[#allocation5 + $0x70] sm:$0xff] %vm2105_vm5, %v2086_v36  ;;  %v2818_v8 = vpop.permute.xlu1 %2817  ;;  %v13113_v49 = vrot.slane %v4365_v19, 4 }
 0x2ff   : > { %2855 = vst.msk [vmem:[#allocation5 + $0x58] sm:$0xff] %vm2843_vm14, %v2818_v8  ;;  %v2640_v56 = vpop.permute.xlu0 %2639  ;;  %v4409_v8 = vrot.slane %v4407_v2, 4  ;;  %v4380_v46 = vrot.slane %v4378_v3, 5  ;;  %v4244_v3 = vld [vmem:[#allocation3 + $0x48] sm:$0xf] }
 0x300   : > { %3185 = vst.msk [vmem:[#allocation5 + $0x58] sm:$0xff] %vm3173_vm15, %v12972_v16  ;;  %4105 = vrot.lane.b32.xlu1 %v12272_v43, %s10788_s25  ;;  %v4238_v16 = vld [vmem:[#allocation3 + $0x30] sm:$0xf] }
 0x301   : > { %2674 = vst.msk [vmem:[#allocation5 + $0x70] sm:$0xff] %vm2659_vm10, %v2640_v56  ;;  %4103 = vrot.lane.b32.xlu0 %v12184_v32, %s10788_s25  ;;  %v4383_v40 = vshrl.u32 %v4238_v16, 16  ;;  %v4386_v61 = vshll.u32 %v4238_v16, 16  ;;  %v4412_v56 = vrot.slane %v4410_v5, 5  ;;  %v4398_v16 = vrot.slane %v4396_v59, 4 }
 0x302   : > { %3263 = vst.msk [vmem:[#allocation5 + $0x58] sm:$0xff] %vm16217_vm3, %v12966_v21  ;;  %v13077_v22 = vpop.permute.xlu1 %3233  ;;  %v4368_v21 = vshll.u32 %v4236_v7, 16  ;;  %v4243_v7 = vld [vmem:[#allocation3 + $0x44] sm:$0x1] }
 0x303   : > { %v2820_v58 = vpop.permute.xlu0 %2819  ;;  %v4385_v31 = vrot.slane %v4383_v40, 4  ;;  %v4388_v14 = vrot.slane %v4386_v61, 5  ;;  %v4426_v37 = vshll.u32 %v4243_v7, 16  ;;  %v4464_v40 = vshll.u32 %v4248_v30, 16 }
 0x304   : > { %4109 = vrot.lane.b32.xlu1 %v12360_v6, %s10788_s25  ;;  %v13101_v36 = vrot.slane %v4368_v21, 5  ;;  %v4413_v21 = vor.u32 %v4412_v56, %v4409_v8  ;;  %v4468_v61 = vshrl.u32 %v4248_v30, 16  ;;  %v4249_v56 = vld [vmem:[#allocation3 + $0x5c] sm:$0x1] }
 0x305   : > { %4107 = vrot.lane.b32.xlu0 %v12263_v25, %s10788_s25  ;;  %v4389_v57 = vor.u32 %v4388_v14, %v4385_v31  ;;  %v13155_v8 = vrot.slane %v4426_v37, 5  ;;  %v4431_v31 = vshrl.u32 %v4244_v3, 16  ;;  %v4434_v14 = vshll.u32 %v4244_v3, 16 }
 0x306   : > { %v13083_v10 = vpop.permute.xlu1 %3155  ;;  %v4375_v45 = vor.u32 %v4374_v17, %v13101_v36  ;;  %v13141_v19 = vrot.slane %v4413_v21, 4  ;;  %v4399_v17 = vor.u32 %v4398_v16, %v13120_v1  ;;  %v4470_v7 = vrot.slane %v4468_v61, 4  ;;  %v13194_v16 = vld [vmem:[#allocation3 + $0x50] sm:$0x1] }
 0x307   : > { %v2728_v54 = vpop.permute.xlu0 %2727  ;;  %v13159_v59 = vrot.slane %v4389_v57, 4  ;;  %v4436_v57 = vrot.slane %v4434_v14, 5 }
 0x308   : > { %2764 = vst.msk [vmem:[#allocation5 + $0x60] sm:$0xff] %vm2751_vm12, %v2728_v54  ;;  %4113 = vrot.lane.b32.xlu1 %v12434_v39, %s10788_s25  ;;  %v4240_v54 = vld [vmem:[#allocation3 + $0x38] sm:$0x1]  ;;  %v4376_v12 = vrot.slane %v4375_v45, 4  ;;  %v4444_v45 = vshrl.u32 %v4245_v50, 16 }
 0x309   : > { %2856 = vst.msk [vmem:[#allocation5 + $0x60] sm:$0xff] %vm2843_vm14, %v2820_v58  ;;  %4111 = vrot.lane.b32.xlu0 %v12347_v42, %s10788_s25  ;;  %v4354_v58 = vshll.u32 %v4234_v26, 16  ;;  %v4455_v26 = vshrl.u32 %v4247_v23, 16  ;;  %v4229_v23 = vld [vmem:[#allocation3 + $0xc] sm:$0xf] }
 0x30a   : > { %3186 = vst.msk [vmem:[#allocation5 + $0x60] sm:$0xff] %vm3173_vm15, %v12987_v52  ;;  %v2734_v18 = vpop.permute.xlu1 %2733  ;;  %v13105_v52 = vld [vmem:[#allocation3 + $0xd8] sm:$0xff]   ;;  %v4314_v61 = vshll.u32 %v4229_v23, 16 }
 0x30b   : > { %3264 = vst.msk [vmem:[#allocation5 + $0x60] sm:$0xff] %vm16217_vm3, %v13049_v53  ;;  %v13099_v55 = vpop.permute.xlu0 %3231  ;;  %v4351_v53 = vor.u32 %v4350_v27, %v13091_v29  ;;  %v4356_v5 = vrot.slane %v4354_v58, 5  ;;  %v4423_v27 = vor.u32 %v4422_v0, %v13110_v15  ;;  %v4460_v58 = vrot.slane %v4458_v62, 5 }
 0x30c   : > { %4117 = vrot.lane.b32.xlu1 %v12974_v47, %s10788_s25 }
 0x30d   : > { %4115 = vrot.lane.b32.xlu0 %v12421_v11, %s10788_s25  ;;  %v4352_v2 = vrot.slane %v4351_v53, 4 }
 0x30e   : > { %v2642_v38 = vpop.permute.xlu1 %2641 }
 0x30f   : > { %2675 = vst.msk [vmem:[#allocation5 + $0x78] sm:$0xff] %vm2659_vm10, %v2642_v38  ;;  %v2824_v24 = vpop.permute.xlu0 %2823  ;;  %v13166_v38 = vrot.slane %v4464_v40, 5  ;;  %v4311_v40 = vshrl.u32 %v4229_v23, 16 }
 0x310   : > { %2767 = vst.msk [vmem:[#allocation5 + $0x78] sm:$0xff] %vm2751_vm12, %v2734_v18  ;;  %4121 = vrot.lane.b32.xlu1 %v13105_v52, %s10788_s25  ;;  %v4402_v18 = vshll.u32 %v4240_v54, 16 }
 0x311   : > { %2859 = vst.msk [vmem:[#allocation5 + $0x78] sm:$0xff] %vm2843_vm14, %v11933_v13  ;;  %4119 = vrot.lane.b32.xlu0 %v13036_v34, %s10788_s25  ;;  %v4471_v37 = vor.u32 %v4470_v7, %v13166_v38  ;;  %s10792_s25 = smov 84  }
 0x312   : > { %3189 = vst.msk [vmem:[#allocation5 + $0x78] sm:$0xff] %vm3173_vm15, %v13083_v10  ;;  %v2822_v20 = vpop.permute.xlu1 %2821  ;;  %v4342_v10 = vrot.slane %v4341_v41, 4  ;;  %v13161_v53 = vrot.slane %v4402_v18, 5 }
 0x313   : > { %3267 = vst.msk [vmem:[#allocation5 + $0x78] sm:$0xff] %vm16217_vm3, %v13077_v22  ;;  %v2732_v13 = vpop.permute.xlu0 %2731  ;;  %v4371_v22 = vsel %vm11233_vm2, %v13113_v49, %v13101_v36  ;;  %v13153_v36 = vrot.slane %v4423_v27, 4  ;;  %v4440_v49 = vshll.u32 %v4245_v50, 16 }
 0x314   : > { %2857 = vst.msk [vmem:[#allocation5 + $0x68] sm:$0xff] %vm2843_vm14, %v2822_v20  ;;  %4163 = vrot.lane.b32.xlu1 %v12047_v28, %s10789_s26  ;;  %v4381_v28 = vsel %vm11233_vm2, %v4376_v12, %v4380_v46  ;;  %v4347_v41 = vsel %vm11233_vm2, %v4342_v10, %v13091_v29  ;;  %v4230_v46 = vld [vmem:[#allocation3 + $0x10] sm:$0xf]  ;;  %v4395_v29 = vsel %vm11233_vm2, %v13159_v59, %v13120_v1  ;;  %v4433_v20 = vrot.slane %v4431_v31, 4  ;;  %v4253_v12 = vld [vmem:[#allocation3 + $0x6c] sm:$0xf] }
 0x315   : > { %3187 = vst.msk [vmem:[#allocation5 + $0x68] sm:$0xff] %vm3173_vm15, %v13026_v33  ;;  %4161 = vrot.lane.b32.xlu0 %v12060_v48, %s10789_s26  ;;  %v4357_v33 = vsel %vm11233_vm2, %v4352_v2, %v4356_v5  ;;  %v4457_v48 = vrot.slane %v4455_v26, 4  ;;  %v4226_v2 = vld [vmem:[#allocation3] sm:$0xf]  ;;  %v4227_v5 = vld [vmem:[#allocation3 + $0x4] sm:$0xf] }
 0x316   : > { %2766 = vst.msk [vmem:[#allocation5 + $0x70] sm:$0xff] %vm2751_vm12, %v2732_v13  ;;  %v13180_v21 = vcombine.low %v4347_v41, %v4357_v33  ;;  %v13207_v62 = vrot.slane %v4440_v49, 5  ;;  %v13209_v13 = vrot.slane %v4444_v45, 4  ;;  %v4324_v10 = vshrl.u32 %v4230_v46, 16  ;;  %v4251_v45 = vld [vmem:[#allocation3 + $0x64] sm:$0xf] }
 0x317   : > { %3265 = vst.msk [vmem:[#allocation5 + $0x68] sm:$0xff] %vm16217_vm3, %v13020_v44  ;;  %v3300_v44 = vpop.permute.xlu1 %3299  ;;  %v3298_v0 = vpop.permute.xlu0 %3297  ;;  %v4461_v27 = vor.u32 %v4460_v58, %v4457_v48  ;;  %v4287_v3 = vshrl.u32 %v4226_v2, 16  ;;  %v4296_v33 = vshll.u32 %v4227_v5, 16  ;;  %v13218_v58 = vrot.slane %v4471_v37, 4 }
 0x318   : > { %2858 = vst.msk [vmem:[#allocation5 + $0x70] sm:$0xff] %vm2843_vm14, %v2824_v24  ;;  %4167 = vrot.lane.b32.xlu1 %v12114_v60, %s10789_s26  ;;  %v4474_v24 = vshll.u32 %v4249_v56, 16  ;;  %v4419_v60 = vsel %vm11233_vm2, %v13141_v19, %v13110_v15  ;;  %v4300_v56 = vshrl.u32 %v4227_v5, 16  ;;  %v4447_v31 = vor.u32 %v13209_v13, %v13207_v62 }
 0x319   : > { %3188 = vst.msk [vmem:[#allocation5 + $0x70] sm:$0xff] %vm3173_vm15, %v13040_v51  ;;  %v13171_v51 = vrot.slane %v4399_v17, 4  ;;  %4165 = vrot.lane.b32.xlu0 %v12124_v4, %s10789_s26  ;;  %v4429_v4 = vsel %vm11233_vm2, %v13153_v36, %v13155_v8  ;;  %v13216_v48 = vrot.slane %v4461_v27, 4  ;;  %v4503_v14 = vshrl.u32 %v4253_v12, 16 }
 0x31a   : > { %3266 = vst.msk [vmem:[#allocation5 + $0x70] sm:$0xff] %vm16217_vm3, %v13099_v55  ;;  %v13175_v55 = vcombine.low %v4371_v22, %v4381_v28  ;;  %v13205_v26 = vrot.slane %v4474_v24, 5  ;;  %v4320_v22 = vshll.u32 %v4230_v46, 16  ;;  %v4290_v28 = vshll.u32 %v4226_v2, 16 }
 0x31b   : > { %3339 = vst.msk [vmem:[#allocation5 + $0x48] sm:$0xff] %vm3329_vm7, %v3300_v44  ;;  %3338 = vst.msk [vmem:[#allocation5 + $0x40] sm:$0xff] %vm3329_vm7, %v3298_v0  ;;  %v3304_v54 = vpop.permute.xlu1 %3303  ;;  %v3302_v30 = vpop.permute.xlu0 %3301  ;;  %v4405_v18 = vsel %vm11233_vm2, %v13171_v51, %v13161_v53  ;;  %v4450_v0 = vshll.u32 %v13194_v16, 16  ;;  %v4506_v24 = vshll.u32 %v4253_v12, 16  ;;  %v4313_v41 = vrot.slane %v4311_v40, 4 }
 0x31c   : > { %3341 = vst.msk [vmem:[#allocation5 + $0x58] sm:$0xff] %vm3329_vm7, %v3304_v54  ;;  %3340 = vst.msk [vmem:[#allocation5 + $0x50] sm:$0xff] %vm3329_vm7, %v3302_v30  ;;  %4171 = vrot.lane.b32.xlu1 %v12184_v32, %s10789_s26  ;;  %v13213_v32 = vld [vmem:[#allocation3 + $0x70] sm:$0xf]  ;;  %v4316_v54 = vrot.slane %v4314_v61, 5  ;;  %v13231_v23 = vrot.slane %v4320_v22, 5 }
 0x31d   : > { %4169 = vrot.lane.b32.xlu0 %v12191_v9, %s10789_s26  ;;  %v4437_v9 = vor.u32 %v4436_v57, %v4433_v20  ;;  %v4512_v49 = vshll.u32 %v13213_v32, 16  ;;  %v4231_v16 = vld [vmem:[#allocation3 + $0x14] sm:$0x1]  ;;  %v4289_v30 = vrot.slane %v4287_v3, 4  ;;  %v4292_v2 = vrot.slane %v4290_v28, 5 }
 0x31e   : > { %v13233_v5 = vrot.slane %v4296_v33, 5  ;;  %v4302_v27 = vrot.slane %v4300_v56, 4  ;;  %v4228_v57 = vld [vmem:[#allocation3 + $0x8] sm:$0x1]  ;;  %v4516_v12 = vshrl.u32 %v13213_v32, 16  ;;  %v4488_v40 = vshll.u32 %v4251_v45, 16 }
 0x31f   : > { %v3308_v17 = vpop.permute.xlu1 %3307  ;;  %v3306_v50 = vpop.permute.xlu0 %3305  ;;  %v13240_v13 = vrot.slane %v4437_v9, 4  ;;  %v13247_v61 = vrot.slane %v4450_v0, 5  ;;  %v13249_v22 = vrot.slane %v4503_v14, 4  ;;  %v4492_v3 = vshrl.u32 %v4251_v45, 16  ;;  %v4265_v53 = vld [vmem:[#allocation3 + $0x9c] sm:$0xf] }
 0x320   : > { %3343 = vst.msk [vmem:[#allocation5 + $0x68] sm:$0xff] %vm3329_vm7, %v3308_v17  ;;  %3342 = vst.msk [vmem:[#allocation5 + $0x60] sm:$0xff] %vm3329_vm7, %v3306_v50  ;;  %4175 = vrot.lane.b32.xlu1 %v12263_v25, %s10789_s26  ;;  %v4326_v25 = vrot.slane %v4324_v10, 4  ;;  %v13251_v10 = vrot.slane %v4506_v24, 5  ;;  %v4250_v17 = vld [vmem:[#allocation3 + $0x60] sm:$0xf]  ;;  %v4317_v32 = vor.u32 %v4316_v54, %v4313_v41  ;;  %v4293_v9 = vor.u32 %v4292_v2, %v4289_v30 }
 0x321   : > { %4173 = vrot.lane.b32.xlu0 %v12272_v43, %s10789_s26  ;;  %v4467_v43 = vsel %vm11233_vm2, %v13216_v48, %v13166_v38  ;;  %v4330_v33 = vshll.u32 %v4231_v16, 16  ;;  %v13256_v56 = vrot.slane %v4512_v49, 5  ;;  %v4260_v50 = vld [vmem:[#allocation3 + $0x88] sm:$0xf]  ;;  %v4303_v0 = vor.u32 %v4302_v27, %v13233_v5  ;;  %v4255_v24 = vld [vmem:[#allocation3 + $0x74] sm:$0x1] }
 0x322   : > { %v3354_v44 = vld [vmem:[#allocation5 + $0x40] sm:$0xff]  ;;  %v3355_v7 = vld [vmem:[#allocation5 + $0x48] sm:$0xff]  ;;  %v4327_v28 = vor.u32 %v4326_v25, %v13231_v23  ;;  %v13259_v14 = vrot.slane %v4447_v31, 4  ;;  %v4479_v54 = vshrl.u32 %v4250_v17, 16  ;;  %v4482_v25 = vshll.u32 %v4250_v17, 16 }
 0x323   : > { %10496 = vmatprep.mubr.msk.bf16.mxu1 %vm3389_vm9, %v3354_v44  ;;  %v3312_v46 = vpop.permute.xlu1 %3311  ;;  %v3310_v37 = vpop.permute.xlu0 %3309  ;;  %v3356_v20 = vld [vmem:[#allocation5 + $0x50] sm:$0xff]  ;;  %v4252_v41 = vld [vmem:[#allocation3 + $0x68] sm:$0x1]  ;;  %v3357_v49 = vld [vmem:[#allocation5 + $0x58] sm:$0xff]  ;;  %v4494_v16 = vrot.slane %v4492_v3, 4  ;;  %v4560_v2 = vshll.u32 %v4260_v50, 16  ;;  %v4509_v3 = vor.u32 %v13251_v10, %v13249_v22 }
 0x324   : > { %10497 = vmatmul.mubr.msk.bf16.gmra.mrb[16].mxu1 %vm3389_vm9, %v3355_v7  ;;  %3345 = vst.msk [vmem:[#allocation5 + $0x78] sm:$0xff] %vm3329_vm7, %v3312_v46  ;;  %3344 = vst.msk [vmem:[#allocation5 + $0x70] sm:$0xff] %vm3329_vm7, %v3310_v37  ;;  %4179 = vrot.lane.b32.xlu1 %v12347_v42, %s10789_s26  ;;  %v4259_v42 = vld [vmem:[#allocation3 + $0x84] sm:$0xf]  ;;  %v4306_v7 = vshll.u32 %v4228_v57, 16  ;;  %v13262_v46 = vrot.slane %v4488_v40, 5 }
 0x325   : > { %10500 = vmatprep.mubr.msk.bf16.mxu1 %vm3389_vm9, %v3356_v20  ;;  %4177 = vrot.lane.b32.xlu0 %v12360_v6, %s10789_s26  ;;  %v4518_v6 = vrot.slane %v4516_v12, 4  ;;  %v4551_v30 = vshrl.u32 %v4259_v42, 16  ;;  %v4554_v31 = vshll.u32 %v4259_v42, 16  ;;  %v4318_v37 = vrot.slane %v4317_v32, 4  ;;  %v4263_v38 = vld [vmem:[#allocation3 + $0x94] sm:$0xf] }
 0x326   : > { %v4328_v20 = vrot.slane %v4327_v28, 4  ;;  %v4332_v57 = vrot.slane %v4330_v33, 5  ;;  %v4564_v12 = vshrl.u32 %v4260_v50, 16  ;;  %v4294_v17 = vrot.slane %v4293_v9, 4  ;;  %v10704_v28 = vld [vmem:[#allocation3 + $0xe4] sm:$0xff]  }
 0x327   : > { %v3955_v44 = vpop.permute.xlu1 %3954  ;;  %v3953_v45 = vpop.permute.xlu0 %3952  ;;  %v3358_v27 = vld [vmem:[#allocation5 + $0x60] sm:$0xff]  ;;  %v4484_v32 = vrot.slane %v4482_v25, 5  ;;  %v4495_v33 = vor.u32 %v4494_v16, %v13262_v46  ;;  %v4498_v50 = vshll.u32 %v4252_v41, 16  ;;  %v4553_v9 = vrot.slane %v4551_v30, 4 }
 0x328   : > { %4001 = vst.msk [vmem:[#allocation6 + $0x8] sm:$0xff] %vm16217_vm3, %v3955_v44  ;;  %4000 = vst.msk [vmem:[#allocation6] sm:$0xff] %vm16217_vm3, %v3953_v45  ;;  %4183 = vrot.lane.b32.xlu1 %v12421_v11, %s10789_s26  ;;  %v4304_v11 = vrot.slane %v4303_v0, 4  ;;  %v4308_v44 = vrot.slane %v4306_v7, 5  ;;  %v4522_v45 = vshll.u32 %v4255_v24, 16  ;;  %v4556_v0 = vrot.slane %v4554_v31, 5 }
 0x329   : > { %4181 = vrot.lane.b32.xlu0 %v12434_v39, %s10789_s26  ;;  %v4519_v39 = vor.u32 %v4518_v6, %v13256_v56  ;;  %v4323_v22 = vsel %vm11233_vm2, %v4318_v37, %v13231_v23  ;;  %v4333_v10 = vsel %vm11233_vm2, %v4328_v20, %v4332_v57  ;;  %v13286_v7 = vrot.slane %v4560_v2, 5  ;;  %v4256_v2 = vld [vmem:[#allocation3 + $0x78] sm:$0xf] }
 0x32a   : > { %v4566_v24 = vrot.slane %v4564_v12, 4  ;;  %v4299_v6 = vsel %vm11233_vm2, %v4294_v17, %v13233_v5  ;;  %v4309_v41 = vsel %vm11233_vm2, %v4304_v11, %v4308_v44  ;;  %v13297_v23 = vrot.slane %v4509_v3, 4  ;;  %v4258_v17 = vld [vmem:[#allocation3 + $0x80] sm:$0x1] }
 0x32b   : > { %v3959_v40 = vpop.permute.xlu1 %3958  ;;  %v3957_v42 = vpop.permute.xlu0 %3956  ;;  %v4443_v16 = vsel %vm11233_vm2, %v13240_v13, %v13207_v62  ;;  %v4453_v5 = vsel %vm11233_vm2, %v13259_v14, %v13247_v61  ;;  %v4520_v30 = vrot.slane %v4519_v39, 4  ;;  %v4524_v31 = vrot.slane %v4522_v45, 5  ;;  %v3360_v62 = vld [vmem:[#allocation5 + $0x70] sm:$0xff] }
 0x32c   : > { %10501 = vmatmul.mubr.msk.bf16.gmra.mrb[20].mxu1 %vm3389_vm9, %v3357_v49  ;;  %4003 = vst.msk [vmem:[#allocation6 + $0x18] sm:$0xff] %vm16217_vm3, %v3959_v40  ;;  %v4481_v49 = vrot.slane %v4479_v54, 4  ;;  %4002 = vst.msk [vmem:[#allocation6 + $0x10] sm:$0xff] %vm16217_vm3, %v3957_v42  ;;  %4187 = vrot.lane.b32.xlu1 %v13036_v34, %s10789_s26  ;;  %v4261_v54 = vld [vmem:[#allocation3 + $0x8c] sm:$0x1]  ;;  %v4496_v20 = vrot.slane %v4495_v33, 4  ;;  %v10066_v13 = vcombine.low %v4299_v6, %v4309_v41 }
 0x32d   : > { %10504 = vmatprep.mubr.msk.bf16.mxu1 %vm3389_vm9, %v3358_v27  ;;  %4185 = vrot.lane.b32.xlu0 %v12974_v47, %s10789_s26  ;;  %v4477_v47 = vsel %vm11233_vm2, %v13218_v58, %v13205_v26  ;;  %v4257_v26 = vld [vmem:[#allocation3 + $0x7c] sm:$0xf]  ;;  %v3359_v58 = vld [vmem:[#allocation5 + $0x68] sm:$0xff]  ;;  %v13310_v27 = vcombine.low %v4323_v22, %v4333_v10  ;;  %v4500_v57 = vrot.slane %v4498_v50, 5  ;;  %v4557_v61 = vor.u32 %v4556_v0, %v4553_v9 }
 0x32e   : > { %v4485_v37 = vor.u32 %v4484_v32, %v4481_v49  ;;  %v4567_v14 = vor.u32 %v4566_v24, %v13286_v7  ;;  %v4570_v12 = vshll.u32 %v4261_v54, 16  ;;  %v4527_v11 = vshrl.u32 %v4256_v2, 16  ;;  %v4262_v0 = vld [vmem:[#allocation3 + $0x90] sm:$0xf] }
 0x32f   : > { %v3963_v34 = vpop.permute.xlu1 %3962  ;;  %v3961_v25 = vpop.permute.xlu0 %3960  ;;  %v4530_v44 = vshll.u32 %v4256_v2, 16  ;;  %v4536_v3 = vshll.u32 %v4257_v26, 16  ;;  %v4540_v42 = vshrl.u32 %v4257_v26, 16  ;;  %v13340_v45 = vcombine.low %v4395_v29, %v4405_v18  ;;  %v4266_v18 = vld [vmem:[#allocation3 + $0xa0] sm:$0xf] }
 0x330   : > { %4005 = vst.msk [vmem:[#allocation6 + $0x28] sm:$0xff] %vm16217_vm3, %v3963_v34  ;;  %4004 = vst.msk [vmem:[#allocation6 + $0x20] sm:$0xff] %vm16217_vm3, %v3961_v25  ;;  %4191 = vrot.lane.b32.xlu1 %v10704_v28, %s10789_s26  ;;  %v13347_v15 = vcombine.low %v4467_v43, %v4477_v47  ;;  %v13349_v19 = vcombine.low %v4443_v16, %v4453_v5  ;;  %v4515_v1 = vsel %vm11233_vm2, %v13297_v23, %v13256_v56  ;;  %v3361_v43 = vld [vmem:[#allocation5 + $0x78] sm:$0xff]  ;;  %v4269_v16 = vld [vmem:[#allocation3 + $0xac] sm:$0xf] }
 0x331   : > { %4189 = vrot.lane.b32.xlu0 %v13105_v52, %s10789_s26  ;;  %v13328_v52 = vcombine.low %v4419_v60, %v4429_v4  ;;  %v4525_v36 = vsel %vm11233_vm2, %v4520_v30, %v4524_v31  ;;  %v4486_v8 = vrot.slane %v4485_v37, 4  ;;  %v4501_v59 = vsel %vm11233_vm2, %v4496_v20, %v4500_v57  ;;  %v4267_v25 = vld [vmem:[#allocation3 + $0xa4] sm:$0x1]  ;;  %v4272_v37 = vld [vmem:[#allocation3 + $0xb8] sm:$0xf]  ;;  %s10802_s26 = smov 96  }
 0x332   : > { %v13363_v51 = vrot.slane %v4557_v61, 4  ;;  %v13365_v60 = vrot.slane %v4567_v14, 4  ;;  %v13367_v4 = vrot.slane %v4570_v12, 5  ;;  %v4546_v29 = vshll.u32 %v4258_v17, 16  ;;  %v4268_v17 = vld [vmem:[#allocation3 + $0xa8] sm:$0xf] }
 0x333   : > { %v3967_v40 = vpop.permute.xlu1 %3966  ;;  %v3965_v39 = vpop.permute.xlu0 %3964  ;;  %v13369_v56 = vrot.slane %v4527_v11, 4  ;;  %v13371_v49 = vrot.slane %v4530_v44, 5  ;;  %v13373_v32 = vrot.slane %v4536_v3, 5  ;;  %v4542_v28 = vrot.slane %v4540_v42, 4 }
 0x334   : > { %10505 = vmatmul.mubr.msk.bf16.gmra.mrb[24].mxu1 %vm3389_vm9, %v3359_v58  ;;  %4007 = vst.msk [vmem:[#allocation6 + $0x38] sm:$0xff] %vm16217_vm3, %v3967_v40  ;;  %4006 = vst.msk [vmem:[#allocation6 + $0x30] sm:$0xff] %vm16217_vm3, %v3965_v39  ;;  %4720 = vrot.lane.b32.xlu1 %v13310_v27, %s10780_s16  ;;  %v4599_v50 = vshrl.u32 %v4265_v53, 16  ;;  %v4602_v9 = vshll.u32 %v4265_v53, 16  ;;  %v4584_v22 = vshll.u32 %v4263_v38, 16  ;;  %v4588_v10 = vshrl.u32 %v4263_v38, 16 }
 0x335   : > { %10508 = vmatprep.mubr.msk.bf16.mxu1 %vm3389_vm9, %v3360_v62  ;;  %4718 = vrot.lane.b32.xlu0 %v10066_v13, %s10780_s16  ;;  %v13379_v24 = vcombine.low %v4515_v1, %v4525_v36  ;;  %v4491_v34 = vsel %vm11233_vm2, %v4486_v8, %v13262_v46  ;;  %v4608_v6 = vshll.u32 %v4266_v18, 16  ;;  %v4612_v41 = vshrl.u32 %v4266_v18, 16  ;;  %v4271_v58 = vld [vmem:[#allocation3 + $0xb4] sm:$0xf]  ;;  %v4264_v13 = vld [vmem:[#allocation3 + $0x98] sm:$0x1] }
 0x336   : > { %v13387_v47 = vcombine.low %v4491_v34, %v4501_v59  ;;  %v4563_v23 = vsel %vm11233_vm2, %v13363_v51, %v13286_v7  ;;  %v4573_v54 = vsel %vm11233_vm2, %v13365_v60, %v13367_v4  ;;  %v13397_v46 = vrot.slane %v4546_v29, 5 }
 0x337   : > { %v3971_v48 = vpop.permute.xlu1 %3970  ;;  %v3969_v33 = vpop.permute.xlu0 %3968  ;;  %v4533_v30 = vor.u32 %v13371_v49, %v13369_v56  ;;  %v4543_v31 = vor.u32 %v4542_v28, %v13373_v32  ;;  %v4575_v2 = vshrl.u32 %v4262_v0, 16  ;;  %v4578_v26 = vshll.u32 %v4262_v0, 16  ;;  %v4273_v28 = vld [vmem:[#allocation3 + $0xbc] sm:$0x1] }
 0x338   : > { %4009 = vst.msk [vmem:[#allocation6 + $0x48] sm:$0xff] %vm16217_vm3, %v3971_v48  ;;  %4008 = vst.msk [vmem:[#allocation6 + $0x40] sm:$0xff] %vm16217_vm3, %v3969_v33  ;;  %4724 = vrot.lane.b32.xlu1 %v13175_v55, %s10780_s16  ;;  %v4601_v57 = vrot.slane %v4599_v50, 4  ;;  %v4604_v62 = vrot.slane %v4602_v9, 5  ;;  %v13403_v61 = vrot.slane %v4584_v22, 5  ;;  %v4590_v14 = vrot.slane %v4588_v10, 4 }
 0x339   : > { %4722 = vrot.lane.b32.xlu0 %v13180_v21, %s10780_s16  ;;  %v13408_v12 = vrot.slane %v4608_v6, 5  ;;  %v4614_v40 = vrot.slane %v4612_v41, 4  ;;  %v4632_v11 = vshll.u32 %v4269_v16, 16  ;;  %v4636_v44 = vshrl.u32 %v4269_v16, 16  ;;  %v4270_v6 = vld [vmem:[#allocation3 + $0xb0] sm:$0x1] }
 0x33a   : > { %v4647_v3 = vshrl.u32 %v4271_v58, 16  ;;  %v4650_v42 = vshll.u32 %v4271_v58, 16  ;;  %v4656_v39 = vshll.u32 %v4272_v37, 16  ;;  %v4660_v1 = vshrl.u32 %v4272_v37, 16 }
 0x33b   : > { %v3975_v5 = vpop.permute.xlu1 %3974  ;;  %v3973_v20 = vpop.permute.xlu0 %3972  ;;  %v4544_v8 = vrot.slane %v4543_v31, 4  ;;  %v4618_v59 = vshll.u32 %v4267_v25, 16  ;;  %v4577_v53 = vrot.slane %v4575_v2, 4  ;;  %v4580_v38 = vrot.slane %v4578_v26, 5 }
 0x33c   : > { %10509 = vmatmul.mubr.msk.bf16.gmra.mrb[28].mxu1 %vm3389_vm9, %v3361_v43  ;;  %4011 = vst.msk [vmem:[#allocation6 + $0x58] sm:$0xff] %vm16217_vm3, %v3975_v5  ;;  %4010 = vst.msk [vmem:[#allocation6 + $0x50] sm:$0xff] %vm16217_vm3, %v3973_v20  ;;  %4728 = vrot.lane.b32.xlu1 %v13328_v52, %s10780_s16  ;;  %v4605_v18 = vor.u32 %v4604_v62, %v4601_v57  ;;  %v4591_v48 = vor.u32 %v4590_v14, %v13403_v61  ;;  %v4594_v43 = vshll.u32 %v4264_v13, 16  ;;  %vm4069_vm9 = vcmask 359744  }
 0x33d   : > { %4726 = vrot.lane.b32.xlu0 %v13340_v45, %s10780_s16  ;;  %v4623_v56 = vshrl.u32 %v4268_v17, 16  ;;  %v4615_v49 = vor.u32 %v4614_v40, %v13408_v12  ;;  %v4626_v33 = vshll.u32 %v4268_v17, 16  ;;  %v13418_v50 = vrot.slane %v4632_v11, 5 }
 0x33e   : > { %v4638_v9 = vrot.slane %v4636_v44, 4  ;;  %v4649_v0 = vrot.slane %v4647_v3, 4  ;;  %v4652_v22 = vrot.slane %v4650_v42, 5  ;;  %v13422_v10 = vrot.slane %v4656_v39, 5 }
 0x33f   : > { %v3979_v36 = vpop.permute.xlu1 %3978  ;;  %v3977_v29 = vpop.permute.xlu0 %3976  ;;  %v4662_v34 = vrot.slane %v4660_v1, 4  ;;  %v4534_v25 = vrot.slane %v4533_v30, 4  ;;  %v4549_v16 = vsel %vm11233_vm2, %v4544_v8, %v13397_v46  ;;  %v4620_v5 = vrot.slane %v4618_v59, 5 }
 0x340   : > { %4013 = vst.msk [vmem:[#allocation6 + $0x68] sm:$0xff] %vm16217_vm3, %v3979_v36  ;;  %4012 = vst.msk [vmem:[#allocation6 + $0x60] sm:$0xff] %vm16217_vm3, %v3977_v29  ;;  %4732 = vrot.lane.b32.xlu1 %v13347_v15, %s10780_s16  ;;  %v4581_v31 = vor.u32 %v4580_v38, %v4577_v53  ;;  %v4592_v26 = vrot.slane %v4591_v48, 4  ;;  %v4596_v58 = vrot.slane %v4594_v43, 5  ;;  %v4666_v37 = vshll.u32 %v4273_v28, 16 }
 0x341   : > { %4730 = vrot.lane.b32.xlu0 %v13349_v19, %s10780_s16  ;;  %v4625_v20 = vrot.slane %v4623_v56, 4  ;;  %v4628_v30 = vrot.slane %v4626_v33, 5  ;;  %v4639_v57 = vor.u32 %v4638_v9, %v13418_v50  ;;  %v4642_v62 = vshll.u32 %v4270_v6, 16 }
 0x342   : > { %v4606_v13 = vrot.slane %v4605_v18, 4  ;;  %v4616_v14 = vrot.slane %v4615_v49, 4  ;;  %v4653_v40 = vor.u32 %v4652_v22, %v4649_v0  ;;  %v4663_v17 = vor.u32 %v4662_v34, %v13422_v10 }
 0x343   : > { %v3983_v41 = vpop.permute.xlu1 %3982  ;;  %v3981_v2 = vpop.permute.xlu0 %3980  ;;  %v13449_v3 = vcombine.low %v4563_v23, %v4573_v54  ;;  %v4539_v42 = vsel %vm11233_vm2, %v4534_v25, %v13373_v32  ;;  %v4582_v4 = vrot.slane %v4581_v31, 4  ;;  %v4668_v8 = vrot.slane %v4666_v37, 5  ;;  %v4275_v25 = vld [vmem:[#allocation3 + $0xc4] sm:$0xf] }
 0x344   : > { %4015 = vst.msk [vmem:[#allocation6 + $0x78] sm:$0xff] %vm16217_vm3, %v3983_v41  ;;  %4014 = vst.msk [vmem:[#allocation6 + $0x70] sm:$0xff] %vm16217_vm3, %v3981_v2  ;;  %4736 = vrot.lane.b32.xlu1 %v13379_v24, %s10780_s16  ;;  %v13457_v36 = vcombine.low %v4539_v42, %v4549_v16  ;;  %v4621_v60 = vsel %vm11233_vm2, %v4616_v14, %v4620_v5  ;;  %v4597_v51 = vsel %vm11233_vm2, %v4592_v26, %v4596_v58  ;;  %vm7350_vm3 = vcmask 654944  }
 0x345   : > { %4734 = vrot.lane.b32.xlu0 %v13387_v47, %s10780_s16  ;;  %v4629_v32 = vor.u32 %v4628_v30, %v4625_v20  ;;  %v4640_v23 = vrot.slane %v4639_v57, 4  ;;  %v4644_v54 = vrot.slane %v4642_v62, 5  ;;  %v4611_v59 = vsel %vm11233_vm2, %v4606_v13, %v13408_v12  ;;  %v4276_v62 = vld [vmem:[#allocation3 + $0xc8] sm:$0x1] }
 0x346   : > { %v4654_v53 = vrot.slane %v4653_v40, 4  ;;  %v4664_v38 = vrot.slane %v4663_v17, 4  ;;  %v13473_v18 = vcombine.low %v4611_v59, %v4621_v60  ;;  %v4587_v48 = vsel %vm11233_vm2, %v4582_v4, %v13403_v61 }
 0x347   : > { %v13432_v46 = vpop.f32.mrb[0].mxu1  ;;  %v4024_v11 = vpop.permute.xlu1 %4023  ;;  %v13479_v56 = vcombine.low %v4587_v48, %v4597_v51  ;;  %v4630_v12 = vrot.slane %v4629_v32, 4  ;;  %v4645_v28 = vsel %vm11233_vm2, %v4640_v23, %v4644_v54  ;;  %v4792_v31 = vshll.u32 %v4275_v25, 16 }
 0x348   : > { %v13437_v44 = vpop.f32.mrb[1].mxu1  ;;  %4071 = vst.msk [vmem:[#allocation6 + $0x8] sm:$0xff] %vm4069_vm9, %v4024_v11  ;;  %v4022_v1 = vpop.permute.xlu0 %4021  ;;  %4740 = vrot.lane.b32.xlu1 %v13449_v3, %s10780_s16  ;;  %v4669_v49 = vsel %vm11233_vm2, %v4664_v38, %v4668_v8  ;;  %v4659_v61 = vsel %vm11233_vm2, %v4654_v53, %v13422_v10  ;;  %v4796_v2 = vshrl.u32 %v4275_v25, 16  ;;  %v4802_v42 = vshll.u32 %v4276_v62, 16 }
 0x349   : > { %v13455_v39 = vpop.f32.mrb[2].mxu1  ;;  %4070 = vst.msk [vmem:[#allocation6] sm:$0xff] %vm4069_vm9, %v4022_v1  ;;  %4738 = vrot.lane.b32.xlu0 %v13457_v36, %s10780_s16  ;;  %v13493_v9 = vcombine.low %v4659_v61, %v4669_v49  ;;  %v4635_v0 = vsel %vm11233_vm2, %v4630_v12, %v13418_v50  ;;  %v4794_v30 = vrot.slane %v4792_v31, 5 }
 0x34a   : > { %v13464_v7 = vpop.f32.mrb[3].mxu1  ;;  %v13499_v34 = vcombine.low %v4635_v0, %v4645_v28  ;;  %v4798_v57 = vrot.slane %v4796_v2, 4  ;;  %v4804_v54 = vrot.slane %v4802_v42, 5 }
 0x34b   : > { %v4028_v29 = vpop.permute.xlu1 %4027 }
 0x34c   : > { %4073 = vst.msk [vmem:[#allocation6 + $0x18] sm:$0xff] %vm4069_vm9, %v4028_v29  ;;  %v4026_v43 = vpop.permute.xlu0 %4025  ;;  %4744 = vrot.lane.b32.xlu1 %v13473_v18, %s10780_s16  ;;  %v4799_v11 = vor.u32 %v4798_v57, %v4794_v30 }
 0x34d   : > { %4072 = vst.msk [vmem:[#allocation6 + $0x10] sm:$0xff] %vm4069_vm9, %v4026_v43  ;;  %4742 = vrot.lane.b32.xlu0 %v13479_v56, %s10780_s16 }
 0x34e   : > { %v4800_v23 = vrot.slane %v4799_v11, 4 }
 0x34f   : > { %v4032_v33 = vpop.permute.xlu1 %4031 }
 0x350   : > { %4075 = vst.msk [vmem:[#allocation6 + $0x28] sm:$0xff] %vm4069_vm9, %v4032_v33  ;;  %v4030_v22 = vpop.permute.xlu0 %4029  ;;  %4748 = vrot.lane.b32.xlu1 %v13493_v9, %s10780_s16  ;;  %v4805_v48 = vsel %vm11233_vm2, %v4800_v23, %v4804_v54 }
 0x351   : > { %4074 = vst.msk [vmem:[#allocation6 + $0x20] sm:$0xff] %vm4069_vm9, %v4030_v22  ;;  %4746 = vrot.lane.b32.xlu0 %v13499_v34, %s10780_s16 }
 0x353   : > { %v4036_v10 = vpop.permute.xlu1 %4035 }
 0x354   : > { %4077 = vst.msk [vmem:[#allocation6 + $0x38] sm:$0xff] %vm4069_vm9, %v4036_v10  ;;  %v4034_v6 = vpop.permute.xlu0 %4033  ;;  %4811 = vrot.lane.b32.xlu1 %v13180_v21, %s10777_s28 }
 0x355   : > { %4076 = vst.msk [vmem:[#allocation6 + $0x30] sm:$0xff] %vm4069_vm9, %v4034_v6  ;;  %4809 = vrot.lane.b32.xlu0 %v13310_v27, %s10777_s28  ;;  %v4274_v27 = vld [vmem:[#allocation3 + $0xc0] sm:$0xf]  ;;  %v4277_v6 = vld [vmem:[#allocation3 + $0xcc] sm:$0xf] }
 0x356   : > { %v4783_v37 = vshrl.u32 %v4274_v27, 16  ;;  %v4786_v20 = vshll.u32 %v4274_v27, 16  ;;  %v4877_v25 = vshll.u32 %v4277_v6, 16  ;;  %v4279_v27 = vld [vmem:[#allocation3 + $0xd4] sm:$0x1] }
 0x357   : > { %v4040_v50 = vpop.permute.xlu1 %4039  ;;  %v4893_v62 = vshll.u32 %v4279_v27, 16 }
 0x358   : > { %4079 = vst.msk [vmem:[#allocation6 + $0x48] sm:$0xff] %vm4069_vm9, %v4040_v50  ;;  %v4038_v41 = vpop.permute.xlu0 %4037  ;;  %4815 = vrot.lane.b32.xlu1 %v13340_v45, %s10777_s28  ;;  %v4785_v40 = vrot.slane %v4783_v37, 4  ;;  %v4788_v17 = vrot.slane %v4786_v20, 5  ;;  %v4278_v50 = vld [vmem:[#allocation3 + $0xd0] sm:$0xf] }
 0x359   : > { %4078 = vst.msk [vmem:[#allocation6 + $0x40] sm:$0xff] %vm4069_vm9, %v4038_v41  ;;  %4813 = vrot.lane.b32.xlu0 %v13175_v55, %s10777_s28 }
 0x35a   : > { %v4789_v32 = vor.u32 %v4788_v17, %v4785_v40 }
 0x35b   : > { %v4044_v16 = vpop.permute.xlu1 %4043 }
 0x35c   : > { %4081 = vst.msk [vmem:[#allocation6 + $0x58] sm:$0xff] %vm4069_vm9, %v4044_v16  ;;  %v4042_v5 = vpop.permute.xlu0 %4041  ;;  %4819 = vrot.lane.b32.xlu1 %v13349_v19, %s10777_s28  ;;  %v4790_v29 = vrot.slane %v4789_v32, 4  ;;  %v4883_v16 = vshll.u32 %v4278_v50, 16 }
 0x35d   : > { %4080 = vst.msk [vmem:[#allocation6 + $0x50] sm:$0xff] %vm4069_vm9, %v4042_v5  ;;  %4817 = vrot.lane.b32.xlu0 %v13328_v52, %s10777_s28  ;;  %v4887_v5 = vshrl.u32 %v4278_v50, 16 }
 0x35e   : > { %v4795_v43 = vsel %vm11233_vm2, %v4790_v29, %v4794_v30  ;;  %v4885_v37 = vrot.slane %v4883_v16, 5 }
 0x35f   : > { %v4048_v26 = vpop.permute.xlu1 %4047  ;;  %v13560_v12 = vcombine.low %v4795_v43, %v4805_v48  ;;  %v4889_v20 = vrot.slane %v4887_v5, 4 }
 0x360   : > { %4083 = vst.msk [vmem:[#allocation6 + $0x68] sm:$0xff] %vm4069_vm9, %v4048_v26  ;;  %v4046_v58 = vpop.permute.xlu0 %4045  ;;  %4823 = vrot.lane.b32.xlu1 %v13387_v47, %s10777_s28 }
 0x361   : > { %4082 = vst.msk [vmem:[#allocation6 + $0x60] sm:$0xff] %vm4069_vm9, %v4046_v58  ;;  %4821 = vrot.lane.b32.xlu0 %v13347_v15, %s10777_s28  ;;  %v4879_v58 = vrot.slane %v4877_v25, 5  ;;  %v4890_v40 = vor.u32 %v4889_v20, %v4885_v37 }
 0x363   : > { %v4052_v13 = vpop.permute.xlu1 %4051  ;;  %v4891_v54 = vrot.slane %v4890_v40, 4 }
 0x364   : > { %4085 = vst.msk [vmem:[#allocation6 + $0x78] sm:$0xff] %vm4069_vm9, %v4052_v13  ;;  %v4050_v14 = vpop.permute.xlu0 %4049  ;;  %4827 = vrot.lane.b32.xlu1 %v13457_v36, %s10777_s28 }
 0x365   : > { %4084 = vst.msk [vmem:[#allocation6 + $0x70] sm:$0xff] %vm4069_vm9, %v4050_v14  ;;  %4825 = vrot.lane.b32.xlu0 %v13379_v24, %s10777_s28  ;;  %vm4209_vm9 = vcmask 687744  }
 0x367   : > { %v13534_v1 = vpop.f32.mrb[4].mxu1  ;;  %v4094_v60 = vpop.permute.xlu1 %4093 }
 0x368   : > { %v13538_v4 = vpop.f32.mrb[5].mxu1  ;;  %4141 = vst.msk [vmem:[#allocation6 + $0x8] sm:$0xff] %vm4139_vm11, %v4094_v60  ;;  %v4092_v51 = vpop.permute.xlu0 %4091  ;;  %4831 = vrot.lane.b32.xlu1 %v13479_v56, %s10777_s28 }
 0x369   : > { %v13541_v8 = vpop.f32.mrb[6].mxu1  ;;  %4140 = vst.msk [vmem:[#allocation6] sm:$0xff] %vm4139_vm11, %v4092_v51  ;;  %4829 = vrot.lane.b32.xlu0 %v13449_v3, %s10777_s28  ;;  %v4895_v51 = vrot.slane %v4893_v62, 5 }
 0x36a   : > { %v13546_v59 = vpop.f32.mrb[7].mxu1 }
 0x36b   : > { %v4098_v53 = vpop.permute.xlu1 %4097  ;;  %v4896_v29 = vsel %vm11233_vm2, %v4891_v54, %v4895_v51 }
 0x36c   : > { %4143 = vst.msk [vmem:[#allocation6 + $0x18] sm:$0xff] %vm4139_vm11, %v4098_v53  ;;  %v4096_v38 = vpop.permute.xlu0 %4095  ;;  %4835 = vrot.lane.b32.xlu1 %v13499_v34, %s10777_s28 }
 0x36d   : > { %4142 = vst.msk [vmem:[#allocation6 + $0x10] sm:$0xff] %vm4139_vm11, %v4096_v38  ;;  %4833 = vrot.lane.b32.xlu0 %v13473_v18, %s10777_s28 }
 0x36f   : > { %v4102_v49 = vpop.permute.xlu1 %4101 }
 0x370   : > { %4145 = vst.msk [vmem:[#allocation6 + $0x28] sm:$0xff] %vm4139_vm11, %v4102_v49  ;;  %v4100_v28 = vpop.permute.xlu0 %4099  ;;  %4839 = vrot.lane.b32.xlu1 %v13560_v12, %s10777_s28 }
 0x371   : > { %4144 = vst.msk [vmem:[#allocation6 + $0x20] sm:$0xff] %vm4139_vm11, %v4100_v28  ;;  %4837 = vrot.lane.b32.xlu0 %v13493_v9, %s10777_s28  ;;  %s10791_s28 = smov 64  }
 0x373   : > { %v4106_v61 = vpop.permute.xlu1 %4105 }
 0x374   : > { %4147 = vst.msk [vmem:[#allocation6 + $0x38] sm:$0xff] %vm4139_vm11, %v4106_v61  ;;  %v4104_v33 = vpop.permute.xlu0 %4103  ;;  %4902 = vrot.lane.b32.xlu1 %v13175_v55, %s10790_s23 }
 0x375   : > { %4146 = vst.msk [vmem:[#allocation6 + $0x30] sm:$0xff] %vm4139_vm11, %v4104_v33  ;;  %4900 = vrot.lane.b32.xlu0 %v13180_v21, %s10790_s23  ;;  %v4874_v21 = vshrl.u32 %v4277_v6, 16 }
 0x377   : > { %v4110_v0 = vpop.permute.xlu1 %4109  ;;  %v4876_v26 = vrot.slane %v4874_v21, 4 }
 0x378   : > { %4149 = vst.msk [vmem:[#allocation6 + $0x48] sm:$0xff] %vm4139_vm11, %v4110_v0  ;;  %v4108_v22 = vpop.permute.xlu0 %4107  ;;  %4906 = vrot.lane.b32.xlu1 %v13328_v52, %s10790_s23 }
 0x379   : > { %4148 = vst.msk [vmem:[#allocation6 + $0x40] sm:$0xff] %vm4139_vm11, %v4108_v22  ;;  %4904 = vrot.lane.b32.xlu0 %v13340_v45, %s10790_s23  ;;  %v4880_v14 = vor.u32 %v4879_v58, %v4876_v26  ;;  %v4280_v22 = vld [vmem:[#allocation3 + $0xd8] sm:$0xf]  ;;  %v4282_v58 = vld [vmem:[#allocation3 + $0xe0] sm:$0x1] }
 0x37a   : > { %v4966_v50 = vshrl.u32 %v4280_v22, 16 }
 0x37b   : > { %v4114_v10 = vpop.permute.xlu1 %4113  ;;  %v4881_v23 = vrot.slane %v4880_v14, 4 }
 0x37c   : > { %4151 = vst.msk [vmem:[#allocation6 + $0x58] sm:$0xff] %vm4139_vm11, %v4114_v10  ;;  %v4112_v41 = vpop.permute.xlu0 %4111  ;;  %4910 = vrot.lane.b32.xlu1 %v13347_v15, %s10790_s23  ;;  %v4281_v10 = vld [vmem:[#allocation3 + $0xdc] sm:$0xf]  ;;  %v4968_v5 = vrot.slane %v4966_v50, 4 }
 0x37d   : > { %4150 = vst.msk [vmem:[#allocation6 + $0x50] sm:$0xff] %vm4139_vm11, %v4112_v41  ;;  %4908 = vrot.lane.b32.xlu0 %v13349_v19, %s10790_s23  ;;  %v4886_v48 = vsel %vm11233_vm2, %v4881_v23, %v4885_v37  ;;  %v4969_v41 = vshll.u32 %v4280_v22, 16  ;;  %v4975_v21 = vshll.u32 %v4281_v10, 16  ;;  %v4979_v25 = vshrl.u32 %v4281_v10, 16 }
 0x37e   : > { %v13622_v49 = vcombine.low %v4886_v48, %v4896_v29 }
 0x37f   : > { %v4118_v31 = vpop.permute.xlu1 %4117  ;;  %v4981_v27 = vrot.slane %v4979_v25, 4 }
 0x380   : > { %4153 = vst.msk [vmem:[#allocation6 + $0x68] sm:$0xff] %vm4139_vm11, %v4118_v31  ;;  %v4116_v2 = vpop.permute.xlu0 %4115  ;;  %4914 = vrot.lane.b32.xlu1 %v13379_v24, %s10790_s23  ;;  %v4971_v31 = vrot.slane %v4969_v41, 5 }
 0x381   : > { %4152 = vst.msk [vmem:[#allocation6 + $0x60] sm:$0xff] %vm4139_vm11, %v4116_v2  ;;  %4912 = vrot.lane.b32.xlu0 %v13387_v47, %s10790_s23  ;;  %v4977_v2 = vrot.slane %v4975_v21, 5  ;;  %v13702_v21 = vld [vmem:[%s16172_s4] ss:$0 sm:$0xff] }
 0x382   : > { %v4972_v20 = vor.u32 %v4971_v31, %v4968_v5  ;;  %v3484_v25 = vadd.f32 %v13432_v46, %v13702_v21  ;;  %v3476_v46 = vadd.f32 %v13702_v21, %v13437_v44 }
 0x383   : > { %v4122_v30 = vpop.permute.xlu1 %4121 }
 0x384   : > { %4155 = vst.msk [vmem:[#allocation6 + $0x78] sm:$0xff] %vm4139_vm11, %v4122_v30  ;;  %v4120_v57 = vpop.permute.xlu0 %4119  ;;  %4918 = vrot.lane.b32.xlu1 %v13449_v3, %s10790_s23  ;;  %v4982_v30 = vor.u32 %v4981_v27, %v4977_v2 }
 0x385   : > { %4154 = vst.msk [vmem:[#allocation6 + $0x70] sm:$0xff] %vm4139_vm11, %v4120_v57  ;;  %4916 = vrot.lane.b32.xlu0 %v13457_v36, %s10790_s23  ;;  %v4985_v57 = vshll.u32 %v4282_v58, 16  ;;  %vm5132_vm11 = vcmask 720544  }
 0x387   : > { %v13596_v13 = vpop.f32.mrb[8].mxu1  ;;  %v4164_v17 = vpop.permute.xlu1 %4163  ;;  %v4987_v51 = vrot.slane %v4985_v57, 5 }
 0x388   : > { %v13600_v11 = vpop.f32.mrb[9].mxu1  ;;  %4211 = vst.msk [vmem:[#allocation6 + $0x8] sm:$0xff] %vm4209_vm9, %v4164_v17  ;;  %v4162_v60 = vpop.permute.xlu0 %4161  ;;  %4922 = vrot.lane.b32.xlu1 %v13473_v18, %s10790_s23  ;;  %v4973_v17 = vrot.slane %v4972_v20, 4 }
 0x389   : > { %v13603_v42 = vpop.f32.mrb[10].mxu1  ;;  %4210 = vst.msk [vmem:[#allocation6] sm:$0xff] %vm4209_vm9, %v4162_v60  ;;  %4920 = vrot.lane.b32.xlu0 %v13479_v56, %s10790_s23  ;;  %v4983_v60 = vrot.slane %v4982_v30, 4 }
 0x38a   : > { %v13608_v32 = vpop.f32.mrb[11].mxu1  ;;  %v4978_v48 = vsel %vm11233_vm2, %v4973_v17, %v4977_v2  ;;  %v3500_v2 = vadd.f32 %v13534_v1, %v13702_v21  ;;  %v3519_v30 = vadd.f32 %v13603_v42, %v13702_v21 }
 0x38b   : > { %v4168_v53 = vpop.permute.xlu1 %4167  ;;  %v3511_v17 = vadd.f32 %v13702_v21, %v13608_v32 }
 0x38c   : > { %4213 = vst.msk [vmem:[#allocation6 + $0x18] sm:$0xff] %vm4209_vm9, %v4168_v53  ;;  %v4166_v38 = vpop.permute.xlu0 %4165  ;;  %4926 = vrot.lane.b32.xlu1 %v13493_v9, %s10790_s23 }
 0x38d   : > { %4212 = vst.msk [vmem:[#allocation6 + $0x10] sm:$0xff] %vm4209_vm9, %v4166_v38  ;;  %4924 = vrot.lane.b32.xlu0 %v13499_v34, %s10790_s23 }
 0x38f   : > { %v4172_v43 = vpop.permute.xlu1 %4171 }
 0x390   : > { %4215 = vst.msk [vmem:[#allocation6 + $0x28] sm:$0xff] %vm4209_vm9, %v4172_v43  ;;  %v4170_v28 = vpop.permute.xlu0 %4169  ;;  %4930 = vrot.lane.b32.xlu1 %v13622_v49, %s10790_s23  ;;  %v4988_v43 = vsel %vm11233_vm2, %v4983_v60, %v4987_v51  ;;  %v3508_v51 = vadd.f32 %v13702_v21, %v13600_v11 }
 0x391   : > { %4214 = vst.msk [vmem:[#allocation6 + $0x20] sm:$0xff] %vm4209_vm9, %v4170_v28  ;;  %4928 = vrot.lane.b32.xlu0 %v13560_v12, %s10790_s23  ;;  %s10796_s23 = smov 52  }
 0x392   : > { %v3610_v32 = vmax.f32 %v3508_v51, 0.0 }
 0x393   : > { %v4176_v61 = vpop.permute.xlu1 %4175 }
 0x394   : > { %4217 = vst.msk [vmem:[#allocation6 + $0x38] sm:$0xff] %vm4209_vm9, %v4176_v61  ;;  %v4174_v33 = vpop.permute.xlu0 %4173  ;;  %4994 = vrot.lane.b32.xlu1 %v13340_v45, %s10791_s28 }
 0x395   : > { %4216 = vst.msk [vmem:[#allocation6 + $0x30] sm:$0xff] %vm4209_vm9, %v4174_v33  ;;  %4992 = vrot.lane.b32.xlu0 %v13175_v55, %s10791_s28  ;;  %v13682_v33 = vcombine.low %v4978_v48, %v4988_v43 }
 0x397   : > { %v4180_v0 = vpop.permute.xlu1 %4179 }
 0x398   : > { %4219 = vst.msk [vmem:[#allocation6 + $0x48] sm:$0xff] %vm4209_vm9, %v4180_v0  ;;  %v4178_v6 = vpop.permute.xlu0 %4177  ;;  %4998 = vrot.lane.b32.xlu1 %v13349_v19, %s10791_s28 }
 0x399   : > { %4218 = vst.msk [vmem:[#allocation6 + $0x40] sm:$0xff] %vm4209_vm9, %v4178_v6  ;;  %4996 = vrot.lane.b32.xlu0 %v13328_v52, %s10791_s28 }
 0x39b   : > { %v4184_v16 = vpop.permute.xlu1 %4183 }
 0x39c   : > { %4221 = vst.msk [vmem:[#allocation6 + $0x58] sm:$0xff] %vm4209_vm9, %v4184_v16  ;;  %v4182_v55 = vpop.permute.xlu0 %4181  ;;  %5002 = vrot.lane.b32.xlu1 %v13387_v47, %s10791_s28 }
 0x39d   : > { %4220 = vst.msk [vmem:[#allocation6 + $0x50] sm:$0xff] %vm4209_vm9, %v4182_v55  ;;  %5000 = vrot.lane.b32.xlu0 %v13347_v15, %s10791_s28  ;;  %v3604_v55 = vmax.f32 %v3484_v25, 0.0 }
 0x39f   : > { %v4188_v26 = vpop.permute.xlu1 %4187 }
 0x3a0   : > { %4223 = vst.msk [vmem:[#allocation6 + $0x68] sm:$0xff] %vm4209_vm9, %v4188_v26  ;;  %v4186_v37 = vpop.permute.xlu0 %4185  ;;  %5006 = vrot.lane.b32.xlu1 %v13457_v36, %s10791_s28  ;;  %v3495_v26 = vadd.f32 %v13702_v21, %v13546_v59 }
 0x3a1   : > { %4222 = vst.msk [vmem:[#allocation6 + $0x60] sm:$0xff] %vm4209_vm9, %v4186_v37  ;;  %5004 = vrot.lane.b32.xlu0 %v13379_v24, %s10791_s28  ;;  %v3492_v37 = vadd.f32 %v13702_v21, %v13538_v4 }
 0x3a2   : > { %v3607_v20 = vmax.f32 %v3495_v26, 0.0 }
 0x3a3   : > { %v4192_v62 = vpop.permute.xlu1 %4191  ;;  %v3606_v59 = vmax.f32 %v3492_v37, 0.0 }
 0x3a4   : > { %4225 = vst.msk [vmem:[#allocation6 + $0x78] sm:$0xff] %vm4209_vm9, %v4192_v62  ;;  %v4190_v14 = vpop.permute.xlu0 %4189  ;;  %5010 = vrot.lane.b32.xlu1 %v13479_v56, %s10791_s28  ;;  %v3516_v62 = vadd.f32 %v13596_v13, %v13702_v21 }
 0x3a5   : > { %4224 = vst.msk [vmem:[#allocation6 + $0x70] sm:$0xff] %vm4209_vm9, %v4190_v14  ;;  %5008 = vrot.lane.b32.xlu0 %v13449_v3, %s10791_s28  ;;  %v3613_v14 = vmax.f32 %v3519_v30, 0.0  ;;  %vm3762_vm9 = vcmask 97312  }
 0x3a6   : > { %v13658_v40 = vpop.f32.mrb[12].mxu1  ;;  %v3612_v42 = vmax.f32 %v3516_v62, 0.0 }
 0x3a7   : > { %v4721_v23 = vpop.permute.xlu1 %4720  ;;  %v13662_v54 = vpop.f32.mrb[13].mxu1  ;;  %v3532_v43 = vadd.f32 %v13658_v40, %v13702_v21 }
 0x3a8   : > { %4767 = vst.msk [vmem:[#allocation6 + $0x8] sm:$0xff] %vm2659_vm10, %v4721_v23  ;;  %v13665_v53 = vpop.f32.mrb[14].mxu1  ;;  %v4719_v38 = vpop.permute.xlu0 %4718  ;;  %5014 = vrot.lane.b32.xlu1 %v13499_v34, %s10791_s28  ;;  %v3611_v23 = vmax.f32 %v3511_v17, 0.0 }
 0x3a9   : > { %4766 = vst.msk [vmem:[#allocation6] sm:$0xff] %vm2659_vm10, %v4719_v38  ;;  %v13670_v29 = vpop.f32.mrb[15].mxu1  ;;  %5012 = vrot.lane.b32.xlu0 %v13473_v18, %s10791_s28  ;;  %v3535_v38 = vadd.f32 %v13665_v53, %v13702_v21  ;;  %v3616_v53 = vmax.f32 %v3532_v43, 0.0 }
 0x3ab   : > { %v4725_v28 = vpop.permute.xlu1 %4724 }
 0x3ac   : > { %4769 = vst.msk [vmem:[#allocation6 + $0x18] sm:$0xff] %vm2659_vm10, %v4725_v28  ;;  %v4723_v61 = vpop.permute.xlu0 %4722  ;;  %5018 = vrot.lane.b32.xlu1 %v13560_v12, %s10791_s28  ;;  %v3617_v28 = vmax.f32 %v3535_v38, 0.0 }
 0x3ad   : > { %4768 = vst.msk [vmem:[#allocation6 + $0x10] sm:$0xff] %vm2659_vm10, %v4723_v61  ;;  %5016 = vrot.lane.b32.xlu0 %v13493_v9, %s10791_s28  ;;  %v3527_v61 = vadd.f32 %v13702_v21, %v13670_v29 }
 0x3af   : > { %v4729_v0 = vpop.permute.xlu1 %4728 }
 0x3b0   : > { %4771 = vst.msk [vmem:[#allocation6 + $0x28] sm:$0xff] %vm2659_vm10, %v4729_v0  ;;  %v4727_v22 = vpop.permute.xlu0 %4726  ;;  %5022 = vrot.lane.b32.xlu1 %v13682_v33, %s10791_s28 }
 0x3b1   : > { %4770 = vst.msk [vmem:[#allocation6 + $0x20] sm:$0xff] %vm2659_vm10, %v4727_v22  ;;  %5020 = vrot.lane.b32.xlu0 %v13622_v49, %s10791_s28  ;;  %v3524_v22 = vadd.f32 %v13702_v21, %v13662_v54  ;;  %s10795_s28 = smov 88  }
 0x3b3   : > { %v4733_v10 = vpop.permute.xlu1 %4732 }
 0x3b4   : > { %4773 = vst.msk [vmem:[#allocation6 + $0x38] sm:$0xff] %vm2659_vm10, %v4733_v10  ;;  %v4731_v6 = vpop.permute.xlu0 %4730  ;;  %5086 = vrot.lane.b32.xlu1 %v13328_v52, %s10792_s25  ;;  %v3487_v52 = vadd.f32 %v13455_v39, %v13702_v21  ;;  %v3615_v10 = vmax.f32 %v3527_v61, 0.0 }
 0x3b5   : > { %4772 = vst.msk [vmem:[#allocation6 + $0x30] sm:$0xff] %vm2659_vm10, %v4731_v6  ;;  %5084 = vrot.lane.b32.xlu0 %v13340_v45, %s10792_s25 }
 0x3b7   : > { %v4737_v50 = vpop.permute.xlu1 %4736 }
 0x3b8   : > { %4775 = vst.msk [vmem:[#allocation6 + $0x48] sm:$0xff] %vm2659_vm10, %v4737_v50  ;;  %v4735_v41 = vpop.permute.xlu0 %4734  ;;  %5090 = vrot.lane.b32.xlu1 %v13347_v15, %s10792_s25  ;;  %v3605_v15 = vmax.f32 %v3487_v52, 0.0  ;;  %v3614_v50 = vmax.f32 %v3524_v22, 0.0 }
 0x3b9   : > { %4774 = vst.msk [vmem:[#allocation6 + $0x40] sm:$0xff] %vm2659_vm10, %v4735_v41  ;;  %5088 = vrot.lane.b32.xlu0 %v13349_v19, %s10792_s25  ;;  %v3479_v19 = vadd.f32 %v13702_v21, %v13464_v7  ;;  %v3602_v7 = vmax.f32 %v3476_v46, 0.0 }
 0x3bb   : > { %v4741_v45 = vpop.permute.xlu1 %4740 }
 0x3bc   : > { %4777 = vst.msk [vmem:[#allocation6 + $0x58] sm:$0xff] %vm2659_vm10, %v4741_v45  ;;  %v4739_v16 = vpop.permute.xlu0 %4738  ;;  %5094 = vrot.lane.b32.xlu1 %v13379_v24, %s10792_s25  ;;  %v3603_v24 = vmax.f32 %v3479_v19, 0.0 }
 0x3bd   : > { %4776 = vst.msk [vmem:[#allocation6 + $0x50] sm:$0xff] %vm2659_vm10, %v4739_v16  ;;  %5092 = vrot.lane.b32.xlu0 %v13387_v47, %s10792_s25  ;;  %v3503_v47 = vadd.f32 %v13541_v8, %v13702_v21  ;;  %v3608_v8 = vmax.f32 %v3500_v2, 0.0 }
 0x3bf   : > { %v4745_v39 = vpop.permute.xlu1 %4744  ;;  %v3609_v27 = vmax.f32 %v3503_v47, 0.0 }
 0x3c0   : > { %4779 = vst.msk [vmem:[#allocation6 + $0x68] sm:$0xff] %vm2659_vm10, %v4745_v39  ;;  %v4743_v5 = vpop.permute.xlu0 %4742  ;;  %3672 = vrot.lane.b32.xlu1 %v3605_v15, %s10780_s16 }
 0x3c1   : > { %4778 = vst.msk [vmem:[#allocation6 + $0x60] sm:$0xff] %vm2659_vm10, %v4743_v5  ;;  %3670 = vrot.lane.b32.xlu0 %v3604_v55, %s10780_s16 }
 0x3c3   : > { %v4749_v31 = vpop.permute.xlu1 %4748 }
 0x3c4   : > { %4781 = vst.msk [vmem:[#allocation6 + $0x78] sm:$0xff] %vm2659_vm10, %v4749_v31  ;;  %v4747_v44 = vpop.permute.xlu0 %4746  ;;  %3668 = vrot.lane.b32.xlu1 %v3603_v24, %s10780_s16 }
 0x3c5   : > { %4780 = vst.msk [vmem:[#allocation6 + $0x70] sm:$0xff] %vm2659_vm10, %v4747_v44  ;;  %3666 = vrot.lane.b32.xlu0 %v3602_v7, %s10780_s16  ;;  %vm4948_vm10 = vcmask 392544  }
 0x3c7   : > { %v4812_v58 = vpop.permute.xlu1 %4811 }
 0x3c8   : > { %4858 = vst.msk [vmem:[#allocation6 + $0x8] sm:$0xff] %vm2105_vm5, %v4812_v58  ;;  %v4810_v1 = vpop.permute.xlu0 %4809  ;;  %3680 = vrot.lane.b32.xlu1 %v3609_v27, %s10780_s16 }
 0x3c9   : > { %4857 = vst.msk [vmem:[#allocation6] sm:$0xff] %vm2105_vm5, %v4810_v1  ;;  %3678 = vrot.lane.b32.xlu0 %v3608_v8, %s10780_s16 }
 0x3cb   : > { %v4816_v57 = vpop.permute.xlu1 %4815 }
 0x3cc   : > { %4860 = vst.msk [vmem:[#allocation6 + $0x18] sm:$0xff] %vm2105_vm5, %v4816_v57  ;;  %v4814_v4 = vpop.permute.xlu0 %4813  ;;  %3676 = vrot.lane.b32.xlu1 %v3607_v20, %s10780_s16 }
 0x3cd   : > { %4859 = vst.msk [vmem:[#allocation6 + $0x10] sm:$0xff] %vm2105_vm5, %v4814_v4  ;;  %3674 = vrot.lane.b32.xlu0 %v3606_v59, %s10780_s16 }
 0x3cf   : > { %v4820_v60 = vpop.permute.xlu1 %4819 }
 0x3d0   : > { %4862 = vst.msk [vmem:[#allocation6 + $0x28] sm:$0xff] %vm2105_vm5, %v4820_v60  ;;  %v4818_v13 = vpop.permute.xlu0 %4817  ;;  %3688 = vrot.lane.b32.xlu1 %v3613_v14, %s10780_s16 }
 0x3d1   : > { %4861 = vst.msk [vmem:[#allocation6 + $0x20] sm:$0xff] %vm2105_vm5, %v4818_v13  ;;  %3686 = vrot.lane.b32.xlu0 %v3612_v42, %s10780_s16 }
 0x3d3   : > { %v4824_v48 = vpop.permute.xlu1 %4823 }
 0x3d4   : > { %4864 = vst.msk [vmem:[#allocation6 + $0x38] sm:$0xff] %vm2105_vm5, %v4824_v48  ;;  %v4822_v11 = vpop.permute.xlu0 %4821  ;;  %3684 = vrot.lane.b32.xlu1 %v3611_v23, %s10780_s16 }
 0x3d5   : > { %4863 = vst.msk [vmem:[#allocation6 + $0x30] sm:$0xff] %vm2105_vm5, %v4822_v11  ;;  %3682 = vrot.lane.b32.xlu0 %v3610_v32, %s10780_s16 }
 0x3d7   : > { %v4828_v0 = vpop.permute.xlu1 %4827 }
 0x3d8   : > { %4866 = vst.msk [vmem:[#allocation6 + $0x48] sm:$0xff] %vm2105_vm5, %v4828_v0  ;;  %v4826_v40 = vpop.permute.xlu0 %4825  ;;  %3696 = vrot.lane.b32.xlu1 %v3617_v28, %s10780_s16 }
 0x3d9   : > { %4865 = vst.msk [vmem:[#allocation6 + $0x40] sm:$0xff] %vm2105_vm5, %v4826_v40  ;;  %3694 = vrot.lane.b32.xlu0 %v3616_v53, %s10780_s16 }
 0x3db   : > { %v4832_v6 = vpop.permute.xlu1 %4831 }
 0x3dc   : > { %4868 = vst.msk [vmem:[#allocation6 + $0x58] sm:$0xff] %vm2105_vm5, %v4832_v6  ;;  %v4830_v29 = vpop.permute.xlu0 %4829  ;;  %3692 = vrot.lane.b32.xlu1 %v3615_v10, %s10780_s16 }
 0x3dd   : > { %4867 = vst.msk [vmem:[#allocation6 + $0x50] sm:$0xff] %vm2105_vm5, %v4830_v29  ;;  %3690 = vrot.lane.b32.xlu0 %v3614_v50, %s10780_s16 }
 0x3df   : > { %v4836_v54 = vpop.permute.xlu1 %4835 }
 0x3e0   : > { %4870 = vst.msk [vmem:[#allocation6 + $0x68] sm:$0xff] %vm2105_vm5, %v4836_v54  ;;  %v4834_v41 = vpop.permute.xlu0 %4833 }
 0x3e1   : > { %4869 = vst.msk [vmem:[#allocation6 + $0x60] sm:$0xff] %vm2105_vm5, %v4834_v41 }
 0x3e3   : > { %v4840_v52 = vpop.permute.xlu1 %4839 }
 0x3e4   : > { %4872 = vst.msk [vmem:[#allocation6 + $0x78] sm:$0xff] %vm2105_vm5, %v4840_v52  ;;  %v4838_v45 = vpop.permute.xlu0 %4837 }
 0x3e5   : > { %4871 = vst.msk [vmem:[#allocation6 + $0x70] sm:$0xff] %vm2105_vm5, %v4838_v45  ;;  %vm5040_vm5 = vcmask 556544  }
 0x3e7   : > { %v4903_v25 = vpop.permute.xlu1 %4902 }
 0x3e8   : > { %4950 = vst.msk [vmem:[#allocation6 + $0x8] sm:$0xff] %vm4948_vm10, %v4903_v25  ;;  %v4901_v16 = vpop.permute.xlu0 %4900 }
 0x3e9   : > { %4949 = vst.msk [vmem:[#allocation6] sm:$0xff] %vm4948_vm10, %v4901_v16 }
 0x3eb   : > { %v4907_v15 = vpop.permute.xlu1 %4906 }
 0x3ec   : > { %4952 = vst.msk [vmem:[#allocation6 + $0x18] sm:$0xff] %vm4948_vm10, %v4907_v15  ;;  %v4905_v19 = vpop.permute.xlu0 %4904 }
 0x3ed   : > { %4951 = vst.msk [vmem:[#allocation6 + $0x10] sm:$0xff] %vm4948_vm10, %v4905_v19 }
 0x3ef   : > { %v4911_v39 = vpop.permute.xlu1 %4910 }
 0x3f0   : > { %4954 = vst.msk [vmem:[#allocation6 + $0x28] sm:$0xff] %vm4948_vm10, %v4911_v39  ;;  %v4909_v55 = vpop.permute.xlu0 %4908 }
 0x3f1   : > { %4953 = vst.msk [vmem:[#allocation6 + $0x20] sm:$0xff] %vm4948_vm10, %v4909_v55 }
 0x3f3   : > { %v4915_v46 = vpop.permute.xlu1 %4914 }
 0x3f4   : > { %4956 = vst.msk [vmem:[#allocation6 + $0x38] sm:$0xff] %vm4948_vm10, %v4915_v46  ;;  %v4913_v5 = vpop.permute.xlu0 %4912 }
 0x3f5   : > { %4955 = vst.msk [vmem:[#allocation6 + $0x30] sm:$0xff] %vm4948_vm10, %v4913_v5 }
 0x3f7   : > { %v10498_v24 = vpop.f32.mrb[16].mxu1  ;;  %v4919_v7 = vpop.permute.xlu1 %4918 }
 0x3f8   : > { %v3548_v47 = vadd.f32 %v10498_v24, %v13702_v21  ;;  %v3539_v31 = vpop.f32.mrb[17].mxu1  ;;  %4958 = vst.msk [vmem:[#allocation6 + $0x48] sm:$0xff] %vm4948_vm10, %v4919_v7  ;;  %v4917_v8 = vpop.permute.xlu0 %4916 }
 0x3f9   : > { %v10499_v2 = vpop.f32.mrb[18].mxu1  ;;  %v3540_v27 = vadd.f32 %v13702_v21, %v3539_v31  ;;  %4957 = vst.msk [vmem:[#allocation6 + $0x40] sm:$0xff] %vm4948_vm10, %v4917_v8 }
 0x3fa   : > { %v3620_v44 = vmax.f32 %v3548_v47, 0.0  ;;  %v3551_v26 = vadd.f32 %v10499_v2, %v13702_v21  ;;  %v3542_v58 = vpop.f32.mrb[19].mxu1 }
 0x3fb   : > { %v3543_v1 = vadd.f32 %v13702_v21, %v3542_v58  ;;  %v4923_v20 = vpop.permute.xlu1 %4922  ;;  %v3618_v30 = vmax.f32 %v3540_v27, 0.0  ;;  %v4283_v27 = vld [vmem:[#allocation3 + $0xe4] sm:$0xf] }
 0x3fc   : > { %v3621_v37 = vmax.f32 %v3551_v26, 0.0  ;;  %3702 = vrot.lane.b32.xlu0 %v3620_v44, %s10780_s16  ;;  %4960 = vst.msk [vmem:[#allocation6 + $0x58] sm:$0xff] %vm4948_vm10, %v4923_v20  ;;  %v4921_v57 = vpop.permute.xlu0 %4920  ;;  %v4284_v26 = vld [vmem:[#allocation3 + $0xe8] sm:$0xf]  ;;  %v5061_v20 = vshll.u32 %v4283_v27, 16 }
 0x3fd   : > { %4959 = vst.msk [vmem:[#allocation6 + $0x50] sm:$0xff] %vm4948_vm10, %v4921_v57  ;;  %v3619_v62 = vmax.f32 %v3543_v1, 0.0  ;;  %v5058_v1 = vshrl.u32 %v4283_v27, 16  ;;  %v5071_v57 = vshrl.u32 %v4284_v26, 16  ;;  %v5155_v27 = vld [vmem:[#allocation3 + $0x18] sm:$0xe] }
 0x3fe   : > { %3704 = vrot.lane.b32.xlu1 %v3621_v37, %s10780_s16 }
 0x3ff   : > { %v10502_v59 = vpop.f32.mrb[20].mxu1  ;;  %v4927_v17 = vpop.permute.xlu1 %4926 }
 0x400   : > { %v3564_v4 = vadd.f32 %v10502_v59, %v13702_v21  ;;  %v3555_v14 = vpop.f32.mrb[21].mxu1  ;;  %3698 = vrot.lane.b32.xlu0 %v3618_v30, %s10780_s16  ;;  %4962 = vst.msk [vmem:[#allocation6 + $0x68] sm:$0xff] %vm4948_vm10, %v4927_v17  ;;  %v4925_v38 = vpop.permute.xlu0 %4924  ;;  %v5067_v30 = vshll.u32 %v4284_v26, 16  ;;  %v5063_v17 = vrot.slane %v5061_v20, 5 }
 0x401   : > { %v10503_v60 = vpop.f32.mrb[22].mxu1  ;;  %v3556_v51 = vadd.f32 %v13702_v21, %v3555_v14  ;;  %4961 = vst.msk [vmem:[#allocation6 + $0x60] sm:$0xff] %vm4948_vm10, %v4925_v38  ;;  %v5150_v38 = vld [vmem:[#allocation3 + $0x4] sm:$0xf] }
 0x402   : > { %v3624_v42 = vmax.f32 %v3564_v4, 0.0  ;;  %v3567_v13 = vadd.f32 %v10503_v60, %v13702_v21  ;;  %3700 = vrot.lane.b32.xlu1 %v3619_v62, %s10780_s16  ;;  %v3558_v23 = vpop.f32.mrb[23].mxu1  ;;  %v5069_v60 = vrot.slane %v5067_v30, 5  ;;  %v5158_v30 = vld [vmem:[#allocation3 + $0x24] sm:$0xe] }
 0x403   : > { %v3559_v32 = vadd.f32 %v13702_v21, %v3558_v23  ;;  %v4931_v43 = vpop.permute.xlu1 %4930  ;;  %v3622_v11 = vmax.f32 %v3556_v51, 0.0 }
 0x404   : > { %v3625_v48 = vmax.f32 %v3567_v13, 0.0  ;;  %3710 = vrot.lane.b32.xlu0 %v3624_v42, %s10780_s16  ;;  %4964 = vst.msk [vmem:[#allocation6 + $0x78] sm:$0xff] %vm4948_vm10, %v4931_v43  ;;  %v4929_v28 = vpop.permute.xlu0 %4928  ;;  %v5073_v42 = vrot.slane %v5071_v57, 4  ;;  %v4285_v13 = vld [vmem:[#allocation3 + $0xec] sm:$0x1] }
 0x405   : > { %4963 = vst.msk [vmem:[#allocation6 + $0x70] sm:$0xff] %vm4948_vm10, %v4929_v28  ;;  %v3623_v0 = vmax.f32 %v3559_v32, 0.0  ;;  %v5077_v43 = vshll.u32 %v4285_v13, 16  ;;  %vm5852_vm10 = vsmask.f32 2304 }
 0x406   : > { %3712 = vrot.lane.b32.xlu1 %v3625_v48, %s10780_s16  ;;  %v5074_v32 = vor.u32 %v5073_v42, %v5069_v60 }
 0x407   : > { %v10506_v61 = vpop.f32.mrb[24].mxu1  ;;  %v4995_v40 = vpop.permute.xlu1 %4994 }
 0x408   : > { %v3580_v53 = vadd.f32 %v10506_v61, %v13702_v21  ;;  %v3571_v22 = vpop.f32.mrb[25].mxu1  ;;  %3706 = vrot.lane.b32.xlu0 %v3622_v11, %s10780_s16  ;;  %5042 = vst.msk [vmem:[#allocation6 + $0x8] sm:$0xff] %vm5040_vm5, %v4995_v40  ;;  %v4993_v41 = vpop.permute.xlu0 %4992  ;;  %v5153_v11 = vld [vmem:[#allocation3 + $0x10] sm:$0xf]  ;;  %v5259_v61 = vrot.slane %v5150_v38, 5  ;;  %v5075_v40 = vrot.slane %v5074_v32, 4 }
 0x409   : > { %v10507_v10 = vpop.f32.mrb[26].mxu1  ;;  %v3572_v50 = vadd.f32 %v13702_v21, %v3571_v22  ;;  %5041 = vst.msk [vmem:[#allocation6] sm:$0xff] %vm5040_vm5, %v4993_v41  ;;  %v5169_v38 = vld [vmem:[#allocation3 + $0x50] sm:$0x1] }
 0x40a   : > { %v3628_v6 = vmax.f32 %v3580_v53, 0.0  ;;  %v3583_v29 = vadd.f32 %v10507_v10, %v13702_v21  ;;  %3708 = vrot.lane.b32.xlu1 %v3623_v0, %s10780_s16  ;;  %v3574_v54 = vpop.f32.mrb[27].mxu1  ;;  %v5149_v0 = vld [vmem:[#allocation3] sm:$0xe]  ;;  %v5151_v53 = vld [vmem:[#allocation3 + $0x8] sm:$0x1] }
 0x40b   : > { %v3575_v45 = vadd.f32 %v13702_v21, %v3574_v54  ;;  %v4999_v25 = vpop.permute.xlu1 %4998  ;;  %v3626_v16 = vmax.f32 %v3572_v50, 0.0  ;;  %v5079_v10 = vrot.slane %v5077_v43, 5  ;;  %v5266_v50 = vrot.slane %v5153_v11, 5 }
 0x40c   : > { %v3629_v52 = vmax.f32 %v3583_v29, 0.0  ;;  %3718 = vrot.lane.b32.xlu0 %v3628_v6, %s10780_s16  ;;  %5044 = vst.msk [vmem:[#allocation6 + $0x18] sm:$0xff] %vm5040_vm5, %v4999_v25  ;;  %v4997_v15 = vpop.permute.xlu0 %4996  ;;  %v5152_v6 = vld [vmem:[#allocation3 + $0xc] sm:$0xe]  ;;  %v10086_v54 = vrot.slane %v5149_v0, 9  ;;  %v5261_v41 = vrot.slane %v5259_v61, 4 }
 0x40d   : > { %5043 = vst.msk [vmem:[#allocation6 + $0x10] sm:$0xff] %vm5040_vm5, %v4997_v15  ;;  %v3627_v39 = vmax.f32 %v3575_v45, 0.0  ;;  %v10087_v45 = vrot.slane %v5152_v6, 9  ;;  %v5156_v25 = vld [vmem:[#allocation3 + $0x1c] sm:$0xf]  ;;  %v5268_v15 = vrot.slane %v5266_v50, 4 }
 0x40e   : > { %3720 = vrot.lane.b32.xlu1 %v3629_v52, %s10780_s16  ;;  %v5262_v52 = vrot.slane %v5151_v53, 5  ;;  %v5172_v6 = vld [vmem:[#allocation3 + $0x5c] sm:$0x1] }
 0x40f   : > { %v10510_v19 = vpop.f32.mrb[28].mxu1  ;;  %v5003_v5 = vpop.permute.xlu1 %5002 }
 0x410   : > { %v3596_v55 = vadd.f32 %v10510_v19, %v13702_v21  ;;  %v3587_v46 = vpop.f32.mrb[29].mxu1  ;;  %3714 = vrot.lane.b32.xlu0 %v3626_v16, %s10780_s16  ;;  %5046 = vst.msk [vmem:[#allocation6 + $0x28] sm:$0xff] %vm5040_vm5, %v5003_v5  ;;  %v5001_v2 = vpop.permute.xlu0 %5000  ;;  %v5263_v5 = vsel %vm11224_vm13, %v5261_v41, %v5262_v52 }
 0x411   : > { %v10511_v24 = vpop.f32.mrb[30].mxu1  ;;  %v3588_v31 = vadd.f32 %v13702_v21, %v3587_v46  ;;  %5045 = vst.msk [vmem:[#allocation6 + $0x20] sm:$0xff] %vm5040_vm5, %v5001_v2  ;;  %v5260_v46 = vsel %vm11224_vm13, %v10086_v54, %v5259_v61  ;;  %v5162_v2 = vld [vmem:[#allocation3 + $0x34] sm:$0xf]  ;;  %v5304_v54 = vrot.slane %v5169_v38, 5 }
 0x412   : > { %v3632_v47 = vmax.f32 %v3596_v55, 0.0  ;;  %3716 = vrot.lane.b32.xlu1 %v3627_v39, %s10780_s16  ;;  %v3590_v7 = vpop.f32.mrb[31].mxu1  ;;  %v3599_v44 = vadd.f32 %v10511_v24, %v13702_v21  ;;  %v5157_v39 = vld [vmem:[#allocation3 + $0x20] sm:$0x1]  ;;  %v5159_v55 = vld [vmem:[#allocation3 + $0x28] sm:$0xf] }
 0x413   : > { %v5007_v58 = vpop.permute.xlu1 %5006  ;;  %v3630_v8 = vmax.f32 %v3588_v31, 0.0  ;;  %v3591_v62 = vadd.f32 %v13702_v21, %v3590_v7  ;;  %v5273_v24 = vrot.slane %v5156_v25, 5  ;;  %v5160_v7 = vld [vmem:[#allocation3 + $0x2c] sm:$0x1]  ;;  %v5276_v26 = vrot.slane %v5157_v39, 5 }
 0x414   : > { %3726 = vrot.lane.b32.xlu0 %v3632_v47, %s10780_s16  ;;  %5048 = vst.msk [vmem:[#allocation6 + $0x38] sm:$0xff] %vm5040_vm5, %v5007_v58  ;;  %v5005_v37 = vpop.permute.xlu0 %5004  ;;  %v3633_v59 = vmax.f32 %v3599_v44, 0.0  ;;  %v5280_v58 = vrot.slane %v5159_v55, 5  ;;  %v5283_v57 = vrot.slane %v5160_v7, 5  ;;  %v5175_v25 = vld [vmem:[#allocation3 + $0x68] sm:$0x1] }
 0x415   : > { %5047 = vst.msk [vmem:[#allocation6 + $0x30] sm:$0xff] %vm5040_vm5, %v5005_v37  ;;  %v3631_v51 = vmax.f32 %v3591_v62, 0.0  ;;  %v5163_v37 = vld [vmem:[#allocation3 + $0x38] sm:$0x1]  ;;  %v5275_v20 = vrot.slane %v5273_v24, 4  ;;  %v5311_v55 = vrot.slane %v5172_v6, 5 }
 0x416   : > { %5098 = vrot.lane.b32.xlu1 %v13449_v3, %s10792_s25  ;;  %v5060_v3 = vrot.slane %v5058_v1, 4  ;;  %v5282_v42 = vrot.slane %v5280_v58, 4  ;;  %v5290_v13 = vrot.slane %v5163_v37, 5  ;;  %v5170_v39 = vld [vmem:[#allocation3 + $0x54] sm:$0xe] }
 0x417   : > { %v5011_v4 = vpop.permute.xlu1 %5010  ;;  %v13928_v7 = vld [vmem:[#allocation3 + $0x7c] sm:$0xf]  ;;  %v5181_v37 = vld [vmem:[#allocation3 + $0x80] sm:$0x1] }
 0x418   : > { %3722 = vrot.lane.b32.xlu0 %v3630_v8, %s10780_s16  ;;  %5050 = vst.msk [vmem:[#allocation6 + $0x48] sm:$0xff] %vm5040_vm5, %v5011_v4  ;;  %v5009_v14 = vpop.permute.xlu0 %5008  ;;  %v5064_v48 = vor.u32 %v5063_v17, %v5060_v3  ;;  %v13877_v8 = vld [vmem:[#allocation3 + $0x40] sm:$0xf]  ;;  %v5166_v3 = vld [vmem:[#allocation3 + $0x44] sm:$0x1]  ;;  %v5284_v43 = vsel %vm11224_vm13, %v5282_v42, %v5283_v57  ;;  %v5332_v38 = vrot.slane %v5181_v37, 5 }
 0x419   : > { %5049 = vst.msk [vmem:[#allocation6 + $0x40] sm:$0xff] %vm5040_vm5, %v5009_v14  ;;  %v10088_v14 = vrot.slane %v5155_v27, 9  ;;  %v5294_v17 = vrot.slane %v13877_v8, 5  ;;  %v5297_v61 = vrot.slane %v5166_v3, 5  ;;  %v5318_v27 = vrot.slane %v5175_v25, 5 }
 0x41a   : > { %3728 = vrot.lane.b32.xlu1 %v3633_v59, %s10780_s16  ;;  %v5065_v22 = vrot.slane %v5064_v48, 4  ;;  %v5287_v59 = vrot.slane %v5162_v2, 5  ;;  %v13892_v48 = vld [vmem:[#allocation3 + $0x58] sm:$0xf]  ;;  %v5184_v42 = vld [vmem:[#allocation3 + $0x8c] sm:$0x1] }
 0x41b   : > { %v5015_v21 = vpop.permute.xlu1 %5014  ;;  %v5308_v41 = vrot.slane %v13892_v48, 5 }
 0x41c   : > { %5096 = vrot.lane.b32.xlu0 %v13457_v36, %s10792_s25  ;;  %5052 = vst.msk [vmem:[#allocation6 + $0x58] sm:$0xff] %vm5040_vm5, %v5015_v21  ;;  %v5013_v23 = vpop.permute.xlu0 %5012  ;;  %v5070_v16 = vsel %vm11233_vm2, %v5065_v22, %v5069_v60  ;;  %v5168_v60 = vld [vmem:[#allocation3 + $0x4c] sm:$0xf]  ;;  %v5274_v21 = vsel %vm11224_vm13, %v10088_v14, %v5273_v24  ;;  %v5289_v11 = vrot.slane %v5287_v59, 4  ;;  %v5329_v14 = vrot.slane %v13928_v7, 5 }
 0x41d   : > { %5051 = vst.msk [vmem:[#allocation6 + $0x50] sm:$0xff] %vm5040_vm5, %v5013_v23  ;;  %v10089_v23 = vrot.slane %v5158_v30, 9  ;;  %v5188_v7 = vld [vmem:[#allocation3 + $0x9c] sm:$0xe] }
 0x41e   : > { %3724 = vrot.lane.b32.xlu1 %v3631_v51, %s10780_s16  ;;  %v5161_v51 = vld [vmem:[#allocation3 + $0x30] sm:$0xe]  ;;  %s10793_s16 = smov 48  }
 0x41f   : > { %v5019_v28 = vpop.permute.xlu1 %5018  ;;  %v5281_v22 = vsel %vm11224_vm13, %v10089_v23, %v5280_v58  ;;  %v5179_v23 = vld [vmem:[#allocation3 + $0x78] sm:$0xe] }
 0x420   : > { %5100 = vrot.lane.b32.xlu0 %v13479_v56, %s10792_s25  ;;  %5054 = vst.msk [vmem:[#allocation6 + $0x68] sm:$0xff] %vm5040_vm5, %v5019_v28  ;;  %v5017_v36 = vpop.permute.xlu0 %5016  ;;  %v5154_v56 = vld [vmem:[#allocation3 + $0x14] sm:$0x1]  ;;  %v5164_v28 = vld [vmem:[#allocation3 + $0x3c] sm:$0xe]  ;;  %v13911_v52 = vcombine.low %v5281_v22, %v5284_v43  ;;  %v5331_v22 = vrot.slane %v5329_v14, 4 }
 0x421   : > { %5053 = vst.msk [vmem:[#allocation6 + $0x60] sm:$0xff] %vm5040_vm5, %v5017_v36  ;;  %v5269_v19 = vrot.slane %v5154_v56, 5  ;;  %v5301_v36 = vrot.slane %v5168_v60, 5  ;;  %v5291_v56 = vsel %vm11224_vm13, %v5289_v11, %v5290_v13 }
 0x422   : > { %5102 = vrot.lane.b32.xlu1 %v13473_v18, %s10792_s25 }
 0x423   : > { %v5023_v29 = vpop.permute.xlu1 %5022  ;;  %v5270_v44 = vsel %vm11224_vm13, %v5268_v15, %v5269_v19  ;;  %v5303_v19 = vrot.slane %v5301_v36, 4 }
 0x424   : > { %5104 = vrot.lane.b32.xlu0 %v13499_v34, %s10792_s25  ;;  %5056 = vst.msk [vmem:[#allocation6 + $0x78] sm:$0xff] %vm5040_vm5, %v5023_v29  ;;  %v5021_v18 = vpop.permute.xlu0 %5020  ;;  %v5080_v34 = vsel %vm11233_vm2, %v5075_v40, %v5079_v10  ;;  %v10090_v40 = vrot.slane %v5161_v51, 9  ;;  %v5296_v10 = vrot.slane %v5294_v17, 4  ;;  %v5167_v29 = vld [vmem:[#allocation3 + $0x48] sm:$0xe] }
 0x425   : > { %5055 = vst.msk [vmem:[#allocation6 + $0x70] sm:$0xff] %vm5040_vm5, %v5021_v18  ;;  %v10085_v31 = vcombine.low %v5070_v16, %v5080_v34  ;;  %v13915_v16 = vld [vmem:[#allocation3 + $0x70] sm:$0xf]  ;;  %v5305_v2 = vsel %vm11224_vm13, %v5303_v19, %v5304_v54  ;;  %v13954_v51 = vld [vmem:[#allocation3 + $0x94] sm:$0xf]  ;;  %v10096_v54 = vrot.slane %v5179_v23, 9 }
 0x426   : > { %5106 = vrot.lane.b32.xlu1 %v13493_v9, %s10792_s25  ;;  %v5288_v18 = vsel %vm11224_vm13, %v10090_v40, %v5287_v59  ;;  %v5298_v15 = vsel %vm11224_vm13, %v5296_v10, %v5297_v61  ;;  %v5176_v59 = vld [vmem:[#allocation3 + $0x6c] sm:$0xe]  ;;  %v5189_v61 = vld [vmem:[#allocation3 + $0xa0] sm:$0xf]  ;;  %v5182_v40 = vld [vmem:[#allocation3 + $0x84] sm:$0xe] }
 0x427   : > { %v5087_v9 = vpop.permute.xlu1 %5086  ;;  %v10095_v11 = vrot.slane %v5176_v59, 9  ;;  %v5339_v10 = vrot.slane %v5184_v42, 5  ;;  %v5343_v6 = vrot.slane %v13954_v51, 5  ;;  %v10099_v59 = vrot.slane %v5188_v7, 9 }
 0x428   : > { %5108 = vrot.lane.b32.xlu0 %v13560_v12, %s10792_s25  ;;  %5134 = vst.msk [vmem:[#allocation6 + $0x8] sm:$0xff] %vm5132_vm11, %v5087_v9  ;;  %v5085_v47 = vpop.permute.xlu0 %5084  ;;  %v5267_v12 = vsel %vm11224_vm13, %v10087_v45, %v5266_v50  ;;  %v13903_v50 = vld [vmem:[#allocation3 + $0x64] sm:$0xf]  ;;  %v10091_v45 = vrot.slane %v5164_v28, 9  ;;  %v5187_v28 = vld [vmem:[#allocation3 + $0x98] sm:$0x1] }
 0x429   : > { %5133 = vst.msk [vmem:[#allocation6] sm:$0xff] %vm5132_vm11, %v5085_v47  ;;  %v13883_v4 = vcombine.low %v5267_v12, %v5270_v44  ;;  %v5315_v9 = vrot.slane %v13903_v50, 5  ;;  %v10092_v47 = vrot.slane %v5167_v29, 9  ;;  %v5310_v12 = vrot.slane %v5308_v41, 4  ;;  %v5173_v44 = vld [vmem:[#allocation3 + $0x60] sm:$0xe] }
 0x42a   : > { %5110 = vrot.lane.b32.xlu1 %v13622_v49, %s10792_s25  ;;  %v10102_v49 = vcombine.low %v5260_v46, %v5263_v5  ;;  %v13924_v5 = vcombine.low %v5288_v18, %v5291_v56  ;;  %v5295_v24 = vsel %vm11224_vm13, %v10091_v45, %v5294_v17  ;;  %v5192_v18 = vld [vmem:[#allocation3 + $0xac] sm:$0xf]  ;;  %v5333_v45 = vsel %vm11224_vm13, %v5331_v22, %v5332_v38 }
 0x42b   : > { %v5091_v1 = vpop.permute.xlu1 %5090  ;;  %v13937_v58 = vcombine.low %v5295_v24, %v5298_v15  ;;  %v5302_v8 = vsel %vm11224_vm13, %v10092_v47, %v5301_v36  ;;  %v5312_v30 = vsel %vm11224_vm13, %v5310_v12, %v5311_v55  ;;  %v5317_v57 = vrot.slane %v5315_v9, 4 }
 0x42c   : > { %5112 = vrot.lane.b32.xlu0 %v13682_v33, %s10792_s25  ;;  %5136 = vst.msk [vmem:[#allocation6 + $0x18] sm:$0xff] %vm5132_vm11, %v5091_v1  ;;  %v5089_v62 = vpop.permute.xlu0 %5088  ;;  %v5277_v33 = vsel %vm11224_vm13, %v5275_v20, %v5276_v26  ;;  %v5322_v26 = vrot.slane %v13915_v16, 5  ;;  %v13941_v1 = vld [vmem:[#allocation3 + $0x88] sm:$0xf]  ;;  %v13950_v17 = vcombine.low %v5302_v8, %v5305_v2  ;;  %v5185_v16 = vld [vmem:[#allocation3 + $0x90] sm:$0xe] }
 0x42d   : > { %5135 = vst.msk [vmem:[#allocation6 + $0x10] sm:$0xff] %vm5132_vm11, %v5089_v62  ;;  %v13899_v53 = vcombine.low %v5274_v21, %v5277_v33  ;;  %v10094_v33 = vrot.slane %v5173_v44, 9  ;;  %v5319_v13 = vsel %vm11224_vm13, %v5317_v57, %v5318_v27  ;;  %v5336_v48 = vrot.slane %v13941_v1, 5 }
 0x42e   : > { %5114 = vrot.lane.b32.xlu1 %v10085_v31, %s10792_s25  ;;  %v5178_v31 = vld [vmem:[#allocation3 + $0x74] sm:$0x1]  ;;  %v5324_v21 = vrot.slane %v5322_v26, 4  ;;  %v5323_v29 = vsel %vm11224_vm13, %v10095_v11, %v5322_v26  ;;  %v5350_v15 = vrot.slane %v5189_v61, 5  ;;  %v10097_v55 = vrot.slane %v5182_v40, 9  ;;  %s10799_s25 = smov 36  }
 0x42f   : > { %v5095_v32 = vpop.permute.xlu1 %5094  ;;  %v5325_v62 = vrot.slane %v5178_v31, 5  ;;  %v5316_v43 = vsel %vm11224_vm13, %v10094_v33, %v5315_v9  ;;  %v5338_v25 = vrot.slane %v5336_v48, 4  ;;  %v5193_v9 = vld [vmem:[#allocation3 + $0xb0] sm:$0x1]  ;;  %v5345_v31 = vrot.slane %v5343_v6, 4 }
 0x430   : > { %5417 = vrot.lane.b32.xlu0 %v10102_v49, %s16214_s29  ;;  %5138 = vst.msk [vmem:[#allocation6 + $0x28] sm:$0xff] %vm5132_vm11, %v5095_v32  ;;  %v5093_v0 = vpop.permute.xlu0 %5092  ;;  %v10093_v49 = vrot.slane %v5170_v39, 9  ;;  %v13974_v56 = vcombine.low %v5316_v43, %v5319_v13  ;;  %v5330_v39 = vsel %vm11224_vm13, %v10096_v54, %v5329_v14  ;;  %v5357_v12 = vrot.slane %v5192_v18, 5  ;;  %v5199_v18 = vld [vmem:[#allocation3 + $0xc8] sm:$0x1] }
 0x431   : > { %5137 = vst.msk [vmem:[#allocation6 + $0x20] sm:$0xff] %vm5132_vm11, %v5093_v0  ;;  %v5326_v0 = vsel %vm11224_vm13, %v5324_v21, %v5325_v62  ;;  %v5340_v47 = vsel %vm11224_vm13, %v5338_v25, %v5339_v10  ;;  %v13994_v27 = vcombine.low %v5330_v39, %v5333_v45  ;;  %v5337_v26 = vsel %vm11224_vm13, %v10097_v55, %v5336_v48  ;;  %v5191_v62 = vld [vmem:[#allocation3 + $0xa8] sm:$0xe]  ;;  %v5194_v21 = vld [vmem:[#allocation3 + $0xb4] sm:$0xe] }
 0x432   : > { %5419 = vrot.lane.b32.xlu1 %v13883_v4, %s16214_s29  ;;  %v5309_v60 = vsel %vm11224_vm13, %v10093_v49, %v5308_v41  ;;  %v5190_v41 = vld [vmem:[#allocation3 + $0xa4] sm:$0x1]  ;;  %v13984_v19 = vcombine.low %v5323_v29, %v5326_v0  ;;  %v10098_v8 = vrot.slane %v5185_v16, 9  ;;  %v5196_v49 = vld [vmem:[#allocation3 + $0xbc] sm:$0x1]  ;;  %v5352_v1 = vrot.slane %v5350_v15, 4 }
 0x433   : > { %v3673_v34 = vpop.permute.xlu1 %3672  ;;  %v13963_v32 = vcombine.low %v5309_v60, %v5312_v30  ;;  %v5353_v2 = vrot.slane %v5190_v41, 5  ;;  %v14004_v57 = vcombine.low %v5337_v26, %v5340_v47  ;;  %v5359_v33 = vrot.slane %v5357_v12, 4  ;;  %v5197_v16 = vld [vmem:[#allocation3 + $0xc0] sm:$0xe] }
 0x434   : > { %5421 = vrot.lane.b32.xlu0 %v13899_v53, %s16214_s29  ;;  %3766 = vst.msk [vmem:[%s11264_s24 + $0x18] sm:$0xff] %vm3762_vm9, %v3673_v34  ;;  %v3671_v46 = vpop.permute.xlu0 %3670  ;;  %v5346_v34 = vrot.slane %v5187_v28, 5  ;;  %v5367_v42 = vrot.slane %v5196_v49, 5  ;;  %v5351_v23 = vsel %vm11224_vm13, %v10099_v59, %v5350_v15  ;;  %v10100_v38 = vrot.slane %v5191_v62, 9  ;;  %v5200_v62 = vld [vmem:[#allocation3 + $0xcc] sm:$0xe] }
 0x435   : > { %3765 = vst.msk [vmem:[%s11264_s24 + $0x10] sm:$0xff] %vm3762_vm9, %v3671_v46  ;;  %v5195_v46 = vld [vmem:[#allocation3 + $0xb8] sm:$0xf]  ;;  %v5354_v60 = vsel %vm11224_vm13, %v5352_v1, %v5353_v2  ;;  %v5489_v25 = vrot.slane %v5199_v18, 5  ;;  %v10118_v15 = vrot.slane %v5197_v16, 9 }
 0x436   : > { %5423 = vrot.lane.b32.xlu1 %v13911_v52, %s16214_s29  ;;  %v5347_v37 = vsel %vm11224_vm13, %v5345_v31, %v5346_v34  ;;  %v5364_v30 = vrot.slane %v5195_v46, 5  ;;  %v14024_v11 = vcombine.low %v5351_v23, %v5354_v60  ;;  %v5358_v61 = vsel %vm11224_vm13, %v10100_v38, %v5357_v12 }
 0x437   : > { %v3669_v20 = vpop.permute.xlu1 %3668  ;;  %v10120_v60 = vrot.slane %v5200_v62, 9  ;;  %vm5853_vm5 = vsmask.f32 6416 }
 0x438   : > { %5425 = vrot.lane.b32.xlu0 %v13924_v5, %s16214_s29  ;;  %3764 = vst.msk [vmem:[%s11264_s24 + $0x8] sm:$0xff] %vm3762_vm9, %v3669_v20  ;;  %v3667_v3 = vpop.permute.xlu0 %3666  ;;  %v5360_v20 = vrot.slane %v5193_v9, 5  ;;  %v5366_v43 = vrot.slane %v5364_v30, 4 }
 0x439   : > { %3763 = vst.msk [vmem:[%s11264_s24] sm:$0xff] %vm3762_vm9, %v3667_v3  ;;  %v5344_v3 = vsel %vm11224_vm13, %v10098_v8, %v5343_v6  ;;  %v5201_v8 = vld [vmem:[#allocation3 + $0xd0] sm:$0xf] }
 0x43a   : > { %5427 = vrot.lane.b32.xlu1 %v13937_v58, %s16214_s29  ;;  %v14014_v13 = vcombine.low %v5344_v3, %v5347_v37  ;;  %v5361_v48 = vsel %vm11224_vm13, %v5359_v33, %v5360_v20  ;;  %v5368_v0 = vsel %vm11224_vm13, %v5366_v43, %v5367_v42  ;;  %v5202_v37 = vld [vmem:[#allocation3 + $0xd4] sm:$0x1]  ;;  %v5563_v1 = vrot.slane %v5201_v8, 5  ;;  %v5801_v43 = vld [vmem:[#allocation3 + $0x24] sm:$0xe] }
 0x43b   : > { %v3681_v36 = vpop.permute.xlu1 %3680  ;;  %v14034_v40 = vcombine.low %v5358_v61, %v5361_v48  ;;  %v5798_v48 = vld [vmem:[#allocation3 + $0x18] sm:$0xe]  ;;  %v5799_v61 = vld [vmem:[#allocation3 + $0x1c] sm:$0xf] }
 0x43c   : > { %5429 = vrot.lane.b32.xlu0 %v13950_v17, %s16214_s29  ;;  %3770 = vst.msk [vmem:[%s11264_s24 + $0x38] sm:$0xff] %vm3762_vm9, %v3681_v36  ;;  %v3679_v50 = vpop.permute.xlu0 %3678  ;;  %v10101_v36 = vrot.slane %v5194_v21, 9 }
 0x43d   : > { %3769 = vst.msk [vmem:[%s11264_s24 + $0x30] sm:$0xff] %vm3762_vm9, %v3679_v50 }
 0x43e   : > { %5431 = vrot.lane.b32.xlu1 %v13963_v32, %s16214_s29  ;;  %v5365_v10 = vsel %vm11224_vm13, %v10101_v36, %v5364_v30  ;;  %v5566_v30 = vrot.slane %v5202_v37, 5  ;;  %v5802_v36 = vld [vmem:[#allocation3 + $0x28] sm:$0xf] }
 0x43f   : > { %v3677_v24 = vpop.permute.xlu1 %3676  ;;  %v14042_v6 = vcombine.low %v5365_v10, %v5368_v0  ;;  %v5912_v10 = vshrl.u32 %v5798_v48, 16 }
 0x440   : > { %5433 = vrot.lane.b32.xlu0 %v13974_v56, %s16214_s29  ;;  %3768 = vst.msk [vmem:[%s11264_s24 + $0x28] sm:$0xff] %vm3762_vm9, %v3677_v24  ;;  %v3675_v44 = vpop.permute.xlu0 %3674 }
 0x441   : > { %3767 = vst.msk [vmem:[%s11264_s24 + $0x20] sm:$0xff] %vm3762_vm9, %v3675_v44 }
 0x442   : > { %5435 = vrot.lane.b32.xlu1 %v13984_v19, %s16214_s29 }
 0x443   : > { %v3689_v14 = vpop.permute.xlu1 %3688 }
 0x444   : > { %5437 = vrot.lane.b32.xlu0 %v13994_v27, %s16214_s29  ;;  %3774 = vst.msk [vmem:[%s11264_s24 + $0x58] sm:$0xff] %vm3762_vm9, %v3689_v14  ;;  %v3687_v51 = vpop.permute.xlu0 %3686  ;;  %v5565_v14 = vrot.slane %v5563_v1, 4 }
 0x445   : > { %3773 = vst.msk [vmem:[%s11264_s24 + $0x50] sm:$0xff] %vm3762_vm9, %v3687_v51  ;;  %v5564_v51 = vsel %vm11224_vm13, %v10120_v60, %v5563_v1 }
 0x446   : > { %5439 = vrot.lane.b32.xlu1 %v14004_v57, %s16214_s29  ;;  %v5567_v33 = vsel %vm11224_vm13, %v5565_v14, %v5566_v30  ;;  %v5806_v14 = vld [vmem:[#allocation3 + $0x38] sm:$0x3] }
 0x447   : > { %v3685_v28 = vpop.permute.xlu1 %3684  ;;  %v14155_v23 = vcombine.low %v5564_v51, %v5567_v33 }
 0x448   : > { %5441 = vrot.lane.b32.xlu0 %v14014_v13, %s16214_s29  ;;  %3772 = vst.msk [vmem:[%s11264_s24 + $0x48] sm:$0xff] %vm3762_vm9, %v3685_v28  ;;  %v3683_v22 = vpop.permute.xlu0 %3682 }
 0x449   : > { %3771 = vst.msk [vmem:[%s11264_s24 + $0x40] sm:$0xff] %vm3762_vm9, %v3683_v22  ;;  %v5800_v22 = vld [vmem:[#allocation3 + $0x20] sm:$0x3] }
 0x44a   : > { %5443 = vrot.lane.b32.xlu1 %v14024_v11, %s16214_s29  ;;  %v5931_v16 = vshrl.u32 %v5800_v22, 16 }
 0x44b   : > { %v3697_v50 = vpop.permute.xlu1 %3696 }
 0x44c   : > { %5445 = vrot.lane.b32.xlu0 %v14034_v40, %s16214_s29  ;;  %3778 = vst.msk [vmem:[%s11264_s24 + $0x78] sm:$0xff] %vm3762_vm9, %v3697_v50  ;;  %v3695_v29 = vpop.permute.xlu0 %3694  ;;  %v5915_v50 = vshll.u32 %v5798_v48, 16  ;;  %v5933_v1 = vrot.slane %v5931_v16, 5  ;;  %v5810_v16 = vld [vmem:[#allocation3 + $0x48] sm:$0xe] }
 0x44d   : > { %3777 = vst.msk [vmem:[%s11264_s24 + $0x70] sm:$0xff] %vm3762_vm9, %v3695_v29  ;;  %v5940_v29 = vshrl.u32 %v5801_v43, 16 }
 0x44e   : > { %5447 = vrot.lane.b32.xlu1 %v14042_v6, %s16214_s29  ;;  %s10800_s29 = smov 56  }
 0x44f   : > { %v3693_v54 = vpop.permute.xlu1 %3692 }
 0x450   : > { %5494 = vrot.lane.b32.xlu0 %v13883_v4, %s10779_s14  ;;  %3776 = vst.msk [vmem:[%s11264_s24 + $0x68] sm:$0xff] %vm3762_vm9, %v3693_v54  ;;  %v3691_v41 = vpop.permute.xlu0 %3690  ;;  %v5198_v4 = vld [vmem:[#allocation3 + $0xc4] sm:$0xf]  ;;  %v5943_v54 = vshll.u32 %v5801_v43, 16 }
 0x451   : > { %3775 = vst.msk [vmem:[%s11264_s24 + $0x60] sm:$0xff] %vm3762_vm9, %v3691_v41  ;;  %v5486_v45 = vrot.slane %v5198_v4, 5  ;;  %v5921_v41 = vshrl.u32 %v5799_v61, 16  ;;  %v5924_v4 = vshll.u32 %v5799_v61, 16 }
 0x452   : > { %5496 = vrot.lane.b32.xlu1 %v13899_v53, %s10779_s14 }
 0x453   : > { %v5488_v34 = vrot.slane %v5486_v45, 4  ;;  %v5487_v55 = vsel %vm11224_vm13, %v10118_v15, %v5486_v45  ;;  %v5952_v45 = vshll.u32 %v5802_v36, 16  ;;  %v5803_v15 = vld [vmem:[#allocation3 + $0x2c] sm:$0x3] }
 0x454   : > { %5498 = vrot.lane.b32.xlu0 %v13911_v52, %s10779_s14  ;;  %v5962_v37 = vshll.u32 %v5803_v15, 16 }
 0x455   : > { %v5490_v39 = vsel %vm11224_vm13, %v5488_v34, %v5489_v25  ;;  %v5804_v25 = vld [vmem:[#allocation3 + $0x30] sm:$0xe]  ;;  %v5934_v34 = vshll.u32 %v5800_v22, 16  ;;  %v5954_v8 = vrot.slane %v5952_v45, 6  ;;  %v5990_v22 = vshll.u32 %v5806_v14, 16 }
 0x456   : > { %5500 = vrot.lane.b32.xlu1 %v13924_v5, %s10779_s14  ;;  %v14088_v9 = vcombine.low %v5487_v55, %v5490_v39  ;;  %v5914_v55 = vrot.slane %v5912_v10, 5 }
 0x458   : > { %5502 = vrot.lane.b32.xlu0 %v13937_v58, %s10779_s14 }
 0x45a   : > { %5504 = vrot.lane.b32.xlu1 %v13950_v17, %s10779_s14 }
 0x45c   : > { %5506 = vrot.lane.b32.xlu0 %v13963_v32, %s10779_s14 }
 0x45e   : > { %5508 = vrot.lane.b32.xlu1 %v13974_v56, %s10779_s14 }
 0x460   : > { %5510 = vrot.lane.b32.xlu0 %v13984_v19, %s10779_s14 }
 0x462   : > { %5512 = vrot.lane.b32.xlu1 %v13994_v27, %s10779_s14 }
 0x464   : > { %5514 = vrot.lane.b32.xlu0 %v14004_v57, %s10779_s14 }
 0x466   : > { %5516 = vrot.lane.b32.xlu1 %v14014_v13, %s10779_s14 }
 0x468   : > { %5518 = vrot.lane.b32.xlu0 %v14024_v11, %s10779_s14 }
 0x46a   : > { %5520 = vrot.lane.b32.xlu1 %v14034_v40, %s10779_s14 }
 0x46c   : > { %5522 = vrot.lane.b32.xlu0 %v14042_v6, %s10779_s14 }
 0x46e   : > { %5524 = vrot.lane.b32.xlu1 %v14088_v9, %s10779_s14  ;;  %v3703_v46 = vpop.permute.xlu0 %3702  ;;  %s10794_s14 = smov 68  }
 0x46f   : > { %3781 = vst.msk [vmem:[%s11264_s24 + $0x90] sm:$0xff] %vm3762_vm9, %v3703_v46  ;;  %v5917_v46 = vrot.slane %v5915_v50, 6 }
 0x470   : > { %v3705_v24 = vpop.permute.xlu1 %3704  ;;  %5571 = vrot.lane.b32.xlu0 %v13899_v53, %s10793_s16 }
 0x471   : > { %3782 = vst.msk [vmem:[%s11264_s24 + $0x98] sm:$0xff] %vm3762_vm9, %v3705_v24  ;;  %v5942_v24 = vrot.slane %v5940_v29, 5 }
 0x472   : > { %5573 = vrot.lane.b32.xlu1 %v13911_v52, %s10793_s16  ;;  %v3699_v47 = vpop.permute.xlu0 %3698 }
 0x473   : > { %3779 = vst.msk [vmem:[%s11264_s24 + $0x80] sm:$0xff] %vm3762_vm9, %v3699_v47  ;;  %v5945_v47 = vrot.slane %v5943_v54, 6 }
 0x474   : > { %v3701_v31 = vpop.permute.xlu1 %3700  ;;  %5575 = vrot.lane.b32.xlu0 %v13924_v5, %s10793_s16 }
 0x475   : > { %3780 = vst.msk [vmem:[%s11264_s24 + $0x88] sm:$0xff] %vm3762_vm9, %v3701_v31  ;;  %v5923_v31 = vrot.slane %v5921_v41, 5  ;;  %v5946_v62 = vor.u32 %v5945_v47, %v5942_v24 }
 0x476   : > { %5577 = vrot.lane.b32.xlu1 %v13937_v58, %s10793_s16  ;;  %v3711_v53 = vpop.permute.xlu0 %3710 }
 0x477   : > { %3785 = vst.msk [vmem:[%s11264_s24 + $0xb0] sm:$0xff] %vm3762_vm9, %v3711_v53  ;;  %v5926_v53 = vrot.slane %v5924_v4, 6  ;;  %v14204_v29 = vrot.slane %v5946_v62, 4  ;;  %v5807_v4 = vld [vmem:[#allocation3 + $0x3c] sm:$0xe] }
 0x478   : > { %v3713_v7 = vpop.permute.xlu1 %3712  ;;  %5579 = vrot.lane.b32.xlu0 %v13950_v17, %s10793_s16 }
 0x479   : > { %3786 = vst.msk [vmem:[%s11264_s24 + $0xb8] sm:$0xff] %vm3762_vm9, %v3713_v7  ;;  %v5805_v7 = vld [vmem:[#allocation3 + $0x34] sm:$0xf]  ;;  %v14181_v33 = vor.u32 %v5926_v53, %v5923_v31 }
 0x47a   : > { %5581 = vrot.lane.b32.xlu1 %v13963_v32, %s10793_s16  ;;  %v3707_v2 = vpop.permute.xlu0 %3706  ;;  %v5980_v60 = vshll.u32 %v5805_v7, 16 }
 0x47b   : > { %3783 = vst.msk [vmem:[%s11264_s24 + $0xa0] sm:$0xff] %vm3762_vm9, %v3707_v2  ;;  %v5968_v2 = vshrl.u32 %v5804_v25, 16 }
 0x47c   : > { %v3709_v12 = vpop.permute.xlu1 %3708  ;;  %5583 = vrot.lane.b32.xlu0 %v13974_v56, %s10793_s16  ;;  %v5982_v41 = vrot.slane %v5980_v60, 6 }
 0x47d   : > { %3784 = vst.msk [vmem:[%s11264_s24 + $0xa8] sm:$0xff] %vm3762_vm9, %v3709_v12  ;;  %v5971_v12 = vshll.u32 %v5804_v25, 16  ;;  %v5808_v25 = vld [vmem:[#allocation3 + $0x40] sm:$0xf] }
 0x47e   : > { %5585 = vrot.lane.b32.xlu1 %v13984_v19, %s10793_s16  ;;  %v3719_v44 = vpop.permute.xlu0 %3718 }
 0x47f   : > { %3789 = vst.msk [vmem:[%s11264_s24 + $0xd0] sm:$0xff] %vm3762_vm9, %v3719_v44  ;;  %v5973_v51 = vrot.slane %v5971_v12, 6  ;;  %v5996_v12 = vshrl.u32 %v5807_v4, 16 }
 0x480   : > { %v3721_v26 = vpop.permute.xlu1 %3720  ;;  %5587 = vrot.lane.b32.xlu0 %v13994_v27, %s10793_s16 }
 0x481   : > { %3790 = vst.msk [vmem:[%s11264_s24 + $0xd8] sm:$0xff] %vm3762_vm9, %v3721_v26 }
 0x482   : > { %5589 = vrot.lane.b32.xlu1 %v14004_v57, %s10793_s16  ;;  %v3715_v49 = vpop.permute.xlu0 %3714 }
 0x483   : > { %3787 = vst.msk [vmem:[%s11264_s24 + $0xc0] sm:$0xff] %vm3762_vm9, %v3715_v49  ;;  %v5959_v49 = vshrl.u32 %v5803_v15, 16  ;;  %v5203_v15 = vld [vmem:[#allocation3 + $0xd8] sm:$0xe] }
 0x484   : > { %v3717_v20 = vpop.permute.xlu1 %3716  ;;  %5591 = vrot.lane.b32.xlu0 %v14014_v13, %s10793_s16 }
 0x485   : > { %3788 = vst.msk [vmem:[%s11264_s24 + $0xc8] sm:$0xff] %vm3762_vm9, %v3717_v20  ;;  %v5936_v20 = vrot.slane %v5934_v34, 6  ;;  %v14189_v43 = vrot.slane %v5959_v49, 5  ;;  %v6005_v49 = vshrl.u32 %v5808_v25, 16 }
 0x486   : > { %5593 = vrot.lane.b32.xlu1 %v14024_v11, %s10793_s16  ;;  %v3727_v59 = vpop.permute.xlu0 %3726 }
 0x487   : > { %3793 = vst.msk [vmem:[%s11264_s24 + $0xf0] sm:$0xff] %vm3762_vm9, %v3727_v59  ;;  %v5918_v59 = vor.u32 %v5917_v46, %v5914_v55 }
 0x488   : > { %v5099_v3 = vpop.permute.xlu1 %5098  ;;  %5595 = vrot.lane.b32.xlu0 %v14034_v40, %s10793_s16 }
 0x489   : > { %5140 = vst.msk [vmem:[#allocation6 + $0x38] sm:$0xff] %vm5132_vm11, %v5099_v3  ;;  %v5977_v3 = vshrl.u32 %v5805_v7, 16  ;;  %v14202_v50 = vrot.slane %v5918_v59, 4  ;;  %v14229_v7 = vrot.slane %v5990_v22, 6 }
 0x48a   : > { %5597 = vrot.lane.b32.xlu1 %v14042_v6, %s10793_s16  ;;  %v3723_v42 = vpop.permute.xlu0 %3722 }
 0x48b   : > { %3791 = vst.msk [vmem:[%s11264_s24 + $0xe0] sm:$0xff] %vm3762_vm9, %v3723_v42  ;;  %v5970_v42 = vrot.slane %v5968_v2, 5  ;;  %v5979_v54 = vrot.slane %v5977_v3, 5  ;;  %v5809_v2 = vld [vmem:[#allocation3 + $0x44] sm:$0x3] }
 0x48c   : > { %v3729_v21 = vpop.permute.xlu1 %3728  ;;  %5599 = vrot.lane.b32.xlu0 %v14088_v9, %s10793_s16  ;;  %v6015_v3 = vshrl.u32 %v5809_v2, 16  ;;  %v6018_v60 = vshll.u32 %v5809_v2, 16 }
 0x48d   : > { %3794 = vst.msk [vmem:[%s11264_s24 + $0xf8] sm:$0xff] %vm3762_vm9, %v3729_v21  ;;  %v5974_v45 = vor.u32 %v5973_v51, %v5970_v42  ;;  %v5812_v42 = vld [vmem:[#allocation3 + $0x50] sm:$0x3]  ;;  %v6024_v51 = vshrl.u32 %v5810_v16, 16 }
 0x48e   : > { %5601 = vrot.lane.b32.xlu1 %v14155_v23, %s10793_s16  ;;  %v5097_v38 = vpop.permute.xlu0 %5096  ;;  %s10798_s16 = smov 92  }
 0x48f   : > { %5139 = vst.msk [vmem:[#allocation6 + $0x30] sm:$0xff] %vm5132_vm11, %v5097_v38  ;;  %v14185_v38 = vld [vmem:[#allocation3 + $0xdc] sm:$0xf]  ;;  %v14236_v62 = vrot.slane %v5974_v45, 4  ;;  %v5814_v45 = vld [vmem:[#allocation3 + $0x58] sm:$0xf] }
 0x490   : > { %v3725_v28 = vpop.permute.xlu1 %3724  ;;  %5649 = vrot.lane.b32.xlu0 %v13911_v52, %s10794_s14  ;;  %v5949_v52 = vshrl.u32 %v5802_v36, 16  ;;  %v5937_v36 = vor.u32 %v5936_v20, %v5933_v1  ;;  %v5811_v1 = vld [vmem:[#allocation3 + $0x4c] sm:$0xf]  ;;  %v10122_v20 = vrot.slane %v5203_v15, 9  ;;  %v6046_v15 = vshll.u32 %v5812_v42, 16 }
 0x491   : > { %3792 = vst.msk [vmem:[%s11264_s24 + $0xe8] sm:$0xff] %vm3762_vm9, %v3725_v28  ;;  %v14191_v28 = vrot.slane %v5962_v37, 6  ;;  %vm14196_vm9 = vmor %vm5852_vm10, %vm5853_vm5  ;;  %v6008_v37 = vshll.u32 %v5808_v25, 16  ;;  %v6036_v22 = vshll.u32 %v5811_v1, 16  ;;  %vm5697_vm10 = vcmask 589344  }
 0x492   : > { %5651 = vrot.lane.b32.xlu1 %v13924_v5, %s10794_s14  ;;  %v5101_v0 = vpop.permute.xlu0 %5100  ;;  %v5951_v26 = vrot.slane %v5949_v52, 5  ;;  %v5929_v52 = vrot.slane %v14181_v33, 4  ;;  %vm5775_vm5 = vcmask 753344  }
 0x493   : > { %5141 = vst.msk [vmem:[#allocation6 + $0x40] sm:$0xff] %vm5132_vm11, %v5101_v0  ;;  %v5987_v0 = vshrl.u32 %v5806_v14, 16  ;;  %v5965_v47 = vor.u32 %v14191_v28, %v14189_v43 }
 0x494   : > { %v5103_v18 = vpop.permute.xlu1 %5102  ;;  %5653 = vrot.lane.b32.xlu0 %v13937_v58, %s10794_s14  ;;  %v14187_v48 = vor.u32 %v5954_v8, %v5951_v26  ;;  %v14225_v31 = vsel %vm14196_vm9, %v5929_v52, %v5937_v36  ;;  %v14233_v26 = vor.u32 %v5982_v41, %v5979_v54  ;;  %v5999_v8 = vshll.u32 %v5807_v4, 16 }
 0x495   : > { %5142 = vst.msk [vmem:[#allocation6 + $0x48] sm:$0xff] %vm5132_vm11, %v5103_v18  ;;  %v5641_v18 = vrot.slane %v14185_v38, 5  ;;  %v14227_v53 = vrot.slane %v5987_v0, 5  ;;  %v14243_v36 = vrot.slane %v5996_v12, 5  ;;  %v6033_v0 = vshrl.u32 %v5811_v1, 16 }
 0x496   : > { %5655 = vrot.lane.b32.xlu1 %v13950_v17, %s10794_s14  ;;  %v5105_v39 = vpop.permute.xlu0 %5104  ;;  %v5957_v24 = vrot.slane %v14187_v48, 4  ;;  %v14248_v41 = vrot.slane %v5999_v8, 6  ;;  %v6007_v4 = vrot.slane %v6005_v49, 5  ;;  %v6010_v52 = vrot.slane %v6008_v37, 6  ;;  %v5815_v37 = vld [vmem:[#allocation3 + $0x5c] sm:$0x3] }
 0x497   : > { %5143 = vst.msk [vmem:[#allocation6 + $0x50] sm:$0xff] %vm5132_vm11, %v5105_v39  ;;  %v5205_v39 = vld [vmem:[#allocation3 + $0xe0] sm:$0x1]  ;;  %v5642_v25 = vsel %vm11224_vm13, %v10122_v20, %v5641_v18  ;;  %v6017_v12 = vrot.slane %v6015_v3, 5  ;;  %v6026_v8 = vrot.slane %v6024_v51, 5  ;;  %v6035_v1 = vrot.slane %v6033_v0, 5 }
 0x498   : > { %v5107_v44 = vpop.permute.xlu1 %5106  ;;  %5657 = vrot.lane.b32.xlu0 %v13963_v32, %s10794_s14  ;;  %v5644_v59 = vrot.slane %v5205_v39, 5  ;;  %v5813_v39 = vld [vmem:[#allocation3 + $0x54] sm:$0xe]  ;;  %v6064_v20 = vshll.u32 %v5814_v45, 16  ;;  %v6074_v0 = vshll.u32 %v5815_v37, 16 }
 0x499   : > { %5144 = vst.msk [vmem:[#allocation6 + $0x58] sm:$0xff] %vm5132_vm11, %v5107_v44  ;;  %v6052_v3 = vshrl.u32 %v5813_v39, 16 }
 0x49a   : > { %5659 = vrot.lane.b32.xlu1 %v13974_v56, %s10794_s14  ;;  %v5109_v30 = vpop.permute.xlu0 %5108 }
 0x49b   : > { %5145 = vst.msk [vmem:[#allocation6 + $0x60] sm:$0xff] %vm5132_vm11, %v5109_v30  ;;  %v5643_v30 = vrot.slane %v5641_v18, 4  ;;  %v6061_v18 = vshrl.u32 %v5814_v45, 16  ;;  %v6002_v45 = vor.u32 %v14248_v41, %v14243_v36 }
 0x49c   : > { %v5111_v21 = vpop.permute.xlu1 %5110  ;;  %5661 = vrot.lane.b32.xlu0 %v13984_v19, %s10794_s14 }
 0x49d   : > { %5146 = vst.msk [vmem:[#allocation6 + $0x68] sm:$0xff] %vm5132_vm11, %v5111_v21  ;;  %v6027_v21 = vshll.u32 %v5810_v16, 16  ;;  %v5645_v16 = vsel %vm11224_vm13, %v5643_v30, %v5644_v59 }
 0x49e   : > { %5663 = vrot.lane.b32.xlu1 %v13994_v27, %s10794_s14  ;;  %v5113_v10 = vpop.permute.xlu0 %5112  ;;  %v14260_v59 = vcombine.low %v5642_v25, %v5645_v16 }
 0x49f   : > { %5147 = vst.msk [vmem:[#allocation6 + $0x70] sm:$0xff] %vm5132_vm11, %v5113_v10  ;;  %v6029_v49 = vrot.slane %v6027_v21, 6  ;;  %v6048_v21 = vrot.slane %v6046_v15, 6 }
 0x4a0   : > { %v5115_v34 = vpop.permute.xlu1 %5114  ;;  %5665 = vrot.lane.b32.xlu0 %v14004_v57, %s10794_s14 }
 0x4a1   : > { %5148 = vst.msk [vmem:[#allocation6 + $0x78] sm:$0xff] %vm5132_vm11, %v5115_v34  ;;  %v6043_v34 = vshrl.u32 %v5812_v42, 16  ;;  %v14262_v42 = vor.u32 %v6010_v52, %v6007_v4  ;;  %v6030_v52 = vor.u32 %v6029_v49, %v6026_v8  ;;  %v5966_v8 = vsel %vm14196_vm9, %v5957_v24, %v5965_v47 }
 0x4a2   : > { %5667 = vrot.lane.b32.xlu1 %v14014_v13, %s10794_s14  ;;  %v5418_v44 = vpop.permute.xlu0 %5417  ;;  %v16276_v49 = vor.u32 %v14229_v7, %v14227_v53 }
 0x4a3   : > { %5465 = vst.msk [vmem:[#allocation6] sm:$0xff] %vm3173_vm15, %v5418_v44  ;;  %v6020_v44 = vrot.slane %v6018_v60, 6  ;;  %v6055_v60 = vshll.u32 %v5813_v39, 16  ;;  %v6045_v51 = vrot.slane %v6043_v34, 5  ;;  %v6066_v34 = vrot.slane %v6064_v20, 6 }
 0x4a4   : > { %v5420_v14 = vpop.permute.xlu1 %5419  ;;  %5669 = vrot.lane.b32.xlu0 %v14024_v11, %s10794_s14  ;;  %v6013_v36 = vrot.slane %v14262_v42, 4  ;;  %v6031_v47 = vrot.slane %v6030_v52, 4 }
 0x4a5   : > { %5466 = vst.msk [vmem:[#allocation6 + $0x8] sm:$0xff] %vm3173_vm15, %v5420_v14  ;;  %v6038_v14 = vrot.slane %v6036_v22, 6  ;;  %v5817_v22 = vld [vmem:[#allocation3 + $0x64] sm:$0xf]  ;;  %v6021_v25 = vor.u32 %v6020_v44, %v6017_v12  ;;  %v6057_v55 = vrot.slane %v6055_v60, 6  ;;  %v6049_v41 = vor.u32 %v6048_v21, %v6045_v51 }
 0x4a6   : > { %5671 = vrot.lane.b32.xlu1 %v14034_v40, %s10794_s14  ;;  %v5422_v10 = vpop.permute.xlu0 %5421  ;;  %v6089_v54 = vshrl.u32 %v5817_v22, 16  ;;  %v6092_v38 = vshll.u32 %v5817_v22, 16  ;;  %v6076_v44 = vrot.slane %v6074_v0, 6 }
 0x4a7   : > { %5467 = vst.msk [vmem:[#allocation6 + $0x10] sm:$0xff] %vm3173_vm15, %v5422_v10  ;;  %v5816_v10 = vld [vmem:[#allocation3 + $0x60] sm:$0xe]  ;;  %v6039_v39 = vor.u32 %v6038_v14, %v6035_v1  ;;  %v16277_v1 = vrot.slane %v14233_v26, 4  ;;  %v6022_v43 = vsel %vm14196_vm9, %v6013_v36, %v6021_v25  ;;  %v5819_v25 = vld [vmem:[#allocation3 + $0x6c] sm:$0xe] }
 0x4a8   : > { %v5424_v2 = vpop.permute.xlu1 %5423  ;;  %5673 = vrot.lane.b32.xlu0 %v14042_v6, %s10794_s14  ;;  %v6080_v16 = vshrl.u32 %v5816_v10, 16  ;;  %v6083_v4 = vshll.u32 %v5816_v10, 16  ;;  %v6091_v7 = vrot.slane %v6089_v54, 5  ;;  %v6094_v60 = vrot.slane %v6092_v38, 6 }
 0x4a9   : > { %5468 = vst.msk [vmem:[#allocation6 + $0x18] sm:$0xff] %vm3173_vm15, %v5424_v2  ;;  %v6071_v2 = vshrl.u32 %v5815_v37, 16  ;;  %v6054_v37 = vrot.slane %v6052_v3, 5  ;;  %v5994_v14 = vsel %vm14196_vm9, %v16277_v1, %v16276_v49  ;;  %v6041_v28 = vrot.slane %v6039_v39, 4  ;;  %v5794_v49 = vld [vmem:[#allocation3 + $0x8] sm:$0x3] }
 0x4aa   : > { %5675 = vrot.lane.b32.xlu1 %v14088_v9, %s10794_s14  ;;  %v5426_v30 = vpop.permute.xlu0 %5425  ;;  %v6082_v20 = vrot.slane %v6080_v16, 5  ;;  %v6085_v10 = vrot.slane %v6083_v4, 6  ;;  %v16279_v38 = vsel %vm14196_vm9, %v14204_v29, %v14187_v48  ;;  %v6040_v48 = vsel %vm14196_vm9, %v6031_v47, %v6039_v39  ;;  %v14327_v29 = vld [vmem:[#allocation3 + $0x70] sm:$0xf] }
 0x4ab   : > { %5469 = vst.msk [vmem:[#allocation6 + $0x20] sm:$0xff] %vm3173_vm15, %v5426_v30  ;;  %v6063_v30 = vrot.slane %v6061_v18, 5  ;;  %v6073_v12 = vrot.slane %v6071_v2, 5  ;;  %v5818_v18 = vld [vmem:[#allocation3 + $0x68] sm:$0x3]  ;;  %v6058_v53 = vor.u32 %v6057_v55, %v6054_v37  ;;  %v6050_v51 = vsel %vm14196_vm9, %v6041_v28, %v6049_v41 }
 0x4ac   : > { %v5428_v46 = vpop.permute.xlu1 %5427  ;;  %5677 = vrot.lane.b32.xlu0 %v14155_v23, %s10794_s14  ;;  %v6099_v2 = vshrl.u32 %v5818_v18, 16  ;;  %v6102_v0 = vshll.u32 %v5818_v18, 16  ;;  %v14313_v54 = vcombine.low %v16279_v38, %v5966_v8  ;;  %v14333_v52 = vcombine.low %v6040_v48, %v6050_v51  ;;  %v5796_v41 = vld [vmem:[#allocation3 + $0x10] sm:$0xf] }
 0x4ad   : > { %5470 = vst.msk [vmem:[#allocation6 + $0x28] sm:$0xff] %vm3173_vm15, %v5428_v46  ;;  %v6067_v3 = vor.u32 %v6066_v34, %v6063_v30  ;;  %v6077_v21 = vor.u32 %v6076_v44, %v6073_v12  ;;  %v6059_v30 = vrot.slane %v6058_v53, 4  ;;  %v14335_v34 = vor.u32 %v6094_v60, %v6091_v7  ;;  %v14364_v60 = vld [vmem:[#allocation3 + $0x78] sm:$0xe] }
 0x4ae   : > { %5679 = vrot.lane.b32.xlu1 %v14260_v59, %s10794_s14  ;;  %v5430_v15 = vpop.permute.xlu0 %5429  ;;  %v14342_v37 = vrot.slane %v6102_v0, 6  ;;  %v6117_v8 = vshrl.u32 %v14327_v29, 16  ;;  %v5896_v47 = vshll.u32 %v5796_v41, 16  ;;  %v5875_v51 = vshrl.u32 %v5794_v49, 16 }
 0x4af   : > { %5471 = vst.msk [vmem:[#allocation6 + $0x30] sm:$0xff] %vm3173_vm15, %v5430_v15  ;;  %v14340_v15 = vrot.slane %v6099_v2, 5  ;;  %v6068_v12 = vsel %vm14196_vm9, %v6059_v30, %v6067_v3  ;;  %v6097_v28 = vrot.slane %v14335_v34, 4  ;;  %v5797_v2 = vld [vmem:[#allocation3 + $0x14] sm:$0x3] }
 0x4b0   : > { %v5432_v46 = vpop.permute.xlu1 %5431  ;;  %5727 = vrot.lane.b32.xlu0 %v13924_v5, %s10795_s28  ;;  %v6003_v5 = vrot.slane %v6002_v45, 4  ;;  %v6086_v45 = vor.u32 %v6085_v10, %v6082_v20 }
 0x4b1   : > { %5472 = vst.msk [vmem:[#allocation6 + $0x38] sm:$0xff] %vm3173_vm15, %v5432_v46  ;;  %v6111_v46 = vshll.u32 %v5819_v25, 16  ;;  %v6105_v53 = vor.u32 %v14342_v37, %v14340_v15  ;;  %v5906_v15 = vshll.u32 %v5797_v2, 16 }
 0x4b2   : > { %5729 = vrot.lane.b32.xlu1 %v13937_v58, %s10795_s28  ;;  %v5434_v24 = vpop.permute.xlu0 %5433  ;;  %v16278_v58 = vsel %vm14196_vm9, %v14202_v50, %v14181_v33  ;;  %v6012_v33 = vsel %vm14196_vm9, %v6003_v5, %v14262_v42  ;;  %v6069_v50 = vrot.slane %v6067_v3, 4  ;;  %v5795_v42 = vld [vmem:[#allocation3 + $0xc] sm:$0xe]  ;;  %v14348_v44 = vrot.slane %v6086_v45, 4  ;;  %v14358_v3 = vld [vmem:[#allocation3 + $0xe8] sm:$0xf] }
 0x4b3   : > { %5473 = vst.msk [vmem:[#allocation6 + $0x40] sm:$0xff] %vm3173_vm15, %v5434_v24  ;;  %v14306_v55 = vcombine.low %v16278_v58, %v14225_v31  ;;  %v14331_v4 = vcombine.low %v6012_v33, %v6022_v43  ;;  %v5884_v10 = vshrl.u32 %v5795_v42, 16  ;;  %v5887_v5 = vshll.u32 %v5795_v42, 16  ;;  %v5206_v33 = vld [vmem:[#allocation3 + $0xe4] sm:$0xe] }
 0x4b4   : > { %v5436_v22 = vpop.permute.xlu1 %5435  ;;  %5731 = vrot.lane.b32.xlu0 %v13950_v17, %s10795_s28  ;;  %v5984_v17 = vsel %vm14196_vm9, %v14236_v62, %v14233_v26  ;;  %v5792_v26 = vld [vmem:[#allocation3] sm:$0xe]  ;;  %v5793_v62 = vld [vmem:[#allocation3 + $0x4] sm:$0xf]  ;;  %v6078_v39 = vsel %vm14196_vm9, %v6069_v50, %v6077_v21  ;;  %v5893_v24 = vshrl.u32 %v5796_v41, 16  ;;  %v5878_v21 = vshll.u32 %v5794_v49, 16 }
 0x4b5   : > { %5474 = vst.msk [vmem:[#allocation6 + $0x48] sm:$0xff] %vm3173_vm15, %v5436_v22  ;;  %v14320_v16 = vcombine.low %v5984_v17, %v5994_v14  ;;  %v5856_v1 = vshrl.u32 %v5792_v26, 16  ;;  %v5859_v14 = vshll.u32 %v5792_v26, 16  ;;  %v5865_v18 = vshrl.u32 %v5793_v62, 16 }
 0x4b6   : > { %5733 = vrot.lane.b32.xlu1 %v13963_v32, %s10795_s28  ;;  %v5438_v31 = vpop.permute.xlu0 %5437  ;;  %v6108_v32 = vshrl.u32 %v5819_v25, 16  ;;  %v5868_v20 = vshll.u32 %v5793_v62, 16  ;;  %v14354_v43 = vcombine.low %v6068_v12, %v6078_v39  ;;  %v6096_v0 = vsel %vm14196_vm9, %v14348_v44, %v14335_v34  ;;  %v5821_v25 = vld [vmem:[#allocation3 + $0x74] sm:$0x3]  ;;  %v5208_v62 = vld [vmem:[#allocation3 + $0xec] sm:$0x1] }
 0x4b7   : > { %5475 = vst.msk [vmem:[#allocation6 + $0x50] sm:$0xff] %vm3173_vm15, %v5438_v31  ;;  %v14372_v22 = vrot.slane %v6111_v46, 6  ;;  %v5858_v58 = vrot.slane %v5856_v1, 5  ;;  %v5861_v38 = vrot.slane %v5859_v14, 6  ;;  %v5867_v17 = vrot.slane %v5865_v18, 5 }
 0x4b8   : > { %v5440_v36 = vpop.permute.xlu1 %5439  ;;  %5735 = vrot.lane.b32.xlu0 %v13974_v56, %s10795_s28  ;;  %v14362_v7 = vrot.slane %v6108_v32, 5  ;;  %v5870_v45 = vrot.slane %v5868_v20, 6  ;;  %v5719_v48 = vrot.slane %v14358_v3, 5  ;;  %v5886_v50 = vrot.slane %v5884_v10, 5 }
 0x4b9   : > { %5476 = vst.msk [vmem:[#allocation6 + $0x58] sm:$0xff] %vm3173_vm15, %v5440_v36  ;;  %v5889_v31 = vrot.slane %v5887_v5, 6  ;;  %v6120_v26 = vshll.u32 %v14327_v29, 16  ;;  %v5895_v30 = vrot.slane %v5893_v24, 5  ;;  %v5898_v42 = vrot.slane %v5896_v47, 6 }
 0x4ba   : > { %5737 = vrot.lane.b32.xlu1 %v13984_v19, %s10795_s28  ;;  %v5442_v56 = vpop.permute.xlu0 %5441  ;;  %v5903_v39 = vshrl.u32 %v5797_v2, 16  ;;  %v6127_v32 = vshrl.u32 %v5821_v25, 16  ;;  %v6130_v36 = vshll.u32 %v5821_v25, 16  ;;  %v6136_v41 = vshrl.u32 %v14364_v60, 16 }
 0x4bb   : > { %5477 = vst.msk [vmem:[#allocation6 + $0x60] sm:$0xff] %vm3173_vm15, %v5442_v56  ;;  %v5862_v12 = vor.u32 %v5861_v38, %v5858_v58  ;;  %v14384_v29 = vor.u32 %v5870_v45, %v5867_v17  ;;  %v5877_v46 = vrot.slane %v5875_v51, 5  ;;  %v5880_v49 = vrot.slane %v5878_v21, 6  ;;  %v5826_v17 = vld [vmem:[#allocation3 + $0x88] sm:$0xf] }
 0x4bc   : > { %v5444_v19 = vpop.permute.xlu1 %5443  ;;  %5739 = vrot.lane.b32.xlu0 %v13994_v27, %s10795_s28  ;;  %v10124_v14 = vrot.slane %v5206_v33, 9  ;;  %v5721_v18 = vrot.slane %v5719_v48, 4  ;;  %v5722_v20 = vrot.slane %v5208_v62, 5  ;;  %v5890_v56 = vor.u32 %v5889_v31, %v5886_v50  ;;  %v5825_v33 = vld [vmem:[#allocation3 + $0x84] sm:$0xe] }
 0x4bd   : > { %5478 = vst.msk [vmem:[#allocation6 + $0x68] sm:$0xff] %vm3173_vm15, %v5444_v19  ;;  %v14389_v10 = vor.u32 %v5898_v42, %v5895_v30  ;;  %v5905_v5 = vrot.slane %v5903_v39, 5  ;;  %v5908_v3 = vrot.slane %v5906_v15, 6  ;;  %v6114_v47 = vor.u32 %v14372_v22, %v14362_v7 }
 0x4be   : > { %5741 = vrot.lane.b32.xlu1 %v14004_v57, %s10795_s28  ;;  %v5446_v27 = vpop.permute.xlu0 %5445  ;;  %v6119_v57 = vrot.slane %v6117_v8, 5  ;;  %v5823_v8 = vld [vmem:[#allocation3 + $0x7c] sm:$0xf]  ;;  %v14399_v19 = vrot.slane %v6127_v32, 5  ;;  %v6139_v51 = vshll.u32 %v14364_v60, 16  ;;  %v5863_v21 = vrot.slane %v5862_v12, 4 }
 0x4bf   : > { %5479 = vst.msk [vmem:[#allocation6 + $0x70] sm:$0xff] %vm3173_vm15, %v5446_v27  ;;  %v5873_v2 = vrot.slane %v14384_v29, 4  ;;  %v5881_v58 = vor.u32 %v5880_v49, %v5877_v46  ;;  %v6145_v38 = vshrl.u32 %v5823_v8, 16  ;;  %v14410_v7 = vrot.slane %v6130_v36, 6  ;;  %v5824_v60 = vld [vmem:[#allocation3 + $0x80] sm:$0x3] }
 0x4c0   : > { %v5448_v37 = vpop.permute.xlu1 %5447  ;;  %5743 = vrot.lane.b32.xlu0 %v14014_v13, %s10795_s28  ;;  %v6122_v13 = vrot.slane %v6120_v26, 6  ;;  %v14412_v22 = vrot.slane %v6136_v41, 5  ;;  %v5723_v45 = vsel %vm11224_vm13, %v5721_v18, %v5722_v20  ;;  %v5891_v25 = vrot.slane %v5890_v56, 4  ;;  %v5827_v26 = vld [vmem:[#allocation3 + $0x8c] sm:$0x3] }
 0x4c1   : > { %5480 = vst.msk [vmem:[#allocation6 + $0x78] sm:$0xff] %vm3173_vm15, %v5448_v37  ;;  %v5901_v27 = vrot.slane %v14389_v10, 4  ;;  %v6148_v31 = vshll.u32 %v5823_v8, 16  ;;  %v6173_v62 = vshrl.u32 %v5826_v17, 16  ;;  %v6176_v30 = vshll.u32 %v5826_v17, 16 }
 0x4c2   : > { %5745 = vrot.lane.b32.xlu1 %v14024_v11, %s10795_s28  ;;  %v5495_v1 = vpop.permute.xlu0 %5494  ;;  %v14395_v11 = vsel %vm14196_vm9, %v6097_v28, %v6105_v53  ;;  %v5720_v28 = vsel %vm11224_vm13, %v10124_v14, %v5719_v48  ;;  %v14408_v53 = vor.u32 %v6122_v13, %v6119_v57  ;;  %v14420_v48 = vrot.slane %v6139_v51, 6  ;;  %v5828_v13 = vld [vmem:[#allocation3 + $0x90] sm:$0xe] }
 0x4c3   : > { %5542 = vst.msk [vmem:[#allocation6] sm:$0xff] %vm2843_vm14, %v5495_v1  ;;  %v5872_v42 = vsel %vm14196_vm9, %v5863_v21, %v14384_v29  ;;  %v5882_v39 = vsel %vm14196_vm9, %v5873_v2, %v5881_v58  ;;  %v6147_v15 = vrot.slane %v6145_v38, 5  ;;  %v6155_v37 = vshrl.u32 %v5824_v60, 16  ;;  %v5830_v58 = vld [vmem:[#allocation3 + $0x98] sm:$0x3] }
 0x4c4   : > { %v5497_v24 = vpop.permute.xlu1 %5496  ;;  %5747 = vrot.lane.b32.xlu0 %v14034_v40, %s10795_s28  ;;  %v10125_v57 = vcombine.low %v5720_v28, %v5723_v45  ;;  %v6158_v32 = vshll.u32 %v5824_v60, 16  ;;  %v6164_v36 = vshrl.u32 %v5825_v33, 16  ;;  %v6167_v41 = vshll.u32 %v5825_v33, 16  ;;  %v5831_v33 = vld [vmem:[#allocation3 + $0x9c] sm:$0xe] }
 0x4c5   : > { %5543 = vst.msk [vmem:[#allocation6 + $0x8] sm:$0xff] %vm2843_vm14, %v5497_v24  ;;  %v5900_v12 = vsel %vm14196_vm9, %v5891_v25, %v14389_v10  ;;  %v6183_v46 = vshrl.u32 %v5827_v26, 16  ;;  %v6186_v49 = vshll.u32 %v5827_v26, 16  ;;  %v6150_v14 = vrot.slane %v6148_v31, 6 }
 0x4c6   : > { %5749 = vrot.lane.b32.xlu1 %v14042_v6, %s10795_s28  ;;  %v5499_v40 = vpop.permute.xlu0 %5498  ;;  %v5909_v6 = vor.u32 %v5908_v3, %v5905_v5  ;;  %v6175_v18 = vrot.slane %v6173_v62, 5  ;;  %v6178_v20 = vrot.slane %v6176_v30, 6  ;;  %v6115_v8 = vrot.slane %v6114_v47, 4  ;;  %v5829_v3 = vld [vmem:[#allocation3 + $0x94] sm:$0xf] }
 0x4c7   : > { %5544 = vst.msk [vmem:[#allocation6 + $0x10] sm:$0xff] %vm2843_vm14, %v5499_v40  ;;  %v6133_v56 = vor.u32 %v14410_v7, %v14399_v19  ;;  %v6142_v10 = vor.u32 %v14420_v48, %v14412_v22  ;;  %v6157_v5 = vrot.slane %v6155_v37, 5  ;;  %v6160_v51 = vrot.slane %v6158_v32, 6  ;;  %v5832_v30 = vld [vmem:[#allocation3 + $0xa0] sm:$0xf] }
 0x4c8   : > { %v5501_v50 = vpop.permute.xlu1 %5500  ;;  %5751 = vrot.lane.b32.xlu0 %v14088_v9, %s10795_s28  ;;  %v5910_v29 = vsel %vm14196_vm9, %v5901_v27, %v5909_v6  ;;  %v6166_v21 = vrot.slane %v6164_v36, 5  ;;  %v6169_v2 = vrot.slane %v6167_v41, 6  ;;  %v6185_v47 = vrot.slane %v6183_v46, 5  ;;  %v5833_v37 = vld [vmem:[#allocation3 + $0xa4] sm:$0x3] }
 0x4c9   : > { %5545 = vst.msk [vmem:[#allocation6 + $0x18] sm:$0xff] %vm2843_vm14, %v5501_v50  ;;  %v6188_v38 = vrot.slane %v6186_v49, 6  ;;  %v6192_v17 = vshrl.u32 %v5828_v13, 16  ;;  %v6195_v19 = vshll.u32 %v5828_v13, 16  ;;  %v6125_v28 = vrot.slane %v14408_v53, 4 }
 0x4ca   : > { %5753 = vrot.lane.b32.xlu1 %v14155_v23, %s10795_s28  ;;  %v5503_v9 = vpop.permute.xlu0 %5502  ;;  %v10126_v23 = vcombine.low %v5872_v42, %v5882_v39  ;;  %v14449_v7 = vor.u32 %v6150_v14, %v6147_v15  ;;  %v14451_v60 = vor.u32 %v6178_v20, %v6175_v18  ;;  %v6201_v22 = vshrl.u32 %v5829_v3, 16 }
 0x4cb   : > { %5546 = vst.msk [vmem:[#allocation6 + $0x20] sm:$0xff] %vm2843_vm14, %v5503_v9  ;;  %v14460_v45 = vcombine.low %v6096_v0, %v14395_v11  ;;  %v6204_v25 = vshll.u32 %v5829_v3, 16  ;;  %v6211_v27 = vshrl.u32 %v5830_v58, 16  ;;  %v6214_v6 = vshll.u32 %v5830_v58, 16 }
 0x4cc   : > { %v5505_v1 = vpop.permute.xlu1 %5504  ;;  %5755 = vrot.lane.b32.xlu0 %v14260_v59, %s10795_s28  ;;  %v14444_v59 = vcombine.low %v5900_v12, %v5910_v29  ;;  %v6124_v48 = vsel %vm14196_vm9, %v6115_v8, %v14408_v53  ;;  %v6134_v31 = vsel %vm14196_vm9, %v6125_v28, %v6133_v56  ;;  %v14469_v26 = vrot.slane %v6142_v10, 4  ;;  %v5835_v12 = vld [vmem:[#allocation3 + $0xac] sm:$0xf]  ;;  %v5834_v8 = vld [vmem:[#allocation3 + $0xa8] sm:$0xe] }
 0x4cd   : > { %5547 = vst.msk [vmem:[#allocation6 + $0x28] sm:$0xff] %vm2843_vm14, %v5505_v1  ;;  %v6161_v34 = vor.u32 %v6160_v51, %v6157_v5  ;;  %v6170_v44 = vor.u32 %v6169_v2, %v6166_v21  ;;  %v6189_v0 = vor.u32 %v6188_v38, %v6185_v47  ;;  %v14472_v11 = vrot.slane %v6192_v17, 5  ;;  %v5838_v56 = vld [vmem:[#allocation3 + $0xb8] sm:$0xf]  ;;  %v5836_v51 = vld [vmem:[#allocation3 + $0xb0] sm:$0x3] }
 0x4ce   : > { %5757 = vrot.lane.b32.xlu1 %v10125_v57, %s10795_s28  ;;  %v5507_v24 = vpop.permute.xlu0 %5506  ;;  %v14474_v62 = vrot.slane %v6195_v19, 6  ;;  %v6153_v53 = vrot.slane %v14449_v7, 4  ;;  %v6181_v39 = vrot.slane %v14451_v60, 4  ;;  %v6203_v15 = vrot.slane %v6201_v22, 5  ;;  %v5837_v17 = vld [vmem:[#allocation3 + $0xb4] sm:$0xe] }
 0x4cf   : > { %5548 = vst.msk [vmem:[#allocation6 + $0x30] sm:$0xff] %vm2843_vm14, %v5507_v24  ;;  %v6220_v9 = vshrl.u32 %v5831_v33, 16  ;;  %v6206_v57 = vrot.slane %v6204_v25, 6  ;;  %v14481_v32 = vrot.slane %v6211_v27, 5  ;;  %v14483_v36 = vrot.slane %v6214_v6, 6  ;;  %s10797_s28 = smov 72  }
 0x4d0   : > { %v5509_v40 = vpop.permute.xlu1 %5508  ;;  %6351 = vrot.lane.b32.xlu0 %v10126_v23, %s16220_s27  ;;  %v6223_v41 = vshll.u32 %v5831_v33, 16  ;;  %v14487_v46 = vcombine.low %v6124_v48, %v6134_v31  ;;  %v6152_v49 = vsel %vm14196_vm9, %v14469_v26, %v14449_v7  ;;  %v6229_v1 = vshrl.u32 %v5832_v30, 16  ;;  %v5839_v27 = vld [vmem:[#allocation3 + $0xbc] sm:$0x3] }
 0x4d1   : > { %5549 = vst.msk [vmem:[#allocation6 + $0x38] sm:$0xff] %vm2843_vm14, %v5509_v40  ;;  %v6232_v23 = vshll.u32 %v5832_v30, 16  ;;  %v14496_v14 = vsel %vm14196_vm9, %v6153_v53, %v6161_v34  ;;  %v14498_v18 = vrot.slane %v6170_v44, 4  ;;  %v14502_v20 = vsel %vm14196_vm9, %v6181_v39, %v6189_v0 }
 0x4d2   : > { %6353 = vrot.lane.b32.xlu1 %v14444_v59, %s16220_s27  ;;  %v5511_v50 = vpop.permute.xlu0 %5510  ;;  %v6198_v13 = vor.u32 %v14474_v62, %v14472_v11  ;;  %v14508_v5 = vrot.slane %v6220_v9, 5  ;;  %v6239_v3 = vshrl.u32 %v5833_v37, 16  ;;  %v6242_v24 = vshll.u32 %v5833_v37, 16 }
 0x4d3   : > { %5550 = vst.msk [vmem:[#allocation6 + $0x40] sm:$0xff] %vm2843_vm14, %v5511_v50  ;;  %v6257_v21 = vshrl.u32 %v5835_v12, 16  ;;  %v14511_v2 = vor.u32 %v6206_v57, %v6203_v15  ;;  %v6217_v58 = vor.u32 %v14483_v36, %v14481_v32  ;;  %v14515_v47 = vrot.slane %v6223_v41, 6 }
 0x4d4   : > { %v5513_v42 = vpop.permute.xlu1 %5512  ;;  %6355 = vrot.lane.b32.xlu0 %v14306_v55, %s16220_s27  ;;  %v6260_v38 = vshll.u32 %v5835_v12, 16  ;;  %v6231_v40 = vrot.slane %v6229_v1, 5  ;;  %v6234_v28 = vrot.slane %v6232_v23, 6  ;;  %v6248_v22 = vshrl.u32 %v5834_v8, 16 }
 0x4d5   : > { %5551 = vst.msk [vmem:[#allocation6 + $0x48] sm:$0xff] %vm2843_vm14, %v5513_v42  ;;  %v6251_v25 = vshll.u32 %v5834_v8, 16  ;;  %v6267_v6 = vshrl.u32 %v5836_v51, 16  ;;  %v6270_v33 = vshll.u32 %v5836_v51, 16  ;;  %v6285_v50 = vshrl.u32 %v5838_v56, 16 }
 0x4d6   : > { %6357 = vrot.lane.b32.xlu1 %v14313_v54, %s16220_s27  ;;  %v5515_v29 = vpop.permute.xlu0 %5514  ;;  %v6288_v48 = vshll.u32 %v5838_v56, 16  ;;  %v6241_v34 = vrot.slane %v6239_v3, 5  ;;  %v6244_v44 = vrot.slane %v6242_v24, 6  ;;  %v6259_v0 = vrot.slane %v6257_v21, 5 }
 0x4d7   : > { %5552 = vst.msk [vmem:[#allocation6 + $0x50] sm:$0xff] %vm2843_vm14, %v5515_v29  ;;  %v6276_v30 = vshrl.u32 %v5837_v17, 16  ;;  %v6262_v42 = vrot.slane %v6260_v38, 6  ;;  %v6279_v53 = vshll.u32 %v5837_v17, 16  ;;  %v6295_v39 = vshrl.u32 %v5839_v27, 16 }
 0x4d8   : > { %v5517_v10 = vpop.permute.xlu1 %5516  ;;  %6359 = vrot.lane.b32.xlu0 %v14320_v16, %s16220_s27  ;;  %v6298_v15 = vshll.u32 %v5839_v27, 16  ;;  %v6209_v9 = vrot.slane %v14511_v2, 4  ;;  %v6235_v57 = vor.u32 %v6234_v28, %v6231_v40  ;;  %v6250_v32 = vrot.slane %v6248_v22, 5 }
 0x4d9   : > { %5553 = vst.msk [vmem:[#allocation6 + $0x58] sm:$0xff] %vm2843_vm14, %v5517_v10  ;;  %v6253_v36 = vrot.slane %v6251_v25, 6  ;;  %v6269_v41 = vrot.slane %v6267_v6, 5  ;;  %v6272_v12 = vrot.slane %v6270_v33, 6  ;;  %v6287_v29 = vrot.slane %v6285_v50, 5 }
 0x4da   : > { %6361 = vrot.lane.b32.xlu1 %v14331_v4, %s16220_s27  ;;  %v5519_v19 = vpop.permute.xlu0 %5518  ;;  %v6290_v1 = vrot.slane %v6288_v48, 6  ;;  %vm5619_vm15 = vcmask 425344   ;;  %v6226_v8 = vor.u32 %v14515_v47, %v14508_v5  ;;  %v6245_v56 = vor.u32 %v6244_v44, %v6241_v34 }
 0x4db   : > { %5554 = vst.msk [vmem:[#allocation6 + $0x60] sm:$0xff] %vm2843_vm14, %v5519_v19  ;;  %v6278_v10 = vrot.slane %v6276_v30, 5  ;;  %v6263_v3 = vor.u32 %v6262_v42, %v6259_v0  ;;  %v6281_v24 = vrot.slane %v6279_v53, 6  ;;  %v6297_v51 = vrot.slane %v6295_v39, 5 }
 0x4dc   : > { %v5521_v31 = vpop.permute.xlu1 %5520  ;;  %6363 = vrot.lane.b32.xlu0 %v14333_v52, %s16220_s27  ;;  %v6300_v21 = vrot.slane %v6298_v15, 6  ;;  %v14540_v17 = vcombine.low %v6152_v49, %v14496_v14  ;;  %v6180_v5 = vsel %vm14196_vm9, %v14498_v18, %v14451_v60  ;;  %v6199_v47 = vrot.slane %v6198_v13, 4 }
 0x4dd   : > { %5555 = vst.msk [vmem:[#allocation6 + $0x68] sm:$0xff] %vm2843_vm14, %v5521_v31  ;;  %v6218_v19 = vsel %vm14196_vm9, %v6209_v9, %v6217_v58  ;;  %v6237_v40 = vrot.slane %v6235_v57, 4  ;;  %v6254_v28 = vor.u32 %v6253_v36, %v6250_v32  ;;  %v6273_v22 = vor.u32 %v6272_v12, %v6269_v41  ;;  %v6799_v9 = vld [vmem:[#allocation3 + $0x4] sm:$0xf]  ;;  %v6802_v32 = vld [vmem:[#allocation3 + $0x10] sm:$0xf] }
 0x4de   : > { %6365 = vrot.lane.b32.xlu1 %v14354_v43, %s16220_s27  ;;  %v5523_v37 = vpop.permute.xlu0 %5522  ;;  %v6291_v7 = vor.u32 %v6290_v1, %v6287_v29  ;;  %v14555_v49 = vcombine.low %v6180_v5, %v14502_v20  ;;  %v6208_v60 = vsel %vm14196_vm9, %v6199_v47, %v14511_v2  ;;  %v6227_v11 = vrot.slane %v6226_v8, 4  ;;  %v6798_v41 = vld [vmem:[#allocation3] sm:$0xc]  ;;  %v6800_v12 = vld [vmem:[#allocation3 + $0x8] sm:$0x3] }
 0x4df   : > { %5556 = vst.msk [vmem:[#allocation6 + $0x70] sm:$0xff] %vm2843_vm14, %v5523_v37  ;;  %v6246_v62 = vsel %vm14196_vm9, %v6237_v40, %v6245_v56  ;;  %v6265_v14 = vrot.slane %v6263_v3, 4  ;;  %v6282_v18 = vor.u32 %v6281_v24, %v6278_v10  ;;  %v6301_v13 = vor.u32 %v6300_v21, %v6297_v51  ;;  %v10705_v1 = vld [vmem:[%s16173_s5] sm:$0xff]   ;;  %v6803_v56 = vld [vmem:[#allocation3 + $0x14] sm:$0x3] }
 0x4e0   : > { %v5525_v23 = vpop.permute.xlu1 %5524  ;;  %6367 = vrot.lane.b32.xlu0 %v14460_v45, %s16220_s27  ;;  %v14565_v25 = vcombine.low %v6208_v60, %v6218_v19  ;;  %v6236_v20 = vsel %vm14196_vm9, %v6227_v11, %v6235_v57  ;;  %v6255_v2 = vrot.slane %v6254_v28, 4  ;;  %v6293_v6 = vrot.slane %v6291_v7, 4  ;;  %v6801_v8 = vld [vmem:[#allocation3 + $0xc] sm:$0xc]  ;;  %10512 = vmatprep.subr.bf16.mxu0 %v10705_v1  ;;  %v6805_v40 = vld [vmem:[#allocation3 + $0x1c] sm:$0xf] }
 0x4e1   : > { %5557 = vst.msk [vmem:[#allocation6 + $0x78] sm:$0xff] %vm2843_vm14, %v5525_v23  ;;  %v6274_v27 = vsel %vm14196_vm9, %v6265_v14, %v6273_v22  ;;  %v14574_v50 = vcombine.low %v6236_v20, %v6246_v62  ;;  %v6283_v31 = vrot.slane %v6282_v18, 4  ;;  %v6911_v36 = vrot.slane %v6799_v9, 6  ;;  %10513 = vmatpush3.bf16.msra.mxu0 %v10705_v1  ;;  %v10707_v62 = vld [vmem:[%s16173_s5 + $0x10] sm:$0xff]  }
 0x4e2   : > { %6369 = vrot.lane.b32.xlu1 %v14487_v46, %s16220_s27  ;;  %v5572_v38 = vpop.permute.xlu0 %5571  ;;  %v6264_v48 = vsel %vm14196_vm9, %v6255_v2, %v6263_v3  ;;  %v6302_v34 = vsel %vm14196_vm9, %v6293_v6, %v6301_v13  ;;  %v6918_v29 = vrot.slane %v6802_v32, 6  ;;  %vm6907_vm14 = vcmask 1045508   ;;  %v6808_v13 = vld [vmem:[#allocation3 + $0x28] sm:$0xf]  ;;  %v6809_v6 = vld [vmem:[#allocation3 + $0x2c] sm:$0x3] }
 0x4e3   : > { %5620 = vst.msk [vmem:[#allocation6] sm:$0xff] %vm5619_vm15, %v5572_v38  ;;  %v14583_v0 = vcombine.low %v6264_v48, %v6274_v27  ;;  %v6292_v30 = vsel %vm14196_vm9, %v6283_v31, %v6291_v7  ;;  %v10146_v10 = vrot.slane %v6798_v41, 10  ;;  %v6913_v3 = vrot.slane %v6911_v36, 4  ;;  %vm14621_vm11 = vmor %vm701_vm0, %vm6907_vm14  ;;  %v6804_v27 = vld [vmem:[#allocation3 + $0x18] sm:$0xc]  ;;  %v10708_v31 = vld [vmem:[%s16173_s5 + $0x18] sm:$0xff]  }
 0x4e4   : > { %v5574_v26 = vpop.permute.xlu1 %5573  ;;  %6371 = vrot.lane.b32.xlu0 %v14540_v17, %s16220_s27  ;;  %v14590_v53 = vcombine.low %v6292_v30, %v6302_v34  ;;  %v6914_v24 = vrot.slane %v6800_v12, 6  ;;  %v10147_v21 = vrot.slane %v6801_v8, 10  ;;  %v6920_v38 = vrot.slane %v6918_v29, 4  ;;  %v6812_v9 = vld [vmem:[#allocation3 + $0x38] sm:$0x3] }
 0x4e5   : > { %5621 = vst.msk [vmem:[#allocation6 + $0x8] sm:$0xff] %vm5619_vm15, %v5574_v26  ;;  %v6921_v5 = vrot.slane %v6803_v56, 6  ;;  %v6912_v28 = vsel %vm14621_vm11, %v10146_v10, %v6911_v36  ;;  %v6806_v26 = vld [vmem:[#allocation3 + $0x20] sm:$0x3]  ;;  %v6925_v11 = vrot.slane %v6805_v40, 6  ;;  %v6932_v48 = vrot.slane %v6808_v13, 6 }
 0x4e6   : > { %6373 = vrot.lane.b32.xlu1 %v14555_v49, %s16220_s27  ;;  %v5576_v58 = vpop.permute.xlu0 %5575  ;;  %v6915_v22 = vsel %vm14621_vm11, %v6913_v3, %v6914_v24  ;;  %v10148_v30 = vrot.slane %v6804_v27, 10  ;;  %v6810_v56 = vld [vmem:[#allocation3 + $0x30] sm:$0xc]  ;;  %v6814_v10 = vld [vmem:[#allocation3 + $0x40] sm:$0xf]  ;;  %vm6781_vm14 = vcmask 786144  }
 0x4e7   : > { %5622 = vst.msk [vmem:[#allocation6 + $0x10] sm:$0xff] %vm5619_vm15, %v5576_v58  ;;  %v6922_v60 = vsel %vm14621_vm11, %v6920_v38, %v6921_v5  ;;  %v10162_v18 = vcombine.low %v6912_v28, %v6915_v22  ;;  %v6928_v58 = vrot.slane %v6806_v26, 6  ;;  %v6934_v32 = vrot.slane %v6932_v48, 4  ;;  %v6815_v5 = vld [vmem:[#allocation3 + $0x44] sm:$0x3] }
 0x4e8   : > { %v5578_v33 = vpop.permute.xlu1 %5577  ;;  %6375 = vrot.lane.b32.xlu0 %v14565_v25, %s16220_s27  ;;  %v6946_v40 = vrot.slane %v6814_v10, 6  ;;  %v10711_v26 = vld [vmem:[%s16173_s5 + $0x30] ss:$0 sps:$4 sm:$0x33]  }
 0x4e9   : > { %5623 = vst.msk [vmem:[#allocation6 + $0x18] sm:$0xff] %vm5619_vm15, %v5578_v33  ;;  %v6927_v33 = vrot.slane %v6925_v11, 4 }
 0x4ea   : > { %6377 = vrot.lane.b32.xlu1 %v14574_v50, %s16220_s27  ;;  %v5580_v44 = vpop.permute.xlu0 %5579 }
 0x4eb   : > { %5624 = vst.msk [vmem:[#allocation6 + $0x20] sm:$0xff] %vm5619_vm15, %v5580_v44  ;;  %v6811_v44 = vld [vmem:[#allocation3 + $0x34] sm:$0xf] }
 0x4ec   : > { %v5582_v42 = vpop.permute.xlu1 %5581  ;;  %6379 = vrot.lane.b32.xlu0 %v14583_v0, %s16220_s27  ;;  %v6939_v36 = vrot.slane %v6811_v44, 6 }
 0x4ed   : > { %5625 = vst.msk [vmem:[#allocation6 + $0x28] sm:$0xff] %vm5619_vm15, %v5582_v42  ;;  %v6929_v42 = vsel %vm14621_vm11, %v6927_v33, %v6928_v58 }
 0x4ee   : > { %6381 = vrot.lane.b32.xlu1 %v14590_v53, %s16220_s27  ;;  %v5584_v39 = vpop.permute.xlu0 %5583  ;;  %v6941_v24 = vrot.slane %v6939_v36, 4 }
 0x4ef   : > { %5626 = vst.msk [vmem:[#allocation6 + $0x30] sm:$0xff] %vm5619_vm15, %v5584_v39  ;;  %v6935_v39 = vrot.slane %v6809_v6, 6 }
 0x4f0   : > { %v5586_v15 = vpop.permute.xlu1 %5585  ;;  %6446 = vrot.lane.b32.xlu0 %v14444_v59, %s10785_s22 }
 0x4f1   : > { %5627 = vst.msk [vmem:[#allocation6 + $0x38] sm:$0xff] %vm5619_vm15, %v5586_v15  ;;  %v6936_v1 = vsel %vm14621_vm11, %v6934_v32, %v6935_v39  ;;  %v6817_v39 = vld [vmem:[#allocation3 + $0x4c] sm:$0xf] }
 0x4f2   : > { %6448 = vrot.lane.b32.xlu1 %v14306_v55, %s10785_s22  ;;  %v5588_v37 = vpop.permute.xlu0 %5587 }
 0x4f3   : > { %5628 = vst.msk [vmem:[#allocation6 + $0x40] sm:$0xff] %vm5619_vm15, %v5588_v37  ;;  %v6807_v37 = vld [vmem:[#allocation3 + $0x24] sm:$0xc] }
 0x4f4   : > { %v5590_v57 = vpop.permute.xlu1 %5589  ;;  %6450 = vrot.lane.b32.xlu0 %v14313_v54, %s10785_s22 }
 0x4f5   : > { %5629 = vst.msk [vmem:[#allocation6 + $0x48] sm:$0xff] %vm5619_vm15, %v5590_v57  ;;  %v6926_v57 = vsel %vm14621_vm11, %v10148_v30, %v6925_v11  ;;  %v6813_v11 = vld [vmem:[#allocation3 + $0x3c] sm:$0xc] }
 0x4f6   : > { %6452 = vrot.lane.b32.xlu1 %v14320_v16, %s10785_s22  ;;  %v5592_v59 = vpop.permute.xlu0 %5591  ;;  %v14663_v12 = vcombine.low %v6926_v57, %v6929_v42  ;;  %v10151_v13 = vrot.slane %v6813_v11, 10 }
 0x4f7   : > { %5630 = vst.msk [vmem:[#allocation6 + $0x50] sm:$0xff] %vm5619_vm15, %v5592_v59  ;;  %v10709_v59 = vld [vmem:[%s16173_s5 + $0x20] sm:$0xff]  }
 0x4f8   : > { %v5594_v23 = vpop.permute.xlu1 %5593  ;;  %6541 = vrot.lane.b32.xlu0 %v14306_v55, %s10796_s23  ;;  %v10706_v55 = vld [vmem:[%s16173_s5 + $0x8] sm:$0xff]  }
 0x4f9   : > { %5631 = vst.msk [vmem:[#allocation6 + $0x58] sm:$0xff] %vm5619_vm15, %v5594_v23  ;;  %10514 = vmatprep.subr.bf16.mxu0 %v10706_v55  ;;  %v6942_v23 = vrot.slane %v6812_v9, 6  ;;  %v6953_v9 = vrot.slane %v6817_v39, 6 }
 0x4fa   : > { %6543 = vrot.lane.b32.xlu1 %v14313_v54, %s10796_s23  ;;  %v5596_v51 = vpop.permute.xlu0 %5595  ;;  %10515 = vmatpush3.bf16.msra.mxu0 %v10706_v55  ;;  %v10150_v55 = vrot.slane %v6810_v56, 10  ;;  %v6821_v56 = vld [vmem:[#allocation3 + $0x5c] sm:$0x3] }
 0x4fb   : > { %5632 = vst.msk [vmem:[#allocation6 + $0x60] sm:$0xff] %vm5619_vm15, %v5596_v51  ;;  %10516 = vmatprep.subr.bf16.mxu0 %v10707_v62  ;;  %v10710_v51 = vld [vmem:[%s16173_s5 + $0x28] sm:$0xff]  }
 0x4fc   : > { %v5598_v19 = vpop.permute.xlu1 %5597  ;;  %6637 = vrot.lane.b32.xlu0 %v14313_v54, %s10797_s28  ;;  %v6919_v54 = vsel %vm14621_vm11, %v10147_v21, %v6918_v29  ;;  %v10149_v29 = vrot.slane %v6807_v37, 10  ;;  %v6940_v22 = vsel %vm14621_vm11, %v10150_v55, %v6939_v36  ;;  %v6818_v37 = vld [vmem:[#allocation3 + $0x50] sm:$0x3] }
 0x4fd   : > { %5633 = vst.msk [vmem:[#allocation6 + $0x68] sm:$0xff] %vm5619_vm15, %v5598_v19  ;;  %v10163_v2 = vcombine.low %v6919_v54, %v6922_v60  ;;  %v6943_v19 = vsel %vm14621_vm11, %v6941_v24, %v6942_v23  ;;  %v6956_v32 = vrot.slane %v6818_v37, 6 }
 0x4fe   : > { %6639 = vrot.lane.b32.xlu1 %v14320_v16, %s10797_s28  ;;  %v5600_v7 = vpop.permute.xlu0 %5599  ;;  %10517 = vmatpush3.bf16.msra.mxu0 %v10707_v62  ;;  %v6933_v3 = vsel %vm14621_vm11, %v10149_v29, %v6932_v48  ;;  %v14693_v60 = vcombine.low %v6940_v22, %v6943_v19  ;;  %v6948_v62 = vrot.slane %v6946_v40, 4  ;;  %v6820_v29 = vld [vmem:[#allocation3 + $0x58] sm:$0xf] }
 0x4ff   : > { %5634 = vst.msk [vmem:[#allocation6 + $0x70] sm:$0xff] %vm5619_vm15, %v5600_v7  ;;  %10518 = vmatprep.subr.bf16.mxu0 %v10708_v31  ;;  %v14678_v38 = vcombine.low %v6933_v3, %v6936_v1  ;;  %v6949_v7 = vrot.slane %v6815_v5, 6  ;;  %v6960_v3 = vrot.slane %v6820_v29, 6  ;;  %v6819_v5 = vld [vmem:[#allocation3 + $0x54] sm:$0xc] }
 0x500   : > { %v5602_v14 = vpop.permute.xlu1 %5601  ;;  %6733 = vrot.lane.b32.xlu0 %v14320_v16, %s10798_s16 }
 0x501   : > { %5635 = vst.msk [vmem:[#allocation6 + $0x78] sm:$0xff] %vm5619_vm15, %v5602_v14  ;;  %v7570_v14 = vsel %vm701_vm0, %v10711_v26, 0  ;;  %v6950_v58 = vsel %vm14621_vm11, %v6948_v62, %v6949_v7  ;;  %v6962_v55 = vrot.slane %v6960_v3, 4  ;;  %vm6685_vm15 = vcmask 622144  }
 0x502   : > { %6735 = vrot.lane.b32.xlu1 %v14331_v4, %s10798_s16  ;;  %v5650_v20 = vpop.permute.xlu0 %5649  ;;  %10519 = vmatpush3.bf16.msra.mxu0 %v10708_v31 }
 0x503   : > { %5698 = vst.msk [vmem:[#allocation6] sm:$0xff] %vm5697_vm10, %v5650_v20  ;;  %10520 = vmatprep.subr.bf16.mxu0 %v10709_v59 }
 0x504   : > { %v5652_v34 = vpop.permute.xlu1 %5651  ;;  %7069 = vrot.lane.b32.xlu0 %v10162_v18, %s16272_s17 }
 0x505   : > { %5699 = vst.msk [vmem:[#allocation6 + $0x8] sm:$0xff] %vm5697_vm10, %v5652_v34 }
 0x506   : > { %7071 = vrot.lane.b32.xlu1 %v10163_v2, %s16272_s17  ;;  %v5654_v15 = vpop.permute.xlu0 %5653  ;;  %10521 = vmatpush3.bf16.msra.mxu0 %v10709_v59  ;;  %v6816_v59 = vld [vmem:[#allocation3 + $0x48] sm:$0xc] }
 0x507   : > { %5700 = vst.msk [vmem:[#allocation6 + $0x10] sm:$0xff] %vm5697_vm10, %v5654_v15  ;;  %10522 = vmatprep.subr.bf16.mxu0 %v10710_v51  ;;  %v10152_v1 = vrot.slane %v6816_v59, 10 }
 0x508   : > { %v5656_v41 = vpop.permute.xlu1 %5655  ;;  %7146 = vrot.lane.b32.xlu0 %v10163_v2, %s10799_s25  ;;  %v6947_v2 = vsel %vm14621_vm11, %v10151_v13, %v6946_v40 }
 0x509   : > { %5701 = vst.msk [vmem:[#allocation6 + $0x18] sm:$0xff] %vm5697_vm10, %v5656_v41  ;;  %v14710_v6 = vcombine.low %v6947_v2, %v6950_v58  ;;  %v6955_v41 = vrot.slane %v6953_v9, 4  ;;  %v6954_v10 = vsel %vm14621_vm11, %v10152_v1, %v6953_v9 }
 0x50a   : > { %7148 = vrot.lane.b32.xlu1 %v14663_v12, %s10799_s25  ;;  %v5658_v8 = vpop.permute.xlu0 %5657  ;;  %10523 = vmatpush3.bf16.msra.mxu0 %v10710_v51 }
 0x50b   : > { %5702 = vst.msk [vmem:[#allocation6 + $0x20] sm:$0xff] %vm5697_vm10, %v5658_v8  ;;  %10594 = vmatprep.subr.msk.bf16.mxu0 %vm701_vm0, %v10711_v26  ;;  %v6957_v23 = vsel %vm14621_vm11, %v6955_v41, %v6956_v32  ;;  %v6825_v41 = vld [vmem:[#allocation3 + $0x6c] sm:$0xc] }
 0x50c   : > { %v5660_v21 = vpop.permute.xlu1 %5659  ;;  %7224 = vrot.lane.b32.xlu0 %v14663_v12, %s10800_s29  ;;  %v14758_v51 = vcombine.low %v6954_v10, %v6957_v23 }
 0x50d   : > { %5703 = vst.msk [vmem:[#allocation6 + $0x28] sm:$0xff] %vm5697_vm10, %v5660_v21  ;;  %v6963_v21 = vrot.slane %v6821_v56, 6 }
 0x50e   : > { %7226 = vrot.lane.b32.xlu1 %v14678_v38, %s10800_s29  ;;  %v5662_v28 = vpop.permute.xlu0 %5661  ;;  %10525 = vmatpush3.bf16.msra.mxu0 %v7570_v14 }
 0x50f   : > { %5704 = vst.msk [vmem:[#allocation6 + $0x30] sm:$0xff] %vm5697_vm10, %v5662_v28  ;;  %v6964_v40 = vsel %vm14621_vm11, %v6962_v55, %v6963_v21 }
 0x510   : > { %v5664_v54 = vpop.permute.xlu1 %5663  ;;  %7302 = vrot.lane.b32.xlu0 %v14678_v38, %s10801_s21 }
 0x511   : > { %5705 = vst.msk [vmem:[#allocation6 + $0x38] sm:$0xff] %vm5697_vm10, %v5664_v54 }
 0x512   : > { %7304 = vrot.lane.b32.xlu1 %v14693_v60, %s10801_s21  ;;  %v5666_v18 = vpop.permute.xlu0 %5665 }
 0x513   : > { %5706 = vst.msk [vmem:[#allocation6 + $0x40] sm:$0xff] %vm5697_vm10, %v5666_v18 }
 0x514   : > { %v5668_v20 = vpop.permute.xlu1 %5667  ;;  %7380 = vrot.lane.b32.xlu0 %v14693_v60, %s10802_s26 }
 0x515   : > { %5707 = vst.msk [vmem:[#allocation6 + $0x48] sm:$0xff] %vm5697_vm10, %v5668_v20  ;;  %v6823_v20 = vld [vmem:[#allocation3 + $0x64] sm:$0xf] }
 0x516   : > { %6545 = vrot.lane.b32.xlu1 %v14320_v16, %s10796_s23  ;;  %v5670_v27 = vpop.permute.xlu0 %5669 }
 0x517   : > { %5708 = vst.msk [vmem:[#allocation6 + $0x50] sm:$0xff] %vm5697_vm10, %v5670_v27  ;;  %v6824_v27 = vld [vmem:[#allocation3 + $0x68] sm:$0x3] }
 0x518   : > { %v5672_v33 = vpop.permute.xlu1 %5671  ;;  %7382 = vrot.lane.b32.xlu0 %v14710_v6, %s10802_s26 }
 0x519   : > { %5709 = vst.msk [vmem:[#allocation6 + $0x58] sm:$0xff] %vm5697_vm10, %v5672_v33  ;;  %v6967_v33 = vrot.slane %v6823_v20, 6 }
 0x51a   : > { %6547 = vrot.lane.b32.xlu1 %v14331_v4, %s10796_s23  ;;  %v5674_v48 = vpop.permute.xlu0 %5673 }
 0x51b   : > { %5710 = vst.msk [vmem:[#allocation6 + $0x60] sm:$0xff] %vm5697_vm10, %v5674_v48  ;;  %v6970_v48 = vrot.slane %v6824_v27, 6 }
 0x51c   : > { %v5676_v31 = vpop.permute.xlu1 %5675  ;;  %6641 = vrot.lane.b32.xlu0 %v14331_v4, %s10797_s28 }
 0x51d   : > { %5711 = vst.msk [vmem:[#allocation6 + $0x68] sm:$0xff] %vm5697_vm10, %v5676_v31 }
 0x51e   : > { %6643 = vrot.lane.b32.xlu1 %v14333_v52, %s10797_s28  ;;  %v5678_v16 = vpop.permute.xlu0 %5677 }
 0x51f   : > { %5712 = vst.msk [vmem:[#allocation6 + $0x70] sm:$0xff] %vm5697_vm10, %v5678_v16  ;;  %v6822_v16 = vld [vmem:[#allocation3 + $0x60] sm:$0xc] }
 0x520   : > { %v5680_v34 = vpop.permute.xlu1 %5679  ;;  %6737 = vrot.lane.b32.xlu0 %v14333_v52, %s10798_s16 }
 0x521   : > { %5713 = vst.msk [vmem:[#allocation6 + $0x78] sm:$0xff] %vm5697_vm10, %v5680_v34  ;;  %v6969_v34 = vrot.slane %v6967_v33, 4  ;;  %vm7194_vm10 = vcmask 326944  }
 0x522   : > { %6739 = vrot.lane.b32.xlu1 %v14354_v43, %s10798_s16  ;;  %v5728_v44 = vpop.permute.xlu0 %5727 }
 0x523   : > { %5776 = vst.msk [vmem:[#allocation6] sm:$0xff] %vm5775_vm5, %v5728_v44  ;;  %v6826_v44 = vld [vmem:[#allocation3 + $0x70] sm:$0xf] }
 0x524   : > { %v5730_v30 = vpop.permute.xlu1 %5729  ;;  %7073 = vrot.lane.b32.xlu0 %v14663_v12, %s16272_s17  ;;  %v6974_v9 = vrot.slane %v6826_v44, 6 }
 0x525   : > { %5777 = vst.msk [vmem:[#allocation6 + $0x8] sm:$0xff] %vm5775_vm5, %v5730_v30  ;;  %v10154_v30 = vrot.slane %v6822_v16, 10 }
 0x526   : > { %7075 = vrot.lane.b32.xlu1 %v14678_v38, %s16272_s17  ;;  %v5732_v42 = vpop.permute.xlu0 %5731 }
 0x527   : > { %5778 = vst.msk [vmem:[#allocation6 + $0x10] sm:$0xff] %vm5775_vm5, %v5732_v42  ;;  %v6971_v42 = vsel %vm14621_vm11, %v6969_v34, %v6970_v48  ;;  %v6968_v37 = vsel %vm14621_vm11, %v10154_v30, %v6967_v33 }
 0x528   : > { %v5734_v15 = vpop.permute.xlu1 %5733  ;;  %7150 = vrot.lane.b32.xlu0 %v14678_v38, %s10799_s25  ;;  %v14824_v32 = vcombine.low %v6968_v37, %v6971_v42 }
 0x529   : > { %5779 = vst.msk [vmem:[#allocation6 + $0x18] sm:$0xff] %vm5775_vm5, %v5734_v15  ;;  %v6827_v15 = vld [vmem:[#allocation3 + $0x74] sm:$0x3] }
 0x52a   : > { %7152 = vrot.lane.b32.xlu1 %v14693_v60, %s10799_s25  ;;  %v5736_v57 = vpop.permute.xlu0 %5735 }
 0x52b   : > { %5780 = vst.msk [vmem:[#allocation6 + $0x20] sm:$0xff] %vm5775_vm5, %v5736_v57 }
 0x52c   : > { %v5738_v36 = vpop.permute.xlu1 %5737  ;;  %7228 = vrot.lane.b32.xlu0 %v14693_v60, %s10800_s29 }
 0x52d   : > { %5781 = vst.msk [vmem:[#allocation6 + $0x28] sm:$0xff] %vm5775_vm5, %v5738_v36  ;;  %v6977_v36 = vrot.slane %v6827_v15, 6 }
 0x52e   : > { %7230 = vrot.lane.b32.xlu1 %v14710_v6, %s10800_s29  ;;  %v5740_v12 = vpop.permute.xlu0 %5739 }
 0x52f   : > { %5782 = vst.msk [vmem:[#allocation6 + $0x30] sm:$0xff] %vm5775_vm5, %v5740_v12  ;;  %v6976_v12 = vrot.slane %v6974_v9, 4 }
 0x530   : > { %v5742_v8 = vpop.permute.xlu1 %5741  ;;  %7306 = vrot.lane.b32.xlu0 %v14710_v6, %s10801_s21 }
 0x531   : > { %5783 = vst.msk [vmem:[#allocation6 + $0x38] sm:$0xff] %vm5775_vm5, %v5742_v8  ;;  %v6978_v1 = vsel %vm14621_vm11, %v6976_v12, %v6977_v36 }
 0x532   : > { %6454 = vrot.lane.b32.xlu1 %v14331_v4, %s10785_s22  ;;  %v5744_v24 = vpop.permute.xlu0 %5743  ;;  %v10153_v4 = vrot.slane %v6819_v5, 10 }
 0x533   : > { %5784 = vst.msk [vmem:[#allocation6 + $0x40] sm:$0xff] %vm5775_vm5, %v5744_v24 }
 0x534   : > { %v5746_v38 = vpop.permute.xlu1 %5745  ;;  %7308 = vrot.lane.b32.xlu0 %v14758_v51, %s10801_s21  ;;  %v6961_v22 = vsel %vm14621_vm11, %v10153_v4, %v6960_v3  ;;  %v6829_v4 = vld [vmem:[#allocation3 + $0x7c] sm:$0xf] }
 0x535   : > { %5785 = vst.msk [vmem:[#allocation6 + $0x48] sm:$0xff] %vm5775_vm5, %v5746_v38  ;;  %v14776_v26 = vcombine.low %v6961_v22, %v6964_v40  ;;  %v6981_v22 = vrot.slane %v6829_v4, 6 }
 0x536   : > { %7384 = vrot.lane.b32.xlu1 %v14758_v51, %s10802_s26  ;;  %v5748_v19 = vpop.permute.xlu0 %5747 }
 0x537   : > { %5786 = vst.msk [vmem:[#allocation6 + $0x50] sm:$0xff] %vm5775_vm5, %v5748_v19 }
 0x538   : > { %v5750_v28 = vpop.permute.xlu1 %5749  ;;  %6456 = vrot.lane.b32.xlu0 %v14333_v52, %s10785_s22 }
 0x539   : > { %5787 = vst.msk [vmem:[#allocation6 + $0x58] sm:$0xff] %vm5775_vm5, %v5750_v28  ;;  %v6830_v28 = vld [vmem:[#allocation3 + $0x80] sm:$0x3] }
 0x53a   : > { %6549 = vrot.lane.b32.xlu1 %v14333_v52, %s10796_s23  ;;  %v5752_v7 = vpop.permute.xlu0 %5751 }
 0x53b   : > { %5788 = vst.msk [vmem:[#allocation6 + $0x60] sm:$0xff] %vm5775_vm5, %v5752_v7  ;;  %v6984_v7 = vrot.slane %v6830_v28, 6 }
 0x53c   : > { %v5754_v54 = vpop.permute.xlu1 %5753  ;;  %7386 = vrot.lane.b32.xlu0 %v14776_v26, %s10802_s26 }
 0x53d   : > { %5789 = vst.msk [vmem:[#allocation6 + $0x68] sm:$0xff] %vm5775_vm5, %v5754_v54 }
 0x53e   : > { %6551 = vrot.lane.b32.xlu1 %v14354_v43, %s10796_s23  ;;  %v5756_v11 = vpop.permute.xlu0 %5755 }
 0x53f   : > { %5790 = vst.msk [vmem:[#allocation6 + $0x70] sm:$0xff] %vm5775_vm5, %v5756_v11  ;;  %v6828_v11 = vld [vmem:[#allocation3 + $0x78] sm:$0xc] }
 0x540   : > { %v5758_v62 = vpop.permute.xlu1 %5757  ;;  %6645 = vrot.lane.b32.xlu0 %v14354_v43, %s10797_s28 }
 0x541   : > { %5791 = vst.msk [vmem:[#allocation6 + $0x78] sm:$0xff] %vm5775_vm5, %v5758_v62  ;;  %vm7272_vm5 = vcmask 490944  }
 0x542   : > { %6647 = vrot.lane.b32.xlu1 %v14460_v45, %s10797_s28  ;;  %v6352_v52 = vpop.permute.xlu0 %6351 }
 0x543   : > { %6399 = vst.msk [vmem:[#allocation6] sm:$0xff] %vm2035_vm4, %v6352_v52  ;;  %v6832_v52 = vld [vmem:[#allocation3 + $0x88] sm:$0xf] }
 0x544   : > { %v6354_v14 = vpop.permute.xlu1 %6353  ;;  %6741 = vrot.lane.b32.xlu0 %v14460_v45, %s10798_s16 }
 0x545   : > { %6400 = vst.msk [vmem:[#allocation6 + $0x8] sm:$0xff] %vm2035_vm4, %v6354_v14  ;;  %v10156_v14 = vrot.slane %v6828_v11, 10 }
 0x546   : > { %6743 = vrot.lane.b32.xlu1 %v14487_v46, %s10798_s16  ;;  %v6356_v18 = vpop.permute.xlu0 %6355 }
 0x547   : > { %6401 = vst.msk [vmem:[#allocation6 + $0x10] sm:$0xff] %vm2035_vm4, %v6356_v18  ;;  %v6982_v20 = vsel %vm14621_vm11, %v10156_v14, %v6981_v22 }
 0x548   : > { %v6358_v13 = vpop.permute.xlu1 %6357  ;;  %7077 = vrot.lane.b32.xlu0 %v14693_v60, %s16272_s17 }
 0x549   : > { %6402 = vst.msk [vmem:[#allocation6 + $0x18] sm:$0xff] %vm2035_vm4, %v6358_v13 }
 0x54a   : > { %7079 = vrot.lane.b32.xlu1 %v14710_v6, %s16272_s17  ;;  %v6360_v58 = vpop.permute.xlu0 %6359 }
 0x54b   : > { %6403 = vst.msk [vmem:[#allocation6 + $0x20] sm:$0xff] %vm2035_vm4, %v6360_v58  ;;  %v6833_v58 = vld [vmem:[#allocation3 + $0x8c] sm:$0x3] }
 0x54c   : > { %v6362_v2 = vpop.permute.xlu1 %6361  ;;  %7154 = vrot.lane.b32.xlu0 %v14710_v6, %s10799_s25 }
 0x54d   : > { %6404 = vst.msk [vmem:[#allocation6 + $0x28] sm:$0xff] %vm2035_vm4, %v6362_v2  ;;  %v6988_v2 = vrot.slane %v6832_v52, 6 }
 0x54e   : > { %7156 = vrot.lane.b32.xlu1 %v14758_v51, %s10799_s25  ;;  %v6364_v60 = vpop.permute.xlu0 %6363 }
 0x54f   : > { %6405 = vst.msk [vmem:[#allocation6 + $0x30] sm:$0xff] %vm2035_vm4, %v6364_v60  ;;  %v6991_v60 = vrot.slane %v6833_v58, 6  ;;  %v6990_v16 = vrot.slane %v6988_v2, 4 }
 0x550   : > { %v6366_v31 = vpop.permute.xlu1 %6365  ;;  %7232 = vrot.lane.b32.xlu0 %v14758_v51, %s10800_s29 }
 0x551   : > { %6406 = vst.msk [vmem:[#allocation6 + $0x38] sm:$0xff] %vm2035_vm4, %v6366_v31  ;;  %v6831_v31 = vld [vmem:[#allocation3 + $0x84] sm:$0xc] }
 0x552   : > { %7234 = vrot.lane.b32.xlu1 %v14776_v26, %s10800_s29  ;;  %v6368_v6 = vpop.permute.xlu0 %6367 }
 0x553   : > { %6407 = vst.msk [vmem:[#allocation6 + $0x40] sm:$0xff] %vm2035_vm4, %v6368_v6  ;;  %v6992_v6 = vsel %vm14621_vm11, %v6990_v16, %v6991_v60 }
 0x554   : > { %v6370_v39 = vpop.permute.xlu1 %6369  ;;  %7310 = vrot.lane.b32.xlu0 %v14776_v26, %s10801_s21 }
 0x555   : > { %6408 = vst.msk [vmem:[#allocation6 + $0x48] sm:$0xff] %vm2035_vm4, %v6370_v39 }
 0x556   : > { %6458 = vrot.lane.b32.xlu1 %v14354_v43, %s10785_s22  ;;  %v6372_v57 = vpop.permute.xlu0 %6371  ;;  %v10155_v43 = vrot.slane %v6825_v41, 10 }
 0x557   : > { %6409 = vst.msk [vmem:[#allocation6 + $0x50] sm:$0xff] %vm2035_vm4, %v6372_v57 }
 0x558   : > { %v6374_v59 = vpop.permute.xlu1 %6373  ;;  %7312 = vrot.lane.b32.xlu0 %v14824_v32, %s10801_s21  ;;  %v6975_v8 = vsel %vm14621_vm11, %v10155_v43, %v6974_v9  ;;  %v6835_v43 = vld [vmem:[#allocation3 + $0x94] sm:$0xf] }
 0x559   : > { %6410 = vst.msk [vmem:[#allocation6 + $0x58] sm:$0xff] %vm2035_vm4, %v6374_v59  ;;  %v14842_v10 = vcombine.low %v6975_v8, %v6978_v1 }
 0x55a   : > { %7388 = vrot.lane.b32.xlu1 %v14824_v32, %s10802_s26  ;;  %v6376_v29 = vpop.permute.xlu0 %6375 }
 0x55b   : > { %6411 = vst.msk [vmem:[#allocation6 + $0x60] sm:$0xff] %vm2035_vm4, %v6376_v29 }
 0x55c   : > { %v6378_v23 = vpop.permute.xlu1 %6377  ;;  %6460 = vrot.lane.b32.xlu0 %v14460_v45, %s10785_s22 }
 0x55d   : > { %6412 = vst.msk [vmem:[#allocation6 + $0x68] sm:$0xff] %vm2035_vm4, %v6378_v23  ;;  %v6836_v23 = vld [vmem:[#allocation3 + $0x98] sm:$0x3] }
 0x55e   : > { %6553 = vrot.lane.b32.xlu1 %v14460_v45, %s10796_s23  ;;  %v6380_v56 = vpop.permute.xlu0 %6379 }
 0x55f   : > { %6413 = vst.msk [vmem:[#allocation6 + $0x70] sm:$0xff] %vm2035_vm4, %v6380_v56  ;;  %v6998_v56 = vrot.slane %v6836_v23, 6 }
 0x560   : > { %v6382_v3 = vpop.permute.xlu1 %6381  ;;  %7390 = vrot.lane.b32.xlu0 %v14842_v10, %s10802_s26 }
 0x561   : > { %6414 = vst.msk [vmem:[#allocation6 + $0x78] sm:$0xff] %vm2035_vm4, %v6382_v3  ;;  %vm6589_vm4 = vcmask 458144  }
 0x562   : > { %6555 = vrot.lane.b32.xlu1 %v14487_v46, %s10796_s23  ;;  %v6447_v24 = vpop.permute.xlu0 %6446 }
 0x563   : > { %6494 = vst.msk [vmem:[#allocation6] sm:$0xff] %vm3329_vm7, %v6447_v24  ;;  %v6834_v24 = vld [vmem:[#allocation3 + $0x90] sm:$0xc] }
 0x564   : > { %v6449_v21 = vpop.permute.xlu1 %6448  ;;  %6649 = vrot.lane.b32.xlu0 %v14487_v46, %s10797_s28 }
 0x565   : > { %6495 = vst.msk [vmem:[#allocation6 + $0x8] sm:$0xff] %vm3329_vm7, %v6449_v21 }
 0x566   : > { %6651 = vrot.lane.b32.xlu1 %v14540_v17, %s10797_s28  ;;  %v6451_v45 = vpop.permute.xlu0 %6450 }
 0x567   : > { %6496 = vst.msk [vmem:[#allocation6 + $0x10] sm:$0xff] %vm3329_vm7, %v6451_v45  ;;  %v6838_v45 = vld [vmem:[#allocation3 + $0xa0] sm:$0xf] }
 0x568   : > { %v6453_v38 = vpop.permute.xlu1 %6452  ;;  %6745 = vrot.lane.b32.xlu0 %v14540_v17, %s10798_s16 }
 0x569   : > { %6497 = vst.msk [vmem:[#allocation6 + $0x18] sm:$0xff] %vm3329_vm7, %v6453_v38  ;;  %v10158_v38 = vrot.slane %v6834_v24, 10 }
 0x56a   : > { %6747 = vrot.lane.b32.xlu1 %v14555_v49, %s10798_s16  ;;  %v6542_v5 = vpop.permute.xlu0 %6541 }
 0x56b   : > { %6590 = vst.msk [vmem:[#allocation6] sm:$0xff] %vm6589_vm4, %v6542_v5 }
 0x56c   : > { %v6544_v55 = vpop.permute.xlu1 %6543  ;;  %7081 = vrot.lane.b32.xlu0 %v14758_v51, %s16272_s17 }
 0x56d   : > { %6591 = vst.msk [vmem:[#allocation6 + $0x8] sm:$0xff] %vm6589_vm4, %v6544_v55 }
 0x56e   : > { %7083 = vrot.lane.b32.xlu1 %v14776_v26, %s16272_s17  ;;  %v6638_v19 = vpop.permute.xlu0 %6637 }
 0x56f   : > { %6686 = vst.msk [vmem:[#allocation6] sm:$0xff] %vm6685_vm15, %v6638_v19  ;;  %v6839_v19 = vld [vmem:[#allocation3 + $0xa4] sm:$0x3] }
 0x570   : > { %v6640_v40 = vpop.permute.xlu1 %6639  ;;  %7158 = vrot.lane.b32.xlu0 %v14776_v26, %s10799_s25  ;;  %v6983_v26 = vrot.slane %v6981_v22, 4 }
 0x571   : > { %6687 = vst.msk [vmem:[#allocation6 + $0x8] sm:$0xff] %vm6685_vm15, %v6640_v40  ;;  %v7002_v40 = vrot.slane %v6838_v45, 6  ;;  %v5843_v45 = vld [vmem:[#allocation3 + $0xcc] sm:$0xe] }
 0x572   : > { %7160 = vrot.lane.b32.xlu1 %v14824_v32, %s10799_s25  ;;  %v6734_v51 = vpop.permute.xlu0 %6733  ;;  %v6985_v18 = vsel %vm14621_vm11, %v6983_v26, %v6984_v7 }
 0x573   : > { %6782 = vst.msk [vmem:[#allocation6] sm:$0xff] %vm6781_vm14, %v6734_v51  ;;  %v14890_v33 = vcombine.low %v6982_v20, %v6985_v18  ;;  %v7005_v51 = vrot.slane %v6839_v19, 6  ;;  %v7004_v11 = vrot.slane %v7002_v40, 4 }
 0x574   : > { %v6736_v54 = vpop.permute.xlu1 %6735  ;;  %7236 = vrot.lane.b32.xlu0 %v14824_v32, %s10800_s29 }
 0x575   : > { %6783 = vst.msk [vmem:[#allocation6 + $0x8] sm:$0xff] %vm6781_vm14, %v6736_v54  ;;  %v6837_v54 = vld [vmem:[#allocation3 + $0x9c] sm:$0xc] }
 0x576   : > { %7238 = vrot.lane.b32.xlu1 %v14842_v10, %s10800_s29  ;;  %v7070_v62 = vpop.permute.xlu0 %7069 }
 0x577   : > { %7117 = vst.msk [vmem:[#allocation6] sm:$0xff] %vm2751_vm12, %v7070_v62  ;;  %v7006_v62 = vsel %vm14621_vm11, %v7004_v11, %v7005_v51 }
 0x578   : > { %v7072_v13 = vpop.permute.xlu1 %7071  ;;  %7314 = vrot.lane.b32.xlu0 %v14842_v10, %s10801_s21 }
 0x579   : > { %7118 = vst.msk [vmem:[#allocation6 + $0x8] sm:$0xff] %vm2751_vm12, %v7072_v13 }
 0x57a   : > { %6462 = vrot.lane.b32.xlu1 %v14487_v46, %s10785_s22  ;;  %v7147_v27 = vpop.permute.xlu0 %7146  ;;  %v10157_v46 = vrot.slane %v6831_v31, 10 }
 0x57b   : > { %7195 = vst.msk [vmem:[#allocation6] sm:$0xff] %vm7194_vm10, %v7147_v27 }
 0x57c   : > { %v7149_v48 = vpop.permute.xlu1 %7148  ;;  %7316 = vrot.lane.b32.xlu0 %v14890_v33, %s10801_s21  ;;  %v6989_v30 = vsel %vm14621_vm11, %v10157_v46, %v6988_v2  ;;  %v6841_v46 = vld [vmem:[#allocation3 + $0xac] sm:$0xf] }
 0x57d   : > { %7196 = vst.msk [vmem:[#allocation6 + $0x8] sm:$0xff] %vm7194_vm10, %v7149_v48  ;;  %v14908_v39 = vcombine.low %v6989_v30, %v6992_v6 }
 0x57e   : > { %7392 = vrot.lane.b32.xlu1 %v14890_v33, %s10802_s26  ;;  %v7225_v34 = vpop.permute.xlu0 %7224 }
 0x57f   : > { %7273 = vst.msk [vmem:[#allocation6] sm:$0xff] %vm7272_vm5, %v7225_v34 }
 0x580   : > { %v7227_v44 = vpop.permute.xlu1 %7226  ;;  %6464 = vrot.lane.b32.xlu0 %v14540_v17, %s10785_s22 }
 0x581   : > { %7274 = vst.msk [vmem:[#allocation6 + $0x8] sm:$0xff] %vm7272_vm5, %v7227_v44  ;;  %v6842_v44 = vld [vmem:[#allocation3 + $0xb0] sm:$0x3] }
 0x582   : > { %6557 = vrot.lane.b32.xlu1 %v14540_v17, %s10796_s23  ;;  %v7303_v42 = vpop.permute.xlu0 %7302 }
 0x583   : > { %7351 = vst.msk [vmem:[#allocation6] sm:$0xff] %vm7350_vm3, %v7303_v42  ;;  %v7012_v42 = vrot.slane %v6842_v44, 6 }
 0x584   : > { %v7305_v15 = vpop.permute.xlu1 %7304  ;;  %7394 = vrot.lane.b32.xlu0 %v14908_v39, %s10802_s26 }
 0x585   : > { %7352 = vst.msk [vmem:[#allocation6 + $0x8] sm:$0xff] %vm7350_vm3, %v7305_v15  ;;  %v15011_v15 = vld [vmem:[#allocation3 + $0xb8] sm:$0xf] }
 0x586   : > { %6559 = vrot.lane.b32.xlu1 %v14555_v49, %s10796_s23  ;;  %v7381_v37 = vpop.permute.xlu0 %7380 }
 0x587   : > { %7429 = vst.msk [vmem:[#allocation6] sm:$0xff] %vm7428_vm8, %v7381_v37 }
 0x588   : > { %v6546_v9 = vpop.permute.xlu1 %6545  ;;  %6653 = vrot.lane.b32.xlu0 %v14555_v49, %s10797_s28 }
 0x589   : > { %6592 = vst.msk [vmem:[#allocation6 + $0x10] sm:$0xff] %vm6589_vm4, %v6546_v9  ;;  %v6840_v9 = vld [vmem:[#allocation3 + $0xa8] sm:$0xc] }
 0x58a   : > { %6655 = vrot.lane.b32.xlu1 %v14565_v25, %s10797_s28  ;;  %v7383_v17 = vpop.permute.xlu0 %7382 }
 0x58b   : > { %7430 = vst.msk [vmem:[#allocation6 + $0x8] sm:$0xff] %vm7428_vm8, %v7383_v17  ;;  %v5841_v17 = vld [vmem:[#allocation3 + $0xc4] sm:$0xf] }
 0x58c   : > { %v6548_v57 = vpop.permute.xlu1 %6547  ;;  %6749 = vrot.lane.b32.xlu0 %v14565_v25, %s10798_s16  ;;  %v6428_v23 = vshll.u32 %v5841_v17, 16 }
 0x58d   : > { %6593 = vst.msk [vmem:[#allocation6 + $0x18] sm:$0xff] %vm6589_vm4, %v6548_v57  ;;  %v5840_v57 = vld [vmem:[#allocation3 + $0xc0] sm:$0xe] }
 0x58e   : > { %6751 = vrot.lane.b32.xlu1 %v14574_v50, %s10798_s16  ;;  %v6642_v36 = vpop.permute.xlu0 %6641  ;;  %v7445_v59 = vld [vmem:[#allocation6] sm:$0xff]  ;;  %v6430_v51 = vrot.slane %v6428_v23, 6 }
 0x58f   : > { %6688 = vst.msk [vmem:[#allocation6 + $0x10] sm:$0xff] %vm6685_vm15, %v6642_v36  ;;  %10526 = vmatprep.mubr.msk.bf16.mxu0 %vm7520_vm1, %v7445_v59  ;;  %v7016_v59 = vrot.slane %v15011_v15, 6 }
 0x590   : > { %v6644_v41 = vpop.permute.xlu1 %6643  ;;  %7085 = vrot.lane.b32.xlu0 %v14824_v32, %s16272_s17  ;;  %v6995_v32 = vrot.slane %v6835_v43, 6  ;;  %v6845_v43 = vld [vmem:[#allocation3 + $0xbc] sm:$0x3] }
 0x591   : > { %6689 = vst.msk [vmem:[#allocation6 + $0x18] sm:$0xff] %vm6685_vm15, %v6644_v41  ;;  %v5842_v41 = vld [vmem:[#allocation3 + $0xc8] sm:$0x3]  ;;  %v7019_v19 = vrot.slane %v6845_v43, 6 }
 0x592   : > { %7087 = vrot.lane.b32.xlu1 %v14842_v10, %s16272_s17  ;;  %v6738_v12 = vpop.permute.xlu0 %6737  ;;  %v7446_v29 = vld [vmem:[#allocation6 + $0x8] sm:$0xff]  ;;  %v6997_v21 = vrot.slane %v6995_v32, 4  ;;  %v6996_v4 = vsel %vm14621_vm11, %v10158_v38, %v6995_v32 }
 0x593   : > { %6784 = vst.msk [vmem:[#allocation6 + $0x10] sm:$0xff] %vm6781_vm14, %v6738_v12  ;;  %10527 = vmatmul.mubr.msk.bf16.vlgmr.msra.gmra.mrb[32].mxu0 %vm7520_vm1, %v7446_v29  ;;  %v10160_v12 = vrot.slane %v6840_v9, 10 }
 0x594   : > { %v6740_v1 = vpop.permute.xlu1 %6739  ;;  %7162 = vrot.lane.b32.xlu0 %v14842_v10, %s10799_s25  ;;  %v6999_v5 = vsel %vm14621_vm11, %v6997_v21, %v6998_v56  ;;  %v6419_v56 = vshll.u32 %v5840_v57, 16  ;;  %v6435_v21 = vshrl.u32 %v5842_v41, 16 }
 0x595   : > { %6785 = vst.msk [vmem:[#allocation6 + $0x18] sm:$0xff] %vm6781_vm14, %v6740_v1  ;;  %v14958_v22 = vcombine.low %v6996_v4, %v6999_v5  ;;  %v6425_v1 = vshrl.u32 %v5841_v17, 16  ;;  %v5845_v4 = vld [vmem:[#allocation3 + $0xd4] sm:$0x3] }
 0x596   : > { %7164 = vrot.lane.b32.xlu1 %v14890_v33, %s10799_s25  ;;  %v7074_v8 = vpop.permute.xlu0 %7073 }
 0x597   : > { %7119 = vst.msk [vmem:[#allocation6 + $0x10] sm:$0xff] %vm2751_vm12, %v7074_v8  ;;  %v6416_v8 = vshrl.u32 %v5840_v57, 16 }
 0x598   : > { %v7076_v3 = vpop.permute.xlu1 %7075  ;;  %7240 = vrot.lane.b32.xlu0 %v14890_v33, %s10800_s29 }
 0x599   : > { %7120 = vst.msk [vmem:[#allocation6 + $0x18] sm:$0xff] %vm2751_vm12, %v7076_v3  ;;  %v5844_v3 = vld [vmem:[#allocation3 + $0xd0] sm:$0xf] }
 0x59a   : > { %7242 = vrot.lane.b32.xlu1 %v14908_v39, %s10800_s29  ;;  %v7151_v10 = vpop.permute.xlu0 %7150 }
 0x59b   : > { %7197 = vst.msk [vmem:[#allocation6 + $0x10] sm:$0xff] %vm7194_vm10, %v7151_v10  ;;  %v6438_v10 = vshll.u32 %v5842_v41, 16 }
 0x59c   : > { %v7153_v55 = vpop.permute.xlu1 %7152  ;;  %7318 = vrot.lane.b32.xlu0 %v14908_v39, %s10801_s21 }
 0x59d   : > { %7198 = vst.msk [vmem:[#allocation6 + $0x18] sm:$0xff] %vm7194_vm10, %v7153_v55  ;;  %v7018_v55 = vrot.slane %v7016_v59, 4 }
 0x59e   : > { %6466 = vrot.lane.b32.xlu1 %v14555_v49, %s10785_s22  ;;  %v7229_v28 = vpop.permute.xlu0 %7228  ;;  %v10159_v49 = vrot.slane %v6837_v54, 10  ;;  %v6523_v54 = vshll.u32 %v5844_v3, 16 }
 0x59f   : > { %7275 = vst.msk [vmem:[#allocation6 + $0x10] sm:$0xff] %vm7272_vm5, %v7229_v28  ;;  %v6427_v28 = vrot.slane %v6425_v1, 5 }
 0x5a0   : > { %v7231_v7 = vpop.permute.xlu1 %7230  ;;  %7320 = vrot.lane.b32.xlu0 %v14958_v22, %s10801_s21  ;;  %v7003_v14 = vsel %vm14621_vm11, %v10159_v49, %v7002_v40  ;;  %v6843_v40 = vld [vmem:[#allocation3 + $0xb4] sm:$0xc]  ;;  %v6421_v49 = vrot.slane %v6419_v56, 6 }
 0x5a1   : > { %7276 = vst.msk [vmem:[#allocation6 + $0x18] sm:$0xff] %vm7272_vm5, %v7231_v7  ;;  %v14976_v13 = vcombine.low %v7003_v14, %v7006_v62  ;;  %v6520_v7 = vshrl.u32 %v5844_v3, 16  ;;  %v6514_v62 = vshll.u32 %v5843_v45, 16  ;;  %v6440_v14 = vrot.slane %v6438_v10, 6 }
 0x5a2   : > { %7396 = vrot.lane.b32.xlu1 %v14958_v22, %s10802_s26  ;;  %v7307_v26 = vpop.permute.xlu0 %7306 }
 0x5a3   : > { %7353 = vst.msk [vmem:[#allocation6 + $0x10] sm:$0xff] %vm7350_vm3, %v7307_v26  ;;  %v6418_v26 = vrot.slane %v6416_v8, 5 }
 0x5a4   : > { %v6455_v52 = vpop.permute.xlu1 %6454  ;;  %6468 = vrot.lane.b32.xlu0 %v14565_v25, %s10785_s22 }
 0x5a5   : > { %6498 = vst.msk [vmem:[#allocation6 + $0x20] sm:$0xff] %vm3329_vm7, %v6455_v52  ;;  %v6437_v52 = vrot.slane %v6435_v21, 5 }
 0x5a6   : > { %6561 = vrot.lane.b32.xlu1 %v14565_v25, %s10796_s23  ;;  %v7309_v18 = vpop.permute.xlu0 %7308 }
 0x5a7   : > { %7354 = vst.msk [vmem:[#allocation6 + $0x18] sm:$0xff] %vm7350_vm3, %v7309_v18  ;;  %v6530_v18 = vshrl.u32 %v5845_v4, 16  ;;  %v6441_v44 = vor.u32 %v6440_v14, %v6437_v52 }
 0x5a8   : > { %v7385_v58 = vpop.permute.xlu1 %7384  ;;  %7398 = vrot.lane.b32.xlu0 %v14976_v13, %s10802_s26 }
 0x5a9   : > { %7431 = vst.msk [vmem:[#allocation6 + $0x10] sm:$0xff] %vm7428_vm8, %v7385_v58  ;;  %v6533_v58 = vshll.u32 %v5845_v4, 16 }
 0x5aa   : > { %6563 = vrot.lane.b32.xlu1 %v14574_v50, %s10796_s23  ;;  %v6457_v20 = vpop.permute.xlu0 %6456 }
 0x5ab   : > { %6499 = vst.msk [vmem:[#allocation6 + $0x28] sm:$0xff] %vm3329_vm7, %v6457_v20 }
 0x5ac   : > { %v6550_v2 = vpop.permute.xlu1 %6549  ;;  %6657 = vrot.lane.b32.xlu0 %v14574_v50, %s10797_s28 }
 0x5ad   : > { %6594 = vst.msk [vmem:[#allocation6 + $0x20] sm:$0xff] %vm6589_vm4, %v6550_v2  ;;  %v10161_v2 = vrot.slane %v6843_v40, 10  ;;  %v6848_v40 = vld [vmem:[#allocation3 + $0xc8] sm:$0x3] }
 0x5ae   : > { %6659 = vrot.lane.b32.xlu1 %v14583_v0, %s10797_s28  ;;  %v7387_v25 = vpop.permute.xlu0 %7386 }
 0x5af   : > { %7432 = vst.msk [vmem:[#allocation6 + $0x18] sm:$0xff] %vm7428_vm8, %v7387_v25  ;;  %v7020_v25 = vsel %vm14621_vm11, %v7018_v55, %v7019_v19  ;;  %v6847_v55 = vld [vmem:[#allocation3 + $0xc4] sm:$0xf] }
 0x5b0   : > { %v6552_v27 = vpop.permute.xlu1 %6551  ;;  %6753 = vrot.lane.b32.xlu0 %v14583_v0, %s10798_s16  ;;  %v7447_v60 = vld [vmem:[#allocation6 + $0x10] sm:$0xff] }
 0x5b1   : > { %6595 = vst.msk [vmem:[#allocation6 + $0x28] sm:$0xff] %vm6589_vm4, %v6552_v27  ;;  %10530 = vmatprep.mubr.msk.bf16.mxu0 %vm7520_vm1, %v7447_v60  ;;  %v6431_v27 = vor.u32 %v6430_v51, %v6427_v28  ;;  %v6522_v60 = vrot.slane %v6520_v7, 5  ;;  %v5846_v28 = vld [vmem:[#allocation3 + $0xd8] sm:$0xe]  ;;  %v7138_v51 = vrot.slane %v6847_v55, 6 }
 0x5b2   : > { %6755 = vrot.lane.b32.xlu1 %v14590_v53, %s10798_s16  ;;  %v6646_v48 = vpop.permute.xlu0 %6645  ;;  %v5847_v7 = vld [vmem:[#allocation3 + $0xdc] sm:$0xf] }
 0x5b3   : > { %6690 = vst.msk [vmem:[#allocation6 + $0x20] sm:$0xff] %vm6685_vm15, %v6646_v48  ;;  %v6525_v48 = vrot.slane %v6523_v54, 6  ;;  %v6616_v52 = vshrl.u32 %v5847_v7, 16  ;;  %v6619_v14 = vshll.u32 %v5847_v7, 16 }
 0x5b4   : > { %v6648_v31 = vpop.permute.xlu1 %6647  ;;  %7089 = vrot.lane.b32.xlu0 %v14890_v33, %s16272_s17  ;;  %v7009_v33 = vrot.slane %v6841_v46, 6  ;;  %v6516_v46 = vrot.slane %v6514_v62, 6  ;;  %v6610_v62 = vshll.u32 %v5846_v28, 16 }
 0x5b5   : > { %6691 = vst.msk [vmem:[#allocation6 + $0x28] sm:$0xff] %vm6685_vm15, %v6648_v31  ;;  %v6526_v9 = vor.u32 %v6525_v48, %v6522_v60 }
 0x5b6   : > { %7091 = vrot.lane.b32.xlu1 %v14908_v39, %s16272_s17  ;;  %v6742_v16 = vpop.permute.xlu0 %6741  ;;  %v7448_v34 = vld [vmem:[#allocation6 + $0x18] sm:$0xff]  ;;  %v7010_v24 = vsel %vm14621_vm11, %v10160_v12, %v7009_v33 }
 0x5b7   : > { %6786 = vst.msk [vmem:[#allocation6 + $0x20] sm:$0xff] %vm6781_vm14, %v6742_v16  ;;  %10531 = vmatmul.mubr.msk.bf16.gmra.mrb[36].mxu0 %vm7520_vm1, %v7448_v34  ;;  %v7017_v16 = vsel %vm14621_vm11, %v10161_v2, %v7016_v59  ;;  %v6528_v12 = vrot.slane %v6526_v9, 4  ;;  %v5850_v2 = vld [vmem:[#allocation3 + $0xe8] sm:$0xf] }
 0x5b8   : > { %v6744_v6 = vpop.permute.xlu1 %6743  ;;  %7166 = vrot.lane.b32.xlu0 %v14908_v39, %s10799_s25  ;;  %v7011_v39 = vrot.slane %v7009_v33, 4  ;;  %v6532_v33 = vrot.slane %v6530_v18, 5  ;;  %v15047_v15 = vcombine.low %v7017_v16, %v7020_v25  ;;  %v7140_v18 = vrot.slane %v7138_v51, 4 }
 0x5b9   : > { %6787 = vst.msk [vmem:[#allocation6 + $0x28] sm:$0xff] %vm6781_vm14, %v6744_v6  ;;  %v6422_v6 = vor.u32 %v6421_v49, %v6418_v26  ;;  %v6607_v26 = vshrl.u32 %v5846_v28, 16 }
 0x5ba   : > { %7168 = vrot.lane.b32.xlu1 %v14958_v22, %s10799_s25  ;;  %v7078_v30 = vpop.permute.xlu0 %7077  ;;  %v7013_v29 = vsel %vm14621_vm11, %v7011_v39, %v7012_v42 }
 0x5bb   : > { %7121 = vst.msk [vmem:[#allocation6 + $0x20] sm:$0xff] %vm2751_vm12, %v7078_v30  ;;  %v15029_v5 = vcombine.low %v7010_v24, %v7013_v29  ;;  %v6535_v30 = vrot.slane %v6533_v58, 6  ;;  %v6423_v39 = vrot.slane %v6422_v6, 4  ;;  %v9330_v29 = vld [vmem:[%s16175_s7] sm:$0x3]  ;;  %v6609_v60 = vrot.slane %v6607_v26, 5 }
 0x5bc   : > { %v7080_v37 = vpop.permute.xlu1 %7079  ;;  %7244 = vrot.lane.b32.xlu0 %v14958_v22, %s10800_s29  ;;  %10595 = vmatprep.subr.msk.bf16.mxu1 %vm701_vm0, %v9330_v29  ;;  %v9467_v8 = vsel %vm701_vm0, %v9330_v29, 0  ;;  %v5849_v58 = vld [vmem:[#allocation3 + $0xe4] sm:$0xe]  ;;  %v6618_v6 = vrot.slane %v6616_v52, 5  ;;  %v6849_v29 = vld [vmem:[#allocation3 + $0xcc] sm:$0xc] }
 0x5bd   : > { %7122 = vst.msk [vmem:[#allocation6 + $0x28] sm:$0xff] %vm2751_vm12, %v7080_v37  ;;  %v6433_v37 = vrot.slane %v6431_v27, 4  ;;  %v6536_v59 = vor.u32 %v6535_v30, %v6532_v33  ;;  %v6432_v41 = vsel %vm14196_vm9, %v6423_v39, %v6431_v27  ;;  %10559 = vmatpush3.bf16.msra.mxu1 %v9467_v8  ;;  %v6850_v27 = vld [vmem:[#allocation3 + $0xd0] sm:$0xf]  ;;  %v6703_v33 = vshrl.u32 %v5849_v58, 16 }
 0x5be   : > { %7246 = vrot.lane.b32.xlu1 %v14976_v13, %s10800_s29  ;;  %v7155_v36 = vpop.permute.xlu0 %7154  ;;  %v5851_v30 = vld [vmem:[#allocation3 + $0xec] sm:$0x3]  ;;  %vm16282_vm0 = vcmask 24576  }
 0x5bf   : > { %7199 = vst.msk [vmem:[#allocation6 + $0x20] sm:$0xff] %vm7194_vm10, %v7155_v36  ;;  %v6442_v57 = vsel %vm14196_vm9, %v6433_v37, %v6441_v44  ;;  %v6621_v44 = vrot.slane %v6619_v14, 6  ;;  %v6712_v37 = vshrl.u32 %v5850_v2, 16  ;;  %v6722_v8 = vshrl.u32 %v5851_v30, 16 }
 0x5c0   : > { %v7157_v32 = vpop.permute.xlu1 %7156  ;;  %7322 = vrot.lane.b32.xlu0 %v14976_v13, %s10801_s21  ;;  %v15065_v1 = vcombine.low %v6432_v41, %v6442_v57  ;;  %v7216_v57 = vrot.slane %v6850_v27, 6 }
 0x5c1   : > { %7200 = vst.msk [vmem:[#allocation6 + $0x28] sm:$0xff] %vm7194_vm10, %v7157_v32  ;;  %v6537_v32 = vsel %vm14196_vm9, %v6528_v12, %v6536_v59 }
 0x5c2   : > { %6470 = vrot.lane.b32.xlu1 %v14574_v50, %s10785_s22  ;;  %v7233_v38 = vpop.permute.xlu0 %7232  ;;  %v6511_v50 = vshrl.u32 %v5843_v45, 16 }
 0x5c3   : > { %7277 = vst.msk [vmem:[#allocation6 + $0x20] sm:$0xff] %vm7272_vm5, %v7233_v38 }
 0x5c4   : > { %v7235_v11 = vpop.permute.xlu1 %7234  ;;  %7324 = vrot.lane.b32.xlu0 %v15029_v5, %s10801_s21  ;;  %v6513_v34 = vrot.slane %v6511_v50, 5  ;;  %v5848_v50 = vld [vmem:[#allocation3 + $0xe0] sm:$0x3] }
 0x5c5   : > { %7278 = vst.msk [vmem:[#allocation6 + $0x28] sm:$0xff] %vm7272_vm5, %v7235_v11  ;;  %v7141_v11 = vrot.slane %v6848_v40, 6  ;;  %v6626_v48 = vshrl.u32 %v5848_v50, 16 }
 0x5c6   : > { %7400 = vrot.lane.b32.xlu1 %v15029_v5, %s10802_s26  ;;  %v7311_v20 = vpop.permute.xlu0 %7310  ;;  %v6517_v36 = vor.u32 %v6516_v46, %v6513_v34  ;;  %v6851_v34 = vld [vmem:[#allocation3 + $0xd4] sm:$0x3]  ;;  %v6612_v46 = vrot.slane %v6610_v62, 6 }
 0x5c7   : > { %7355 = vst.msk [vmem:[#allocation6 + $0x20] sm:$0xff] %vm7350_vm3, %v7311_v20  ;;  %v7142_v25 = vsel %vm14621_vm11, %v7140_v18, %v7141_v11  ;;  %v7219_v59 = vrot.slane %v6851_v34, 6  ;;  %v6853_v34 = vld [vmem:[#allocation3 + $0xdc] sm:$0xf] }
 0x5c8   : > { %v6459_v31 = vpop.permute.xlu1 %6458  ;;  %6472 = vrot.lane.b32.xlu0 %v14583_v0, %s10785_s22  ;;  %v6518_v23 = vrot.slane %v6517_v36, 4 }
 0x5c9   : > { %6500 = vst.msk [vmem:[#allocation6 + $0x30] sm:$0xff] %vm3329_vm7, %v6459_v31  ;;  %v6629_v31 = vshll.u32 %v5848_v50, 16 }
 0x5ca   : > { %6565 = vrot.lane.b32.xlu1 %v14583_v0, %s10796_s23  ;;  %v7313_v42 = vpop.permute.xlu0 %7312  ;;  %v6527_v3 = vsel %vm14196_vm9, %v6518_v23, %v6526_v9  ;;  %v6715_v9 = vshll.u32 %v5850_v2, 16  ;;  %v6622_v23 = vor.u32 %v6621_v44, %v6618_v6  ;;  %v6854_v44 = vld [vmem:[#allocation3 + $0xe0] sm:$0x3] }
 0x5cb   : > { %7356 = vst.msk [vmem:[#allocation6 + $0x28] sm:$0xff] %vm7350_vm3, %v7313_v42  ;;  %v15079_v10 = vcombine.low %v6527_v3, %v6537_v32  ;;  %v6706_v42 = vshll.u32 %v5849_v58, 16  ;;  %v6631_v41 = vrot.slane %v6629_v31, 6  ;;  %v6705_v32 = vrot.slane %v6703_v33, 5  ;;  %v6856_v33 = vld [vmem:[#allocation3 + $0xe8] sm:$0xf] }
 0x5cc   : > { %v7389_v17 = vpop.permute.xlu1 %7388  ;;  %7402 = vrot.lane.b32.xlu0 %v15047_v15, %s10802_s26  ;;  %v6714_v3 = vrot.slane %v6712_v37, 5  ;;  %v6624_v40 = vrot.slane %v6622_v23, 4 }
 0x5cd   : > { %7433 = vst.msk [vmem:[#allocation6 + $0x20] sm:$0xff] %vm7428_vm8, %v7389_v17 }
 0x5ce   : > { %6567 = vrot.lane.b32.xlu1 %v14590_v53, %s10796_s23  ;;  %v6461_v0 = vpop.permute.xlu0 %6460 }
 0x5cf   : > { %6501 = vst.msk [vmem:[#allocation6 + $0x38] sm:$0xff] %vm3329_vm7, %v6461_v0  ;;  %v6628_v0 = vrot.slane %v6626_v48, 5 }
 0x5d0   : > { %v6554_v43 = vpop.permute.xlu1 %6553  ;;  %6661 = vrot.lane.b32.xlu0 %v14590_v53, %s10797_s28 }
 0x5d1   : > { %6596 = vst.msk [vmem:[#allocation6 + $0x30] sm:$0xff] %vm6589_vm4, %v6554_v43  ;;  %v6613_v43 = vor.u32 %v6612_v46, %v6609_v60  ;;  %v6632_v28 = vor.u32 %v6631_v41, %v6628_v0  ;;  %v7294_v46 = vrot.slane %v6853_v34, 6 }
 0x5d2   : > { %6663 = vrot.lane.b32.xlu1 %v15065_v1, %s10797_s28  ;;  %v7391_v56 = vpop.permute.xlu0 %7390 }
 0x5d3   : > { %7434 = vst.msk [vmem:[#allocation6 + $0x28] sm:$0xff] %vm7428_vm8, %v7391_v56  ;;  %v6708_v56 = vrot.slane %v6706_v42, 6  ;;  %v6633_v52 = vsel %vm14196_vm9, %v6624_v40, %v6632_v28  ;;  %v15205_v40 = vld [vmem:[#allocation4 + $0x1c] sm:$0xf] }
 0x5d4   : > { %v6556_v24 = vpop.permute.xlu1 %6555  ;;  %6757 = vrot.lane.b32.xlu0 %v15065_v1, %s10798_s16  ;;  %v7449_v21 = vld [vmem:[#allocation6 + $0x20] sm:$0xff] }
 0x5d5   : > { %6597 = vst.msk [vmem:[#allocation6 + $0x38] sm:$0xff] %vm6589_vm4, %v6556_v24  ;;  %10534 = vmatprep.mubr.msk.bf16.mxu0 %vm7520_vm1, %v7449_v21  ;;  %v6717_v24 = vrot.slane %v6715_v9, 6  ;;  %v6725_v21 = vshll.u32 %v5851_v30, 16  ;;  %v7296_v9 = vrot.slane %v7294_v46, 4 }
 0x5d6   : > { %6759 = vrot.lane.b32.xlu1 %v15079_v10, %s10798_s16  ;;  %v6650_v45 = vpop.permute.xlu0 %6649 }
 0x5d7   : > { %6692 = vst.msk [vmem:[#allocation6 + $0x30] sm:$0xff] %vm6685_vm15, %v6650_v45  ;;  %v6718_v7 = vor.u32 %v6717_v24, %v6714_v3 }
 0x5d8   : > { %v6652_v38 = vpop.permute.xlu1 %6651  ;;  %7093 = vrot.lane.b32.xlu0 %v14958_v22, %s16272_s17  ;;  %v6846_v22 = vld [vmem:[#allocation3 + $0xc0] sm:$0xc] }
 0x5d9   : > { %6693 = vst.msk [vmem:[#allocation6 + $0x38] sm:$0xff] %vm6685_vm15, %v6652_v38  ;;  %v7218_v38 = vrot.slane %v7216_v57, 4  ;;  %v6720_v18 = vrot.slane %v6718_v7, 4 }
 0x5da   : > { %7095 = vrot.lane.b32.xlu1 %v14976_v13, %s16272_s17  ;;  %v6746_v19 = vpop.permute.xlu0 %6745  ;;  %v7450_v4 = vld [vmem:[#allocation6 + $0x28] sm:$0xff] }
 0x5db   : > { %6788 = vst.msk [vmem:[#allocation6 + $0x30] sm:$0xff] %vm6781_vm14, %v6746_v19  ;;  %10535 = vmatmul.mubr.msk.bf16.gmra.mrb[40].mxu0 %vm7520_vm1, %v7450_v4  ;;  %v7220_v19 = vsel %vm14621_vm11, %v7218_v38, %v7219_v59  ;;  %v6614_v4 = vrot.slane %v6613_v43, 4  ;;  %v6857_v59 = vld [vmem:[#allocation3 + $0xec] sm:$0x3] }
 0x5dc   : > { %v6748_v54 = vpop.permute.xlu1 %6747  ;;  %7170 = vrot.lane.b32.xlu0 %v14976_v13, %s10799_s25  ;;  %v10178_v13 = vrot.slane %v6846_v22, 10  ;;  %v6727_v22 = vrot.slane %v6725_v21, 6 }
 0x5dd   : > { %6789 = vst.msk [vmem:[#allocation6 + $0x38] sm:$0xff] %vm6781_vm14, %v6748_v54  ;;  %v6724_v54 = vrot.slane %v6722_v8, 5  ;;  %v6623_v62 = vsel %vm14196_vm9, %v6614_v4, %v6622_v23  ;;  %v7375_v23 = vrot.slane %v6857_v59, 6  ;;  %v15203_v4 = vld [vmem:[#allocation4 + $0x18] sm:$0xf] }
 0x5de   : > { %7172 = vrot.lane.b32.xlu1 %v15029_v5, %s10799_s25  ;;  %v7082_v49 = vpop.permute.xlu0 %7081  ;;  %v7139_v39 = vsel %vm14621_vm11, %v10178_v13, %v7138_v51  ;;  %v6709_v51 = vor.u32 %v6708_v56, %v6705_v32  ;;  %v10144_v13 = vcombine.low %v6623_v62, %v6633_v52  ;;  %v8541_v62 = vshrl.u32 %v15203_v4, 16 }
 0x5df   : > { %7123 = vst.msk [vmem:[#allocation6 + $0x30] sm:$0xff] %vm2751_vm12, %v7082_v49  ;;  %v15112_v36 = vcombine.low %v7139_v39, %v7142_v25  ;;  %v6728_v58 = vor.u32 %v6727_v22, %v6724_v54  ;;  %v7372_v39 = vrot.slane %v6856_v33, 6  ;;  %v8544_v52 = vshll.u32 %v15203_v4, 16 }
 0x5e0   : > { %v7084_v20 = vpop.permute.xlu1 %7083  ;;  %7248 = vrot.lane.b32.xlu0 %v15029_v5, %s10800_s29  ;;  %v6710_v14 = vrot.slane %v6709_v51, 4  ;;  %v15210_v51 = vld [vmem:[#allocation4 + $0x14] sm:$0x1] }
 0x5e1   : > { %7124 = vst.msk [vmem:[#allocation6 + $0x38] sm:$0xff] %vm2751_vm12, %v7084_v20  ;;  %v6729_v25 = vsel %vm14196_vm9, %v6720_v18, %v6728_v58  ;;  %v7374_v43 = vrot.slane %v7372_v39, 4 }
 0x5e2   : > { %7250 = vrot.lane.b32.xlu1 %v15047_v15, %s10800_s29  ;;  %v7159_v16 = vpop.permute.xlu0 %7158  ;;  %v6719_v2 = vsel %vm14196_vm9, %v6710_v14, %v6718_v7  ;;  %vm16283_vm9 = vmmov %vm16282_vm0  ;;  %v8550_v14 = vshll.u32 %v15205_v40, 16 }
 0x5e3   : > { %7201 = vst.msk [vmem:[#allocation6 + $0x30] sm:$0xff] %vm7194_vm10, %v7159_v16  ;;  %v10145_v48 = vcombine.low %v6719_v2, %v6729_v25  ;;  %v7376_v3 = vsel %vm14621_vm11, %v7374_v43, %v7375_v23  ;;  %v8543_v25 = vrot.slane %v8541_v62, 4 }
 0x5e4   : > { %v7161_v17 = vpop.permute.xlu1 %7160  ;;  %7326 = vrot.lane.b32.xlu0 %v15047_v15, %s10801_s21 }
 0x5e5   : > { %7202 = vst.msk [vmem:[#allocation6 + $0x38] sm:$0xff] %vm7194_vm10, %v7161_v17  ;;  %v7297_v17 = vrot.slane %v6854_v44, 6 }
 0x5e6   : > { %6474 = vrot.lane.b32.xlu1 %v14590_v53, %s10785_s22  ;;  %v7237_v12 = vpop.permute.xlu0 %7236  ;;  %v10180_v53 = vrot.slane %v6849_v29, 10 }
 0x5e7   : > { %7279 = vst.msk [vmem:[#allocation6 + $0x30] sm:$0xff] %vm7272_vm5, %v7237_v12  ;;  %v7298_v12 = vsel %vm14621_vm11, %v7296_v9, %v7297_v17  ;;  %v15241_v17 = vld [vmem:[#allocation4 + $0x24] sm:$0xf] }
 0x5e8   : > { %v7239_v45 = vpop.permute.xlu1 %7238  ;;  %7328 = vrot.lane.b32.xlu0 %v15112_v36, %s10801_s21  ;;  %v7217_v26 = vsel %vm14621_vm11, %v10180_v53, %v7216_v57  ;;  %v15195_v53 = vld [vmem:[#allocation4 + $0xc] sm:$0xf] }
 0x5e9   : > { %7280 = vst.msk [vmem:[#allocation6 + $0x38] sm:$0xff] %vm7272_vm5, %v7239_v45  ;;  %v15132_v50 = vcombine.low %v7217_v26, %v7220_v19  ;;  %v10803_v19 = vmov 4286578559   ;;  %v8517_v7 = vshrl.u32 %v15195_v53, 16  ;;  %v8520_v54 = vshll.u32 %v15195_v53, 16 }
 0x5ea   : > { %7404 = vrot.lane.b32.xlu1 %v15112_v36, %s10802_s26  ;;  %v7315_v55 = vpop.permute.xlu0 %7314  ;;  %492 = vst.msk [vmem:[#allocation4] sm:$0xf] %vm333_vm6, %v10803_v19  ;;  %493 = vst.msk [vmem:[#allocation4 + $0x4] sm:$0xf] %vm333_vm6, %v10803_v19 }
 0x5eb   : > { %7357 = vst.msk [vmem:[#allocation6 + $0x30] sm:$0xff] %vm7350_vm3, %v7315_v55  ;;  %v15197_v55 = vld [vmem:[#allocation4 + $0x10] sm:$0xf]  ;;  %v8519_v18 = vrot.slane %v8517_v7, 4  ;;  %v8522_v58 = vrot.slane %v8520_v54, 5 }
 0x5ec   : > { %v6463_v11 = vpop.permute.xlu1 %6462  ;;  %6476 = vrot.lane.b32.xlu0 %v15065_v1, %s10785_s22  ;;  %494 = vst.msk [vmem:[#allocation4 + $0x8] sm:$0x1] %vm16282_vm0, %v10803_v19  ;;  %v8526_v22 = vshll.u32 %v15197_v55, 16 }
 0x5ed   : > { %6502 = vst.msk [vmem:[#allocation6 + $0x40] sm:$0xff] %vm3329_vm7, %v6463_v11  ;;  %v8530_v11 = vshrl.u32 %v15197_v55, 16 }
 0x5ee   : > { %6569 = vrot.lane.b32.xlu1 %v15065_v1, %s10796_s23  ;;  %v7317_v49 = vpop.permute.xlu0 %7316  ;;  %496 = vst.msk [vmem:[#allocation4 + $0xcc] sm:$0xf] %vm333_vm6, %v10803_v19  ;;  %497 = vst.msk [vmem:[#allocation4 + $0xd0] sm:$0xf] %vm333_vm6, %v10803_v19  ;;  %vm16284_vm6 = vcmask 31744  }
 0x5ef   : > { %7358 = vst.msk [vmem:[#allocation6 + $0x38] sm:$0xff] %vm7350_vm3, %v7317_v49  ;;  %v15217_v49 = vld [vmem:[#allocation4 + $0x20] sm:$0x1]  ;;  %vm16286_vm0 = vmmov %vm16284_vm6 }
 0x5f0   : > { %v7393_v20 = vpop.permute.xlu1 %7392  ;;  %7406 = vrot.lane.b32.xlu0 %v15132_v50, %s10802_s26  ;;  %498 = vst.msk [vmem:[#allocation4 + $0xd4] sm:$0x1] %vm16283_vm9, %v10803_v19  ;;  %v8560_v34 = vshll.u32 %v15217_v49, 16  ;;  %v8565_v19 = vshrl.u32 %v15241_v17, 16  ;;  %vm16287_vm9 = vmmov %vm16286_vm0 }
 0x5f1   : > { %7435 = vst.msk [vmem:[#allocation6 + $0x30] sm:$0xff] %vm7428_vm8, %v7393_v20  ;;  %v15224_v20 = vrot.slane %v8526_v22, 5 }
 0x5f2   : > { %6571 = vrot.lane.b32.xlu1 %v15079_v10, %s10796_s23  ;;  %v6465_v1 = vpop.permute.xlu0 %6464  ;;  %s16300_s23 = smov 20  }
 0x5f3   : > { %6503 = vst.msk [vmem:[#allocation6 + $0x48] sm:$0xff] %vm3329_vm7, %v6465_v1  ;;  %v8532_v1 = vrot.slane %v8530_v11, 4 }
 0x5f4   : > { %v6558_v27 = vpop.permute.xlu1 %6557  ;;  %6665 = vrot.lane.b32.xlu0 %v15079_v10, %s10797_s28  ;;  %v6852_v10 = vld [vmem:[#allocation3 + $0xd8] sm:$0xc] }
 0x5f5   : > { %6598 = vst.msk [vmem:[#allocation6 + $0x40] sm:$0xff] %vm6589_vm4, %v6558_v27  ;;  %v10182_v37 = vrot.slane %v6852_v10, 10  ;;  %v8546_v27 = vrot.slane %v8544_v52, 5  ;;  %v8438_v10 = vld [vmem:[#allocation4] sm:$0xf]  ;;  %v8567_v52 = vrot.slane %v8565_v19, 4 }
 0x5f6   : > { %6667 = vrot.lane.b32.xlu1 %v10144_v13, %s10797_s28  ;;  %v7395_v60 = vpop.permute.xlu0 %7394  ;;  %v8493_v33 = vshrl.u32 %v8438_v10, 16  ;;  %s10363_s28 = sshll.u32 %s10877_s13, 12  ;;  %s16332_s13 = sand.u32 1, %s10766_s10  }
 0x5f7   : > { %7436 = vst.msk [vmem:[#allocation6 + $0x38] sm:$0xff] %vm7428_vm8, %v7395_v60  ;;  %v7295_v41 = vsel %vm14621_vm11, %v10182_v37, %v7294_v46  ;;  %v15228_v60 = vrot.slane %v8550_v14, 5  ;;  %v15234_v46 = vld [vmem:[#allocation4 + $0x4] sm:$0xf]  ;;  %v8547_v44 = vor.u32 %v8546_v27, %v8543_v25  ;;  %v8996_v25 = vld [vmem:[#allocation4] sm:$0xe]  ;;  %s16116_s14 = scalar_lea.hbm %s16177_s9, %s10363_s28 }
 0x5f8   : > { %v6560_v31 = vpop.permute.xlu1 %6559  ;;  %6761 = vrot.lane.b32.xlu0 %v10144_v13, %s10798_s16  ;;  %v7451_v16 = vld [vmem:[#allocation6 + $0x30] sm:$0xff]  ;;  %v10183_v8 = vcombine.low %v7295_v41, %v7298_v12  ;;  %v8506_v37 = vshrl.u32 %v15234_v46, 16  ;;  %v8495_v41 = vrot.slane %v8493_v33, 4 }
 0x5f9   : > { %6599 = vst.msk [vmem:[#allocation6 + $0x48] sm:$0xff] %vm6589_vm4, %v6560_v31  ;;  %10538 = vmatprep.mubr.msk.bf16.mxu0 %vm7520_vm1, %v7451_v16  ;;  %v8533_v31 = vor.u32 %v8532_v1, %v15224_v20  ;;  %v8554_v16 = vshrl.u32 %v15205_v40, 16  ;;  %v8548_v59 = vrot.slane %v8547_v44, 4 }
 0x5fa   : > { %6763 = vrot.lane.b32.xlu1 %v10145_v48, %s10798_s16  ;;  %v6654_v61 = vpop.permute.xlu0 %6653  ;;  %v8523_v48 = vor.u32 %v8522_v58, %v8519_v18  ;;  %v8508_v43 = vrot.slane %v8506_v37, 4  ;;  %v8998_v37 = vld [vmem:[#allocation4 + $0x18] sm:$0xe]  ;;  %s9836_s16 = sshll.u32 %s11264_s24, 4  ;;  %s16120_s16 = int_to_ptr.vmem [resolvable:$true] %s9836_s16 }
 0x5fb   : > { %6694 = vst.msk [vmem:[#allocation6 + $0x40] sm:$0xff] %vm6685_vm15, %v6654_v61  ;;  %s10712_s27 = scalar_lea.vmem %s16120_s16, 4096 }
 0x5fc   : > { %v6656_v6 = vpop.permute.xlu1 %6655  ;;  %7097 = vrot.lane.b32.xlu0 %v15029_v5, %s16272_s17  ;;  %v6855_v5 = vld [vmem:[#allocation3 + $0xe4] sm:$0xc]  ;;  %p10713_p11 = scmp.ne.s32.totalorder %s16120_s16, %s10712_s27 }
 0x5fd   : > { %6695 = vst.msk [vmem:[#allocation6 + $0x48] sm:$0xff] %vm6685_vm15, %v6656_v6  ;;  %v10184_v29 = vrot.slane %v6855_v5, 10  ;;  %v15236_v6 = vld [vmem:[#allocation4 + $0x8] sm:$0x1]  ;;  %v8534_v5 = vrot.slane %v8533_v31, 4 }
 0x5fe   : > { %7099 = vrot.lane.b32.xlu1 %v15047_v15, %s16272_s17  ;;  %v6750_v30 = vpop.permute.xlu0 %6749  ;;  %v7452_v42 = vld [vmem:[#allocation6 + $0x38] sm:$0xff]  ;;  %p10714_p12 = pnand %p10713_p11, %p10894_p5 }
 0x5ff   : > { %6790 = vst.msk [vmem:[#allocation6 + $0x40] sm:$0xff] %vm6781_vm14, %v6750_v30  ;;  %10539 = vmatmul.mubr.msk.bf16.gmra.mrb[44].mxu0 %vm7520_vm1, %v7452_v42  ;;  %v7373_v56 = vsel %vm14621_vm11, %v10184_v29, %v7372_v39  ;;  %v8496_v30 = vshll.u32 %v8438_v10, 16  ;;  %v8502_v42 = vshll.u32 %v15234_v46, 16  ;;  %v8512_v39 = vshll.u32 %v15236_v6, 16  ;;  %vm16285_vm11 = vmmov %vm16284_vm6 }
 0x600   : > { %v6752_v57 = vpop.permute.xlu1 %6751  ;;  %7174 = vrot.lane.b32.xlu0 %v15047_v15, %s10799_s25  ;;  %v10185_v21 = vcombine.low %v7373_v56, %v7376_v3  ;;  %p10715_p13 = pneg %p10714_p12 }
 0x601   : > { %6791 = vst.msk [vmem:[#allocation6 + $0x48] sm:$0xff] %vm6781_vm14, %v6752_v57  ;;  %v8524_v57 = vrot.slane %v8523_v48, 4  ;;  %v8498_v12 = vrot.slane %v8496_v30, 5  ;;  %v8504_v29 = vrot.slane %v8502_v42, 5 }
 0x602   : > { %7176 = vrot.lane.b32.xlu1 %v15112_v36, %s10799_s25  ;;  %v7086_v0 = vpop.permute.xlu0 %7085 }
 0x603   : > { %7125 = vst.msk [vmem:[#allocation6 + $0x40] sm:$0xff] %vm2751_vm12, %v7086_v0  ;;  %v15245_v0 = vld [vmem:[#allocation4 + $0x28] sm:$0xf]  ;;  %v8529_v56 = vsel %vm11233_vm2, %v8524_v57, %v15224_v20 }
 0x604   : > { %v7088_v15 = vpop.permute.xlu1 %7087  ;;  %7252 = vrot.lane.b32.xlu0 %v15112_v36, %s10800_s29  ;;  %v8574_v7 = vshll.u32 %v15245_v0, 16  ;;  %v8578_v54 = vshrl.u32 %v15245_v0, 16  ;;  %v8962_v33 = vmax.bf16 %v8529_v56, %v15195_v53  ;;  %v9077_v53 = vrot.slane %v15197_v55, 5 }
 0x605   : > { %7126 = vst.msk [vmem:[#allocation6 + $0x48] sm:$0xff] %vm2751_vm12, %v7088_v15 }
 0x606   : > { %7254 = vrot.lane.b32.xlu1 %v15132_v50, %s10800_s29  ;;  %v7163_v32 = vpop.permute.xlu0 %7162  ;;  %v8576_v18 = vrot.slane %v8574_v7, 5  ;;  %v8580_v58 = vrot.slane %v8578_v54, 4  ;;  %s16126_s29 = scalar_lea.sflag [#allocation8], %s16332_s13 }
 0x607   : > { %7203 = vst.msk [vmem:[#allocation6 + $0x40] sm:$0xff] %vm7194_vm10, %v7163_v32  ;;  %v15247_v32 = vld [vmem:[#allocation4 + $0x2c] sm:$0x1] }
 0x608   : > { %v7165_v24 = vpop.permute.xlu1 %7164  ;;  %7330 = vrot.lane.b32.xlu0 %v15132_v50, %s10801_s21  ;;  %v8536_v50 = vshll.u32 %v15210_v51, 16  ;;  %v8581_v31 = vor.u32 %v8580_v58, %v8576_v18 }
 0x609   : > { %7204 = vst.msk [vmem:[#allocation6 + $0x48] sm:$0xff] %vm7194_vm10, %v7165_v24  ;;  %v8553_v24 = vsel %vm11233_vm2, %v8548_v59, %v15228_v60  ;;  %v9070_v59 = vrot.slane %v15234_v46, 5 }
 0x60a   : > { %7332 = vrot.lane.b32.xlu1 %v10183_v8, %s10801_s21  ;;  %v7241_v36 = vpop.permute.xlu0 %7240  ;;  %v15226_v2 = vrot.slane %v8536_v50, 5  ;;  %v8584_v50 = vshll.u32 %v15247_v32, 16  ;;  %v8964_v42 = vmax.bf16 %v8553_v24, %v15203_v4  ;;  %s16291_s21 = smov 12  }
 0x60b   : > { %7281 = vst.msk [vmem:[#allocation6 + $0x40] sm:$0xff] %vm7272_vm5, %v7241_v36  ;;  %v8499_v36 = vor.u32 %v8498_v12, %v8495_v41  ;;  %v9073_v41 = vrot.slane %v15236_v6, 5  ;;  %v9072_v56 = vrot.slane %v9070_v59, 4 }
 0x60c   : > { %v7243_v45 = vpop.permute.xlu1 %7242  ;;  %7408 = vrot.lane.b32.xlu0 %v10183_v8, %s10802_s26  ;;  %v8514_v8 = vrot.slane %v8512_v39, 5  ;;  %v8539_v3 = vsel %vm11233_vm2, %v8534_v5, %v15226_v2  ;;  %v8586_v2 = vrot.slane %v8584_v50, 5  ;;  %v8582_v39 = vrot.slane %v8581_v31, 4 }
 0x60d   : > { %7282 = vst.msk [vmem:[#allocation6 + $0x48] sm:$0xff] %vm7272_vm5, %v7243_v45  ;;  %v8556_v45 = vrot.slane %v8554_v16, 4  ;;  %v8500_v22 = vrot.slane %v8499_v36, 4  ;;  %v8963_v30 = vmax.bf16 %v8539_v3, %v15197_v55  ;;  %v10242_v5 = vrot.slane %v8996_v25, 9 }
 0x60e   : > { %7410 = vrot.lane.b32.xlu1 %v10185_v21, %s10802_s26  ;;  %v7319_v47 = vpop.permute.xlu0 %7318  ;;  %v8509_v21 = vor.u32 %v8508_v43, %v8504_v29  ;;  %v8587_v43 = vsel %vm11233_vm2, %v8582_v39, %v8586_v2  ;;  %v9079_v36 = vrot.slane %v9077_v53, 4 }
 0x60f   : > { %7359 = vst.msk [vmem:[#allocation6 + $0x40] sm:$0xff] %vm7350_vm3, %v7319_v47  ;;  %v8562_v47 = vrot.slane %v8560_v34, 5  ;;  %v8505_v20 = vsel %vm11233_vm2, %v8500_v22, %v8504_v29  ;;  %v8967_v6 = vmax.bf16 %v8587_v43, %v15245_v0  ;;  %v9071_v55 = vsel %vm11224_vm13, %v10242_v5, %v9070_v59  ;;  %v15344_v43 = vld [vmem:[#allocation4 + $0x3c] sm:$0xf] }
 0x610   : > { %v6467_v38 = vpop.permute.xlu1 %6466  ;;  %v8510_v11 = vrot.slane %v8509_v21, 4  ;;  %v8960_v16 = vmax.bf16 %v8505_v20, %v8438_v10  ;;  %v9084_v21 = vrot.slane %v15205_v40, 5 }
 0x611   : > { %6504 = vst.msk [vmem:[#allocation6 + $0x50] sm:$0xff] %vm3329_vm7, %v6467_v38 }
 0x612   : > { %v7321_v28 = vpop.permute.xlu0 %7320  ;;  %v8515_v1 = vsel %vm11233_vm2, %v8510_v11, %v8514_v8  ;;  %v10244_v8 = vrot.slane %v8998_v37, 9  ;;  %v9230_v54 = vmax.bf16 %v9071_v55, %v8960_v16  ;;  %v9000_v16 = vld [vmem:[#allocation4 + $0x30] sm:$0xe] }
 0x613   : > { %7360 = vst.msk [vmem:[#allocation6 + $0x48] sm:$0xff] %vm7350_vm3, %v7321_v28  ;;  %v8568_v28 = vshll.u32 %v15241_v17, 16  ;;  %v15273_v34 = vmax.bf16 %v8515_v1, %v15234_v46  ;;  %v10246_v59 = vrot.slane %v9000_v16, 9 }
 0x614   : > { %v7397_v26 = vpop.permute.xlu1 %7396  ;;  %v9085_v7 = vsel %vm11224_vm13, %v10244_v8, %v9084_v21 }
 0x615   : > { %7437 = vst.msk [vmem:[#allocation6 + $0x40] sm:$0xff] %vm7428_vm8, %v7397_v26  ;;  %v8557_v26 = vor.u32 %v8556_v45, %v15228_v60  ;;  %v8570_v14 = vrot.slane %v8568_v28, 5 }
 0x616   : > { %v6469_v13 = vpop.permute.xlu0 %6468 }
 0x617   : > { %6505 = vst.msk [vmem:[#allocation6 + $0x58] sm:$0xff] %vm3329_vm7, %v6469_v13  ;;  %v8558_v13 = vrot.slane %v8557_v26, 4  ;;  %v8571_v48 = vor.u32 %v8570_v14, %v8567_v52  ;;  %v15318_v52 = vmax.bf16 %v9085_v7, %v8964_v42 }
 0x618   : > { %v6562_v61 = vpop.permute.xlu1 %6561 }
 0x619   : > { %6600 = vst.msk [vmem:[#allocation6 + $0x50] sm:$0xff] %vm6589_vm4, %v6562_v61  ;;  %v8997_v61 = vld [vmem:[#allocation4 + $0xc] sm:$0xe]  ;;  %v8563_v44 = vsel %vm11233_vm2, %v8558_v13, %v8562_v47  ;;  %v8572_v10 = vrot.slane %v8571_v48, 4  ;;  %v9091_v47 = vrot.slane %v15245_v0, 5 }
 0x61a   : > { %v7399_v9 = vpop.permute.xlu0 %7398  ;;  %v8965_v57 = vmax.bf16 %v8563_v44, %v15205_v40  ;;  %v10243_v12 = vrot.slane %v8997_v61, 9  ;;  %v9086_v40 = vrot.slane %v9084_v21, 4  ;;  %v8478_v48 = vld [vmem:[#allocation4 + $0x38] sm:$0x1]  ;;  %v8479_v21 = vld [vmem:[#allocation4 + $0x44] sm:$0x1] }
 0x61b   : > { %7438 = vst.msk [vmem:[#allocation6 + $0x48] sm:$0xff] %vm7428_vm8, %v7399_v9  ;;  %v8577_v4 = vsel %vm11233_vm2, %v8572_v10, %v8576_v18  ;;  %v9093_v11 = vrot.slane %v9091_v47, 4  ;;  %v15322_v18 = vld [vmem:[#allocation4 + $0x34] sm:$0xf]  ;;  %v8608_v5 = vshll.u32 %v8478_v48, 16 }
 0x61c   : > { %v6564_v23 = vpop.permute.xlu1 %6563  ;;  %v7453_v15 = vld [vmem:[#allocation6 + $0x40] sm:$0xff]  ;;  %v8966_v46 = vmax.bf16 %v8577_v4, %v15241_v17  ;;  %v9078_v24 = vsel %vm11224_vm13, %v10243_v12, %v9077_v53  ;;  %v9074_v17 = vsel %vm11224_vm13, %v9072_v56, %v9073_v41  ;;  %v8602_v10 = vshrl.u32 %v15322_v18, 16 }
 0x61d   : > { %6601 = vst.msk [vmem:[#allocation6 + $0x58] sm:$0xff] %vm6589_vm4, %v6564_v23  ;;  %10542 = vmatprep.mubr.msk.bf16.mxu0 %vm7520_vm1, %v7453_v15  ;;  %v8999_v23 = vld [vmem:[#allocation4 + $0x24] sm:$0xe]  ;;  %v9080_v15 = vrot.slane %v15210_v51, 5  ;;  %v9087_v51 = vrot.slane %v15217_v49, 5  ;;  %v9231_v0 = vmax.bf16 %v9074_v17, %v15273_v34  ;;  %v9098_v4 = vrot.slane %v15322_v18, 5 }
 0x61e   : > { %v6658_v38 = vpop.permute.xlu0 %6657  ;;  %v10245_v45 = vrot.slane %v8999_v23, 9  ;;  %v15310_v49 = vld [vmem:[#allocation4 + $0x30] sm:$0xf]  ;;  %v15346_v23 = vld [vmem:[#allocation4 + $0x40] sm:$0xf]  ;;  %v8610_v8 = vrot.slane %v8608_v5, 5 }
 0x61f   : > { %6696 = vst.msk [vmem:[#allocation6 + $0x50] sm:$0xff] %vm6685_vm15, %v6658_v38  ;;  %v9094_v38 = vrot.slane %v15247_v32, 5  ;;  %v9081_v28 = vsel %vm11224_vm13, %v9079_v36, %v9080_v15  ;;  %v9232_v32 = vmax.bf16 %v9078_v24, %v8962_v33  ;;  %v9088_v50 = vsel %vm11224_vm13, %v9086_v40, %v9087_v51 }
 0x620   : > { %v6660_v62 = vpop.permute.xlu1 %6659  ;;  %v9092_v22 = vsel %vm11224_vm13, %v10245_v45, %v9091_v47  ;;  %v15327_v20 = vmax.bf16 %v9088_v50, %v8965_v57  ;;  %v8589_v13 = vshrl.u32 %v15310_v49, 16  ;;  %v8592_v31 = vshll.u32 %v15310_v49, 16 }
 0x621   : > { %6697 = vst.msk [vmem:[#allocation6 + $0x58] sm:$0xff] %vm6685_vm15, %v6660_v62  ;;  %v9233_v62 = vmax.bf16 %v9081_v28, %v8963_v30  ;;  %v15320_v14 = vmax.bf16 %v9092_v22, %v8966_v46  ;;  %v9095_v58 = vsel %vm11224_vm13, %v9093_v11, %v9094_v38  ;;  %v9266_v1 = vmax.bf16 %v9232_v32, %v9230_v54  ;;  %v9001_v38 = vld [vmem:[#allocation4 + $0x3c] sm:$0xe] }
 0x622   : > { %v6754_v27 = vpop.permute.xlu0 %6753  ;;  %v7454_v60 = vld [vmem:[#allocation6 + $0x48] sm:$0xff]  ;;  %v15330_v25 = vmax.bf16 %v9095_v58, %v8967_v6  ;;  %v8591_v44 = vrot.slane %v8589_v13, 4  ;;  %v8598_v33 = vshll.u32 %v15322_v18, 16  ;;  %v9101_v46 = vrot.slane %v8478_v48, 5 }
 0x623   : > { %6792 = vst.msk [vmem:[#allocation6 + $0x50] sm:$0xff] %vm6781_vm14, %v6754_v27  ;;  %10543 = vmatmul.mubr.msk.bf16.gmra.mrb[48].mxu0 %vm7520_vm1, %v7454_v60  ;;  %v9267_v27 = vmax.bf16 %v9233_v62, %v9231_v0  ;;  %v9268_v60 = vmax.bf16 %v15318_v52, %v9232_v32  ;;  %v9269_v34 = vmax.bf16 %v15327_v20, %v9233_v62  ;;  %v9100_v36 = vrot.slane %v9098_v4, 4 }
 0x624   : > { %v6756_v9 = vpop.permute.xlu1 %6755  ;;  %v9298_v61 = vmax.bf16 %v9266_v1, %v15318_v52  ;;  %v8600_v57 = vrot.slane %v8598_v33, 5  ;;  %v9270_v6 = vmax.bf16 %v15320_v14, %v15318_v52  ;;  %v9099_v24 = vsel %vm11224_vm13, %v10246_v59, %v9098_v4  ;;  %v15384_v33 = vld [vmem:[#allocation4 + $0x4c] sm:$0xf]  ;;  %v8480_v59 = vld [vmem:[#allocation4 + $0x50] sm:$0x1] }
 0x625   : > { %6793 = vst.msk [vmem:[#allocation6 + $0x58] sm:$0xff] %vm6781_vm14, %v6756_v9  ;;  %v9299_v42 = vmax.bf16 %v9267_v27, %v15327_v20  ;;  %v9300_v37 = vmax.bf16 %v9268_v60, %v15320_v14  ;;  %v8594_v9 = vrot.slane %v8592_v31, 5  ;;  %v9301_v39 = vmax.bf16 %v9269_v34, %v15330_v25 }
 0x626   : > { %v7090_v29 = vpop.permute.xlu0 %7089  ;;  %v9271_v51 = vmax.bf16 %v15330_v25, %v15327_v20  ;;  %v8613_v17 = vshrl.u32 %v15344_v43, 16  ;;  %v8616_v45 = vshll.u32 %v15344_v43, 16  ;;  %v8622_v47 = vshll.u32 %v15346_v23, 16 }
 0x627   : > { %7127 = vst.msk [vmem:[#allocation6 + $0x50] sm:$0xff] %vm2751_vm12, %v7090_v29  ;;  %v10261_v12 = vcombine.low %v9298_v61, %v9299_v42  ;;  %v8595_v53 = vor.u32 %v8594_v9, %v8591_v44  ;;  %v8604_v29 = vrot.slane %v8602_v10, 4  ;;  %v10262_v15 = vcombine.low %v9300_v37, %v9301_v39 }
 0x628   : > { %v7092_v3 = vpop.permute.xlu1 %7091  ;;  %v9102_v40 = vsel %vm11224_vm13, %v9100_v36, %v9101_v46  ;;  %v8626_v54 = vshrl.u32 %v15346_v23, 16  ;;  %v8615_v11 = vrot.slane %v8613_v17, 4  ;;  %v8618_v0 = vrot.slane %v8616_v45, 5  ;;  %v15412_v45 = vld [vmem:[#allocation4 + $0x54] sm:$0xf] }
 0x629   : > { %7128 = vst.msk [vmem:[#allocation6 + $0x58] sm:$0xff] %vm2751_vm12, %v7092_v3  ;;  %10560 = vmatprep.mubr.msk.bf16.mxu1 %vm16284_vm6, %v10261_v12  ;;  %v8596_v56 = vrot.slane %v8595_v53, 4  ;;  %v8605_v3 = vor.u32 %v8604_v29, %v8600_v57  ;;  %v8624_v32 = vrot.slane %v8622_v47, 5  ;;  %v8632_v58 = vshll.u32 %v8479_v21, 16  ;;  %v9002_v12 = vld [vmem:[#allocation4 + $0x48] sm:$0xe]  ;;  %vm16288_vm6 = vmmov %vm16286_vm0 }
 0x62a   : > { %v7167_v19 = vpop.permute.xlu0 %7166  ;;  %10561 = vmatmul.mubr.msk.bf16.vlgmr.msra.gmra.mrb[32].mxu1 %vm16285_vm11, %v10262_v15  ;;  %v8628_v52 = vrot.slane %v8626_v54, 4  ;;  %v10247_v20 = vrot.slane %v9001_v38, 9  ;;  %v9108_v31 = vrot.slane %v8479_v21, 5  ;;  %v8646_v15 = vshll.u32 %v15384_v33, 16  ;;  %vm16289_vm11 = vmmov %vm16286_vm0 }
 0x62b   : > { %7205 = vst.msk [vmem:[#allocation6 + $0x50] sm:$0xff] %vm7194_vm10, %v7167_v19  ;;  %v8601_v28 = vsel %vm11233_vm2, %v8596_v56, %v8600_v57  ;;  %v8606_v7 = vrot.slane %v8605_v3, 4  ;;  %v8634_v48 = vrot.slane %v8632_v58, 5  ;;  %v8656_v36 = vshll.u32 %v8480_v59, 16 }
 0x62c   : > { %v7169_v26 = vpop.permute.xlu1 %7168  ;;  %v8968_v22 = vmax.bf16 %v8601_v28, %v15310_v49  ;;  %v9105_v49 = vrot.slane %v15346_v23, 5  ;;  %v8629_v60 = vor.u32 %v8628_v52, %v8624_v32  ;;  %v9112_v17 = vrot.slane %v15384_v33, 5  ;;  %v8481_v52 = vld [vmem:[#allocation4 + $0x5c] sm:$0x1] }
 0x62d   : > { %7206 = vst.msk [vmem:[#allocation6 + $0x58] sm:$0xff] %vm7194_vm10, %v7169_v26  ;;  %v15368_v26 = vld [vmem:[#allocation4 + $0x48] sm:$0xf]  ;;  %v8611_v62 = vsel %vm11233_vm2, %v8606_v7, %v8610_v8  ;;  %v9115_v28 = vrot.slane %v8480_v59, 5  ;;  %v8661_v58 = vshrl.u32 %v15412_v45, 16 }
 0x62e   : > { %v7245_v2 = vpop.permute.xlu0 %7244  ;;  %v8969_v1 = vmax.bf16 %v8611_v62, %v15322_v18  ;;  %v15374_v13 = vmax.bf16 %v9099_v24, %v8968_v22  ;;  %v8637_v16 = vshrl.u32 %v15368_v26, 16  ;;  %v9106_v18 = vsel %vm11224_vm13, %v10247_v20, %v9105_v49 }
 0x62f   : > { %7283 = vst.msk [vmem:[#allocation6 + $0x50] sm:$0xff] %vm7272_vm5, %v7245_v2  ;;  %v8619_v2 = vor.u32 %v8618_v0, %v8615_v11  ;;  %v8630_v42 = vrot.slane %v8629_v60, 4  ;;  %v9107_v37 = vrot.slane %v9105_v49, 4  ;;  %v8648_v24 = vrot.slane %v8646_v15, 5 }
 0x630   : > { %v7247_v30 = vpop.permute.xlu1 %7246  ;;  %v15379_v34 = vmax.bf16 %v9102_v40, %v8969_v1  ;;  %v9302_v61 = vmax.bf16 %v9270_v6, %v15374_v13  ;;  %v9272_v9 = vmax.bf16 %v15374_v13, %v15320_v14  ;;  %v8639_v10 = vrot.slane %v8637_v16, 4  ;;  %v15417_v40 = vld [vmem:[#allocation4 + $0x58] sm:$0xf] }
 0x631   : > { %7284 = vst.msk [vmem:[#allocation6 + $0x58] sm:$0xff] %vm7272_vm5, %v7247_v30  ;;  %v8620_v44 = vrot.slane %v8619_v2, 4  ;;  %v8635_v29 = vsel %vm11233_vm2, %v8630_v42, %v8634_v48  ;;  %v9109_v4 = vsel %vm11224_vm13, %v9107_v37, %v9108_v31  ;;  %v8650_v6 = vshrl.u32 %v15384_v33, 16 }
 0x632   : > { %v7323_v41 = vpop.permute.xlu0 %7322  ;;  %v9303_v39 = vmax.bf16 %v9271_v51, %v15379_v34  ;;  %v9273_v5 = vmax.bf16 %v15379_v34, %v15330_v25  ;;  %v8971_v25 = vmax.bf16 %v8635_v29, %v15346_v23  ;;  %v8664_v20 = vshll.u32 %v15412_v45, 16 }
 0x633   : > { %7361 = vst.msk [vmem:[#allocation6 + $0x50] sm:$0xff] %vm7350_vm3, %v7323_v41  ;;  %v8625_v57 = vsel %vm11233_vm2, %v8620_v44, %v8624_v32  ;;  %v8640_v41 = vshll.u32 %v15368_v26, 16  ;;  %v8652_v23 = vrot.slane %v8650_v6, 4  ;;  %v8670_v49 = vshll.u32 %v15417_v40, 16 }
 0x634   : > { %v6471_v55 = vpop.permute.xlu1 %6470  ;;  %v8970_v14 = vmax.bf16 %v8625_v57, %v15344_v43  ;;  %v10263_v8 = vcombine.low %v9302_v61, %v9303_v39  ;;  %v10248_v43 = vrot.slane %v9002_v12, 9  ;;  %v15409_v21 = vmax.bf16 %v9109_v4, %v8971_v25  ;;  %v15443_v57 = vld [vmem:[#allocation4 + $0x60] sm:$0xf] }
 0x635   : > { %6506 = vst.msk [vmem:[#allocation6 + $0x60] sm:$0xff] %vm3329_vm7, %v6471_v55  ;;  %v8642_v46 = vrot.slane %v8640_v41, 5  ;;  %v8653_v11 = vor.u32 %v8652_v23, %v8648_v24  ;;  %v8666_v61 = vrot.slane %v8664_v20, 5  ;;  %v8680_v42 = vshll.u32 %v8481_v52, 16  ;;  %v15477_v20 = vld [vmem:[#allocation4 + $0x6c] sm:$0xf] }
 0x636   : > { %v7325_v19 = vpop.permute.xlu0 %7324  ;;  %v15404_v3 = vmax.bf16 %v9106_v18, %v8970_v14  ;;  %10564 = vmatprep.mubr.msk.bf16.mxu1 %vm16286_vm0, %v10263_v8  ;;  %v9305_v54 = vmax.bf16 %v9273_v5, %v15409_v21  ;;  %v9113_v0 = vsel %vm11224_vm13, %v10248_v43, %v9112_v17  ;;  %v9275_v62 = vmax.bf16 %v15409_v21, %v15379_v34 }
 0x637   : > { %7362 = vst.msk [vmem:[#allocation6 + $0x58] sm:$0xff] %vm7350_vm3, %v7325_v19  ;;  %v8643_v51 = vor.u32 %v8642_v46, %v8639_v10  ;;  %v8658_v19 = vrot.slane %v8656_v36, 5  ;;  %v8654_v2 = vrot.slane %v8653_v11, 4  ;;  %v8663_v34 = vrot.slane %v8661_v58, 4  ;;  %v15455_v46 = vld [vmem:[#allocation4 + $0x64] sm:$0xf] }
 0x638   : > { %v7401_v50 = vpop.permute.xlu1 %7400  ;;  %v9304_v38 = vmax.bf16 %v9272_v9, %v15404_v3  ;;  %v9274_v7 = vmax.bf16 %v15404_v3, %v15374_v13  ;;  %v8672_v18 = vrot.slane %v8670_v49, 5  ;;  %v8682_v59 = vrot.slane %v8680_v42, 5  ;;  %v8482_v36 = vld [vmem:[#allocation4 + $0x68] sm:$0x1] }
 0x639   : > { %7439 = vst.msk [vmem:[#allocation6 + $0x50] sm:$0xff] %vm7428_vm8, %v7401_v50  ;;  %v8644_v22 = vrot.slane %v8643_v51, 4  ;;  %v9114_v50 = vrot.slane %v9112_v17, 4  ;;  %v8659_v44 = vsel %vm11233_vm2, %v8654_v2, %v8658_v19  ;;  %v8667_v10 = vor.u32 %v8666_v61, %v8663_v34  ;;  %v9004_v51 = vld [vmem:[#allocation4 + $0x60] sm:$0xe] }
 0x63a   : > { %v6473_v27 = vpop.permute.xlu0 %6472  ;;  %v10264_v1 = vcombine.low %v9304_v38, %v9305_v54  ;;  %v9119_v41 = vrot.slane %v15417_v40, 5  ;;  %v9122_v12 = vrot.slane %v8481_v52, 5  ;;  %v8685_v6 = vshrl.u32 %v15443_v57, 16  ;;  %v15489_v61 = vld [vmem:[#allocation4 + $0x70] sm:$0xf] }
 0x63b   : > { %6507 = vst.msk [vmem:[#allocation6 + $0x68] sm:$0xff] %vm3329_vm7, %v6473_v27  ;;  %v8649_v13 = vsel %vm11233_vm2, %v8644_v22, %v8648_v24  ;;  %v9003_v27 = vld [vmem:[#allocation4 + $0x54] sm:$0xe]  ;;  %v9116_v16 = vsel %vm11224_vm13, %v9114_v50, %v9115_v28  ;;  %v8668_v4 = vrot.slane %v8667_v10, 4  ;;  %v8688_v43 = vshll.u32 %v15443_v57, 16 }
 0x63c   : > { %v6566_v30 = vpop.permute.xlu1 %6565  ;;  %v8972_v31 = vmax.bf16 %v8649_v13, %v15368_v26  ;;  %10565 = vmatmul.mubr.msk.bf16.gmra.mrb[36].mxu1 %vm16287_vm9, %v10264_v1  ;;  %v8973_v26 = vmax.bf16 %v8659_v44, %v15384_v33  ;;  %v10249_v39 = vrot.slane %v9003_v27, 9  ;;  %v9121_v25 = vrot.slane %v9119_v41, 4  ;;  %v8483_v10 = vld [vmem:[#allocation4 + $0x74] sm:$0x1] }
 0x63d   : > { %6602 = vst.msk [vmem:[#allocation6 + $0x60] sm:$0xff] %vm6589_vm4, %v6566_v30  ;;  %v8674_v30 = vshrl.u32 %v15417_v40, 16  ;;  %v8673_v24 = vsel %vm11233_vm2, %v8668_v4, %v8672_v18  ;;  %v8687_v38 = vrot.slane %v8685_v6, 4  ;;  %v8694_v54 = vshll.u32 %v15455_v46, 16 }
 0x63e   : > { %v7403_v53 = vpop.permute.xlu0 %7402  ;;  %v15441_v9 = vmax.bf16 %v9113_v0, %v8972_v31  ;;  %v15447_v29 = vmax.bf16 %v9116_v16, %v8973_v26  ;;  %v9120_v8 = vsel %vm11224_vm13, %v10249_v39, %v9119_v41  ;;  %v8974_v17 = vmax.bf16 %v8673_v24, %v15412_v45 }
 0x63f   : > { %7440 = vst.msk [vmem:[#allocation6 + $0x58] sm:$0xff] %vm7428_vm8, %v7403_v53  ;;  %v8676_v5 = vrot.slane %v8674_v30, 4  ;;  %v8704_v0 = vshll.u32 %v8482_v36, 16  ;;  %v10250_v45 = vrot.slane %v9004_v51, 9  ;;  %v8696_v52 = vrot.slane %v8694_v54, 5 }
 0x640   : > { %v6568_v55 = vpop.permute.xlu1 %6567  ;;  %v7455_v56 = vld [vmem:[#allocation6 + $0x50] sm:$0xff]  ;;  %v9306_v14 = vmax.bf16 %v9274_v7, %v15441_v9  ;;  %v9276_v33 = vmax.bf16 %v15441_v9, %v15404_v3  ;;  %v9277_v3 = vmax.bf16 %v15447_v29, %v15409_v21  ;;  %v8690_v7 = vrot.slane %v8688_v43, 5 }
 0x641   : > { %6603 = vst.msk [vmem:[#allocation6 + $0x68] sm:$0xff] %vm6589_vm4, %v6568_v55  ;;  %10546 = vmatprep.mubr.msk.bf16.mxu0 %vm7520_vm1, %v7455_v56  ;;  %v8677_v15 = vor.u32 %v8676_v5, %v8672_v18  ;;  %v9307_v56 = vmax.bf16 %v9275_v62, %v15447_v29  ;;  %v8698_v21 = vshrl.u32 %v15455_v46, 16  ;;  %v15473_v11 = vmax.bf16 %v9120_v8, %v8974_v17 }
 0x642   : > { %v6662_v47 = vpop.permute.xlu0 %6661  ;;  %v8691_v62 = vor.u32 %v8690_v7, %v8687_v38  ;;  %v8706_v13 = vrot.slane %v8704_v0, 5  ;;  %v9126_v2 = vrot.slane %v15455_v46, 5  ;;  %v9129_v49 = vrot.slane %v8482_v36, 5  ;;  %v15520_v7 = vld [vmem:[#allocation4 + $0x7c] sm:$0xf] }
 0x643   : > { %6698 = vst.msk [vmem:[#allocation6 + $0x60] sm:$0xff] %vm6685_vm15, %v6662_v47  ;;  %v8678_v23 = vrot.slane %v8677_v15, 4  ;;  %v9123_v47 = vsel %vm11224_vm13, %v9121_v25, %v9122_v12  ;;  %v10265_v28 = vcombine.low %v9306_v14, %v9307_v56  ;;  %v8700_v58 = vrot.slane %v8698_v21, 4  ;;  %v9005_v12 = vld [vmem:[#allocation4 + $0x6c] sm:$0xe] }
 0x644   : > { %v6664_v32 = vpop.permute.xlu1 %6663  ;;  %v9308_v1 = vmax.bf16 %v9276_v33, %v15473_v11  ;;  %v9127_v16 = vsel %vm11224_vm13, %v10250_v45, %v9126_v2  ;;  %v9128_v34 = vrot.slane %v9126_v2, 4  ;;  %v8709_v44 = vshrl.u32 %v15477_v20, 16  ;;  %v8484_v45 = vld [vmem:[#allocation4 + $0x80] sm:$0x1] }
 0x645   : > { %6699 = vst.msk [vmem:[#allocation6 + $0x68] sm:$0xff] %vm6685_vm15, %v6664_v32  ;;  %v8683_v22 = vsel %vm11233_vm2, %v8678_v23, %v8682_v59  ;;  %10568 = vmatprep.mubr.msk.bf16.mxu1 %vm16288_vm6, %v10265_v28  ;;  %v8701_v31 = vor.u32 %v8700_v58, %v8696_v52  ;;  %v8712_v18 = vshll.u32 %v15477_v20, 16  ;;  %v8718_v33 = vshll.u32 %v15489_v61, 16  ;;  %v15516_v23 = vld [vmem:[#allocation4 + $0x78] sm:$0xf] }
 0x646   : > { %v6758_v60 = vpop.permute.xlu0 %6757  ;;  %v7456_v48 = vld [vmem:[#allocation6 + $0x58] sm:$0xff]  ;;  %v8975_v50 = vmax.bf16 %v8683_v22, %v15417_v40  ;;  %v9278_v40 = vmax.bf16 %v15473_v11, %v15441_v9  ;;  %v9130_v5 = vsel %vm11224_vm13, %v9128_v34, %v9129_v49  ;;  %v8711_v59 = vrot.slane %v8709_v44, 4  ;;  %v9006_v49 = vld [vmem:[#allocation4 + $0x78] sm:$0xe] }
 0x647   : > { %6794 = vst.msk [vmem:[#allocation6 + $0x60] sm:$0xff] %vm6781_vm14, %v6758_v60  ;;  %10547 = vmatmul.mubr.msk.bf16.gmra.mrb[52].mxu0 %vm7520_vm1, %v7456_v48  ;;  %v8692_v48 = vrot.slane %v8691_v62, 4  ;;  %v8702_v26 = vrot.slane %v8701_v31, 4  ;;  %v8714_v41 = vrot.slane %v8712_v18, 5  ;;  %v8728_v25 = vshll.u32 %v8483_v10, 16 }
 0x648   : > { %v6760_v37 = vpop.permute.xlu1 %6759  ;;  %v15482_v60 = vmax.bf16 %v9123_v47, %v8975_v50  ;;  %v10251_v24 = vrot.slane %v9005_v12, 9  ;;  %v9136_v28 = vrot.slane %v8483_v10, 5  ;;  %v8733_v58 = vshrl.u32 %v15516_v23, 16  ;;  %v15545_v18 = vld [vmem:[#allocation4 + $0x84] sm:$0xf] }
 0x649   : > { %6795 = vst.msk [vmem:[#allocation6 + $0x68] sm:$0xff] %vm6781_vm14, %v6760_v37  ;;  %v8697_v37 = vsel %vm11233_vm2, %v8692_v48, %v8696_v52  ;;  %v8707_v4 = vsel %vm11233_vm2, %v8702_v26, %v8706_v13  ;;  %v8715_v8 = vor.u32 %v8714_v41, %v8711_v59  ;;  %v8736_v13 = vshll.u32 %v15516_v23, 16 }
 0x64a   : > { %v7094_v53 = vpop.permute.xlu0 %7093  ;;  %v9309_v42 = vmax.bf16 %v9277_v3, %v15482_v60  ;;  %v9279_v9 = vmax.bf16 %v15482_v60, %v15447_v29  ;;  %v8976_v39 = vmax.bf16 %v8697_v37, %v15443_v57  ;;  %v8722_v29 = vshrl.u32 %v15489_v61, 16 }
 0x64b   : > { %7129 = vst.msk [vmem:[#allocation6 + $0x60] sm:$0xff] %vm2751_vm12, %v7094_v53  ;;  %v8977_v15 = vmax.bf16 %v8707_v4, %v15455_v46  ;;  %v9133_v3 = vrot.slane %v15489_v61, 5  ;;  %v8716_v51 = vrot.slane %v8715_v8, 4  ;;  %v8730_v46 = vrot.slane %v8728_v25, 5 }
 0x64c   : > { %v7096_v55 = vpop.permute.xlu1 %7095  ;;  %v10266_v14 = vcombine.low %v9308_v1, %v9309_v42  ;;  %v15508_v57 = vmax.bf16 %v9127_v16, %v8976_v39  ;;  %v8724_v56 = vrot.slane %v8722_v29, 4  ;;  %v8746_v2 = vshrl.u32 %v15520_v7, 16 }
 0x64d   : > { %7130 = vst.msk [vmem:[#allocation6 + $0x68] sm:$0xff] %vm2751_vm12, %v7096_v55  ;;  %v8720_v55 = vrot.slane %v8718_v33, 5  ;;  %v15513_v36 = vmax.bf16 %v9130_v5, %v8977_v15  ;;  %v9134_v38 = vsel %vm11224_vm13, %v10251_v24, %v9133_v3  ;;  %v8735_v48 = vrot.slane %v8733_v58, 4  ;;  %v15563_v33 = vld [vmem:[%s16174_s6] ss:$0 sm:$0xff] }
 0x64e   : > { %v7171_v19 = vpop.permute.xlu0 %7170  ;;  %10569 = vmatmul.mubr.msk.bf16.gmra.mrb[40].mxu1 %vm16289_vm11, %v10266_v14  ;;  %v9310_v43 = vmax.bf16 %v9278_v40, %v15508_v57  ;;  %v9280_v22 = vmax.bf16 %v15508_v57, %v15473_v11  ;;  %v8742_v11 = vshll.u32 %v15520_v7, 16  ;;  %v8752_v31 = vshll.u32 %v8484_v45, 16 }
 0x64f   : > { %7207 = vst.msk [vmem:[#allocation6 + $0x60] sm:$0xff] %vm7194_vm10, %v7171_v19  ;;  %v8725_v47 = vor.u32 %v8724_v56, %v8720_v55  ;;  %v9135_v19 = vrot.slane %v9133_v3, 4  ;;  %v9311_v54 = vmax.bf16 %v9279_v9, %v15513_v36  ;;  %v8721_v21 = vsel %vm11233_vm2, %v8716_v51, %v8720_v55  ;;  %v9007_v51 = vld [vmem:[#allocation4 + $0x84] sm:$0xe] }
 0x650   : > { %v7173_v32 = vpop.permute.xlu1 %7172  ;;  %v9281_v0 = vmax.bf16 %v15513_v36, %v15482_v60  ;;  %v8978_v62 = vmax.bf16 %v8721_v21, %v15477_v20  ;;  %v8738_v16 = vrot.slane %v8736_v13, 5  ;;  %v8744_v34 = vrot.slane %v8742_v11, 5 }
 0x651   : > { %7208 = vst.msk [vmem:[#allocation6 + $0x68] sm:$0xff] %vm7194_vm10, %v7173_v32  ;;  %v8726_v50 = vrot.slane %v8725_v47, 4  ;;  %v9137_v52 = vsel %vm11224_vm13, %v9135_v19, %v9136_v28  ;;  %v10267_v1 = vcombine.low %v9310_v43, %v9311_v54  ;;  %v8748_v44 = vrot.slane %v8746_v2, 4 }
 0x652   : > { %v7249_v27 = vpop.permute.xlu0 %7248  ;;  %v15540_v20 = vmax.bf16 %v9134_v38, %v8978_v62  ;;  %v8754_v37 = vrot.slane %v8752_v31, 5  ;;  %v10252_v26 = vrot.slane %v9006_v49, 9  ;;  %v9140_v9 = vrot.slane %v15520_v7, 5 }
 0x653   : > { %7285 = vst.msk [vmem:[#allocation6 + $0x60] sm:$0xff] %vm7272_vm5, %v7249_v27  ;;  %v8731_v60 = vsel %vm11233_vm2, %v8726_v50, %v8730_v46  ;;  %10572 = vmatprep.mubr.msk.bf16.mxu1 %vm16286_vm0, %v10267_v1  ;;  %v8739_v39 = vor.u32 %v8738_v16, %v8735_v48  ;;  %v8749_v5 = vor.u32 %v8748_v44, %v8744_v34  ;;  %v9143_v59 = vrot.slane %v8484_v45, 5 }
 0x654   : > { %v7251_v30 = vpop.permute.xlu1 %7250  ;;  %v8979_v40 = vmax.bf16 %v8731_v60, %v15489_v61  ;;  %v9312_v42 = vmax.bf16 %v9280_v22, %v15540_v20  ;;  %v15552_v61 = vld [vmem:[#allocation4 + $0x88] sm:$0xf]  ;;  %v9141_v12 = vsel %vm11224_vm13, %v10252_v26, %v9140_v9  ;;  %v9282_v14 = vmax.bf16 %v15540_v20, %v15508_v57 }
 0x655   : > { %7286 = vst.msk [vmem:[#allocation6 + $0x68] sm:$0xff] %vm7272_vm5, %v7251_v30  ;;  %v8757_v4 = vshrl.u32 %v15545_v18, 16  ;;  %v8740_v15 = vrot.slane %v8739_v39, 4  ;;  %v8750_v8 = vrot.slane %v8749_v5, 4  ;;  %v8760_v3 = vshll.u32 %v15545_v18, 16 }
 0x656   : > { %v7327_v53 = vpop.permute.xlu0 %7326  ;;  %v15550_v10 = vmax.bf16 %v9137_v52, %v8979_v40  ;;  %v8766_v43 = vshll.u32 %v15552_v61, 16  ;;  %v8770_v47 = vshrl.u32 %v15552_v61, 16  ;;  %v10253_v62 = vrot.slane %v9007_v51, 9 }
 0x657   : > { %7363 = vst.msk [vmem:[#allocation6 + $0x60] sm:$0xff] %vm7350_vm3, %v7327_v53  ;;  %v9142_v53 = vrot.slane %v9140_v9, 4  ;;  %v8759_v24 = vrot.slane %v8757_v4, 4  ;;  %v8762_v21 = vrot.slane %v8760_v3, 5  ;;  %v9147_v26 = vrot.slane %v15552_v61, 5 }
 0x658   : > { %v6475_v6 = vpop.permute.xlu1 %6474  ;;  %v9313_v29 = vmax.bf16 %v9281_v0, %v15550_v10  ;;  %v9283_v25 = vmax.bf16 %v15550_v10, %v15513_v36  ;;  %v8745_v36 = vsel %vm11233_vm2, %v8740_v15, %v8744_v34  ;;  %v8768_v22 = vrot.slane %v8766_v43, 5  ;;  %v15600_v9 = vld [vmem:[#allocation4 + $0x90] sm:$0xf] }
 0x659   : > { %6508 = vst.msk [vmem:[#allocation6 + $0x70] sm:$0xff] %vm3329_vm7, %v6475_v6  ;;  %v15568_v6 = vld [vmem:[#allocation4 + $0x8c] sm:$0x1]  ;;  %v9144_v56 = vsel %vm11224_vm13, %v9142_v53, %v9143_v59  ;;  %v8980_v28 = vmax.bf16 %v8745_v36, %v15516_v23  ;;  %v8763_v13 = vor.u32 %v8762_v21, %v8759_v24  ;;  %v15606_v53 = vld [vmem:[#allocation4 + $0x94] sm:$0xf]  ;;  %v9149_v15 = vrot.slane %v9147_v26, 4 }
 0x65a   : > { %v7329_v17 = vpop.permute.xlu0 %7328  ;;  %v10268_v46 = vcombine.low %v9312_v42, %v9313_v29  ;;  %v8776_v50 = vshll.u32 %v15568_v6, 16  ;;  %v9148_v29 = vsel %vm11224_vm13, %v10253_v62, %v9147_v26  ;;  %v8784_v3 = vshll.u32 %v15600_v9, 16 }
 0x65b   : > { %7364 = vst.msk [vmem:[#allocation6 + $0x68] sm:$0xff] %vm7350_vm3, %v7329_v17  ;;  %v8755_v17 = vsel %vm11233_vm2, %v8750_v8, %v8754_v37  ;;  %v15588_v23 = vmax.bf16 %v9141_v12, %v8980_v28  ;;  %v8764_v42 = vrot.slane %v8763_v13, 4  ;;  %v8486_v8 = vld [vmem:[#allocation4 + $0x98] sm:$0x1]  ;;  %v8790_v43 = vshll.u32 %v15606_v53, 16 }
 0x65c   : > { %v7405_v32 = vpop.permute.xlu1 %7404  ;;  %v8981_v54 = vmax.bf16 %v8755_v17, %v15520_v7  ;;  %v8778_v60 = vrot.slane %v8776_v50, 5  ;;  %v8794_v51 = vshrl.u32 %v15606_v53, 16  ;;  %v8800_v36 = vshll.u32 %v8486_v8, 16 }
 0x65d   : > { %7441 = vst.msk [vmem:[#allocation6 + $0x60] sm:$0xff] %vm7428_vm8, %v7405_v32  ;;  %v8772_v32 = vrot.slane %v8770_v47, 4  ;;  %v9314_v34 = vmax.bf16 %v9282_v14, %v15588_v23  ;;  %v9284_v12 = vmax.bf16 %v15588_v23, %v15540_v20  ;;  %v8769_v14 = vsel %vm11233_vm2, %v8764_v42, %v8768_v22 }
 0x65e   : > { %v6477_v27 = vpop.permute.xlu0 %6476  ;;  %v15590_v7 = vmax.bf16 %v9144_v56, %v8981_v54  ;;  %v8982_v20 = vmax.bf16 %v8769_v14, %v15545_v18  ;;  %v9008_v56 = vld [vmem:[#allocation4 + $0x90] sm:$0xe]  ;;  %v8786_v17 = vrot.slane %v8784_v3, 5  ;;  %v8792_v47 = vrot.slane %v8790_v43, 5 }
 0x65f   : > { %6509 = vst.msk [vmem:[#allocation6 + $0x78] sm:$0xff] %vm3329_vm7, %v6477_v27  ;;  %vm16290_vm7 = vmmov %vm16286_vm0  ;;  %v8773_v27 = vor.u32 %v8772_v32, %v8768_v22  ;;  %v8802_v22 = vrot.slane %v8800_v36, 5  ;;  %v9157_v62 = vrot.slane %v8486_v8, 5 }
 0x660   : > { %v6570_v30 = vpop.permute.xlu1 %6569  ;;  %10573 = vmatmul.mubr.msk.bf16.gmra.mrb[44].mxu1 %vm16290_vm7, %v10268_v46  ;;  %v9315_v44 = vmax.bf16 %v9283_v25, %v15590_v7 }
 0x661   : > { %6604 = vst.msk [vmem:[#allocation6 + $0x70] sm:$0xff] %vm6589_vm4, %v6570_v30  ;;  %v8774_v37 = vrot.slane %v8773_v27, 4 }
 0x662   : > { %v7407_v41 = vpop.permute.xlu0 %7406  ;;  %v10269_v59 = vcombine.low %v9314_v34, %v9315_v44 }
 0x663   : > { %7442 = vst.msk [vmem:[#allocation6 + $0x68] sm:$0xff] %vm7428_vm8, %v7407_v41  ;;  %v9150_v41 = vrot.slane %v15568_v6, 5  ;;  %v8779_v4 = vsel %vm11233_vm2, %v8774_v37, %v8778_v60 }
 0x664   : > { %v6572_v55 = vpop.permute.xlu1 %6571  ;;  %v7457_v57 = vld [vmem:[#allocation6 + $0x60] sm:$0xff]  ;;  %v8983_v6 = vmax.bf16 %v8779_v4, %v15552_v61  ;;  %v15629_v61 = vmax.bf16 %v9148_v29, %v8982_v20  ;;  %v15664_v4 = vld [vmem:[#allocation4 + $0xa8] sm:$0xf] }
 0x665   : > { %6605 = vst.msk [vmem:[#allocation6 + $0x78] sm:$0xff] %vm6589_vm4, %v6572_v55  ;;  %10550 = vmatprep.mubr.msk.bf16.mxu0 %vm7520_vm1, %v7457_v57  ;;  %vm16292_vm4 = vmmov %vm16286_vm0  ;;  %v9285_v55 = vmax.bf16 %v15590_v7, %v15550_v10  ;;  %v8781_v57 = vshrl.u32 %v15600_v9, 16  ;;  %v9151_v24 = vsel %vm11224_vm13, %v9149_v15, %v9150_v41  ;;  %v8829_v3 = vshrl.u32 %v15664_v4, 16 }
 0x666   : > { %v10528_v38 = vpop.f32.mrb[32].mxu0  ;;  %v6666_v19 = vpop.permute.xlu0 %6665  ;;  %10576 = vmatprep.mubr.msk.bf16.mxu1 %vm16292_vm4, %v10269_v59  ;;  %v15631_v10 = vmax.bf16 %v9151_v24, %v8983_v6  ;;  %v9316_v54 = vmax.bf16 %v9284_v12, %v15629_v61 }
 0x667   : > { %v7615_v0 = vadd.f32 %v10528_v38, %v15563_v33  ;;  %6700 = vst.msk [vmem:[#allocation6 + $0x70] sm:$0xff] %vm6685_vm15, %v6666_v19  ;;  %v7606_v45 = vpop.f32.mrb[33].mxu0  ;;  %v8783_v46 = vrot.slane %v8781_v57, 4  ;;  %v8796_v38 = vrot.slane %v8794_v51, 4  ;;  %v10254_v19 = vrot.slane %v9008_v56, 9 }
 0x668   : > { %v7607_v52 = vadd.f32 %v15563_v33, %v7606_v45  ;;  %v6668_v58 = vpop.permute.xlu1 %6667  ;;  %v10529_v1 = vpop.f32.mrb[34].mxu0  ;;  %v9317_v21 = vmax.bf16 %v9285_v55, %v15631_v10  ;;  %v15638_v45 = vld [vmem:[#allocation4 + $0x9c] sm:$0xf]  ;;  %v9287_v27 = vmax.bf16 %v15631_v10, %v15590_v7 }
 0x669   : > { %v7735_v11 = vmax.f32 %v7615_v0, 0.0  ;;  %6701 = vst.msk [vmem:[#allocation6 + $0x78] sm:$0xff] %vm6685_vm15, %v6668_v58  ;;  %v7618_v2 = vadd.f32 %v10529_v1, %v15563_v33  ;;  %v7609_v49 = vpop.f32.mrb[35].mxu0  ;;  %v9154_v0 = vrot.slane %v15606_v53, 5  ;;  %v8787_v32 = vor.u32 %v8786_v17, %v8783_v46  ;;  %v15643_v58 = vld [vmem:[#allocation4 + $0xa0] sm:$0xf]  ;;  %vm16297_vm15 = vmmov %vm16286_vm0 }
 0x66a   : > { %v7733_v48 = vmax.f32 %v7607_v52, 0.0  ;;  %v7610_v31 = vadd.f32 %v15563_v33, %v7609_v49  ;;  %v6762_v40 = vpop.permute.xlu0 %6761  ;;  %v7458_v16 = vld [vmem:[#allocation6 + $0x68] sm:$0xff]  ;;  %v8797_v50 = vor.u32 %v8796_v38, %v8792_v47  ;;  %v9286_v52 = vmax.bf16 %v15629_v61, %v15588_v23  ;;  %v9009_v7 = vld [vmem:[#allocation4 + $0x9c] sm:$0xe]  ;;  %v8467_v17 = vld [vmem:[#allocation4 + $0xac] sm:$0xf] }
 0x66b   : > { %v7736_v30 = vmax.f32 %v7618_v2, 0.0  ;;  %6796 = vst.msk [vmem:[#allocation6 + $0x70] sm:$0xff] %vm6781_vm14, %v6762_v40  ;;  %10551 = vmatmul.mubr.msk.bf16.gmra.mrb[56].mxu0 %vm7520_vm1, %v7458_v16  ;;  %v8487_v1 = vld [vmem:[#allocation4 + $0xa4] sm:$0x1]  ;;  %v9155_v2 = vsel %vm11224_vm13, %v10254_v19, %v9154_v0  ;;  %v9156_v49 = vrot.slane %v9154_v0, 4  ;;  %v8788_v60 = vrot.slane %v8787_v32, 4 }
 0x66c   : > { %v7734_v39 = vmax.f32 %v7610_v31, 0.0  ;;  %v6764_v5 = vpop.permute.xlu1 %6763  ;;  %7797 = vrot.lane.b32.xlu0 %v7733_v48, %s16291_s21  ;;  %v8798_v48 = vrot.slane %v8797_v50, 4  ;;  %v8805_v31 = vshrl.u32 %v15638_v45, 16  ;;  %v8808_v23 = vshll.u32 %v15638_v45, 16 }
 0x66d   : > { %6797 = vst.msk [vmem:[#allocation6 + $0x78] sm:$0xff] %vm6781_vm14, %v6764_v5  ;;  %v9158_v16 = vsel %vm11224_vm13, %v9156_v49, %v9157_v62  ;;  %v8814_v34 = vshll.u32 %v15643_v58, 16  ;;  %v8818_v44 = vshrl.u32 %v15643_v58, 16  ;;  %v8793_v42 = vsel %vm11233_vm2, %v8788_v60, %v8792_v47  ;;  %v8488_v47 = vld [vmem:[#allocation4 + $0xb0] sm:$0x1]  ;;  %vm16298_vm14 = vmmov %vm16286_vm0 }
 0x66e   : > { %7799 = vrot.lane.b32.xlu1 %v7734_v39, %s16291_s21  ;;  %v7098_v25 = vpop.permute.xlu0 %7097  ;;  %v8803_v37 = vsel %vm11233_vm2, %v8798_v48, %v8802_v22  ;;  %v8807_v26 = vrot.slane %v8805_v31, 4  ;;  %v8810_v39 = vrot.slane %v8808_v23, 5  ;;  %v8984_v59 = vmax.bf16 %v8793_v42, %v15600_v9  ;;  %v8468_v23 = vld [vmem:[#allocation4 + $0xb4] sm:$0xf] }
 0x66f   : > { %7131 = vst.msk [vmem:[#allocation6 + $0x70] sm:$0xff] %vm2751_vm12, %v7098_v25  ;;  %v8985_v41 = vmax.bf16 %v8803_v37, %v15606_v53  ;;  %v8816_v12 = vrot.slane %v8814_v34, 5  ;;  %v8820_v14 = vrot.slane %v8818_v44, 4  ;;  %v10255_v8 = vrot.slane %v9009_v7, 9  ;;  %v8469_v44 = vld [vmem:[#allocation4 + $0xb8] sm:$0xf] }
 0x670   : > { %v7100_v18 = vpop.permute.xlu1 %7099  ;;  %7801 = vrot.lane.b32.xlu0 %v7735_v11, %s16291_s21  ;;  %v10270_v11 = vcombine.low %v9316_v54, %v9317_v21  ;;  %v8811_v29 = vor.u32 %v8810_v39, %v8807_v26  ;;  %v9161_v25 = vrot.slane %v15643_v58, 5  ;;  %v15668_v6 = vmax.bf16 %v9155_v2, %v8984_v59  ;;  %v9010_v21 = vld [vmem:[#allocation4 + $0xa8] sm:$0xe] }
 0x671   : > { %7132 = vst.msk [vmem:[#allocation6 + $0x78] sm:$0xff] %vm2751_vm12, %v7100_v18  ;;  %vm16293_vm12 = vmmov %vm16286_vm0  ;;  %v15670_v55 = vmax.bf16 %v9158_v16, %v8985_v41  ;;  %v8821_v57 = vor.u32 %v8820_v14, %v8816_v12  ;;  %v9164_v9 = vrot.slane %v8487_v1, 5  ;;  %v8831_v54 = vrot.slane %v8829_v3, 4  ;;  %v15716_v3 = vld [vmem:[#allocation4 + $0xc0] sm:$0xf] }
 0x672   : > { %7803 = vrot.lane.b32.xlu1 %v7736_v30, %s16291_s21  ;;  %v7175_v28 = vpop.permute.xlu0 %7174  ;;  %10577 = vmatmul.mubr.msk.bf16.gmra.mrb[48].mxu1 %vm16293_vm12, %v10270_v11  ;;  %v8824_v30 = vshll.u32 %v8487_v1, 16  ;;  %v8812_v53 = vrot.slane %v8811_v29, 4  ;;  %v9162_v56 = vsel %vm11224_vm13, %v10255_v8, %v9161_v25  ;;  %v9163_v24 = vrot.slane %v9161_v25, 4  ;;  %v9011_v8 = vld [vmem:[#allocation4 + $0xb4] sm:$0xe] }
 0x673   : > { %7209 = vst.msk [vmem:[#allocation6 + $0x70] sm:$0xff] %vm7194_vm10, %v7175_v28  ;;  %v9318_v51 = vmax.bf16 %v9286_v52, %v15668_v6  ;;  %v9319_v18 = vmax.bf16 %v9287_v27, %v15670_v55  ;;  %v8822_v46 = vrot.slane %v8821_v57, 4  ;;  %v9288_v36 = vmax.bf16 %v15668_v6, %v15629_v61 }
 0x674   : > { %v7177_v13 = vpop.permute.xlu1 %7176  ;;  %v8826_v15 = vrot.slane %v8824_v30, 5  ;;  %v8817_v38 = vsel %vm11233_vm2, %v8812_v53, %v8816_v12  ;;  %v9165_v19 = vsel %vm11224_vm13, %v9163_v24, %v9164_v9  ;;  %v9289_v28 = vmax.bf16 %v15670_v55, %v15631_v10 }
 0x675   : > { %7210 = vst.msk [vmem:[#allocation6 + $0x78] sm:$0xff] %vm7194_vm10, %v7177_v13  ;;  %v10271_v0 = vcombine.low %v9318_v51, %v9319_v18  ;;  %v8986_v32 = vmax.bf16 %v8817_v38, %v15638_v45  ;;  %v8832_v50 = vshll.u32 %v15664_v4, 16  ;;  %v8838_v52 = vshll.u32 %v8467_v17, 16  ;;  %vm16299_vm10 = vmmov %vm16286_vm0 }
 0x676   : > { %v7253_v40 = vpop.permute.xlu0 %7252  ;;  %v8827_v61 = vsel %vm11233_vm2, %v8822_v46, %v8826_v15  ;;  %v8842_v1 = vshrl.u32 %v8467_v17, 16  ;;  %v8848_v13 = vshll.u32 %v8488_v47, 16  ;;  %v10256_v49 = vrot.slane %v9010_v21, 9 }
 0x677   : > { %7287 = vst.msk [vmem:[#allocation6 + $0x70] sm:$0xff] %vm7272_vm5, %v7253_v40  ;;  %v8987_v62 = vmax.bf16 %v8827_v61, %v15643_v58  ;;  %v15694_v10 = vmax.bf16 %v9162_v56, %v8986_v32  ;;  %v8834_v2 = vrot.slane %v8832_v50, 5  ;;  %v9168_v27 = vrot.slane %v8467_v17, 5 }
 0x678   : > { %v7255_v5 = vpop.permute.xlu1 %7254  ;;  %v8840_v60 = vrot.slane %v8838_v52, 5  ;;  %v8844_v48 = vrot.slane %v8842_v1, 4  ;;  %v8850_v31 = vrot.slane %v8848_v13, 5  ;;  %v9171_v42 = vrot.slane %v8488_v47, 5 }
 0x679   : > { %7288 = vst.msk [vmem:[#allocation6 + $0x78] sm:$0xff] %vm7272_vm5, %v7255_v5  ;;  %v15697_v45 = vmax.bf16 %v9165_v19, %v8987_v62  ;;  %v9320_v58 = vmax.bf16 %v9288_v36, %v15694_v10  ;;  %v8835_v40 = vor.u32 %v8834_v2, %v8831_v54  ;;  %v9169_v16 = vsel %vm11224_vm13, %v10256_v49, %v9168_v27  ;;  %v8489_v5 = vld [vmem:[#allocation4 + $0xbc] sm:$0x1] }
 0x67a   : > { %v7331_v20 = vpop.permute.xlu0 %7330  ;;  %v9170_v34 = vrot.slane %v9168_v27, 4  ;;  %v8845_v7 = vor.u32 %v8844_v48, %v8840_v60  ;;  %v9290_v37 = vmax.bf16 %v15694_v10, %v15668_v6  ;;  %v8853_v59 = vshrl.u32 %v8468_v23, 16 }
 0x67b   : > { %7365 = vst.msk [vmem:[#allocation6 + $0x70] sm:$0xff] %vm7350_vm3, %v7331_v20  ;;  %v9321_v30 = vmax.bf16 %v9289_v28, %v15697_v45  ;;  %v8836_v26 = vrot.slane %v8835_v40, 4  ;;  %v9291_v39 = vmax.bf16 %v15697_v45, %v15670_v55  ;;  %v8856_v41 = vshll.u32 %v8468_v23, 16 }
 0x67c   : > { %v7333_v43 = vpop.permute.xlu1 %7332  ;;  %v8846_v14 = vrot.slane %v8845_v7, 4  ;;  %v9172_v29 = vsel %vm11224_vm13, %v9170_v34, %v9171_v42  ;;  %v8862_v15 = vshll.u32 %v8469_v44, 16  ;;  %v8855_v57 = vrot.slane %v8853_v59, 4  ;;  %v8471_v34 = vld [vmem:[#allocation4 + $0xc4] sm:$0xf] }
 0x67d   : > { %7366 = vst.msk [vmem:[#allocation6 + $0x78] sm:$0xff] %vm7350_vm3, %v7333_v43  ;;  %vm16294_vm3 = vmmov %vm16286_vm0  ;;  %v10272_v12 = vcombine.low %v9320_v58, %v9321_v30  ;;  %v8841_v20 = vsel %vm11233_vm2, %v8836_v26, %v8840_v60  ;;  %v8858_v6 = vrot.slane %v8856_v41, 5  ;;  %v8866_v9 = vshrl.u32 %v8469_v44, 16  ;;  %v9012_v26 = vld [vmem:[#allocation4 + $0xc0] sm:$0xe] }
 0x67e   : > { %v7409_v22 = vpop.permute.xlu0 %7408  ;;  %10580 = vmatprep.mubr.msk.bf16.mxu1 %vm16294_vm3, %v10271_v0  ;;  %v8851_v55 = vsel %vm11233_vm2, %v8846_v14, %v8850_v31  ;;  %v8988_v53 = vmax.bf16 %v8841_v20, %v15664_v4  ;;  %v8864_v56 = vrot.slane %v8862_v15, 5  ;;  %v8872_v24 = vshll.u32 %v8489_v5, 16  ;;  %v8472_v20 = vld [vmem:[#allocation4 + $0xcc] sm:$0xf] }
 0x67f   : > { %7443 = vst.msk [vmem:[#allocation6 + $0x70] sm:$0xff] %vm7428_vm8, %v7409_v22  ;;  %v8989_v51 = vmax.bf16 %v8851_v55, %v8467_v17  ;;  %v8859_v18 = vor.u32 %v8858_v6, %v8855_v57  ;;  %v8868_v46 = vrot.slane %v8866_v9, 4  ;;  %v10257_v36 = vrot.slane %v9011_v8, 9  ;;  %v8473_v55 = vld [vmem:[#allocation4 + $0xd0] sm:$0xf] }
 0x680   : > { %v7411_v11 = vpop.permute.xlu1 %7410  ;;  %v15719_v47 = vmax.bf16 %v9169_v16, %v8988_v53  ;;  %v8874_v38 = vrot.slane %v8872_v24, 5  ;;  %v9175_v19 = vrot.slane %v8469_v44, 5  ;;  %v9178_v28 = vrot.slane %v8489_v5, 5 }
 0x681   : > { %7444 = vst.msk [vmem:[#allocation6 + $0x78] sm:$0xff] %vm7428_vm8, %v7411_v11  ;;  %vm16295_vm8 = vmmov %vm16286_vm0  ;;  %v15721_v21 = vmax.bf16 %v9172_v29, %v8989_v51  ;;  %v8860_v4 = vrot.slane %v8859_v18, 4  ;;  %v8869_v22 = vor.u32 %v8868_v46, %v8864_v56  ;;  %v8877_v0 = vshrl.u32 %v15716_v3, 16  ;;  %v8491_v51 = vld [vmem:[#allocation4 + $0xd4] sm:$0x1] }
 0x682   : > { %10581 = vmatmul.mubr.msk.bf16.gmra.mrb[52].mxu1 %vm16295_vm8, %v10272_v12  ;;  %v9322_v32 = vmax.bf16 %v9290_v37, %v15719_v47  ;;  %v9176_v50 = vsel %vm11224_vm13, %v10257_v36, %v9175_v19  ;;  %v9177_v62 = vrot.slane %v9175_v19, 4  ;;  %v9292_v37 = vmax.bf16 %v15719_v47, %v15694_v10 }
 0x683   : > { %v9323_v13 = vmax.bf16 %v9291_v39, %v15721_v21  ;;  %v8865_v11 = vsel %vm11233_vm2, %v8860_v4, %v8864_v56  ;;  %v8870_v2 = vrot.slane %v8869_v22, 4  ;;  %v9293_v5 = vmax.bf16 %v15721_v21, %v15697_v45 }
 0x684   : > { %v8990_v60 = vmax.bf16 %v8865_v11, %v8468_v23  ;;  %v9179_v48 = vsel %vm11224_vm13, %v9177_v62, %v9178_v28  ;;  %v8490_v23 = vld [vmem:[#allocation4 + $0xc8] sm:$0x1]  ;;  %v8879_v59 = vrot.slane %v8877_v0, 4  ;;  %v8880_v41 = vshll.u32 %v15716_v3, 16 }
 0x685   : > { %v10273_v40 = vcombine.low %v9322_v32, %v9323_v13  ;;  %v8875_v16 = vsel %vm11233_vm2, %v8870_v2, %v8874_v38  ;;  %v8886_v14 = vshll.u32 %v8471_v34, 16  ;;  %v8890_v29 = vshrl.u32 %v8471_v34, 16  ;;  %v9013_v32 = vld [vmem:[#allocation4 + $0xcc] sm:$0xe] }
 0x686   : > { %v7459_v25 = vld [vmem:[#allocation6 + $0x70] sm:$0xff]  ;;  %v8991_v7 = vmax.bf16 %v8875_v16, %v8469_v44  ;;  %v15738_v42 = vmax.bf16 %v9176_v50, %v8990_v60  ;;  %v8882_v10 = vrot.slane %v8880_v41, 5  ;;  %v8896_v15 = vshll.u32 %v8490_v23, 16 }
 0x687   : > { %10554 = vmatprep.mubr.msk.bf16.mxu0 %vm7520_vm1, %v7459_v25  ;;  %v10258_v8 = vrot.slane %v9012_v26, 9  ;;  %v9182_v25 = vrot.slane %v8471_v34, 5  ;;  %v8888_v45 = vrot.slane %v8886_v14, 5  ;;  %v8892_v9 = vrot.slane %v8890_v29, 4 }
 0x688   : > { %v7460_v43 = vld [vmem:[#allocation6 + $0x78] sm:$0xff]  ;;  %v15747_v12 = vmax.bf16 %v9179_v48, %v8991_v7  ;;  %v9324_v44 = vmax.bf16 %v9292_v37, %v15738_v42  ;;  %v8883_v53 = vor.u32 %v8882_v10, %v8879_v59  ;;  %v8898_v56 = vrot.slane %v8896_v15, 5 }
 0x689   : > { %10555 = vmatmul.mubr.msk.bf16.gmra.mrb[60].mxu0 %vm7520_vm1, %v7460_v43  ;;  %vm16296_vm1 = vmmov %vm16286_vm0  ;;  %v9184_v24 = vrot.slane %v9182_v25, 4  ;;  %v9185_v43 = vrot.slane %v8490_v23, 5  ;;  %v8893_v46 = vor.u32 %v8892_v9, %v8888_v45  ;;  %v9183_v36 = vsel %vm11224_vm13, %v10258_v8, %v9182_v25 }
 0x68a   : > { %v10532_v54 = vpop.f32.mrb[36].mxu0  ;;  %10584 = vmatprep.mubr.msk.bf16.mxu1 %vm16296_vm1, %v10273_v40  ;;  %v9325_v6 = vmax.bf16 %v9293_v5, %v15747_v12  ;;  %v9294_v38 = vmax.bf16 %v15738_v42, %v15719_v47  ;;  %v8884_v19 = vrot.slane %v8883_v53, 4  ;;  %v9295_v28 = vmax.bf16 %v15747_v12, %v15721_v21 }
 0x68b   : > { %v7631_v61 = vadd.f32 %v10532_v54, %v15563_v33  ;;  %v7622_v17 = vpop.f32.mrb[37].mxu0  ;;  %v8901_v54 = vshrl.u32 %v8472_v20, 16  ;;  %v8904_v4 = vshll.u32 %v8472_v20, 16  ;;  %v8894_v22 = vrot.slane %v8893_v46, 4 }
 0x68c   : > { %v7623_v52 = vadd.f32 %v15563_v33, %v7622_v17  ;;  %v10533_v1 = vpop.f32.mrb[38].mxu0  ;;  %v10274_v18 = vcombine.low %v9324_v44, %v9325_v6  ;;  %v8910_v0 = vshll.u32 %v8473_v55, 16  ;;  %v8920_v17 = vshll.u32 %v8491_v51, 16 }
 0x68d   : > { %v7739_v49 = vmax.f32 %v7631_v61, 0.0  ;;  %v7625_v27 = vpop.f32.mrb[39].mxu0  ;;  %v7634_v30 = vadd.f32 %v10533_v1, %v15563_v33  ;;  %v8914_v61 = vshrl.u32 %v8473_v55, 16  ;;  %v8889_v50 = vsel %vm11233_vm2, %v8884_v19, %v8888_v45 }
 0x68e   : > { %v7737_v31 = vmax.f32 %v7623_v52, 0.0  ;;  %v7626_v58 = vadd.f32 %v15563_v33, %v7625_v27  ;;  %10585 = vmatmul.mubr.msk.bf16.gmra.mrb[56].mxu1 %vm16297_vm15, %v10274_v18  ;;  %v9186_v47 = vsel %vm11224_vm13, %v9184_v24, %v9185_v43  ;;  %v8903_v62 = vrot.slane %v8901_v54, 4 }
 0x68f   : > { %v7740_v57 = vmax.f32 %v7634_v30, 0.0  ;;  %v8906_v52 = vrot.slane %v8904_v4, 5  ;;  %v8899_v21 = vsel %vm11233_vm2, %v8894_v22, %v8898_v56  ;;  %v8992_v1 = vmax.bf16 %v8889_v50, %v15716_v3 }
 0x690   : > { %v7738_v39 = vmax.f32 %v7626_v58, 0.0  ;;  %7805 = vrot.lane.b32.xlu0 %v7737_v31, %s16291_s21  ;;  %v8912_v13 = vrot.slane %v8910_v0, 5  ;;  %v8916_v11 = vrot.slane %v8914_v61, 4  ;;  %v8993_v2 = vmax.bf16 %v8899_v21, %v8471_v34 }
 0x691   : > { %v10259_v27 = vrot.slane %v9013_v32, 9  ;;  %v9189_v60 = vrot.slane %v8473_v55, 5  ;;  %v9262_v48 = vmax.bf16 %v9183_v36, %v8992_v1  ;;  %v8922_v58 = vrot.slane %v8920_v17, 5 }
 0x692   : > { %7807 = vrot.lane.b32.xlu1 %v7738_v39, %s16291_s21  ;;  %v8917_v31 = vor.u32 %v8916_v11, %v8912_v13  ;;  %v9192_v40 = vrot.slane %v8491_v51, 5  ;;  %v9263_v16 = vmax.bf16 %v9186_v47, %v8993_v2 }
 0x693   : > { %v9191_v7 = vrot.slane %v9189_v60, 4  ;;  %v9326_v37 = vmax.bf16 %v9294_v38, %v9262_v48  ;;  %v9190_v3 = vsel %vm11224_vm13, %v10259_v27, %v9189_v60  ;;  %v9296_v41 = vmax.bf16 %v9262_v48, %v15738_v42 }
 0x694   : > { %7809 = vrot.lane.b32.xlu0 %v7739_v49, %s16291_s21  ;;  %v8907_v49 = vor.u32 %v8906_v52, %v8903_v62  ;;  %v8918_v23 = vrot.slane %v8917_v31, 4  ;;  %v9327_v26 = vmax.bf16 %v9295_v28, %v9263_v16  ;;  %v9297_v29 = vmax.bf16 %v9263_v16, %v15747_v12 }
 0x695   : > { %v9193_v59 = vsel %vm11224_vm13, %v9191_v7, %v9192_v40  ;;  %vm7893_vm13 = vcmask 162912  }
 0x696   : > { %7811 = vrot.lane.b32.xlu1 %v7740_v57, %s16291_s21  ;;  %v8908_v30 = vrot.slane %v8907_v49, 4  ;;  %v8923_v34 = vsel %vm11233_vm2, %v8918_v23, %v8922_v58  ;;  %v10275_v44 = vcombine.low %v9326_v37, %v9327_v26 }
 0x697   : > { %v8995_v14 = vmax.bf16 %v8923_v34, %v8473_v55 }
 0x698   : > { %v8913_v39 = vsel %vm11233_vm2, %v8908_v30, %v8912_v13  ;;  %10588 = vmatprep.mubr.msk.bf16.mxu1 %vm16298_vm14, %v10275_v44  ;;  %vm16301_vm2 = vcmask 195744  }
 0x699   : > { %v8994_v5 = vmax.bf16 %v8913_v39, %v8472_v20  ;;  %v9265_v15 = vmax.bf16 %v9193_v59, %v8995_v14  ;;  %vm16302_vm5 = vmmov %vm16301_vm2 }
 0x69a   : > { %vm16303_vm9 = vmmov %vm16301_vm2 }
 0x69b   : > { %v9264_v10 = vmax.bf16 %v9190_v3, %v8994_v5  ;;  %v9329_v25 = vmax.bf16 %v9297_v29, %v9265_v15  ;;  %vm16304_vm6 = vmmov %vm16301_vm2 }
 0x69c   : > { %vm16305_vm11 = vmmov %vm16301_vm2 }
 0x69d   : > { %v9328_v8 = vmax.bf16 %v9296_v41, %v9264_v10  ;;  %vm16306_vm0 = vmmov %vm16301_vm2 }
 0x69e   : > { %vm16307_vm7 = vmmov %vm16306_vm0 }
 0x69f   : > { %v10276_v57 = vcombine.low %v9328_v8, %v9329_v25  ;;  %vm16308_vm4 = vmmov %vm16306_vm0 }
 0x6a0   : > { %vm16309_vm12 = vmmov %vm16306_vm0 }
 0x6a1   : > { %10589 = vmatmul.mubr.msk.bf16.gmra.mrb[60].mxu1 %vm16299_vm10, %v10276_v57  ;;  %vm16310_vm3 = vmmov %vm16306_vm0 }
 0x6a2   : > { %vm16311_vm8 = vmmov %vm16306_vm0 }
 0x6a3   : > { %vm16312_vm1 = vmmov %vm16306_vm0 }
 0x6a4   : > { %vm16313_vm15 = vmmov %vm16306_vm0 }
 0x6a5   : > { %vm16314_vm14 = vmmov %vm16306_vm0 }
 0x6a6   : > { %vm16315_vm10 = vmmov %vm16306_vm0 }
 0x6ae   : > { %v10536_v63 = vpop.f32.mrb[40].mxu0 }
 0x6af   : > { %v7638_v20 = vpop.f32.mrb[41].mxu0  ;;  %v7647_v42 = vadd.f32 %v10536_v63, %v15563_v33 }
 0x6b0   : > { %v7639_v35 = vadd.f32 %v15563_v33, %v7638_v20  ;;  %v10537_v6 = vpop.f32.mrb[42].mxu0 }
 0x6b1   : > { %v7641_v45 = vpop.f32.mrb[43].mxu0  ;;  %v7650_v55 = vadd.f32 %v10537_v6, %v15563_v33  ;;  %v7743_v56 = vmax.f32 %v7647_v42, 0.0 }
 0x6b2   : > { %v7741_v9 = vmax.f32 %v7639_v35, 0.0  ;;  %v7642_v12 = vadd.f32 %v15563_v33, %v7641_v45 }
 0x6b3   : > { %v7744_v24 = vmax.f32 %v7650_v55, 0.0 }
 0x6b4   : > { %v7742_v53 = vmax.f32 %v7642_v12, 0.0  ;;  %7813 = vrot.lane.b32.xlu0 %v7741_v9, %s16291_s21 }
 0x6b6   : > { %7815 = vrot.lane.b32.xlu1 %v7742_v53, %s16291_s21 }
 0x6b8   : > { %7817 = vrot.lane.b32.xlu0 %v7743_v56, %s16291_s21 }
 0x6ba   : > { %7819 = vrot.lane.b32.xlu1 %v7744_v24, %s16291_s21 }
 0x6d2   : > { %v10540_v43 = vpop.f32.mrb[44].mxu0 }
 0x6d3   : > { %v7654_v51 = vpop.f32.mrb[45].mxu0  ;;  %v7663_v38 = vadd.f32 %v10540_v43, %v15563_v33 }
 0x6d4   : > { %v7655_v18 = vadd.f32 %v15563_v33, %v7654_v51  ;;  %v10541_v46 = vpop.f32.mrb[46].mxu0 }
 0x6d5   : > { %v7657_v36 = vpop.f32.mrb[47].mxu0  ;;  %v7666_v54 = vadd.f32 %v10541_v46, %v15563_v33  ;;  %v7747_v22 = vmax.f32 %v7663_v38, 0.0 }
 0x6d6   : > { %v7745_v19 = vmax.f32 %v7655_v18, 0.0  ;;  %v7658_v28 = vadd.f32 %v15563_v33, %v7657_v36 }
 0x6d7   : > { %v7748_v0 = vmax.f32 %v7666_v54, 0.0 }
 0x6d8   : > { %v7746_v4 = vmax.f32 %v7658_v28, 0.0  ;;  %7821 = vrot.lane.b32.xlu0 %v7745_v19, %s16291_s21 }
 0x6da   : > { %7823 = vrot.lane.b32.xlu1 %v7746_v4, %s16291_s21 }
 0x6dc   : > { %7825 = vrot.lane.b32.xlu0 %v7747_v22, %s16291_s21 }
 0x6de   : > { %7827 = vrot.lane.b32.xlu1 %v7748_v0, %s16291_s21  ;;  %v7798_v61 = vpop.permute.xlu0 %7797 }
 0x6df   : > { %7894 = vst.msk [vmem:[%s11264_s24] sm:$0xff] %vm7893_vm13, %v7798_v61 }
 0x6e0   : > { %v7800_v17 = vpop.permute.xlu1 %7799 }
 0x6e1   : > { %7895 = vst.msk [vmem:[%s11264_s24 + $0x8] sm:$0xff] %vm7893_vm13, %v7800_v17 }
 0x6e2   : > { %v7802_v32 = vpop.permute.xlu0 %7801 }
 0x6e3   : > { %7896 = vst.msk [vmem:[%s11264_s24 + $0x10] sm:$0xff] %vm7893_vm13, %v7802_v32 }
 0x6e4   : > { %v7804_v50 = vpop.permute.xlu1 %7803 }
 0x6e5   : > { %7897 = vst.msk [vmem:[%s11264_s24 + $0x18] sm:$0xff] %vm7893_vm13, %v7804_v50 }
 0x6f6   : > { %v10544_v47 = vpop.f32.mrb[48].mxu0 }
 0x6f7   : > { %v7670_v62 = vpop.f32.mrb[49].mxu0  ;;  %v7679_v13 = vadd.f32 %v10544_v47, %v15563_v33 }
 0x6f8   : > { %v7671_v52 = vadd.f32 %v15563_v33, %v7670_v62  ;;  %v10545_v21 = vpop.f32.mrb[50].mxu0 }
 0x6f9   : > { %v7673_v1 = vpop.f32.mrb[51].mxu0  ;;  %v7682_v49 = vadd.f32 %v10545_v21, %v15563_v33  ;;  %v7751_v60 = vmax.f32 %v7679_v13, 0.0 }
 0x6fa   : > { %v7749_v11 = vmax.f32 %v7671_v52, 0.0  ;;  %v7674_v2 = vadd.f32 %v15563_v33, %v7673_v1 }
 0x6fb   : > { %v7752_v48 = vmax.f32 %v7682_v49, 0.0 }
 0x6fc   : > { %v7750_v27 = vmax.f32 %v7674_v2, 0.0  ;;  %7829 = vrot.lane.b32.xlu0 %v7749_v11, %s16291_s21 }
 0x6fd   : > { %v15818_v30 = vpop.f32.mrb[32].mxu1 }
 0x6fe   : > { %7831 = vrot.lane.b32.xlu1 %v7750_v27, %s16291_s21  ;;  %v15822_v7 = vpop.f32.mrb[33].mxu1 }
 0x6ff   : > { %v15824_v37 = vpop.f32.mrb[34].mxu1 }
 0x700   : > { %7833 = vrot.lane.b32.xlu0 %v7751_v60, %s16291_s21  ;;  %v15826_v23 = vpop.f32.mrb[35].mxu1 }
 0x702   : > { %7835 = vrot.lane.b32.xlu1 %v7752_v48, %s16291_s21  ;;  %v7806_v31 = vpop.permute.xlu0 %7805 }
 0x703   : > { %7898 = vst.msk [vmem:[%s11264_s24 + $0x20] sm:$0xff] %vm7893_vm13, %v7806_v31 }
 0x704   : > { %v7808_v58 = vpop.permute.xlu1 %7807 }
 0x705   : > { %7899 = vst.msk [vmem:[%s11264_s24 + $0x28] sm:$0xff] %vm7893_vm13, %v7808_v58 }
 0x706   : > { %v7810_v40 = vpop.permute.xlu0 %7809 }
 0x707   : > { %7900 = vst.msk [vmem:[%s11264_s24 + $0x30] sm:$0xff] %vm7893_vm13, %v7810_v40  ;;  %v15904_v40 = vld [vmem:[%s16176_s8] ss:$0 sm:$0xff] }
 0x708   : > { %v7812_v16 = vpop.permute.xlu1 %7811 }
 0x709   : > { %7901 = vst.msk [vmem:[%s11264_s24 + $0x38] sm:$0xff] %vm7893_vm13, %v7812_v16 }
 0x70f   : > { %v15828_v39 = vpop.f32.mrb[36].mxu1 }
 0x710   : > { %v15830_v34 = vpop.f32.mrb[37].mxu1 }
 0x711   : > { %v15833_v41 = vpop.f32.mrb[38].mxu1 }
 0x712   : > { %v15835_v14 = vpop.f32.mrb[39].mxu1 }
 0x71a   : > { %v10548_v26 = vpop.f32.mrb[52].mxu0 }
 0x71b   : > { %v7686_v3 = vpop.f32.mrb[53].mxu0  ;;  %v7695_v29 = vadd.f32 %v10548_v26, %v15563_v33 }
 0x71c   : > { %v7687_v5 = vadd.f32 %v15563_v33, %v7686_v3  ;;  %v10549_v59 = vpop.f32.mrb[54].mxu0 }
 0x71d   : > { %v7689_v44 = vpop.f32.mrb[55].mxu0  ;;  %v7698_v8 = vadd.f32 %v10549_v59, %v15563_v33  ;;  %v7755_v57 = vmax.f32 %v7695_v29, 0.0 }
 0x71e   : > { %v7753_v10 = vmax.f32 %v7687_v5, 0.0  ;;  %v7690_v15 = vadd.f32 %v15563_v33, %v7689_v44  ;;  %v9504_v44 = vadd.f32 %v15904_v40, %v15822_v7 }
 0x71f   : > { %v7756_v63 = vmax.f32 %v7698_v8, 0.0  ;;  %v9507_v8 = vadd.f32 %v15904_v40, %v15826_v23 }
 0x720   : > { %v7754_v25 = vmax.f32 %v7690_v15, 0.0  ;;  %7837 = vrot.lane.b32.xlu0 %v7753_v10, %s16291_s21  ;;  %v9630_v15 = vmax.f32 %v9504_v44, 0.0 }
 0x721   : > { %v15850_v45 = vpop.f32.mrb[40].mxu1  ;;  %v9631_v7 = vmax.f32 %v9507_v8, 0.0 }
 0x722   : > { %7839 = vrot.lane.b32.xlu1 %v7754_v25, %s16291_s21  ;;  %v15852_v9 = vpop.f32.mrb[41].mxu1  ;;  %v9512_v25 = vadd.f32 %v15818_v30, %v15904_v40 }
 0x723   : > { %v15856_v12 = vpop.f32.mrb[42].mxu1 }
 0x724   : > { %7841 = vrot.lane.b32.xlu0 %v7755_v57, %s16291_s21  ;;  %v15858_v55 = vpop.f32.mrb[43].mxu1  ;;  %v9520_v57 = vadd.f32 %v15904_v40, %v15830_v34  ;;  %v9523_v34 = vadd.f32 %v15904_v40, %v15835_v14  ;;  %v9536_v14 = vadd.f32 %v15904_v40, %v15852_v9  ;;  %v9544_v9 = vadd.f32 %v15850_v45, %v15904_v40 }
 0x726   : > { %7843 = vrot.lane.b32.xlu1 %v7756_v63, %s16291_s21  ;;  %v7814_v20 = vpop.permute.xlu0 %7813 }
 0x727   : > { %7902 = vst.msk [vmem:[%s11264_s24 + $0x40] sm:$0xff] %vm7893_vm13, %v7814_v20  ;;  %v9632_v20 = vmax.f32 %v9512_v25, 0.0 }
 0x728   : > { %v7816_v35 = vpop.permute.xlu1 %7815 }
 0x729   : > { %7903 = vst.msk [vmem:[%s11264_s24 + $0x48] sm:$0xff] %vm7893_vm13, %v7816_v35 }
 0x72a   : > { %v7818_v6 = vpop.permute.xlu0 %7817 }
 0x72b   : > { %7904 = vst.msk [vmem:[%s11264_s24 + $0x50] sm:$0xff] %vm7893_vm13, %v7818_v6  ;;  %v9634_v6 = vmax.f32 %v9520_v57, 0.0 }
 0x72c   : > { %v7820_v42 = vpop.permute.xlu1 %7819 }
 0x72d   : > { %7905 = vst.msk [vmem:[%s11264_s24 + $0x58] sm:$0xff] %vm7893_vm13, %v7820_v42 }
 0x733   : > { %v15860_v53 = vpop.f32.mrb[44].mxu1 }
 0x734   : > { %v15862_v56 = vpop.f32.mrb[45].mxu1 }
 0x735   : > { %v15864_v24 = vpop.f32.mrb[46].mxu1 }
 0x736   : > { %v15866_v43 = vpop.f32.mrb[47].mxu1 }
 0x73e   : > { %v10552_v51 = vpop.f32.mrb[56].mxu0 }
 0x73f   : > { %v7702_v18 = vpop.f32.mrb[57].mxu0  ;;  %v7711_v19 = vadd.f32 %v10552_v51, %v15563_v33  ;;  %v9528_v51 = vadd.f32 %v15828_v39, %v15904_v40 }
 0x740   : > { %v7703_v46 = vadd.f32 %v15563_v33, %v7702_v18  ;;  %v10553_v36 = vpop.f32.mrb[58].mxu0 }
 0x741   : > { %v7705_v38 = vpop.f32.mrb[59].mxu0  ;;  %v7714_v4 = vadd.f32 %v10553_v36, %v15563_v33  ;;  %v7759_v0 = vmax.f32 %v7711_v19, 0.0  ;;  %v9635_v36 = vmax.f32 %v9523_v34, 0.0  ;;  %v9636_v19 = vmax.f32 %v9528_v51, 0.0 }
 0x742   : > { %v7757_v28 = vmax.f32 %v7703_v46, 0.0  ;;  %v7706_v54 = vadd.f32 %v15563_v33, %v7705_v38  ;;  %v9531_v46 = vadd.f32 %v15833_v41, %v15904_v40  ;;  %v9539_v41 = vadd.f32 %v15904_v40, %v15858_v55 }
 0x743   : > { %v7760_v61 = vmax.f32 %v7714_v4, 0.0  ;;  %v9547_v4 = vadd.f32 %v15856_v12, %v15904_v40 }
 0x744   : > { %v7758_v22 = vmax.f32 %v7706_v54, 0.0  ;;  %7845 = vrot.lane.b32.xlu0 %v7757_v28, %s16291_s21  ;;  %v9637_v39 = vmax.f32 %v9531_v46, 0.0  ;;  %v9638_v54 = vmax.f32 %v9536_v14, 0.0 }
 0x745   : > { %v15875_v17 = vpop.f32.mrb[48].mxu1  ;;  %v9641_v45 = vmax.f32 %v9547_v4, 0.0 }
 0x746   : > { %7847 = vrot.lane.b32.xlu1 %v7758_v22, %s16291_s21  ;;  %v15878_v50 = vpop.f32.mrb[49].mxu1  ;;  %v9639_v22 = vmax.f32 %v9539_v41, 0.0 }
 0x747   : > { %v15882_v47 = vpop.f32.mrb[50].mxu1 }
 0x748   : > { %7849 = vrot.lane.b32.xlu0 %v7759_v0, %s16291_s21  ;;  %v15884_v52 = vpop.f32.mrb[51].mxu1  ;;  %v9552_v0 = vadd.f32 %v15904_v40, %v15862_v56  ;;  %v9560_v56 = vadd.f32 %v15860_v53, %v15904_v40  ;;  %v9576_v53 = vadd.f32 %v15875_v17, %v15904_v40 }
 0x74a   : > { %7851 = vrot.lane.b32.xlu1 %v7760_v61, %s16291_s21  ;;  %v7822_v32 = vpop.permute.xlu0 %7821 }
 0x74b   : > { %7906 = vst.msk [vmem:[%s11264_s24 + $0x60] sm:$0xff] %vm7893_vm13, %v7822_v32  ;;  %v9640_v32 = vmax.f32 %v9544_v9, 0.0 }
 0x74c   : > { %v7824_v62 = vpop.permute.xlu1 %7823 }
 0x74d   : > { %7907 = vst.msk [vmem:[%s11264_s24 + $0x68] sm:$0xff] %vm7893_vm13, %v7824_v62 }
 0x74e   : > { %v7826_v21 = vpop.permute.xlu0 %7825 }
 0x74f   : > { %7908 = vst.msk [vmem:[%s11264_s24 + $0x70] sm:$0xff] %vm7893_vm13, %v7826_v21  ;;  %v9642_v21 = vmax.f32 %v9552_v0, 0.0 }
 0x750   : > { %v7828_v1 = vpop.permute.xlu1 %7827 }
 0x751   : > { %7909 = vst.msk [vmem:[%s11264_s24 + $0x78] sm:$0xff] %vm7893_vm13, %v7828_v1  ;;  %v9555_v1 = vadd.f32 %v15904_v40, %v15866_v43 }
 0x755   : > { %v15892_v13 = vpop.f32.mrb[52].mxu1 }
 0x756   : > { %v15894_v11 = vpop.f32.mrb[53].mxu1 }
 0x757   : > { %v15896_v49 = vpop.f32.mrb[54].mxu1 }
 0x758   : > { %v15898_v60 = vpop.f32.mrb[55].mxu1 }
 0x759   : > { %v9587_v17 = vadd.f32 %v15904_v40, %v15898_v60 }
 0x75c   : > { %v10556_v2 = vpop.f32.mrb[60].mxu0 }
 0x75d   : > { %v7718_v27 = vpop.f32.mrb[61].mxu0  ;;  %v7727_v16 = vadd.f32 %v10556_v2, %v15563_v33  ;;  %v9563_v2 = vadd.f32 %v15864_v24, %v15904_v40  ;;  %v9579_v24 = vadd.f32 %v15882_v47, %v15904_v40  ;;  %v9592_v47 = vadd.f32 %v15892_v13, %v15904_v40 }
 0x75e   : > { %v7719_v48 = vadd.f32 %v15563_v33, %v7718_v27  ;;  %v10557_v31 = vpop.f32.mrb[62].mxu0  ;;  %v9643_v27 = vmax.f32 %v9555_v1, 0.0 }
 0x75f   : > { %v7721_v58 = vpop.f32.mrb[63].mxu0  ;;  %v7730_v5 = vadd.f32 %v10557_v31, %v15563_v33  ;;  %v7763_v29 = vmax.f32 %v7727_v16, 0.0  ;;  %v9644_v31 = vmax.f32 %v9560_v56, 0.0  ;;  %v9645_v43 = vmax.f32 %v9563_v2, 0.0 }
 0x760   : > { %v7761_v26 = vmax.f32 %v7719_v48, 0.0  ;;  %v7722_v3 = vadd.f32 %v15563_v33, %v7721_v58  ;;  %v9515_v33 = vadd.f32 %v15824_v37, %v15904_v40  ;;  %v9568_v48 = vadd.f32 %v15904_v40, %v15878_v50 }
 0x761   : > { %v7764_v10 = vmax.f32 %v7730_v5, 0.0  ;;  %v15924_v63 = vpop.f32.mrb[56].mxu1  ;;  %v9571_v16 = vadd.f32 %v15904_v40, %v15884_v52  ;;  %v9649_v52 = vmax.f32 %v9579_v24, 0.0  ;;  %v9652_v60 = vmax.f32 %v9592_v47, 0.0 }
 0x762   : > { %v7762_v59 = vmax.f32 %v7722_v3, 0.0  ;;  %7853 = vrot.lane.b32.xlu0 %v7761_v26, %s16291_s21  ;;  %v15926_v23 = vpop.f32.mrb[57].mxu1  ;;  %v9633_v37 = vmax.f32 %v9515_v33, 0.0  ;;  %v9646_v58 = vmax.f32 %v9568_v48, 0.0  ;;  %v9584_v26 = vadd.f32 %v15904_v40, %v15894_v11 }
 0x763   : > { %v15929_v30 = vpop.f32.mrb[58].mxu1  ;;  %v9647_v50 = vmax.f32 %v9571_v16, 0.0  ;;  %v9648_v3 = vmax.f32 %v9576_v53, 0.0  ;;  %v9595_v11 = vadd.f32 %v15896_v49, %v15904_v40  ;;  %v9600_v44 = vadd.f32 %v15904_v40, %v15926_v23 }
 0x764   : > { %7855 = vrot.lane.b32.xlu1 %v7762_v59, %s16291_s21  ;;  %v15931_v35 = vpop.f32.mrb[59].mxu1  ;;  %v9650_v5 = vmax.f32 %v9584_v26, 0.0  ;;  %v9651_v59 = vmax.f32 %v9587_v17, 0.0  ;;  %v9608_v25 = vadd.f32 %v15924_v63, %v15904_v40 }
 0x765   : > { %v9653_v13 = vmax.f32 %v9595_v11, 0.0  ;;  %v9603_v49 = vadd.f32 %v15904_v40, %v15931_v35 }
 0x766   : > { %7857 = vrot.lane.b32.xlu0 %v7763_v29, %s16291_s21 }
 0x767   : > { %v9655_v57 = vmax.f32 %v9603_v49, 0.0 }
 0x768   : > { %7859 = vrot.lane.b32.xlu1 %v7764_v10, %s16291_s21  ;;  %s10804_s21 = smov [#allocation7]  }
 0x769   : > { %s10716_s22 = sshll.u32 %s10804_s21, 4  ;;  %s10717_s22 = int_to_ptr.vmem [resolvable:$false] %s10716_s22 }
 0x76a   : > { %9694 = vrot.lane.b32.xlu0 %v9630_v15, %s16300_s23  ;;  %v9654_v15 = vmax.f32 %v9600_v44, 0.0  ;;  %s10718_s17 = scalar_lea.vmem %s10717_s22, 8192  ;;  %p10719_p0 = scmp.lt.s32.totalorder %s16120_s16, %s10717_s22 }
 0x76b   : > { %p10720_p1 = scmp.lt.s32.totalorder %s10718_s17, %s10712_s27 }
 0x76c   : > { %9696 = vrot.lane.b32.xlu1 %v9631_v7, %s16300_s23  ;;  %v9611_v7 = vadd.f32 %v15929_v30, %v15904_v40 }
 0x76d   : > { %p10721_p2 = por %p10720_p1, %p10719_p0 }
 0x76e   : > { %9698 = vrot.lane.b32.xlu0 %v9632_v20, %s16300_s23  ;;  %v7830_v42 = vpop.permute.xlu0 %7829  ;;  %v9656_v20 = vmax.f32 %v9608_v25, 0.0  ;;  %v9657_v35 = vmax.f32 %v9611_v7, 0.0 }
 0x76f   : > { %7910 = vst.msk [vmem:[%s11264_s24 + $0x80] sm:$0xff] %vm7893_vm13, %v7830_v42  ;;  %p10722_p3 = pnand %p10721_p2, %p10715_p13 }
 0x770   : > { %v7832_v18 = vpop.permute.xlu1 %7831  ;;  %9700 = vrot.lane.b32.xlu1 %v9633_v37, %s16300_s23 }
 0x771   : > { %7911 = vst.msk [vmem:[%s11264_s24 + $0x88] sm:$0xff] %vm7893_vm13, %v7832_v18 }
 0x772   : > { %9702 = vrot.lane.b32.xlu0 %v9634_v6, %s16300_s23  ;;  %v7834_v38 = vpop.permute.xlu0 %7833 }
 0x773   : > { %7912 = vst.msk [vmem:[%s11264_s24 + $0x90] sm:$0xff] %vm7893_vm13, %v7834_v38 }
 0x774   : > { %v7836_v28 = vpop.permute.xlu1 %7835  ;;  %9704 = vrot.lane.b32.xlu1 %v9635_v36, %s16300_s23  ;;  %v15964_v61 = vpop.f32.mrb[60].mxu1 }
 0x775   : > { %7913 = vst.msk [vmem:[%s11264_s24 + $0x98] sm:$0xff] %vm7893_vm13, %v7836_v28  ;;  %v9615_v55 = vpop.f32.mrb[61].mxu1  ;;  %v9624_v30 = vadd.f32 %v15964_v61, %v15904_v40 }
 0x776   : > { %9706 = vrot.lane.b32.xlu0 %v9636_v19, %s16300_s23  ;;  %v15967_v62 = vpop.f32.mrb[62].mxu1  ;;  %v9616_v23 = vadd.f32 %v15904_v40, %v9615_v55 }
 0x777   : > { %v9618_v12 = vpop.f32.mrb[63].mxu1  ;;  %v9627_v6 = vadd.f32 %v15967_v62, %v15904_v40  ;;  %v9660_v42 = vmax.f32 %v9624_v30, 0.0 }
 0x778   : > { %9708 = vrot.lane.b32.xlu1 %v9637_v39, %s16300_s23  ;;  %v9658_v37 = vmax.f32 %v9616_v23, 0.0  ;;  %v9619_v63 = vadd.f32 %v15904_v40, %v9618_v12 }
 0x779   : > { %v9661_v51 = vmax.f32 %v9627_v6, 0.0 }
 0x77a   : > { %9710 = vrot.lane.b32.xlu0 %v9638_v54, %s16300_s23  ;;  %v9659_v34 = vmax.f32 %v9619_v63, 0.0 }
 0x77c   : > { %9712 = vrot.lane.b32.xlu1 %v9639_v22, %s16300_s23 }
 0x77e   : > { %9714 = vrot.lane.b32.xlu0 %v9640_v32, %s16300_s23 }
 0x780   : > { %9716 = vrot.lane.b32.xlu1 %v9641_v45, %s16300_s23 }
 0x782   : > { %9718 = vrot.lane.b32.xlu0 %v9642_v21, %s16300_s23 }
 0x784   : > { %9720 = vrot.lane.b32.xlu1 %v9643_v27, %s16300_s23 }
 0x786   : > { %9722 = vrot.lane.b32.xlu0 %v9644_v31, %s16300_s23 }
 0x788   : > { %9724 = vrot.lane.b32.xlu1 %v9645_v43, %s16300_s23 }
 0x78a   : > { %9726 = vrot.lane.b32.xlu0 %v9646_v58, %s16300_s23 }
 0x78c   : > { %9728 = vrot.lane.b32.xlu1 %v9647_v50, %s16300_s23 }
 0x78e   : > { %9730 = vrot.lane.b32.xlu0 %v9648_v3, %s16300_s23 }
 0x790   : > { %9732 = vrot.lane.b32.xlu1 %v9649_v52, %s16300_s23 }
 0x792   : > { %9734 = vrot.lane.b32.xlu0 %v9650_v5, %s16300_s23  ;;  %v7838_v29 = vpop.permute.xlu0 %7837 }
 0x793   : > { %7914 = vst.msk [vmem:[%s11264_s24 + $0xa0] sm:$0xff] %vm7893_vm13, %v7838_v29 }
 0x794   : > { %v7840_v10 = vpop.permute.xlu1 %7839  ;;  %9736 = vrot.lane.b32.xlu1 %v9651_v59, %s16300_s23 }
 0x795   : > { %7915 = vst.msk [vmem:[%s11264_s24 + $0xa8] sm:$0xff] %vm7893_vm13, %v7840_v10 }
 0x796   : > { %9738 = vrot.lane.b32.xlu0 %v9652_v60, %s16300_s23  ;;  %v7842_v8 = vpop.permute.xlu0 %7841 }
 0x797   : > { %7916 = vst.msk [vmem:[%s11264_s24 + $0xb0] sm:$0xff] %vm7893_vm13, %v7842_v8 }
 0x798   : > { %v7844_v33 = vpop.permute.xlu1 %7843  ;;  %9740 = vrot.lane.b32.xlu1 %v9653_v13, %s16300_s23 }
 0x799   : > { %7917 = vst.msk [vmem:[%s11264_s24 + $0xb8] sm:$0xff] %vm7893_vm13, %v7844_v33 }
 0x79a   : > { %9742 = vrot.lane.b32.xlu0 %v9654_v15, %s16300_s23 }
 0x79c   : > { %9744 = vrot.lane.b32.xlu1 %v9655_v57, %s16300_s23 }
 0x79e   : > { %9746 = vrot.lane.b32.xlu0 %v9656_v20, %s16300_s23 }
 0x7a0   : > { %9748 = vrot.lane.b32.xlu1 %v9657_v35, %s16300_s23 }
 0x7a2   : > { %9750 = vrot.lane.b32.xlu0 %v9658_v37, %s16300_s23 }
 0x7a4   : > { %9752 = vrot.lane.b32.xlu1 %v9659_v34, %s16300_s23 }
 0x7a6   : > { %9754 = vrot.lane.b32.xlu0 %v9660_v42, %s16300_s23 }
 0x7a8   : > { %9756 = vrot.lane.b32.xlu1 %v9661_v51, %s16300_s23 }
 0x7b6   : > { %v7846_v18 = vpop.permute.xlu0 %7845 }
 0x7b7   : > { %7918 = vst.msk [vmem:[%s11264_s24 + $0xc0] sm:$0xff] %vm7893_vm13, %v7846_v18 }
 0x7b8   : > { %v7848_v40 = vpop.permute.xlu1 %7847 }
 0x7b9   : > { %7919 = vst.msk [vmem:[%s11264_s24 + $0xc8] sm:$0xff] %vm7893_vm13, %v7848_v40 }
 0x7ba   : > { %v7850_v46 = vpop.permute.xlu0 %7849 }
 0x7bb   : > { %7920 = vst.msk [vmem:[%s11264_s24 + $0xd0] sm:$0xff] %vm7893_vm13, %v7850_v46 }
 0x7bc   : > { %v7852_v36 = vpop.permute.xlu1 %7851 }
 0x7bd   : > { %7921 = vst.msk [vmem:[%s11264_s24 + $0xd8] sm:$0xff] %vm7893_vm13, %v7852_v36 }
 0x7d4   : > { %v7854_v14 = vpop.permute.xlu0 %7853 }
 0x7d5   : > { %7922 = vst.msk [vmem:[%s11264_s24 + $0xe0] sm:$0xff] %vm7893_vm13, %v7854_v14 }
 0x7d6   : > { %v7856_v38 = vpop.permute.xlu1 %7855 }
 0x7d7   : > { %7923 = vst.msk [vmem:[%s11264_s24 + $0xe8] sm:$0xff] %vm7893_vm13, %v7856_v38 }
 0x7d8   : > { %v7858_v19 = vpop.permute.xlu0 %7857 }
 0x7d9   : > { %7924 = vst.msk [vmem:[%s11264_s24 + $0xf0] sm:$0xff] %vm7893_vm13, %v7858_v19 }
 0x7da   : > { %v7860_v28 = vpop.permute.xlu1 %7859 }
 0x7db   : > { %7925 = vst.msk [vmem:[%s11264_s24 + $0xf8] sm:$0xff] %vm7893_vm13, %v7860_v28  ;;  %vm16316_vm13 = vmmov %vm16306_vm0 }
 0x7dc   : > { %v9695_v39 = vpop.permute.xlu0 %9694 }
 0x7dd   : > { %9790 = vst.msk [vmem:[%s11264_s24] sm:$0xff] %vm16301_vm2, %v9695_v39  ;;  %vm16317_vm2 = vmmov %vm16306_vm0 }
 0x7de   : > { %v9697_v54 = vpop.permute.xlu1 %9696 }
 0x7df   : > { %9791 = vst.msk [vmem:[%s11264_s24 + $0x8] sm:$0xff] %vm16302_vm5, %v9697_v54  ;;  %vm16318_vm5 = vmmov %vm16306_vm0 }
 0x7e0   : > { %v9699_v41 = vpop.permute.xlu0 %9698 }
 0x7e1   : > { %9792 = vst.msk [vmem:[%s11264_s24 + $0x10] sm:$0xff] %vm16303_vm9, %v9699_v41  ;;  %vm16319_vm9 = vmmov %vm16306_vm0 }
 0x7e2   : > { %v9701_v9 = vpop.permute.xlu1 %9700 }
 0x7e3   : > { %9793 = vst.msk [vmem:[%s11264_s24 + $0x18] sm:$0xff] %vm16304_vm6, %v9701_v9  ;;  %vm16320_vm6 = vmmov %vm16306_vm0 }
 0x7e4   : > { %v9703_v4 = vpop.permute.xlu0 %9702 }
 0x7e5   : > { %9794 = vst.msk [vmem:[%s11264_s24 + $0x20] sm:$0xff] %vm16305_vm11, %v9703_v4  ;;  %vm16321_vm11 = vmmov %vm16306_vm0 }
 0x7e6   : > { %v9705_v22 = vpop.permute.xlu1 %9704 }
 0x7e7   : > { %9795 = vst.msk [vmem:[%s11264_s24 + $0x28] sm:$0xff] %vm16306_vm0, %v9705_v22 }
 0x7e8   : > { %v9707_v0 = vpop.permute.xlu0 %9706 }
 0x7e9   : > { %9796 = vst.msk [vmem:[%s11264_s24 + $0x30] sm:$0xff] %vm16307_vm7, %v9707_v0  ;;  %vm16322_vm7 = vmmov %vm16306_vm0 }
 0x7ea   : > { %v9709_v61 = vpop.permute.xlu1 %9708 }
 0x7eb   : > { %9797 = vst.msk [vmem:[%s11264_s24 + $0x38] sm:$0xff] %vm16308_vm4, %v9709_v61  ;;  %vm16323_vm4 = vmmov %vm16306_vm0 }
 0x7ec   : > { %v9711_v32 = vpop.permute.xlu0 %9710 }
 0x7ed   : > { %9798 = vst.msk [vmem:[%s11264_s24 + $0x40] sm:$0xff] %vm16309_vm12, %v9711_v32  ;;  %vm16324_vm12 = vmmov %vm16306_vm0 }
 0x7ee   : > { %v9713_v55 = vpop.permute.xlu1 %9712 }
 0x7ef   : > { %9799 = vst.msk [vmem:[%s11264_s24 + $0x48] sm:$0xff] %vm16310_vm3, %v9713_v55  ;;  %vm16325_vm3 = vmmov %vm16306_vm0 }
 0x7f0   : > { %v9715_v62 = vpop.permute.xlu0 %9714 }
 0x7f1   : > { %9800 = vst.msk [vmem:[%s11264_s24 + $0x50] sm:$0xff] %vm16311_vm8, %v9715_v62  ;;  %vm16326_vm8 = vmmov %vm16306_vm0 }
 0x7f2   : > { %v9717_v45 = vpop.permute.xlu1 %9716 }
 0x7f3   : > { %9801 = vst.msk [vmem:[%s11264_s24 + $0x58] sm:$0xff] %vm16312_vm1, %v9717_v45  ;;  %vm16327_vm1 = vmmov %vm16306_vm0 }
 0x7f4   : > { %v9719_v21 = vpop.permute.xlu0 %9718 }
 0x7f5   : > { %9802 = vst.msk [vmem:[%s11264_s24 + $0x60] sm:$0xff] %vm16313_vm15, %v9719_v21  ;;  %vm16328_vm15 = vmmov %vm16306_vm0 }
 0x7f6   : > { %v9721_v1 = vpop.permute.xlu1 %9720 }
 0x7f7   : > { %9803 = vst.msk [vmem:[%s11264_s24 + $0x68] sm:$0xff] %vm16314_vm14, %v9721_v1  ;;  %vm16329_vm14 = vmmov %vm16306_vm0 }
 0x7f8   : > { %v9723_v12 = vpop.permute.xlu0 %9722 }
 0x7f9   : > { %9804 = vst.msk [vmem:[%s11264_s24 + $0x70] sm:$0xff] %vm16315_vm10, %v9723_v12  ;;  %vm16330_vm10 = vmmov %vm16306_vm0 }
 0x7fa   : > { %v9725_v56 = vpop.permute.xlu1 %9724 }
 0x7fb   : > { %9805 = vst.msk [vmem:[%s11264_s24 + $0x78] sm:$0xff] %vm16316_vm13, %v9725_v56  ;;  %vm16331_vm13 = vmmov %vm16306_vm0 }
 0x7fc   : > { %v9727_v2 = vpop.permute.xlu0 %9726 }
 0x7fd   : > { %9806 = vst.msk [vmem:[%s11264_s24 + $0x80] sm:$0xff] %vm16317_vm2, %v9727_v2 }
 0x7fe   : > { %v9729_v27 = vpop.permute.xlu1 %9728 }
 0x7ff   : > { %9807 = vst.msk [vmem:[%s11264_s24 + $0x88] sm:$0xff] %vm16318_vm5, %v9729_v27 }
 0x800   : > { %v9731_v48 = vpop.permute.xlu0 %9730 }
 0x801   : > { %9808 = vst.msk [vmem:[%s11264_s24 + $0x90] sm:$0xff] %vm16319_vm9, %v9731_v48 }
 0x802   : > { %v9733_v31 = vpop.permute.xlu1 %9732 }
 0x803   : > { %9809 = vst.msk [vmem:[%s11264_s24 + $0x98] sm:$0xff] %vm16320_vm6, %v9733_v31 }
 0x804   : > { %v9735_v43 = vpop.permute.xlu0 %9734 }
 0x805   : > { %9810 = vst.msk [vmem:[%s11264_s24 + $0xa0] sm:$0xff] %vm16321_vm11, %v9735_v43 }
 0x806   : > { %v9737_v58 = vpop.permute.xlu1 %9736 }
 0x807   : > { %9811 = vst.msk [vmem:[%s11264_s24 + $0xa8] sm:$0xff] %vm16306_vm0, %v9737_v58 }
 0x808   : > { %v9739_v16 = vpop.permute.xlu0 %9738 }
 0x809   : > { %9812 = vst.msk [vmem:[%s11264_s24 + $0xb0] sm:$0xff] %vm16322_vm7, %v9739_v16 }
 0x80a   : > { %v9741_v53 = vpop.permute.xlu1 %9740 }
 0x80b   : > { %9813 = vst.msk [vmem:[%s11264_s24 + $0xb8] sm:$0xff] %vm16323_vm4, %v9741_v53 }
 0x80c   : > { %v9743_v24 = vpop.permute.xlu0 %9742 }
 0x80d   : > { %9814 = vst.msk [vmem:[%s11264_s24 + $0xc0] sm:$0xff] %vm16324_vm12, %v9743_v24 }
 0x80e   : > { %v9745_v50 = vpop.permute.xlu1 %9744 }
 0x80f   : > { %9815 = vst.msk [vmem:[%s11264_s24 + $0xc8] sm:$0xff] %vm16325_vm3, %v9745_v50 }
 0x810   : > { %v9747_v26 = vpop.permute.xlu0 %9746 }
 0x811   : > { %9816 = vst.msk [vmem:[%s11264_s24 + $0xd0] sm:$0xff] %vm16326_vm8, %v9747_v26 }
 0x812   : > { %v9749_v3 = vpop.permute.xlu1 %9748 }
 0x813   : > { %9817 = vst.msk [vmem:[%s11264_s24 + $0xd8] sm:$0xff] %vm16327_vm1, %v9749_v3 }
 0x814   : > { %v9751_v52 = vpop.permute.xlu0 %9750 }
 0x815   : > { %9818 = vst.msk [vmem:[%s11264_s24 + $0xe0] sm:$0xff] %vm16328_vm15, %v9751_v52 }
 0x816   : > { %v9753_v5 = vpop.permute.xlu1 %9752 }
 0x817   : > { %9819 = vst.msk [vmem:[%s11264_s24 + $0xe8] sm:$0xff] %vm16329_vm14, %v9753_v5 }
 0x818   : > { %v9755_v17 = vpop.permute.xlu0 %9754 }
 0x819   : > { %9820 = vst.msk [vmem:[%s11264_s24 + $0xf0] sm:$0xff] %vm16330_vm10, %v9755_v17 }
 0x81a   : > { %v9757_v47 = vpop.permute.xlu1 %9756 }
 0x81b   : > { %9821 = vst.msk [vmem:[%s11264_s24 + $0xf8] sm:$0xff] %vm16331_vm13, %v9757_v47 }
 0x81c   : > { %10725 = shalt.err (!%p10722_p3)
}
 0x81d   : > { %s10726_s24 = scalar_lea.hbm %s16116_s14, 4096  ;;  %s10730_s25 = scalar_lea.hbm %s16177_s9, 8192 }
 0x81e   : > { %p10727_p4 = scmp.ne.s32.totalorder %s16116_s14, %s10726_s24  ;;  %p10731_p9 = scmp.lt.u32.totalorder %s16116_s14, %s16177_s9 }
 0x81f   : > { %p10732_p10 = scmp.lt.u32.totalorder %s10730_s25, %s10726_s24  ;;  %p10734_p12 = scmp.lt.u32.totalorder %s10726_s24, %s16116_s14 }
 0x820   : > { %p10728_p7 = pnand %p10727_p4, %p10894_p5 }
 0x821   : > { %p10733_p11 = por %p10732_p10, %p10731_p9 }
 0x822   : > { %p10729_p8 = pneg %p10728_p7 }
 0x823   : > { %p10735_p13 = por %p10734_p12, %p10733_p11 }
 0x825   : > { %p10736_p0 = pnand %p10735_p13, %p10729_p8 }
 0x827   : > { %10739 = shalt.err (!%p10736_p0)
}
 0x828   : > { %s10805_s27 = smov 128   ;;  %s16333_s21 = smov 8  }
 0x829   : > { %10596 = dma.vmem_to_hbm [thread:$0]  (%p10894_p5), %s16120_s16, 4096, %s16116_s14, %s16126_s29, %s10805_s27, %s10805_s27, %s16333_s21  }
 0x82a PF: > { %p10602_p1 = scmp.ge.s32.totalorder %s10774_s12, 2  ;;  %s9851_s22 = sand.u32 1, %s10762_s30  }
 0x82b   : > { %s9852_s17 = scalar_lea.sflag [#allocation8], %s9851_s22 }
 0x82c   : > { %p10599_p2 = pnand %p10602_p1, %p10898_p6 }
 0x82e   : > { %10757 = dma.done.wait (!%p10599_p2), %s9852_s17, 4096  }
 0x82f   : > { %10759 = vsyncadd (!%p10599_p2), %s9852_s17, 4294963200  ;;  %p19_p3 = scmp.ge.s32.totalorder %s10881_s15, 4   ;;  %s16334_s30 = smov %s10766_s10 }
 0x830   : > { %s16335_s10 = smov %s10770_s11  ;;  %s16336_s11 = smov %s10892_s18 }
 0x831   : > { %s16337_s12 = smov %s10881_s15  ;;  %21 = sbr.rel (!%p19_p3) target bundleno = 3 (0x3), region = 97 }
 0x838   :  { %9857 = vsyncpa [#allocation8], 1 }
 0x839   :  { %9859 = vsyncpa [#allocation8 + $0x1], 1 }

</bundles_post_ra>
